<compile_context>
chip_gen: v7x
topology: tpu7x:2x2x1
jax: 0.10.0
libtpu: 0.0.40
codegen_flags: <defaults>
</compile_context>

<pallas_src>
import functools

import jax
import jax.numpy as jnp
from jax.experimental import pallas as pl
from jax.experimental.pallas import tpu as pltpu


# ---------------------------------------------------------------------------
# in-kernel helpers
# ---------------------------------------------------------------------------
def _layer_norm(x, gamma, beta, eps=1e-5):
    mu = jnp.mean(x, axis=-1, keepdims=True)
    xc = x - mu
    var = jnp.mean(xc * xc, axis=-1, keepdims=True)
    return xc * jax.lax.rsqrt(var + eps) * gamma + beta


# ---------------------------------------------------------------------------
# Pallas kernel: one chunk of whole sequences per grid step, all layers unrolled.
# ---------------------------------------------------------------------------
def transformer_kernel(x_ref,                    # (S, N, D) f32
                       ln1g_ref, ln1b_ref,       # (depth, 1, D) f32
                       wqkv_ref,                 # (depth, D, 3*inner)  bf16
                       wo_ref, bo_ref,           # (depth, inner, D) bf16, (depth, 1, D) f32
                       ln2g_ref, ln2b_ref,       # (depth, 1, D) f32
                       w1_ref, b1_ref,           # (depth, D, mlp) bf16, (depth, 1, mlp) f32
                       w2_ref, b2_ref,           # (depth, mlp, D) bf16, (depth, 1, D) f32
                       o_ref,                    # (S, N, D) f32
                       *, heads, dim_head):
    S, N, D = x_ref.shape
    depth = wqkv_ref.shape[0]
    inner = heads * dim_head
    scale = dim_head ** (-0.5)
    T = S * N

    # Token-major f32 residual stream, resident in VMEM/vregs across all layers.
    # (S, N, D) -> (T, D) only merges leading dims: layout-preserving, no relayout.
    x = x_ref[...].astype(jnp.float32).reshape(T, D)

    for l in range(depth):                        # static unroll (depth=2)
        # ----------------- PreNorm + Attention -----------------
        xn = _layer_norm(x, ln1g_ref[l], ln1b_ref[l])
        qkv = jnp.dot(xn.astype(jnp.bfloat16), wqkv_ref[l],
                      preferred_element_type=jnp.float32)          # (T, 3*inner) f32
        # single bf16 cast for q, k and v (hoisted out of the head loop)
        qkv = qkv.reshape(S, N, 3 * inner).astype(jnp.bfloat16)

        head_outs = []
        for h in range(heads):                    # static unroll over heads
            q = qkv[:, :, h * dim_head:(h + 1) * dim_head]
            k = qkv[:, :, inner + h * dim_head: inner + (h + 1) * dim_head]
            v = qkv[:, :, 2 * inner + h * dim_head: 2 * inner + (h + 1) * dim_head]
            # bf16 MXU operands, f32 accumulation (single-pass MXU)
            dots = jnp.einsum("snd,smd->snm", q, k,
                              preferred_element_type=jnp.float32) * scale
            dots = dots - jnp.max(dots, axis=-1, keepdims=True)
            p = jnp.exp(dots)
            # EUP reciprocal instead of VALU divide for the softmax denominator
            p = p * pl.reciprocal(jnp.sum(p, axis=-1, keepdims=True), approx=True)
            head_outs.append(
                jnp.einsum("snm,smd->snd", p.astype(jnp.bfloat16), v,
                           preferred_element_type=jnp.float32))
        attn = jnp.concatenate(head_outs, axis=-1).reshape(T, inner)
        attn = jnp.dot(attn.astype(jnp.bfloat16), wo_ref[l],
                       preferred_element_type=jnp.float32) + bo_ref[l]
        x = x + attn

        # ----------------- PreNorm + FeedForward -----------------
        xn = _layer_norm(x, ln2g_ref[l], ln2b_ref[l])
        h1 = jnp.dot(xn.astype(jnp.bfloat16), w1_ref[l],
                     preferred_element_type=jnp.float32) + b1_ref[l]
        h1 = h1 * jax.nn.sigmoid(h1)                                # SiLU, f32 VPU/EUP
        h2 = jnp.dot(h1.astype(jnp.bfloat16), w2_ref[l],
                     preferred_element_type=jnp.float32) + b2_ref[l]
        x = x + h2

    o_ref[...] = x.reshape(S, N, D).astype(o_ref.dtype)


# ---------------------------------------------------------------------------
# wrapper
# ---------------------------------------------------------------------------
def transformer_pallas(x, params, *, heads, dim_head, seq_chunks=1):
    """x: (B, P, N, D) float32.  Returns (B, P, N, D) float32."""
    B, P, N, D = x.shape
    BP = B * P
    assert BP % seq_chunks == 0, (BP, seq_chunks)
    S = BP // seq_chunks
    xr = x.reshape(BP, N, D)

    inner = heads * dim_head
    depth = params["wqkv"].shape[0]
    mlp_dim = params["w1"].shape[-1]
    T = BP * N

    bf16_keys = {"wqkv", "wo", "w1", "w2"}        # MXU operands -> bf16 at wrapper time
    order = ["ln1_g", "ln1_b", "wqkv", "wo", "bo",
             "ln2_g", "ln2_b", "w1", "b1", "w2", "b2"]
    args = [params[k].astype(jnp.bfloat16) if k in bf16_keys else params[k]
            for k in order]

    def full(a):
        return pl.BlockSpec(a.shape, lambda i: (0,) * a.ndim)

    # ---- cost estimate: this kernel is latency-bound; help XLA overlap it ----
    flops_per_layer = (
        2 * T * D * (3 * inner)                       # qkv projection
        + 2 * BP * heads * N * N * dim_head * 2       # scores + p@v
        + 2 * T * inner * D                           # output projection
        + 2 * T * D * mlp_dim + 2 * T * mlp_dim * D)  # feed-forward
    transc_per_layer = (BP * heads * N * N            # exp in softmax
                        + T * mlp_dim                 # sigmoid in SiLU
                        + 2 * T)                      # rsqrt in the two LayerNorms
    bytes_accessed = (2 * int(xr.size) * 4
                      + sum(int(a.size) * a.dtype.itemsize for a in args))
    cost = pl.CostEstimate(flops=int(depth * flops_per_layer),
                           transcendentals=int(depth * transc_per_layer),
                           bytes_accessed=int(bytes_accessed))

    out = pl.pallas_call(
        functools.partial(transformer_kernel, heads=heads, dim_head=dim_head),
        out_shape=jax.ShapeDtypeStruct((BP, N, D), jnp.float32),
        grid_spec=pltpu.PrefetchScalarGridSpec(
            num_scalar_prefetch=0,
            grid=(seq_chunks,),
            in_specs=[pl.BlockSpec((S, N, D), lambda i: (i, 0, 0))]
                     + [full(a) for a in args],
            out_specs=pl.BlockSpec((S, N, D), lambda i: (i, 0, 0)),
        ),
        compiler_params=pltpu.CompilerParams(
            dimension_semantics=("parallel",)),
        cost_estimate=cost,
    )(xr, *args)

    return out.reshape(B, P, N, D)


# ---------------------------------------------------------------------------
# plain-JAX f32 reference (same math, no Pallas) for a numerical sanity check
# ---------------------------------------------------------------------------
def transformer_ref(x, p, heads, dim_head):
    B, P, N, D = x.shape
    depth = p["wqkv"].shape[0]
    inner = heads * dim_head
    scale = dim_head ** (-0.5)

    def ln(v, g, b, eps=1e-5):
        mu = v.mean(-1, keepdims=True)
        var = ((v - mu) ** 2).mean(-1, keepdims=True)
        return (v - mu) * jax.lax.rsqrt(var + eps) * g + b

    h = x.astype(jnp.float32)
    for l in range(depth):
        xn = ln(h, p["ln1_g"][l], p["ln1_b"][l])
        qkv = xn @ p["wqkv"][l]
        q, k, v = jnp.split(qkv, 3, axis=-1)
        sh = lambda t: t.reshape(B, P, N, heads, dim_head).transpose(0, 1, 3, 2, 4)
        q, k, v = sh(q), sh(k), sh(v)
        dots = jnp.einsum("bphnd,bphmd->bphnm", q, k) * scale
        attn = jax.nn.softmax(dots, axis=-1)
        o = jnp.einsum("bphnm,bphmd->bphnd", attn, v)
        o = o.transpose(0, 1, 3, 2, 4).reshape(B, P, N, inner)
        h = h + (o @ p["wo"][l] + p["bo"][l])

        xn = ln(h, p["ln2_g"][l], p["ln2_b"][l])
        ff = jax.nn.silu(xn @ p["w1"][l] + p["b1"][l]) @ p["w2"][l] + p["b2"][l]
        h = h + ff
    return h


# ---------------------------------------------------------------------------
# deterministic parameter construction (weights stacked along depth axis)
# ---------------------------------------------------------------------------
def make_params(key, depth, dim, heads, dim_head, mlp_dim):
    inner = heads * dim_head
    ks = jax.random.split(key, 11)

    def nrm(k, shape, scale):
        return scale * jax.random.normal(k, shape, jnp.float32)

    return {
        "ln1_g": 1.0 + 0.1 * jax.random.normal(ks[0], (depth, 1, dim), jnp.float32),
        "ln1_b": 0.05 * jax.random.normal(ks[1], (depth, 1, dim), jnp.float32),
        "wqkv":  nrm(ks[2], (depth, dim, 3 * inner), dim ** -0.5),
        "wo":    nrm(ks[3], (depth, inner, dim), inner ** -0.5),
        "bo":    0.05 * jax.random.normal(ks[4], (depth, 1, dim), jnp.float32),
        "ln2_g": 1.0 + 0.1 * jax.random.normal(ks[5], (depth, 1, dim), jnp.float32),
        "ln2_b": 0.05 * jax.random.normal(ks[6], (depth, 1, dim), jnp.float32),
        "w1":    nrm(ks[7], (depth, dim, mlp_dim), dim ** -0.5),
        "b1":    0.05 * jax.random.normal(ks[8], (depth, 1, mlp_dim), jnp.float32),
        "w2":    nrm(ks[9], (depth, mlp_dim, dim), mlp_dim ** -0.5),
        "b2":    0.05 * jax.random.normal(ks[10], (depth, 1, dim), jnp.float32),
    }


if __name__ == "__main__":
    # Transformer(dim=32, depth=2, heads=4, dim_head=8, mlp_dim=64) on a
    # (batch=2, patches=4, seq=16, dim=32) input, as MobileViT feeds it.
    B, P, N = 2, 4, 16
    dim, depth, heads, dim_head, mlp_dim = 32, 2, 4, 8, 64

    key = jax.random.PRNGKey(0)
    kx, kp = jax.random.split(key)
    x = jax.random.normal(kx, (B, P, N, dim), jnp.float32)
    params = make_params(kp, depth, dim, heads, dim_head, mlp_dim)

    out = transformer_pallas(x, params, heads=heads, dim_head=dim_head)
    out = jax.block_until_ready(out)

    ref = jax.block_until_ready(transformer_ref(x, params, heads, dim_head))
    assert out.shape == (B, P, N, dim), out.shape
    max_err = float(jnp.max(jnp.abs(out - ref)))
    # kernel uses bf16 MXU operands + approx reciprocal (f32 accumulation);
    # compare against the f32 reference with a matching tolerance
    assert jnp.allclose(out, ref, atol=3e-2, rtol=3e-2), max_err

    print("KERNEL_OK")
</pallas_src>

<mosaic_0001>
module attributes {stable_mosaic.version = 11 : i64} {
  func.func @transformer_kernel(%arg0: i32, %arg1: memref<8x16x32xf32, #tpu.memory_space<vmem>>, %arg2: memref<2x1x32xf32, #tpu.memory_space<vmem>>, %arg3: memref<2x1x32xf32, #tpu.memory_space<vmem>>, %arg4: memref<2x32x96xbf16, #tpu.memory_space<vmem>>, %arg5: memref<2x32x32xbf16, #tpu.memory_space<vmem>>, %arg6: memref<2x1x32xf32, #tpu.memory_space<vmem>>, %arg7: memref<2x1x32xf32, #tpu.memory_space<vmem>>, %arg8: memref<2x1x32xf32, #tpu.memory_space<vmem>>, %arg9: memref<2x32x64xbf16, #tpu.memory_space<vmem>>, %arg10: memref<2x1x64xf32, #tpu.memory_space<vmem>>, %arg11: memref<2x64x32xbf16, #tpu.memory_space<vmem>>, %arg12: memref<2x1x32xf32, #tpu.memory_space<vmem>>, %arg13: memref<8x16x32xf32, #tpu.memory_space<vmem>>) attributes {dimension_semantics = [#tpu.dimension_semantics<parallel>], iteration_bounds = array<i64: 1>, scalar_prefetch = 0 : i64, scratch_operands = 0 : i64, tpu.core_type = #tpu.core_type<tc>, window_params = [{transform_indices = @transform_0, window_bounds = array<i64: 8, 16, 32>}, {pipeline_mode = #tpu.pipeline_mode<synchronous>, transform_indices = @transform_1, window_bounds = array<i64: 2, 1, 32>}, {pipeline_mode = #tpu.pipeline_mode<synchronous>, transform_indices = @transform_2, window_bounds = array<i64: 2, 1, 32>}, {pipeline_mode = #tpu.pipeline_mode<synchronous>, transform_indices = @transform_3, window_bounds = array<i64: 2, 32, 96>}, {pipeline_mode = #tpu.pipeline_mode<synchronous>, transform_indices = @transform_4, window_bounds = array<i64: 2, 32, 32>}, {pipeline_mode = #tpu.pipeline_mode<synchronous>, transform_indices = @transform_5, window_bounds = array<i64: 2, 1, 32>}, {pipeline_mode = #tpu.pipeline_mode<synchronous>, transform_indices = @transform_6, window_bounds = array<i64: 2, 1, 32>}, {pipeline_mode = #tpu.pipeline_mode<synchronous>, transform_indices = @transform_7, window_bounds = array<i64: 2, 1, 32>}, {pipeline_mode = #tpu.pipeline_mode<synchronous>, transform_indices = @transform_8, window_bounds = array<i64: 2, 32, 64>}, {pipeline_mode = #tpu.pipeline_mode<synchronous>, transform_indices = @transform_9, window_bounds = array<i64: 2, 1, 64>}, {pipeline_mode = #tpu.pipeline_mode<synchronous>, transform_indices = @transform_10, window_bounds = array<i64: 2, 64, 32>}, {pipeline_mode = #tpu.pipeline_mode<synchronous>, transform_indices = @transform_11, window_bounds = array<i64: 2, 1, 32>}, {transform_indices = @transform_12, window_bounds = array<i64: 8, 16, 32>}]} {
    %c0 = arith.constant 0 : index
    %c0_0 = arith.constant 0 : index
    %c0_1 = arith.constant 0 : index
    %0 = vector.load %arg1[%c0, %c0_0, %c0_1] : memref<8x16x32xf32, #tpu.memory_space<vmem>>, vector<8x16x32xf32>
    %1 = vector.shape_cast %0 : vector<8x16x32xf32> to vector<128x32xf32>
    %c0_2 = arith.constant 0 : index
    %c0_3 = arith.constant 0 : index
    %c0_4 = arith.constant 0 : index
    %2 = vector.load %arg2[%c0_2, %c0_3, %c0_4] : memref<2x1x32xf32, #tpu.memory_space<vmem>>, vector<1x1x32xf32>
    %3 = vector.shape_cast %2 : vector<1x1x32xf32> to vector<1x32xf32>
    %c0_5 = arith.constant 0 : index
    %c0_6 = arith.constant 0 : index
    %c0_7 = arith.constant 0 : index
    %4 = vector.load %arg3[%c0_5, %c0_6, %c0_7] : memref<2x1x32xf32, #tpu.memory_space<vmem>>, vector<1x1x32xf32>
    %5 = vector.shape_cast %4 : vector<1x1x32xf32> to vector<1x32xf32>
    %cst = arith.constant dense<0.000000e+00> : vector<128xf32>
    %6 = vector.multi_reduction <add>, %1, %cst [1] : vector<128x32xf32> to vector<128xf32>
    %7 = vector.shape_cast %6 : vector<128xf32> to vector<128x1xf32>
    %cst_8 = arith.constant 3.200000e+01 : f32
    %8 = vector.broadcast %cst_8 : f32 to vector<128x1xf32>
    %9 = arith.divf %7, %8 : vector<128x1xf32>
    %10 = vector.broadcast %9 : vector<128x1xf32> to vector<128x32xf32>
    %11 = arith.subf %1, %10 : vector<128x32xf32>
    %12 = arith.mulf %11, %11 : vector<128x32xf32>
    %cst_9 = arith.constant dense<0.000000e+00> : vector<128xf32>
    %13 = vector.multi_reduction <add>, %12, %cst_9 [1] : vector<128x32xf32> to vector<128xf32>
    %14 = vector.shape_cast %13 : vector<128xf32> to vector<128x1xf32>
    %cst_10 = arith.constant 3.200000e+01 : f32
    %15 = vector.broadcast %cst_10 : f32 to vector<128x1xf32>
    %16 = arith.divf %14, %15 : vector<128x1xf32>
    %cst_11 = arith.constant 9.99999974E-6 : f32
    %17 = vector.broadcast %cst_11 : f32 to vector<128x1xf32>
    %18 = arith.addf %16, %17 : vector<128x1xf32>
    %19 = math.rsqrt %18 : vector<128x1xf32>
    %20 = vector.broadcast %19 : vector<128x1xf32> to vector<128x32xf32>
    %21 = arith.mulf %11, %20 : vector<128x32xf32>
    %22 = vector.broadcast %3 : vector<1x32xf32> to vector<128x32xf32>
    %23 = arith.mulf %21, %22 : vector<128x32xf32>
    %24 = vector.broadcast %5 : vector<1x32xf32> to vector<128x32xf32>
    %25 = arith.addf %23, %24 : vector<128x32xf32>
    %26 = arith.truncf %25 : vector<128x32xf32> to vector<128x32xbf16>
    %c0_12 = arith.constant 0 : index
    %c0_13 = arith.constant 0 : index
    %c0_14 = arith.constant 0 : index
    %27 = vector.load %arg4[%c0_12, %c0_13, %c0_14] : memref<2x32x96xbf16, #tpu.memory_space<vmem>>, vector<1x32x96xbf16>
    %28 = vector.shape_cast %27 : vector<1x32x96xbf16> to vector<32x96xbf16>
    %cst_15 = arith.constant dense<0.000000e+00> : vector<128x96xf32>
    %29 = tpu.matmul %26, %28, %cst_15 {dimension_numbers = #tpu.dot_dimension_numbers<[1], [0], [0], [1], [0, 0, 1, 1], [], []>} : vector<128x32xbf16>, vector<32x96xbf16>, vector<128x96xf32> -> vector<128x96xf32>
    %30 = vector.shape_cast %29 : vector<128x96xf32> to vector<8x16x96xf32>
    %31 = arith.truncf %30 : vector<8x16x96xf32> to vector<8x16x96xbf16>
    %32 = vector.extract_strided_slice %31 {offsets = [0, 0, 0], sizes = [8, 16, 8], strides = [1, 1, 1]} : vector<8x16x96xbf16> to vector<8x16x8xbf16>
    %33 = vector.extract_strided_slice %31 {offsets = [0, 0, 32], sizes = [8, 16, 8], strides = [1, 1, 1]} : vector<8x16x96xbf16> to vector<8x16x8xbf16>
    %34 = vector.extract_strided_slice %31 {offsets = [0, 0, 64], sizes = [8, 16, 8], strides = [1, 1, 1]} : vector<8x16x96xbf16> to vector<8x16x8xbf16>
    "tpu.trace_start"() <{level = 10 : i32, message = "snd,smd->snm"}> : () -> ()
    %cst_16 = arith.constant dense<0.000000e+00> : vector<8x16x16xf32>
    %35 = tpu.matmul %32, %33, %cst_16 {dimension_numbers = #tpu.dot_dimension_numbers<[2], [2], [1], [1], [0, 0, 0, 1, 1, 1], [0], [0]>} : vector<8x16x8xbf16>, vector<8x16x8xbf16>, vector<8x16x16xf32> -> vector<8x16x16xf32>
    "tpu.trace_stop"() : () -> ()
    %cst_17 = arith.constant 0.353553385 : f32
    %36 = vector.broadcast %cst_17 : f32 to vector<8x16x16xf32>
    %37 = arith.mulf %35, %36 : vector<8x16x16xf32>
    %cst_18 = arith.constant dense<0xFF800000> : vector<8x16xf32>
    %38 = vector.multi_reduction <maximumf>, %37, %cst_18 [2] : vector<8x16x16xf32> to vector<8x16xf32>
    %39 = vector.shape_cast %38 : vector<8x16xf32> to vector<8x16x1xf32>
    %40 = vector.broadcast %39 : vector<8x16x1xf32> to vector<8x16x16xf32>
    %41 = arith.subf %37, %40 : vector<8x16x16xf32>
    %42 = math.exp %41 : vector<8x16x16xf32>
    %cst_19 = arith.constant dense<0.000000e+00> : vector<8x16xf32>
    %43 = vector.multi_reduction <add>, %42, %cst_19 [2] : vector<8x16x16xf32> to vector<8x16xf32>
    %44 = vector.shape_cast %43 : vector<8x16xf32> to vector<8x16x1xf32>
    %45 = tpu.reciprocal %44 {approx = true} : vector<8x16x1xf32> -> vector<8x16x1xf32>
    %46 = vector.broadcast %45 : vector<8x16x1xf32> to vector<8x16x16xf32>
    %47 = arith.mulf %42, %46 : vector<8x16x16xf32>
    %48 = arith.truncf %47 : vector<8x16x16xf32> to vector<8x16x16xbf16>
    "tpu.trace_start"() <{level = 10 : i32, message = "snm,smd->snd"}> : () -> ()
    %cst_20 = arith.constant dense<0.000000e+00> : vector<8x16x8xf32>
    %49 = tpu.matmul %48, %34, %cst_20 {dimension_numbers = #tpu.dot_dimension_numbers<[2], [1], [1], [2], [0, 0, 0, 1, 1, 2], [0], [0]>} : vector<8x16x16xbf16>, vector<8x16x8xbf16>, vector<8x16x8xf32> -> vector<8x16x8xf32>
    "tpu.trace_stop"() : () -> ()
    %50 = vector.extract_strided_slice %31 {offsets = [0, 0, 8], sizes = [8, 16, 8], strides = [1, 1, 1]} : vector<8x16x96xbf16> to vector<8x16x8xbf16>
    %51 = vector.extract_strided_slice %31 {offsets = [0, 0, 40], sizes = [8, 16, 8], strides = [1, 1, 1]} : vector<8x16x96xbf16> to vector<8x16x8xbf16>
    %52 = vector.extract_strided_slice %31 {offsets = [0, 0, 72], sizes = [8, 16, 8], strides = [1, 1, 1]} : vector<8x16x96xbf16> to vector<8x16x8xbf16>
    "tpu.trace_start"() <{level = 10 : i32, message = "snd,smd->snm"}> : () -> ()
    %cst_21 = arith.constant dense<0.000000e+00> : vector<8x16x16xf32>
    %53 = tpu.matmul %50, %51, %cst_21 {dimension_numbers = #tpu.dot_dimension_numbers<[2], [2], [1], [1], [0, 0, 0, 1, 1, 1], [0], [0]>} : vector<8x16x8xbf16>, vector<8x16x8xbf16>, vector<8x16x16xf32> -> vector<8x16x16xf32>
    "tpu.trace_stop"() : () -> ()
    %cst_22 = arith.constant 0.353553385 : f32
    %54 = vector.broadcast %cst_22 : f32 to vector<8x16x16xf32>
    %55 = arith.mulf %53, %54 : vector<8x16x16xf32>
    %cst_23 = arith.constant dense<0xFF800000> : vector<8x16xf32>
    %56 = vector.multi_reduction <maximumf>, %55, %cst_23 [2] : vector<8x16x16xf32> to vector<8x16xf32>
    %57 = vector.shape_cast %56 : vector<8x16xf32> to vector<8x16x1xf32>
    %58 = vector.broadcast %57 : vector<8x16x1xf32> to vector<8x16x16xf32>
    %59 = arith.subf %55, %58 : vector<8x16x16xf32>
    %60 = math.exp %59 : vector<8x16x16xf32>
    %cst_24 = arith.constant dense<0.000000e+00> : vector<8x16xf32>
    %61 = vector.multi_reduction <add>, %60, %cst_24 [2] : vector<8x16x16xf32> to vector<8x16xf32>
    %62 = vector.shape_cast %61 : vector<8x16xf32> to vector<8x16x1xf32>
    %63 = tpu.reciprocal %62 {approx = true} : vector<8x16x1xf32> -> vector<8x16x1xf32>
    %64 = vector.broadcast %63 : vector<8x16x1xf32> to vector<8x16x16xf32>
    %65 = arith.mulf %60, %64 : vector<8x16x16xf32>
    %66 = arith.truncf %65 : vector<8x16x16xf32> to vector<8x16x16xbf16>
    "tpu.trace_start"() <{level = 10 : i32, message = "snm,smd->snd"}> : () -> ()
    %cst_25 = arith.constant dense<0.000000e+00> : vector<8x16x8xf32>
    %67 = tpu.matmul %66, %52, %cst_25 {dimension_numbers = #tpu.dot_dimension_numbers<[2], [1], [1], [2], [0, 0, 0, 1, 1, 2], [0], [0]>} : vector<8x16x16xbf16>, vector<8x16x8xbf16>, vector<8x16x8xf32> -> vector<8x16x8xf32>
    "tpu.trace_stop"() : () -> ()
    %68 = vector.extract_strided_slice %31 {offsets = [0, 0, 16], sizes = [8, 16, 8], strides = [1, 1, 1]} : vector<8x16x96xbf16> to vector<8x16x8xbf16>
    %69 = vector.extract_strided_slice %31 {offsets = [0, 0, 48], sizes = [8, 16, 8], strides = [1, 1, 1]} : vector<8x16x96xbf16> to vector<8x16x8xbf16>
    %70 = vector.extract_strided_slice %31 {offsets = [0, 0, 80], sizes = [8, 16, 8], strides = [1, 1, 1]} : vector<8x16x96xbf16> to vector<8x16x8xbf16>
    "tpu.trace_start"() <{level = 10 : i32, message = "snd,smd->snm"}> : () -> ()
    %cst_26 = arith.constant dense<0.000000e+00> : vector<8x16x16xf32>
    %71 = tpu.matmul %68, %69, %cst_26 {dimension_numbers = #tpu.dot_dimension_numbers<[2], [2], [1], [1], [0, 0, 0, 1, 1, 1], [0], [0]>} : vector<8x16x8xbf16>, vector<8x16x8xbf16>, vector<8x16x16xf32> -> vector<8x16x16xf32>
    "tpu.trace_stop"() : () -> ()
    %cst_27 = arith.constant 0.353553385 : f32
    %72 = vector.broadcast %cst_27 : f32 to vector<8x16x16xf32>
    %73 = arith.mulf %71, %72 : vector<8x16x16xf32>
    %cst_28 = arith.constant dense<0xFF800000> : vector<8x16xf32>
    %74 = vector.multi_reduction <maximumf>, %73, %cst_28 [2] : vector<8x16x16xf32> to vector<8x16xf32>
    %75 = vector.shape_cast %74 : vector<8x16xf32> to vector<8x16x1xf32>
    %76 = vector.broadcast %75 : vector<8x16x1xf32> to vector<8x16x16xf32>
    %77 = arith.subf %73, %76 : vector<8x16x16xf32>
    %78 = math.exp %77 : vector<8x16x16xf32>
    %cst_29 = arith.constant dense<0.000000e+00> : vector<8x16xf32>
    %79 = vector.multi_reduction <add>, %78, %cst_29 [2] : vector<8x16x16xf32> to vector<8x16xf32>
    %80 = vector.shape_cast %79 : vector<8x16xf32> to vector<8x16x1xf32>
    %81 = tpu.reciprocal %80 {approx = true} : vector<8x16x1xf32> -> vector<8x16x1xf32>
    %82 = vector.broadcast %81 : vector<8x16x1xf32> to vector<8x16x16xf32>
    %83 = arith.mulf %78, %82 : vector<8x16x16xf32>
    %84 = arith.truncf %83 : vector<8x16x16xf32> to vector<8x16x16xbf16>
    "tpu.trace_start"() <{level = 10 : i32, message = "snm,smd->snd"}> : () -> ()
    %cst_30 = arith.constant dense<0.000000e+00> : vector<8x16x8xf32>
    %85 = tpu.matmul %84, %70, %cst_30 {dimension_numbers = #tpu.dot_dimension_numbers<[2], [1], [1], [2], [0, 0, 0, 1, 1, 2], [0], [0]>} : vector<8x16x16xbf16>, vector<8x16x8xbf16>, vector<8x16x8xf32> -> vector<8x16x8xf32>
    "tpu.trace_stop"() : () -> ()
    %86 = vector.extract_strided_slice %31 {offsets = [0, 0, 24], sizes = [8, 16, 8], strides = [1, 1, 1]} : vector<8x16x96xbf16> to vector<8x16x8xbf16>
    %87 = vector.extract_strided_slice %31 {offsets = [0, 0, 56], sizes = [8, 16, 8], strides = [1, 1, 1]} : vector<8x16x96xbf16> to vector<8x16x8xbf16>
    %88 = vector.extract_strided_slice %31 {offsets = [0, 0, 88], sizes = [8, 16, 8], strides = [1, 1, 1]} : vector<8x16x96xbf16> to vector<8x16x8xbf16>
    "tpu.trace_start"() <{level = 10 : i32, message = "snd,smd->snm"}> : () -> ()
    %cst_31 = arith.constant dense<0.000000e+00> : vector<8x16x16xf32>
    %89 = tpu.matmul %86, %87, %cst_31 {dimension_numbers = #tpu.dot_dimension_numbers<[2], [2], [1], [1], [0, 0, 0, 1, 1, 1], [0], [0]>} : vector<8x16x8xbf16>, vector<8x16x8xbf16>, vector<8x16x16xf32> -> vector<8x16x16xf32>
    "tpu.trace_stop"() : () -> ()
    %cst_32 = arith.constant 0.353553385 : f32
    %90 = vector.broadcast %cst_32 : f32 to vector<8x16x16xf32>
    %91 = arith.mulf %89, %90 : vector<8x16x16xf32>
    %cst_33 = arith.constant dense<0xFF800000> : vector<8x16xf32>
    %92 = vector.multi_reduction <maximumf>, %91, %cst_33 [2] : vector<8x16x16xf32> to vector<8x16xf32>
    %93 = vector.shape_cast %92 : vector<8x16xf32> to vector<8x16x1xf32>
    %94 = vector.broadcast %93 : vector<8x16x1xf32> to vector<8x16x16xf32>
    %95 = arith.subf %91, %94 : vector<8x16x16xf32>
    %96 = math.exp %95 : vector<8x16x16xf32>
    %cst_34 = arith.constant dense<0.000000e+00> : vector<8x16xf32>
    %97 = vector.multi_reduction <add>, %96, %cst_34 [2] : vector<8x16x16xf32> to vector<8x16xf32>
    %98 = vector.shape_cast %97 : vector<8x16xf32> to vector<8x16x1xf32>
    %99 = tpu.reciprocal %98 {approx = true} : vector<8x16x1xf32> -> vector<8x16x1xf32>
    %100 = vector.broadcast %99 : vector<8x16x1xf32> to vector<8x16x16xf32>
    %101 = arith.mulf %96, %100 : vector<8x16x16xf32>
    %102 = arith.truncf %101 : vector<8x16x16xf32> to vector<8x16x16xbf16>
    "tpu.trace_start"() <{level = 10 : i32, message = "snm,smd->snd"}> : () -> ()
    %cst_35 = arith.constant dense<0.000000e+00> : vector<8x16x8xf32>
    %103 = tpu.matmul %102, %88, %cst_35 {dimension_numbers = #tpu.dot_dimension_numbers<[2], [1], [1], [2], [0, 0, 0, 1, 1, 2], [0], [0]>} : vector<8x16x16xbf16>, vector<8x16x8xbf16>, vector<8x16x8xf32> -> vector<8x16x8xf32>
    "tpu.trace_stop"() : () -> ()
    %104 = tpu.concatenate %49, %67, %85, %103 in 2 : vector<8x16x8xf32>, vector<8x16x8xf32>, vector<8x16x8xf32>, vector<8x16x8xf32> -> vector<8x16x32xf32>
    %105 = vector.shape_cast %104 : vector<8x16x32xf32> to vector<128x32xf32>
    %106 = arith.truncf %105 : vector<128x32xf32> to vector<128x32xbf16>
    %c0_36 = arith.constant 0 : index
    %c0_37 = arith.constant 0 : index
    %c0_38 = arith.constant 0 : index
    %107 = vector.load %arg5[%c0_36, %c0_37, %c0_38] : memref<2x32x32xbf16, #tpu.memory_space<vmem>>, vector<1x32x32xbf16>
    %108 = vector.shape_cast %107 : vector<1x32x32xbf16> to vector<32x32xbf16>
    %cst_39 = arith.constant dense<0.000000e+00> : vector<128x32xf32>
    %109 = tpu.matmul %106, %108, %cst_39 {dimension_numbers = #tpu.dot_dimension_numbers<[1], [0], [0], [1], [0, 0, 1, 1], [], []>} : vector<128x32xbf16>, vector<32x32xbf16>, vector<128x32xf32> -> vector<128x32xf32>
    %c0_40 = arith.constant 0 : index
    %c0_41 = arith.constant 0 : index
    %c0_42 = arith.constant 0 : index
    %110 = vector.load %arg6[%c0_40, %c0_41, %c0_42] : memref<2x1x32xf32, #tpu.memory_space<vmem>>, vector<1x1x32xf32>
    %111 = vector.shape_cast %110 : vector<1x1x32xf32> to vector<1x32xf32>
    %112 = vector.broadcast %111 : vector<1x32xf32> to vector<128x32xf32>
    %113 = arith.addf %109, %112 : vector<128x32xf32>
    %114 = arith.addf %1, %113 : vector<128x32xf32>
    %c0_43 = arith.constant 0 : index
    %c0_44 = arith.constant 0 : index
    %c0_45 = arith.constant 0 : index
    %115 = vector.load %arg7[%c0_43, %c0_44, %c0_45] : memref<2x1x32xf32, #tpu.memory_space<vmem>>, vector<1x1x32xf32>
    %116 = vector.shape_cast %115 : vector<1x1x32xf32> to vector<1x32xf32>
    %c0_46 = arith.constant 0 : index
    %c0_47 = arith.constant 0 : index
    %c0_48 = arith.constant 0 : index
    %117 = vector.load %arg8[%c0_46, %c0_47, %c0_48] : memref<2x1x32xf32, #tpu.memory_space<vmem>>, vector<1x1x32xf32>
    %118 = vector.shape_cast %117 : vector<1x1x32xf32> to vector<1x32xf32>
    %cst_49 = arith.constant dense<0.000000e+00> : vector<128xf32>
    %119 = vector.multi_reduction <add>, %114, %cst_49 [1] : vector<128x32xf32> to vector<128xf32>
    %120 = vector.shape_cast %119 : vector<128xf32> to vector<128x1xf32>
    %cst_50 = arith.constant 3.200000e+01 : f32
    %121 = vector.broadcast %cst_50 : f32 to vector<128x1xf32>
    %122 = arith.divf %120, %121 : vector<128x1xf32>
    %123 = vector.broadcast %122 : vector<128x1xf32> to vector<128x32xf32>
    %124 = arith.subf %114, %123 : vector<128x32xf32>
    %125 = arith.mulf %124, %124 : vector<128x32xf32>
    %cst_51 = arith.constant dense<0.000000e+00> : vector<128xf32>
    %126 = vector.multi_reduction <add>, %125, %cst_51 [1] : vector<128x32xf32> to vector<128xf32>
    %127 = vector.shape_cast %126 : vector<128xf32> to vector<128x1xf32>
    %cst_52 = arith.constant 3.200000e+01 : f32
    %128 = vector.broadcast %cst_52 : f32 to vector<128x1xf32>
    %129 = arith.divf %127, %128 : vector<128x1xf32>
    %cst_53 = arith.constant 9.99999974E-6 : f32
    %130 = vector.broadcast %cst_53 : f32 to vector<128x1xf32>
    %131 = arith.addf %129, %130 : vector<128x1xf32>
    %132 = math.rsqrt %131 : vector<128x1xf32>
    %133 = vector.broadcast %132 : vector<128x1xf32> to vector<128x32xf32>
    %134 = arith.mulf %124, %133 : vector<128x32xf32>
    %135 = vector.broadcast %116 : vector<1x32xf32> to vector<128x32xf32>
    %136 = arith.mulf %134, %135 : vector<128x32xf32>
    %137 = vector.broadcast %118 : vector<1x32xf32> to vector<128x32xf32>
    %138 = arith.addf %136, %137 : vector<128x32xf32>
    %139 = arith.truncf %138 : vector<128x32xf32> to vector<128x32xbf16>
    %c0_54 = arith.constant 0 : index
    %c0_55 = arith.constant 0 : index
    %c0_56 = arith.constant 0 : index
    %140 = vector.load %arg9[%c0_54, %c0_55, %c0_56] : memref<2x32x64xbf16, #tpu.memory_space<vmem>>, vector<1x32x64xbf16>
    %141 = vector.shape_cast %140 : vector<1x32x64xbf16> to vector<32x64xbf16>
    %cst_57 = arith.constant dense<0.000000e+00> : vector<128x64xf32>
    %142 = tpu.matmul %139, %141, %cst_57 {dimension_numbers = #tpu.dot_dimension_numbers<[1], [0], [0], [1], [0, 0, 1, 1], [], []>} : vector<128x32xbf16>, vector<32x64xbf16>, vector<128x64xf32> -> vector<128x64xf32>
    %c0_58 = arith.constant 0 : index
    %c0_59 = arith.constant 0 : index
    %c0_60 = arith.constant 0 : index
    %143 = vector.load %arg10[%c0_58, %c0_59, %c0_60] : memref<2x1x64xf32, #tpu.memory_space<vmem>>, vector<1x1x64xf32>
    %144 = vector.shape_cast %143 : vector<1x1x64xf32> to vector<1x64xf32>
    %145 = vector.broadcast %144 : vector<1x64xf32> to vector<128x64xf32>
    %146 = arith.addf %142, %145 : vector<128x64xf32>
    %147 = arith.negf %146 : vector<128x64xf32>
    %148 = math.exp %147 : vector<128x64xf32>
    %cst_61 = arith.constant 1.000000e+00 : f32
    %149 = vector.broadcast %cst_61 : f32 to vector<128x64xf32>
    %150 = arith.addf %149, %148 : vector<128x64xf32>
    %151 = arith.divf %149, %150 : vector<128x64xf32>
    %152 = arith.mulf %146, %151 : vector<128x64xf32>
    %153 = arith.truncf %152 : vector<128x64xf32> to vector<128x64xbf16>
    %c0_62 = arith.constant 0 : index
    %c0_63 = arith.constant 0 : index
    %c0_64 = arith.constant 0 : index
    %154 = vector.load %arg11[%c0_62, %c0_63, %c0_64] : memref<2x64x32xbf16, #tpu.memory_space<vmem>>, vector<1x64x32xbf16>
    %155 = vector.shape_cast %154 : vector<1x64x32xbf16> to vector<64x32xbf16>
    %cst_65 = arith.constant dense<0.000000e+00> : vector<128x32xf32>
    %156 = tpu.matmul %153, %155, %cst_65 {dimension_numbers = #tpu.dot_dimension_numbers<[1], [0], [0], [1], [0, 0, 1, 1], [], []>} : vector<128x64xbf16>, vector<64x32xbf16>, vector<128x32xf32> -> vector<128x32xf32>
    %c0_66 = arith.constant 0 : index
    %c0_67 = arith.constant 0 : index
    %c0_68 = arith.constant 0 : index
    %157 = vector.load %arg12[%c0_66, %c0_67, %c0_68] : memref<2x1x32xf32, #tpu.memory_space<vmem>>, vector<1x1x32xf32>
    %158 = vector.shape_cast %157 : vector<1x1x32xf32> to vector<1x32xf32>
    %159 = vector.broadcast %158 : vector<1x32xf32> to vector<128x32xf32>
    %160 = arith.addf %156, %159 : vector<128x32xf32>
    %161 = arith.addf %114, %160 : vector<128x32xf32>
    %c1 = arith.constant 1 : index
    %c0_69 = arith.constant 0 : index
    %c0_70 = arith.constant 0 : index
    %162 = vector.load %arg2[%c1, %c0_69, %c0_70] : memref<2x1x32xf32, #tpu.memory_space<vmem>>, vector<1x1x32xf32>
    %163 = vector.shape_cast %162 : vector<1x1x32xf32> to vector<1x32xf32>
    %c1_71 = arith.constant 1 : index
    %c0_72 = arith.constant 0 : index
    %c0_73 = arith.constant 0 : index
    %164 = vector.load %arg3[%c1_71, %c0_72, %c0_73] : memref<2x1x32xf32, #tpu.memory_space<vmem>>, vector<1x1x32xf32>
    %165 = vector.shape_cast %164 : vector<1x1x32xf32> to vector<1x32xf32>
    %cst_74 = arith.constant dense<0.000000e+00> : vector<128xf32>
    %166 = vector.multi_reduction <add>, %161, %cst_74 [1] : vector<128x32xf32> to vector<128xf32>
    %167 = vector.shape_cast %166 : vector<128xf32> to vector<128x1xf32>
    %cst_75 = arith.constant 3.200000e+01 : f32
    %168 = vector.broadcast %cst_75 : f32 to vector<128x1xf32>
    %169 = arith.divf %167, %168 : vector<128x1xf32>
    %170 = vector.broadcast %169 : vector<128x1xf32> to vector<128x32xf32>
    %171 = arith.subf %161, %170 : vector<128x32xf32>
    %172 = arith.mulf %171, %171 : vector<128x32xf32>
    %cst_76 = arith.constant dense<0.000000e+00> : vector<128xf32>
    %173 = vector.multi_reduction <add>, %172, %cst_76 [1] : vector<128x32xf32> to vector<128xf32>
    %174 = vector.shape_cast %173 : vector<128xf32> to vector<128x1xf32>
    %cst_77 = arith.constant 3.200000e+01 : f32
    %175 = vector.broadcast %cst_77 : f32 to vector<128x1xf32>
    %176 = arith.divf %174, %175 : vector<128x1xf32>
    %cst_78 = arith.constant 9.99999974E-6 : f32
    %177 = vector.broadcast %cst_78 : f32 to vector<128x1xf32>
    %178 = arith.addf %176, %177 : vector<128x1xf32>
    %179 = math.rsqrt %178 : vector<128x1xf32>
    %180 = vector.broadcast %179 : vector<128x1xf32> to vector<128x32xf32>
    %181 = arith.mulf %171, %180 : vector<128x32xf32>
    %182 = vector.broadcast %163 : vector<1x32xf32> to vector<128x32xf32>
    %183 = arith.mulf %181, %182 : vector<128x32xf32>
    %184 = vector.broadcast %165 : vector<1x32xf32> to vector<128x32xf32>
    %185 = arith.addf %183, %184 : vector<128x32xf32>
    %186 = arith.truncf %185 : vector<128x32xf32> to vector<128x32xbf16>
    %c1_79 = arith.constant 1 : index
    %c0_80 = arith.constant 0 : index
    %c0_81 = arith.constant 0 : index
    %187 = vector.load %arg4[%c1_79, %c0_80, %c0_81] : memref<2x32x96xbf16, #tpu.memory_space<vmem>>, vector<1x32x96xbf16>
    %188 = vector.shape_cast %187 : vector<1x32x96xbf16> to vector<32x96xbf16>
    %cst_82 = arith.constant dense<0.000000e+00> : vector<128x96xf32>
    %189 = tpu.matmul %186, %188, %cst_82 {dimension_numbers = #tpu.dot_dimension_numbers<[1], [0], [0], [1], [0, 0, 1, 1], [], []>} : vector<128x32xbf16>, vector<32x96xbf16>, vector<128x96xf32> -> vector<128x96xf32>
    %190 = vector.shape_cast %189 : vector<128x96xf32> to vector<8x16x96xf32>
    %191 = arith.truncf %190 : vector<8x16x96xf32> to vector<8x16x96xbf16>
    %192 = vector.extract_strided_slice %191 {offsets = [0, 0, 0], sizes = [8, 16, 8], strides = [1, 1, 1]} : vector<8x16x96xbf16> to vector<8x16x8xbf16>
    %193 = vector.extract_strided_slice %191 {offsets = [0, 0, 32], sizes = [8, 16, 8], strides = [1, 1, 1]} : vector<8x16x96xbf16> to vector<8x16x8xbf16>
    %194 = vector.extract_strided_slice %191 {offsets = [0, 0, 64], sizes = [8, 16, 8], strides = [1, 1, 1]} : vector<8x16x96xbf16> to vector<8x16x8xbf16>
    "tpu.trace_start"() <{level = 10 : i32, message = "snd,smd->snm"}> : () -> ()
    %cst_83 = arith.constant dense<0.000000e+00> : vector<8x16x16xf32>
    %195 = tpu.matmul %192, %193, %cst_83 {dimension_numbers = #tpu.dot_dimension_numbers<[2], [2], [1], [1], [0, 0, 0, 1, 1, 1], [0], [0]>} : vector<8x16x8xbf16>, vector<8x16x8xbf16>, vector<8x16x16xf32> -> vector<8x16x16xf32>
    "tpu.trace_stop"() : () -> ()
    %cst_84 = arith.constant 0.353553385 : f32
    %196 = vector.broadcast %cst_84 : f32 to vector<8x16x16xf32>
    %197 = arith.mulf %195, %196 : vector<8x16x16xf32>
    %cst_85 = arith.constant dense<0xFF800000> : vector<8x16xf32>
    %198 = vector.multi_reduction <maximumf>, %197, %cst_85 [2] : vector<8x16x16xf32> to vector<8x16xf32>
    %199 = vector.shape_cast %198 : vector<8x16xf32> to vector<8x16x1xf32>
    %200 = vector.broadcast %199 : vector<8x16x1xf32> to vector<8x16x16xf32>
    %201 = arith.subf %197, %200 : vector<8x16x16xf32>
    %202 = math.exp %201 : vector<8x16x16xf32>
    %cst_86 = arith.constant dense<0.000000e+00> : vector<8x16xf32>
    %203 = vector.multi_reduction <add>, %202, %cst_86 [2] : vector<8x16x16xf32> to vector<8x16xf32>
    %204 = vector.shape_cast %203 : vector<8x16xf32> to vector<8x16x1xf32>
    %205 = tpu.reciprocal %204 {approx = true} : vector<8x16x1xf32> -> vector<8x16x1xf32>
    %206 = vector.broadcast %205 : vector<8x16x1xf32> to vector<8x16x16xf32>
    %207 = arith.mulf %202, %206 : vector<8x16x16xf32>
    %208 = arith.truncf %207 : vector<8x16x16xf32> to vector<8x16x16xbf16>
    "tpu.trace_start"() <{level = 10 : i32, message = "snm,smd->snd"}> : () -> ()
    %cst_87 = arith.constant dense<0.000000e+00> : vector<8x16x8xf32>
    %209 = tpu.matmul %208, %194, %cst_87 {dimension_numbers = #tpu.dot_dimension_numbers<[2], [1], [1], [2], [0, 0, 0, 1, 1, 2], [0], [0]>} : vector<8x16x16xbf16>, vector<8x16x8xbf16>, vector<8x16x8xf32> -> vector<8x16x8xf32>
    "tpu.trace_stop"() : () -> ()
    %210 = vector.extract_strided_slice %191 {offsets = [0, 0, 8], sizes = [8, 16, 8], strides = [1, 1, 1]} : vector<8x16x96xbf16> to vector<8x16x8xbf16>
    %211 = vector.extract_strided_slice %191 {offsets = [0, 0, 40], sizes = [8, 16, 8], strides = [1, 1, 1]} : vector<8x16x96xbf16> to vector<8x16x8xbf16>
    %212 = vector.extract_strided_slice %191 {offsets = [0, 0, 72], sizes = [8, 16, 8], strides = [1, 1, 1]} : vector<8x16x96xbf16> to vector<8x16x8xbf16>
    "tpu.trace_start"() <{level = 10 : i32, message = "snd,smd->snm"}> : () -> ()
    %cst_88 = arith.constant dense<0.000000e+00> : vector<8x16x16xf32>
    %213 = tpu.matmul %210, %211, %cst_88 {dimension_numbers = #tpu.dot_dimension_numbers<[2], [2], [1], [1], [0, 0, 0, 1, 1, 1], [0], [0]>} : vector<8x16x8xbf16>, vector<8x16x8xbf16>, vector<8x16x16xf32> -> vector<8x16x16xf32>
    "tpu.trace_stop"() : () -> ()
    %cst_89 = arith.constant 0.353553385 : f32
    %214 = vector.broadcast %cst_89 : f32 to vector<8x16x16xf32>
    %215 = arith.mulf %213, %214 : vector<8x16x16xf32>
    %cst_90 = arith.constant dense<0xFF800000> : vector<8x16xf32>
    %216 = vector.multi_reduction <maximumf>, %215, %cst_90 [2] : vector<8x16x16xf32> to vector<8x16xf32>
    %217 = vector.shape_cast %216 : vector<8x16xf32> to vector<8x16x1xf32>
    %218 = vector.broadcast %217 : vector<8x16x1xf32> to vector<8x16x16xf32>
    %219 = arith.subf %215, %218 : vector<8x16x16xf32>
    %220 = math.exp %219 : vector<8x16x16xf32>
    %cst_91 = arith.constant dense<0.000000e+00> : vector<8x16xf32>
    %221 = vector.multi_reduction <add>, %220, %cst_91 [2] : vector<8x16x16xf32> to vector<8x16xf32>
    %222 = vector.shape_cast %221 : vector<8x16xf32> to vector<8x16x1xf32>
    %223 = tpu.reciprocal %222 {approx = true} : vector<8x16x1xf32> -> vector<8x16x1xf32>
    %224 = vector.broadcast %223 : vector<8x16x1xf32> to vector<8x16x16xf32>
    %225 = arith.mulf %220, %224 : vector<8x16x16xf32>
    %226 = arith.truncf %225 : vector<8x16x16xf32> to vector<8x16x16xbf16>
    "tpu.trace_start"() <{level = 10 : i32, message = "snm,smd->snd"}> : () -> ()
    %cst_92 = arith.constant dense<0.000000e+00> : vector<8x16x8xf32>
    %227 = tpu.matmul %226, %212, %cst_92 {dimension_numbers = #tpu.dot_dimension_numbers<[2], [1], [1], [2], [0, 0, 0, 1, 1, 2], [0], [0]>} : vector<8x16x16xbf16>, vector<8x16x8xbf16>, vector<8x16x8xf32> -> vector<8x16x8xf32>
    "tpu.trace_stop"() : () -> ()
    %228 = vector.extract_strided_slice %191 {offsets = [0, 0, 16], sizes = [8, 16, 8], strides = [1, 1, 1]} : vector<8x16x96xbf16> to vector<8x16x8xbf16>
    %229 = vector.extract_strided_slice %191 {offsets = [0, 0, 48], sizes = [8, 16, 8], strides = [1, 1, 1]} : vector<8x16x96xbf16> to vector<8x16x8xbf16>
    %230 = vector.extract_strided_slice %191 {offsets = [0, 0, 80], sizes = [8, 16, 8], strides = [1, 1, 1]} : vector<8x16x96xbf16> to vector<8x16x8xbf16>
    "tpu.trace_start"() <{level = 10 : i32, message = "snd,smd->snm"}> : () -> ()
    %cst_93 = arith.constant dense<0.000000e+00> : vector<8x16x16xf32>
    %231 = tpu.matmul %228, %229, %cst_93 {dimension_numbers = #tpu.dot_dimension_numbers<[2], [2], [1], [1], [0, 0, 0, 1, 1, 1], [0], [0]>} : vector<8x16x8xbf16>, vector<8x16x8xbf16>, vector<8x16x16xf32> -> vector<8x16x16xf32>
    "tpu.trace_stop"() : () -> ()
    %cst_94 = arith.constant 0.353553385 : f32
    %232 = vector.broadcast %cst_94 : f32 to vector<8x16x16xf32>
    %233 = arith.mulf %231, %232 : vector<8x16x16xf32>
    %cst_95 = arith.constant dense<0xFF800000> : vector<8x16xf32>
    %234 = vector.multi_reduction <maximumf>, %233, %cst_95 [2] : vector<8x16x16xf32> to vector<8x16xf32>
    %235 = vector.shape_cast %234 : vector<8x16xf32> to vector<8x16x1xf32>
    %236 = vector.broadcast %235 : vector<8x16x1xf32> to vector<8x16x16xf32>
    %237 = arith.subf %233, %236 : vector<8x16x16xf32>
    %238 = math.exp %237 : vector<8x16x16xf32>
    %cst_96 = arith.constant dense<0.000000e+00> : vector<8x16xf32>
    %239 = vector.multi_reduction <add>, %238, %cst_96 [2] : vector<8x16x16xf32> to vector<8x16xf32>
    %240 = vector.shape_cast %239 : vector<8x16xf32> to vector<8x16x1xf32>
    %241 = tpu.reciprocal %240 {approx = true} : vector<8x16x1xf32> -> vector<8x16x1xf32>
    %242 = vector.broadcast %241 : vector<8x16x1xf32> to vector<8x16x16xf32>
    %243 = arith.mulf %238, %242 : vector<8x16x16xf32>
    %244 = arith.truncf %243 : vector<8x16x16xf32> to vector<8x16x16xbf16>
    "tpu.trace_start"() <{level = 10 : i32, message = "snm,smd->snd"}> : () -> ()
    %cst_97 = arith.constant dense<0.000000e+00> : vector<8x16x8xf32>
    %245 = tpu.matmul %244, %230, %cst_97 {dimension_numbers = #tpu.dot_dimension_numbers<[2], [1], [1], [2], [0, 0, 0, 1, 1, 2], [0], [0]>} : vector<8x16x16xbf16>, vector<8x16x8xbf16>, vector<8x16x8xf32> -> vector<8x16x8xf32>
    "tpu.trace_stop"() : () -> ()
    %246 = vector.extract_strided_slice %191 {offsets = [0, 0, 24], sizes = [8, 16, 8], strides = [1, 1, 1]} : vector<8x16x96xbf16> to vector<8x16x8xbf16>
    %247 = vector.extract_strided_slice %191 {offsets = [0, 0, 56], sizes = [8, 16, 8], strides = [1, 1, 1]} : vector<8x16x96xbf16> to vector<8x16x8xbf16>
    %248 = vector.extract_strided_slice %191 {offsets = [0, 0, 88], sizes = [8, 16, 8], strides = [1, 1, 1]} : vector<8x16x96xbf16> to vector<8x16x8xbf16>
    "tpu.trace_start"() <{level = 10 : i32, message = "snd,smd->snm"}> : () -> ()
    %cst_98 = arith.constant dense<0.000000e+00> : vector<8x16x16xf32>
    %249 = tpu.matmul %246, %247, %cst_98 {dimension_numbers = #tpu.dot_dimension_numbers<[2], [2], [1], [1], [0, 0, 0, 1, 1, 1], [0], [0]>} : vector<8x16x8xbf16>, vector<8x16x8xbf16>, vector<8x16x16xf32> -> vector<8x16x16xf32>
    "tpu.trace_stop"() : () -> ()
    %cst_99 = arith.constant 0.353553385 : f32
    %250 = vector.broadcast %cst_99 : f32 to vector<8x16x16xf32>
    %251 = arith.mulf %249, %250 : vector<8x16x16xf32>
    %cst_100 = arith.constant dense<0xFF800000> : vector<8x16xf32>
    %252 = vector.multi_reduction <maximumf>, %251, %cst_100 [2] : vector<8x16x16xf32> to vector<8x16xf32>
    %253 = vector.shape_cast %252 : vector<8x16xf32> to vector<8x16x1xf32>
    %254 = vector.broadcast %253 : vector<8x16x1xf32> to vector<8x16x16xf32>
    %255 = arith.subf %251, %254 : vector<8x16x16xf32>
    %256 = math.exp %255 : vector<8x16x16xf32>
    %cst_101 = arith.constant dense<0.000000e+00> : vector<8x16xf32>
    %257 = vector.multi_reduction <add>, %256, %cst_101 [2] : vector<8x16x16xf32> to vector<8x16xf32>
    %258 = vector.shape_cast %257 : vector<8x16xf32> to vector<8x16x1xf32>
    %259 = tpu.reciprocal %258 {approx = true} : vector<8x16x1xf32> -> vector<8x16x1xf32>
    %260 = vector.broadcast %259 : vector<8x16x1xf32> to vector<8x16x16xf32>
    %261 = arith.mulf %256, %260 : vector<8x16x16xf32>
    %262 = arith.truncf %261 : vector<8x16x16xf32> to vector<8x16x16xbf16>
    "tpu.trace_start"() <{level = 10 : i32, message = "snm,smd->snd"}> : () -> ()
    %cst_102 = arith.constant dense<0.000000e+00> : vector<8x16x8xf32>
    %263 = tpu.matmul %262, %248, %cst_102 {dimension_numbers = #tpu.dot_dimension_numbers<[2], [1], [1], [2], [0, 0, 0, 1, 1, 2], [0], [0]>} : vector<8x16x16xbf16>, vector<8x16x8xbf16>, vector<8x16x8xf32> -> vector<8x16x8xf32>
    "tpu.trace_stop"() : () -> ()
    %264 = tpu.concatenate %209, %227, %245, %263 in 2 : vector<8x16x8xf32>, vector<8x16x8xf32>, vector<8x16x8xf32>, vector<8x16x8xf32> -> vector<8x16x32xf32>
    %265 = vector.shape_cast %264 : vector<8x16x32xf32> to vector<128x32xf32>
    %266 = arith.truncf %265 : vector<128x32xf32> to vector<128x32xbf16>
    %c1_103 = arith.constant 1 : index
    %c0_104 = arith.constant 0 : index
    %c0_105 = arith.constant 0 : index
    %267 = vector.load %arg5[%c1_103, %c0_104, %c0_105] : memref<2x32x32xbf16, #tpu.memory_space<vmem>>, vector<1x32x32xbf16>
    %268 = vector.shape_cast %267 : vector<1x32x32xbf16> to vector<32x32xbf16>
    %cst_106 = arith.constant dense<0.000000e+00> : vector<128x32xf32>
    %269 = tpu.matmul %266, %268, %cst_106 {dimension_numbers = #tpu.dot_dimension_numbers<[1], [0], [0], [1], [0, 0, 1, 1], [], []>} : vector<128x32xbf16>, vector<32x32xbf16>, vector<128x32xf32> -> vector<128x32xf32>
    %c1_107 = arith.constant 1 : index
    %c0_108 = arith.constant 0 : index
    %c0_109 = arith.constant 0 : index
    %270 = vector.load %arg6[%c1_107, %c0_108, %c0_109] : memref<2x1x32xf32, #tpu.memory_space<vmem>>, vector<1x1x32xf32>
    %271 = vector.shape_cast %270 : vector<1x1x32xf32> to vector<1x32xf32>
    %272 = vector.broadcast %271 : vector<1x32xf32> to vector<128x32xf32>
    %273 = arith.addf %269, %272 : vector<128x32xf32>
    %274 = arith.addf %161, %273 : vector<128x32xf32>
    %c1_110 = arith.constant 1 : index
    %c0_111 = arith.constant 0 : index
    %c0_112 = arith.constant 0 : index
    %275 = vector.load %arg7[%c1_110, %c0_111, %c0_112] : memref<2x1x32xf32, #tpu.memory_space<vmem>>, vector<1x1x32xf32>
    %276 = vector.shape_cast %275 : vector<1x1x32xf32> to vector<1x32xf32>
    %c1_113 = arith.constant 1 : index
    %c0_114 = arith.constant 0 : index
    %c0_115 = arith.constant 0 : index
    %277 = vector.load %arg8[%c1_113, %c0_114, %c0_115] : memref<2x1x32xf32, #tpu.memory_space<vmem>>, vector<1x1x32xf32>
    %278 = vector.shape_cast %277 : vector<1x1x32xf32> to vector<1x32xf32>
    %cst_116 = arith.constant dense<0.000000e+00> : vector<128xf32>
    %279 = vector.multi_reduction <add>, %274, %cst_116 [1] : vector<128x32xf32> to vector<128xf32>
    %280 = vector.shape_cast %279 : vector<128xf32> to vector<128x1xf32>
    %cst_117 = arith.constant 3.200000e+01 : f32
    %281 = vector.broadcast %cst_117 : f32 to vector<128x1xf32>
    %282 = arith.divf %280, %281 : vector<128x1xf32>
    %283 = vector.broadcast %282 : vector<128x1xf32> to vector<128x32xf32>
    %284 = arith.subf %274, %283 : vector<128x32xf32>
    %285 = arith.mulf %284, %284 : vector<128x32xf32>
    %cst_118 = arith.constant dense<0.000000e+00> : vector<128xf32>
    %286 = vector.multi_reduction <add>, %285, %cst_118 [1] : vector<128x32xf32> to vector<128xf32>
    %287 = vector.shape_cast %286 : vector<128xf32> to vector<128x1xf32>
    %cst_119 = arith.constant 3.200000e+01 : f32
    %288 = vector.broadcast %cst_119 : f32 to vector<128x1xf32>
    %289 = arith.divf %287, %288 : vector<128x1xf32>
    %cst_120 = arith.constant 9.99999974E-6 : f32
    %290 = vector.broadcast %cst_120 : f32 to vector<128x1xf32>
    %291 = arith.addf %289, %290 : vector<128x1xf32>
    %292 = math.rsqrt %291 : vector<128x1xf32>
    %293 = vector.broadcast %292 : vector<128x1xf32> to vector<128x32xf32>
    %294 = arith.mulf %284, %293 : vector<128x32xf32>
    %295 = vector.broadcast %276 : vector<1x32xf32> to vector<128x32xf32>
    %296 = arith.mulf %294, %295 : vector<128x32xf32>
    %297 = vector.broadcast %278 : vector<1x32xf32> to vector<128x32xf32>
    %298 = arith.addf %296, %297 : vector<128x32xf32>
    %299 = arith.truncf %298 : vector<128x32xf32> to vector<128x32xbf16>
    %c1_121 = arith.constant 1 : index
    %c0_122 = arith.constant 0 : index
    %c0_123 = arith.constant 0 : index
    %300 = vector.load %arg9[%c1_121, %c0_122, %c0_123] : memref<2x32x64xbf16, #tpu.memory_space<vmem>>, vector<1x32x64xbf16>
    %301 = vector.shape_cast %300 : vector<1x32x64xbf16> to vector<32x64xbf16>
    %cst_124 = arith.constant dense<0.000000e+00> : vector<128x64xf32>
    %302 = tpu.matmul %299, %301, %cst_124 {dimension_numbers = #tpu.dot_dimension_numbers<[1], [0], [0], [1], [0, 0, 1, 1], [], []>} : vector<128x32xbf16>, vector<32x64xbf16>, vector<128x64xf32> -> vector<128x64xf32>
    %c1_125 = arith.constant 1 : index
    %c0_126 = arith.constant 0 : index
    %c0_127 = arith.constant 0 : index
    %303 = vector.load %arg10[%c1_125, %c0_126, %c0_127] : memref<2x1x64xf32, #tpu.memory_space<vmem>>, vector<1x1x64xf32>
    %304 = vector.shape_cast %303 : vector<1x1x64xf32> to vector<1x64xf32>
    %305 = vector.broadcast %304 : vector<1x64xf32> to vector<128x64xf32>
    %306 = arith.addf %302, %305 : vector<128x64xf32>
    %307 = arith.negf %306 : vector<128x64xf32>
    %308 = math.exp %307 : vector<128x64xf32>
    %cst_128 = arith.constant 1.000000e+00 : f32
    %309 = vector.broadcast %cst_128 : f32 to vector<128x64xf32>
    %310 = arith.addf %309, %308 : vector<128x64xf32>
    %311 = arith.divf %309, %310 : vector<128x64xf32>
    %312 = arith.mulf %306, %311 : vector<128x64xf32>
    %313 = arith.truncf %312 : vector<128x64xf32> to vector<128x64xbf16>
    %c1_129 = arith.constant 1 : index
    %c0_130 = arith.constant 0 : index
    %c0_131 = arith.constant 0 : index
    %314 = vector.load %arg11[%c1_129, %c0_130, %c0_131] : memref<2x64x32xbf16, #tpu.memory_space<vmem>>, vector<1x64x32xbf16>
    %315 = vector.shape_cast %314 : vector<1x64x32xbf16> to vector<64x32xbf16>
    %cst_132 = arith.constant dense<0.000000e+00> : vector<128x32xf32>
    %316 = tpu.matmul %313, %315, %cst_132 {dimension_numbers = #tpu.dot_dimension_numbers<[1], [0], [0], [1], [0, 0, 1, 1], [], []>} : vector<128x64xbf16>, vector<64x32xbf16>, vector<128x32xf32> -> vector<128x32xf32>
    %c1_133 = arith.constant 1 : index
    %c0_134 = arith.constant 0 : index
    %c0_135 = arith.constant 0 : index
    %317 = vector.load %arg12[%c1_133, %c0_134, %c0_135] : memref<2x1x32xf32, #tpu.memory_space<vmem>>, vector<1x1x32xf32>
    %318 = vector.shape_cast %317 : vector<1x1x32xf32> to vector<1x32xf32>
    %319 = vector.broadcast %318 : vector<1x32xf32> to vector<128x32xf32>
    %320 = arith.addf %316, %319 : vector<128x32xf32>
    %321 = arith.addf %274, %320 : vector<128x32xf32>
    %322 = vector.shape_cast %321 : vector<128x32xf32> to vector<8x16x32xf32>
    %c0_136 = arith.constant 0 : index
    %c0_137 = arith.constant 0 : index
    %c0_138 = arith.constant 0 : index
    %323 = vector.load %arg13[%c0_136, %c0_137, %c0_138] : memref<8x16x32xf32, #tpu.memory_space<vmem>>, vector<8x16x32xf32>
    tpu.vector_store %arg13[%c0_136, %c0_137, %c0_138], %322 {strides = array<i32>} : memref<8x16x32xf32, #tpu.memory_space<vmem>>, vector<8x16x32xf32>,
    return
  }
  func.func @transform_0(%arg0: i32) -> (i32, i32, i32) {
    %c0_i32 = arith.constant 0 : i32
    %c0_i32_0 = arith.constant 0 : i32
    %c0_i32_1 = arith.constant 0 : i32
    return %arg0, %c0_i32, %c0_i32_0 : i32, i32, i32
  }
  func.func @transform_1(%arg0: i32) -> (i32, i32, i32) {
    %c0_i32 = arith.constant 0 : i32
    %c0_i32_0 = arith.constant 0 : i32
    %c0_i32_1 = arith.constant 0 : i32
    %c0_i32_2 = arith.constant 0 : i32
    return %c0_i32, %c0_i32_0, %c0_i32_1 : i32, i32, i32
  }
  func.func @transform_2(%arg0: i32) -> (i32, i32, i32) {
    %c0_i32 = arith.constant 0 : i32
    %c0_i32_0 = arith.constant 0 : i32
    %c0_i32_1 = arith.constant 0 : i32
    %c0_i32_2 = arith.constant 0 : i32
    return %c0_i32, %c0_i32_0, %c0_i32_1 : i32, i32, i32
  }
  func.func @transform_3(%arg0: i32) -> (i32, i32, i32) {
    %c0_i32 = arith.constant 0 : i32
    %c0_i32_0 = arith.constant 0 : i32
    %c0_i32_1 = arith.constant 0 : i32
    %c0_i32_2 = arith.constant 0 : i32
    return %c0_i32, %c0_i32_0, %c0_i32_1 : i32, i32, i32
  }
  func.func @transform_4(%arg0: i32) -> (i32, i32, i32) {
    %c0_i32 = arith.constant 0 : i32
    %c0_i32_0 = arith.constant 0 : i32
    %c0_i32_1 = arith.constant 0 : i32
    %c0_i32_2 = arith.constant 0 : i32
    return %c0_i32, %c0_i32_0, %c0_i32_1 : i32, i32, i32
  }
  func.func @transform_5(%arg0: i32) -> (i32, i32, i32) {
    %c0_i32 = arith.constant 0 : i32
    %c0_i32_0 = arith.constant 0 : i32
    %c0_i32_1 = arith.constant 0 : i32
    %c0_i32_2 = arith.constant 0 : i32
    return %c0_i32, %c0_i32_0, %c0_i32_1 : i32, i32, i32
  }
  func.func @transform_6(%arg0: i32) -> (i32, i32, i32) {
    %c0_i32 = arith.constant 0 : i32
    %c0_i32_0 = arith.constant 0 : i32
    %c0_i32_1 = arith.constant 0 : i32
    %c0_i32_2 = arith.constant 0 : i32
    return %c0_i32, %c0_i32_0, %c0_i32_1 : i32, i32, i32
  }
  func.func @transform_7(%arg0: i32) -> (i32, i32, i32) {
    %c0_i32 = arith.constant 0 : i32
    %c0_i32_0 = arith.constant 0 : i32
    %c0_i32_1 = arith.constant 0 : i32
    %c0_i32_2 = arith.constant 0 : i32
    return %c0_i32, %c0_i32_0, %c0_i32_1 : i32, i32, i32
  }
  func.func @transform_8(%arg0: i32) -> (i32, i32, i32) {
    %c0_i32 = arith.constant 0 : i32
    %c0_i32_0 = arith.constant 0 : i32
    %c0_i32_1 = arith.constant 0 : i32
    %c0_i32_2 = arith.constant 0 : i32
    return %c0_i32, %c0_i32_0, %c0_i32_1 : i32, i32, i32
  }
  func.func @transform_9(%arg0: i32) -> (i32, i32, i32) {
    %c0_i32 = arith.constant 0 : i32
    %c0_i32_0 = arith.constant 0 : i32
    %c0_i32_1 = arith.constant 0 : i32
    %c0_i32_2 = arith.constant 0 : i32
    return %c0_i32, %c0_i32_0, %c0_i32_1 : i32, i32, i32
  }
  func.func @transform_10(%arg0: i32) -> (i32, i32, i32) {
    %c0_i32 = arith.constant 0 : i32
    %c0_i32_0 = arith.constant 0 : i32
    %c0_i32_1 = arith.constant 0 : i32
    %c0_i32_2 = arith.constant 0 : i32
    return %c0_i32, %c0_i32_0, %c0_i32_1 : i32, i32, i32
  }
  func.func @transform_11(%arg0: i32) -> (i32, i32, i32) {
    %c0_i32 = arith.constant 0 : i32
    %c0_i32_0 = arith.constant 0 : i32
    %c0_i32_1 = arith.constant 0 : i32
    %c0_i32_2 = arith.constant 0 : i32
    return %c0_i32, %c0_i32_0, %c0_i32_1 : i32, i32, i32
  }
  func.func @transform_12(%arg0: i32) -> (i32, i32, i32) {
    %c0_i32 = arith.constant 0 : i32
    %c0_i32_0 = arith.constant 0 : i32
    %c0_i32_1 = arith.constant 0 : i32
    return %arg0, %c0_i32, %c0_i32_0 : i32, i32, i32
  }
}

</mosaic_0001>

<bundles_post_ra>
// kernel: tpu_custom_call.1
= control target key start
LH: loop header
LB: loop body
LE: loop exit
PB: predicated region body
PF: predicated region fallthrough
CT: control target
= control target key end

     0   :  { %17 = vsyncpa [#allocation3], 0  ;;  %s18146_s0 = inlined_call_operand.hbm [shape: f32[8,16,32], index: 0, kind: input, shape index: {}]   ;;  %s18147_s1 = inlined_call_operand.vmem [shape: f32[2,1,32], index: 1, kind: input, shape index: {}]   ;;  %s18148_s2 = inlined_call_operand.vmem [shape: f32[2,1,32], index: 2, kind: input, shape index: {}]   ;;  %s18149_s3 = inlined_call_operand.vmem [shape: bf16[2,32,96], index: 3, kind: input, shape index: {}]   ;;  %s18150_s4 = inlined_call_operand.vmem [shape: bf16[2,32,32], index: 4, kind: input, shape index: {}]   ;;  %s18151_s5 = inlined_call_operand.hbm [shape: f32[2,1,32], index: 5, kind: input, shape index: {}]   ;;  %s18152_s6 = inlined_call_operand.hbm [shape: f32[2,1,32], index: 6, kind: input, shape index: {}]   ;;  %s18153_s7 = inlined_call_operand.hbm [shape: f32[2,1,32], index: 7, kind: input, shape index: {}]   ;;  %s18154_s8 = inlined_call_operand.vmem [shape: bf16[2,32,64], index: 8, kind: input, shape index: {}]   ;;  %s18155_s9 = inlined_call_operand.hbm [shape: f32[2,1,64], index: 9, kind: input, shape index: {}]   ;;  %s18156_s10 = inlined_call_operand.vmem [shape: bf16[2,64,32], index: 10, kind: input, shape index: {}]   ;;  %s18157_s11 = inlined_call_operand.vmem [shape: f32[2,1,32], index: 11, kind: input, shape index: {}]   ;;  %s18158_s12 = inlined_call_operand.hbm [shape: f32[8,16,32], index: 12, kind: output, shape index: {}]  }
   0x1   :  { %18 = vsyncpa [#allocation6], 0 }
   0x2   :  { %19 = vsyncpa [#allocation9], 0 }
   0x3   :  { %20 = vsyncpa [#allocation4], 0  ;;  %s13838_s21 = smov [#allocation5]   ;;  %s13698_s25 = scalar_lea.hbm %s18151_s5, 32 }
   0x4   :  { %s46_s22 = sshll.u32 %s13838_s21, 4  ;;  %p13699_p0 = scmp.ne.s32.totalorder %s18151_s5, %s13698_s25  ;;  %s47_s22 = int_to_ptr.vmem [resolvable:$true] %s46_s22 }
   0x5   :  { %p13702_p1 = scmp.lt.u32.totalorder %s13698_s25, %s18151_s5 }
   0x7   :  { %p13704_p2 = pnand %p13702_p1, %p13699_p0 }
   0x9   :  { %13707 = shalt.err (!%p13704_p2)
}
   0xa   :  { %s13708_s30 = scalar_lea.vmem %s47_s22, 32  ;;  %p13713_p4 = scmp.lt.s32.totalorder %s47_s22, %s47_s22 }
   0xb   :  { %p13709_p3 = scmp.ne.s32.totalorder %s47_s22, %s13708_s30  ;;  %p13714_p5 = scmp.lt.s32.totalorder %s13708_s30, %s13708_s30 }
   0xd   :  { %p13715_p6 = por %p13714_p5, %p13713_p4 }
   0xf   :  { %p13716_p7 = pnand %p13715_p6, %p13709_p3 }
  0x11   :  { %13719 = shalt.err (!%p13716_p7)
}
  0x12   :  { %s13839_s13 = smov 16   ;;  %s13840_s14 = smov 1  }
  0x13   :  { %52 = dma.hbm_to_vmem [thread:$0]  %s18151_s5, 32, %s47_s22, [#allocation6], %s13839_s13, %s13839_s13, %s13840_s14  }
  0x14   :  { %s13841_s17 = smov [#allocation8]   ;;  %s13842_s19 = smov [#allocation2]  }
  0x15   :  { %s70_s18 = sshll.u32 %s13841_s17, 4  ;;  %s26_s20 = sshll.u32 %s13842_s19, 4  ;;  %s71_s18 = int_to_ptr.vmem [resolvable:$true] %s70_s18  ;;  %s27_s20 = int_to_ptr.vmem [resolvable:$true] %s26_s20 }
  0x16   :  { %s13720_s24 = scalar_lea.hbm %s18153_s7, 32 }
  0x17   :  { %p13721_p8 = scmp.ne.s32.totalorder %s18153_s7, %s13720_s24  ;;  %p13724_p9 = scmp.lt.u32.totalorder %s13720_s24, %s18153_s7 }
  0x19   :  { %p13726_p10 = pnand %p13724_p9, %p13721_p8 }
  0x1b   :  { %13729 = shalt.err (!%p13726_p10)
}
  0x1c   :  { %s13730_s5 = scalar_lea.vmem %s71_s18, 32  ;;  %p13735_p12 = scmp.lt.s32.totalorder %s71_s18, %s71_s18 }
  0x1d   :  { %p13731_p11 = scmp.ne.s32.totalorder %s71_s18, %s13730_s5  ;;  %p13736_p13 = scmp.lt.s32.totalorder %s13730_s5, %s13730_s5 }
  0x1f   :  { %p13737_p0 = por %p13736_p13, %p13735_p12 }
  0x21   :  { %p13738_p1 = pnand %p13737_p0, %p13731_p11 }
  0x23   :  { %13741 = shalt.err (!%p13738_p1)
}
  0x24   :  { %76 = dma.hbm_to_vmem [thread:$0]  %s18153_s7, 32, %s71_s18, [#allocation9], %s13839_s13, %s13839_s13, %s13840_s14  }
  0x25   :  { %s13742_s16 = scalar_lea.hbm %s18146_s0, 2048 }
  0x26   :  { %p13743_p2 = scmp.ne.s32.totalorder %s18146_s0, %s13742_s16  ;;  %p13746_p3 = scmp.lt.u32.totalorder %s13742_s16, %s18146_s0 }
  0x28   :  { %p13748_p4 = pnand %p13746_p3, %p13743_p2 }
  0x2a   :  { %13751 = shalt.err (!%p13748_p4)
}
  0x2b   :  { %s13752_s24 = scalar_lea.vmem %s27_s20, 2048  ;;  %p13757_p6 = scmp.lt.s32.totalorder %s27_s20, %s27_s20 }
  0x2c   :  { %p13753_p5 = scmp.ne.s32.totalorder %s27_s20, %s13752_s24  ;;  %p13758_p7 = scmp.lt.s32.totalorder %s13752_s24, %s13752_s24 }
  0x2e   :  { %p13759_p8 = por %p13758_p7, %p13757_p6 }
  0x30   :  { %p13760_p9 = pnand %p13759_p8, %p13753_p5 }
  0x32   :  { %13763 = shalt.err (!%p13760_p9)
}
  0x33   :  { %s13843_s7 = smov 128   ;;  %s13844_s18 = smov 8  }
  0x34   :  { %32 = dma.hbm_to_vmem [thread:$0]  %s18146_s0, 2048, %s27_s20, [#allocation3], %s13843_s7, %s13843_s7, %s13844_s18  }
  0x35   :  { %s13845_s27 = smov [#allocation7]   ;;  %s13846_s5 = smov [#allocation10]  }
  0x36   :  { %s58_s28 = sshll.u32 %s13845_s27, 4  ;;  %s84_s22 = sshll.u32 %s13846_s5, 4  ;;  %s59_s28 = int_to_ptr.vmem [resolvable:$true] %s58_s28  ;;  %s85_s22 = int_to_ptr.vmem [resolvable:$true] %s84_s22 }
  0x37   :  { %s13764_s15 = scalar_lea.hbm %s18152_s6, 32 }
  0x38   :  { %p13765_p10 = scmp.ne.s32.totalorder %s18152_s6, %s13764_s15  ;;  %p13768_p11 = scmp.lt.u32.totalorder %s13764_s15, %s18152_s6 }
  0x3a   :  { %p13770_p12 = pnand %p13768_p11, %p13765_p10 }
  0x3c   :  { %13773 = shalt.err (!%p13770_p12)
}
  0x3d   :  { %s13774_s0 = scalar_lea.vmem %s59_s28, 32  ;;  %p13779_p0 = scmp.lt.s32.totalorder %s59_s28, %s59_s28 }
  0x3e   :  { %p13775_p13 = scmp.ne.s32.totalorder %s59_s28, %s13774_s0  ;;  %p13780_p1 = scmp.lt.s32.totalorder %s13774_s0, %s13774_s0 }
  0x40   :  { %p13781_p2 = por %p13780_p1, %p13779_p0 }
  0x42   :  { %p13782_p3 = pnand %p13781_p2, %p13775_p13 }
  0x44   :  { %13785 = shalt.err (!%p13782_p3)
}
  0x45   :  { %64 = dma.hbm_to_vmem [thread:$0]  %s18152_s6, 32, %s59_s28, [#allocation6], %s13839_s13, %s13839_s13, %s13840_s14  }
  0x46   :  { %s13786_s26 = scalar_lea.hbm %s18155_s9, 32 }
  0x47   :  { %p13787_p4 = scmp.ne.s32.totalorder %s18155_s9, %s13786_s26  ;;  %p13790_p5 = scmp.lt.u32.totalorder %s13786_s26, %s18155_s9 }
  0x49   :  { %p13792_p6 = pnand %p13790_p5, %p13787_p4 }
  0x4b   :  { %13795 = shalt.err (!%p13792_p6)
}
  0x4c   :  { %s13796_s15 = scalar_lea.vmem %s85_s22, 32  ;;  %p13801_p8 = scmp.lt.s32.totalorder %s85_s22, %s85_s22 }
  0x4d   :  { %p13797_p7 = scmp.ne.s32.totalorder %s85_s22, %s13796_s15  ;;  %p13802_p9 = scmp.lt.s32.totalorder %s13796_s15, %s13796_s15 }
  0x4f   :  { %p13803_p10 = por %p13802_p9, %p13801_p8 }
  0x51   :  { %p13804_p11 = pnand %p13803_p10, %p13797_p7 }
  0x53   :  { %13807 = shalt.err (!%p13804_p11)
}
  0x54   :  { %90 = dma.hbm_to_vmem [thread:$0]  %s18155_s9, 32, %s85_s22, [#allocation9], %s13839_s13, %s13839_s13, %s13840_s14  }
  0x55   :  { %13830 = dma.done.wait [#allocation3], 2048  }
  0x56   :  { %13831 = vsyncadd [#allocation3], 4294965248 }
  0x57   :  { %13832 = dma.done.wait [#allocation6], 64  }
  0x58   :  { %13833 = vsyncadd [#allocation6], 4294967232 }
  0x59   :  { %13834 = dma.done.wait [#allocation9], 64  }
  0x5a   :  { %13835 = vsyncadd [#allocation9], 4294967232  ;;  %vm129_vm0 = vcmask 261120   ;;  %v111_v0 = vld [vmem:[#allocation2] sm:$0xff]  ;;  %v113_v1 = vld [vmem:[#allocation2 + $0x10] sm:$0xff]  ;;  %vm13848_vm1 = vmmov 0  }
  0x5b   :  { %v112_v2 = vld [vmem:[#allocation2 + $0x8] sm:$0xff]  ;;  %v130_v3 = vsel %vm129_vm0, %v111_v0, 0.0  ;;  %v136_v4 = vsel %vm129_vm0, %v113_v1, 0.0  ;;  %v114_v5 = vld [vmem:[#allocation2 + $0x18] sm:$0xff]  ;;  %v14004_v6 = vld [vmem:[#allocation2 + $0x20] sm:$0xff]  ;;  %s13849_s20 = smov 96  }
  0x5c   :  { %131 = vadd.xlane.f32.xlu0 %v130_v3  ;;  %137 = vadd.xlane.f32.xlu1 %v136_v4  ;;  %v14006_v7 = vld [vmem:[#allocation2 + $0x28] sm:$0xff]  ;;  %v14008_v8 = vld [vmem:[#allocation2 + $0x30] sm:$0xff]  ;;  %v14010_v9 = vld [vmem:[#allocation2 + $0x38] sm:$0xff]  ;;  %v133_v10 = vsel %vm129_vm0, %v112_v2, 0.0  ;;  %v139_v11 = vsel %vm129_vm0, %v114_v5, 0.0  ;;  %v142_v14 = vsel %vm129_vm0, %v14004_v6, 0.0 }
  0x5d   :  { %v14014_v12 = vld [vmem:[#allocation2 + $0x40] sm:$0xff]  ;;  %v14016_v13 = vld [vmem:[#allocation2 + $0x48] sm:$0xff]  ;;  %v145_v15 = vsel %vm129_vm0, %v14006_v7, 0.0  ;;  %v148_v16 = vsel %vm129_vm0, %v14008_v8, 0.0  ;;  %v151_v17 = vsel %vm129_vm0, %v14010_v9, 0.0  ;;  %v14030_v20 = vld [vmem:[#allocation2 + $0x50] sm:$0xff] }
  0x5e   :  { %v154_v18 = vsel %vm129_vm0, %v14014_v12, 0.0  ;;  %v157_v19 = vsel %vm129_vm0, %v14016_v13, 0.0  ;;  %v14032_v21 = vld [vmem:[#allocation2 + $0x58] sm:$0xff]  ;;  %v160_v22 = vsel %vm129_vm0, %v14030_v20, 0.0  ;;  %v14038_v24 = vld [vmem:[#allocation2 + $0x60] sm:$0xff]  ;;  %v14040_v25 = vld [vmem:[#allocation2 + $0x68] sm:$0xff] }
  0x5f   :  { %v163_v23 = vsel %vm129_vm0, %v14032_v21, 0.0  ;;  %v166_v26 = vsel %vm129_vm0, %v14038_v24, 0.0  ;;  %v169_v27 = vsel %vm129_vm0, %v14040_v25, 0.0  ;;  %v14046_v28 = vld [vmem:[#allocation2 + $0x70] sm:$0xff]  ;;  %v14048_v29 = vld [vmem:[#allocation2 + $0x78] sm:$0xff]  ;;  %s13850_s23 = smov 64  }
  0x60   :  { %134 = vadd.xlane.f32.xlu0 %v133_v10  ;;  %140 = vadd.xlane.f32.xlu1 %v139_v11  ;;  %v172_v30 = vsel %vm129_vm0, %v14046_v28, 0.0  ;;  %v175_v31 = vsel %vm129_vm0, %v14048_v29, 0.0  ;;  %vm539_vm2 = vcmask 64512   ;;  %vm953_vm3 = vcmask 130048   ;;  %s13851_s24 = smov 88   ;;  %s13852_s25 = smov 120  }
  0x61   :  { %s13853_s26 = smov 56   ;;  %s13854_s27 = smov 80   ;;  %vm4690_vm4 = vcmask 195584   ;;  %vm5440_vm5 = vcmask 523264  }
  0x62   :  { %s13855_s5 = smov 112   ;;  %s13856_s29 = smov 48  }
  0x63   :  { %s13857_s30 = smov 72   ;;  %s13858_s15 = smov 104  }
  0x64   :  { %143 = vadd.xlane.f32.xlu0 %v142_v14  ;;  %146 = vadd.xlane.f32.xlu1 %v145_v15  ;;  %s13859_s6 = smov 40   ;;  %s13860_s14 = smov 24  }
  0x68   :  { %149 = vadd.xlane.f32.xlu0 %v148_v16  ;;  %152 = vadd.xlane.f32.xlu1 %v151_v17 }
  0x6c   :  { %155 = vadd.xlane.f32.xlu0 %v154_v18  ;;  %158 = vadd.xlane.f32.xlu1 %v157_v19 }
  0x70   :  { %161 = vadd.xlane.f32.xlu0 %v160_v22  ;;  %164 = vadd.xlane.f32.xlu1 %v163_v23 }
  0x74   :  { %167 = vadd.xlane.f32.xlu0 %v166_v26  ;;  %170 = vadd.xlane.f32.xlu1 %v169_v27 }
  0x78   :  { %173 = vadd.xlane.f32.xlu0 %v172_v30  ;;  %176 = vadd.xlane.f32.xlu1 %v175_v31 }
  0xe9   :  { %v132_v32 = vpop.xlane.xlu0 %131  ;;  %v138_v33 = vpop.xlane.xlu1 %137 }
  0xea   :  { %v179_v34 = vmul.f32 0.03125, %v132_v32  ;;  %v181_v35 = vmul.f32 0.03125, %v138_v33 }
  0xec   :  { %v14054_v36 = vsub.f32 %v111_v0, %v179_v34  ;;  %v14056_v37 = vsub.f32 %v113_v1, %v181_v35 }
  0xed   :  { %v135_v38 = vpop.xlane.xlu0 %134  ;;  %v141_v39 = vpop.xlane.xlu1 %140 }
  0xee   :  { %v180_v40 = vmul.f32 0.03125, %v135_v38  ;;  %v182_v41 = vmul.f32 0.03125, %v141_v39  ;;  %v211_v42 = vmul.f32 %v14054_v36, %v14054_v36  ;;  %v213_v43 = vmul.f32 %v14056_v37, %v14056_v37 }
  0xf0   :  { %v14062_v44 = vsub.f32 %v112_v2, %v180_v40  ;;  %v14064_v45 = vsub.f32 %v114_v5, %v182_v41  ;;  %v227_v46 = vsel %vm129_vm0, %v211_v42, 0.0  ;;  %v233_v49 = vsel %vm129_vm0, %v213_v43, 0.0 }
  0xf1   :  { %228 = vadd.xlane.f32.xlu0 %v227_v46  ;;  %v144_v47 = vpop.xlane.xlu0 %143  ;;  %v147_v48 = vpop.xlane.xlu1 %146 }
  0xf2   :  { %v183_v50 = vmul.f32 0.03125, %v144_v47  ;;  %v184_v51 = vmul.f32 0.03125, %v147_v48  ;;  %v212_v52 = vmul.f32 %v14062_v44, %v14062_v44  ;;  %v214_v53 = vmul.f32 %v14064_v45, %v14064_v45 }
  0xf4   :  { %v14073_v54 = vsub.f32 %v14004_v6, %v183_v50  ;;  %v14076_v55 = vsub.f32 %v14006_v7, %v184_v51  ;;  %v230_v56 = vsel %vm129_vm0, %v212_v52, 0.0  ;;  %v236_v59 = vsel %vm129_vm0, %v214_v53, 0.0  ;;  %v12895_v53 = vld [vmem:[%s18149_s3 + $0x8] sm:$0xff]  }
  0xf5   :  { %234 = vadd.xlane.f32.xlu0 %v233_v49  ;;  %231 = vadd.xlane.f32.xlu1 %v230_v56  ;;  %v150_v57 = vpop.xlane.xlu0 %149  ;;  %v153_v58 = vpop.xlane.xlu1 %152 }
  0xf6   :  { %v185_v60 = vmul.f32 0.03125, %v150_v57  ;;  %v186_v61 = vmul.f32 0.03125, %v153_v58  ;;  %v215_v62 = vmul.f32 %v14073_v54, %v14073_v54  ;;  %v216_v63 = vmul.f32 %v14076_v55, %v14076_v55 }
  0xf8   :  { %v14085_v0 = vsub.f32 %v14008_v8, %v185_v60  ;;  %v14088_v1 = vsub.f32 %v14010_v9, %v186_v61  ;;  %v239_v2 = vsel %vm129_vm0, %v215_v62, 0.0  ;;  %v242_v5 = vsel %vm129_vm0, %v216_v63, 0.0 }
  0xf9   :  { %237 = vadd.xlane.f32.xlu1 %v236_v59  ;;  %240 = vadd.xlane.f32.xlu0 %v239_v2  ;;  %v156_v3 = vpop.xlane.xlu0 %155  ;;  %v159_v4 = vpop.xlane.xlu1 %158 }
  0xfa   :  { %v187_v6 = vmul.f32 0.03125, %v156_v3  ;;  %v188_v7 = vmul.f32 0.03125, %v159_v4  ;;  %v217_v10 = vmul.f32 %v14085_v0, %v14085_v0  ;;  %v218_v8 = vmul.f32 %v14088_v1, %v14088_v1 }
  0xfc   :  { %v14097_v11 = vsub.f32 %v14014_v12, %v187_v6  ;;  %v14100_v9 = vsub.f32 %v14016_v13, %v188_v7  ;;  %v245_v14 = vsel %vm129_vm0, %v217_v10, 0.0  ;;  %v248_v17 = vsel %vm129_vm0, %v218_v8, 0.0 }
  0xfd   :  { %243 = vadd.xlane.f32.xlu1 %v242_v5  ;;  %246 = vadd.xlane.f32.xlu0 %v245_v14  ;;  %v162_v15 = vpop.xlane.xlu0 %161  ;;  %v165_v16 = vpop.xlane.xlu1 %164 }
  0xfe   :  { %v189_v18 = vmul.f32 0.03125, %v162_v15  ;;  %v190_v19 = vmul.f32 0.03125, %v165_v16  ;;  %v219_v22 = vmul.f32 %v14097_v11, %v14097_v11  ;;  %v220_v12 = vmul.f32 %v14100_v9, %v14100_v9 }
 0x100   :  { %v14109_v23 = vsub.f32 %v14030_v20, %v189_v18  ;;  %v14112_v13 = vsub.f32 %v14032_v21, %v190_v19  ;;  %v251_v26 = vsel %vm129_vm0, %v219_v22, 0.0  ;;  %v254_v31 = vsel %vm129_vm0, %v220_v12, 0.0 }
 0x101   :  { %249 = vadd.xlane.f32.xlu1 %v248_v17  ;;  %252 = vadd.xlane.f32.xlu0 %v251_v26  ;;  %v168_v27 = vpop.xlane.xlu0 %167  ;;  %v171_v30 = vpop.xlane.xlu1 %170 }
 0x102   :  { %v191_v32 = vmul.f32 0.03125, %v168_v27  ;;  %v192_v33 = vmul.f32 0.03125, %v171_v30  ;;  %v221_v34 = vmul.f32 %v14109_v23, %v14109_v23  ;;  %v222_v20 = vmul.f32 %v14112_v13, %v14112_v13 }
 0x104   :  { %v14121_v35 = vsub.f32 %v14038_v24, %v191_v32  ;;  %v14124_v21 = vsub.f32 %v14040_v25, %v192_v33  ;;  %v257_v38 = vsel %vm129_vm0, %v221_v34, 0.0  ;;  %v260_v41 = vsel %vm129_vm0, %v222_v20, 0.0 }
 0x105   :  { %255 = vadd.xlane.f32.xlu1 %v254_v31  ;;  %258 = vadd.xlane.f32.xlu0 %v257_v38  ;;  %v174_v39 = vpop.xlane.xlu0 %173  ;;  %v177_v40 = vpop.xlane.xlu1 %176  ;;  %v14156_v31 = vld [vmem:[%s18147_s1] ss:$0 sm:$0xff] }
 0x106   :  { %v193_v42 = vmul.f32 0.03125, %v174_v39  ;;  %v194_v43 = vmul.f32 0.03125, %v177_v40  ;;  %v223_v46 = vmul.f32 %v14121_v35, %v14121_v35  ;;  %v224_v24 = vmul.f32 %v14124_v21, %v14124_v21 }
 0x108   :  { %v14133_v47 = vsub.f32 %v14046_v28, %v193_v42  ;;  %v14136_v25 = vsub.f32 %v14048_v29, %v194_v43  ;;  %v263_v48 = vsel %vm129_vm0, %v223_v46, 0.0  ;;  %v266_v49 = vsel %vm129_vm0, %v224_v24, 0.0  ;;  %v12894_v29 = vld [vmem:[%s18149_s3] sm:$0xff]  }
 0x109   :  { %261 = vadd.xlane.f32.xlu1 %v260_v41  ;;  %264 = vadd.xlane.f32.xlu0 %v263_v48  ;;  %v14163_v43 = vld [vmem:[%s18148_s2] ss:$0 sm:$0xff] }
 0x10a   :  { %v225_v50 = vmul.f32 %v14133_v47, %v14133_v47  ;;  %v226_v51 = vmul.f32 %v14136_v25, %v14136_v25  ;;  %11690 = vmatprep.subr.bf16.mxu0 %v12894_v29  ;;  %12626 = vmatprep.subr.bf16.mxu1 %v12894_v29 }
 0x10b   :  { %11691 = vmatpush3.bf16.msra.mxu0 %v12894_v29  ;;  %12628 = vmatpush3.bf16.msra.mxu1 %v12894_v29 }
 0x10c   :  { %v269_v52 = vsel %vm129_vm0, %v225_v50, 0.0  ;;  %v272_v28 = vsel %vm129_vm0, %v226_v51, 0.0  ;;  %11692 = vmatprep.subr.bf16.mxu0 %v12895_v53  ;;  %12627 = vmatprep.subr.bf16.mxu1 %v12895_v53 }
 0x10d   :  { %267 = vadd.xlane.f32.xlu1 %v266_v49  ;;  %270 = vadd.xlane.f32.xlu0 %v269_v52 }
 0x10f   :  { %11693 = vmatpush3.bf16.msra.mxu0 %v12895_v53  ;;  %12629 = vmatpush3.bf16.msra.mxu1 %v12895_v53 }
 0x111   :  { %273 = vadd.xlane.f32.xlu1 %v272_v28 }
 0x17e   :  { %v229_v56 = vpop.xlane.xlu0 %228 }
 0x17f   :  { %v275_v57 = vmul.f32 0.03125, %v229_v56 }
 0x181   :  { %v291_v58 = vadd.f32 1e-05, %v275_v57 }
 0x182   :  { %v232_v59 = vpop.xlane.xlu1 %231  ;;  %v235_v60 = vpop.xlane.xlu0 %234 }
 0x183   :  { %12914 = vrsqrt.f32 %v291_v58  ;;  %v276_v61 = vmul.f32 0.03125, %v232_v59  ;;  %v277_v62 = vmul.f32 0.03125, %v235_v60 }
 0x185   :  { %v292_v63 = vadd.f32 1e-05, %v276_v61  ;;  %v293_v2 = vadd.f32 1e-05, %v277_v62 }
 0x186   :  { %v238_v3 = vpop.xlane.xlu1 %237  ;;  %v241_v4 = vpop.xlane.xlu0 %240 }
 0x187   :  { %12916 = vrsqrt.f32 %v292_v63  ;;  %v278_v5 = vmul.f32 0.03125, %v238_v3  ;;  %v279_v6 = vmul.f32 0.03125, %v241_v4 }
 0x188   :  { %12918 = vrsqrt.f32 %v293_v2 }
 0x189   :  { %v294_v7 = vadd.f32 1e-05, %v278_v5  ;;  %v295_v10 = vadd.f32 1e-05, %v279_v6 }
 0x18a   :  { %v244_v8 = vpop.xlane.xlu1 %243  ;;  %v247_v14 = vpop.xlane.xlu0 %246 }
 0x18b   :  { %12920 = vrsqrt.f32 %v294_v7  ;;  %v280_v15 = vmul.f32 0.03125, %v244_v8  ;;  %v281_v16 = vmul.f32 0.03125, %v247_v14 }
 0x18c   :  { %12922 = vrsqrt.f32 %v295_v10 }
 0x18d   :  { %v12915_v17 = vpop.eup %12914  ;;  %v296_v18 = vadd.f32 1e-05, %v280_v15  ;;  %v297_v19 = vadd.f32 1e-05, %v281_v16 }
 0x18e   :  { %v250_v22 = vpop.xlane.xlu1 %249  ;;  %v253_v12 = vpop.xlane.xlu0 %252  ;;  %v323_v26 = vmul.f32 %v12915_v17, %v14054_v36 }
 0x18f   :  { %12924 = vrsqrt.f32 %v296_v18  ;;  %v282_v27 = vmul.f32 0.03125, %v250_v22  ;;  %v283_v30 = vmul.f32 0.03125, %v253_v12 }
 0x190   :  { %12926 = vrsqrt.f32 %v297_v19  ;;  %v345_v41 = vmul.f32 %v14156_v31, %v323_v26 }
 0x191   :  { %v12917_v32 = vpop.eup %12916  ;;  %v298_v33 = vadd.f32 1e-05, %v282_v27  ;;  %v299_v34 = vadd.f32 1e-05, %v283_v30 }
 0x192   :  { %v12919_v20 = vpop.eup %12918  ;;  %v256_v38 = vpop.xlane.xlu1 %255  ;;  %v324_v40 = vmul.f32 %v12917_v32, %v14062_v44  ;;  %v367_v28 = vadd.f32 %v14163_v43, %v345_v41 }
 0x193   :  { %v259_v39 = vpop.xlane.xlu0 %258  ;;  %12928 = vrsqrt.f32 %v298_v33  ;;  %v284_v36 = vmul.f32 0.03125, %v256_v38  ;;  %v325_v46 = vmul.f32 %v12919_v20, %v14056_v37 }
 0x194   :  { %v285_v42 = vmul.f32 0.03125, %v259_v39  ;;  %12930 = vrsqrt.f32 %v299_v34  ;;  %v346_v24 = vmul.f32 %v14156_v31, %v324_v40 }
 0x195   :  { %v12921_v48 = vpop.eup %12920  ;;  %v300_v49 = vadd.f32 1e-05, %v284_v36  ;;  %v347_v56 = vmul.f32 %v14156_v31, %v325_v46 }
 0x196   :  { %v301_v50 = vadd.f32 1e-05, %v285_v42  ;;  %v12923_v51 = vpop.eup %12922  ;;  %v262_v44 = vpop.xlane.xlu1 %261  ;;  %v368_v29 = vadd.f32 %v14163_v43, %v346_v24  ;;  %v326_v53 = vmul.f32 %v12921_v48, %v14064_v45 }
 0x197   :  { %v265_v52 = vpop.xlane.xlu0 %264  ;;  %12932 = vrsqrt.f32 %v300_v49  ;;  %v286_v57 = vmul.f32 0.03125, %v262_v44  ;;  %v327_v60 = vmul.f32 %v12923_v51, %v14073_v54  ;;  %v369_v45 = vadd.f32 %v14163_v43, %v347_v56 }
 0x198   :  { %v287_v37 = vmul.f32 0.03125, %v265_v52  ;;  %12934 = vrsqrt.f32 %v301_v50  ;;  %v383_v58 = vpack.c.bf16 %v368_v29, %v367_v28  ;;  %v348_v59 = vmul.f32 %v14156_v31, %v326_v53 }
 0x199   :  { %v12925_v61 = vpop.eup %12924  ;;  %v302_v62 = vadd.f32 1e-05, %v286_v57  ;;  %v349_v7 = vmul.f32 %v14156_v31, %v327_v60 }
 0x19a   :  { %v303_v63 = vadd.f32 1e-05, %v287_v37  ;;  %v12927_v2 = vpop.eup %12926  ;;  %v268_v3 = vpop.xlane.xlu1 %267  ;;  %11694 = vmatprep.mubr.msk.bf16.mxu0 %vm129_vm0, %v383_v58  ;;  %v370_v5 = vadd.f32 %v14163_v43, %v348_v59  ;;  %v328_v6 = vmul.f32 %v12925_v61, %v14076_v55 }
 0x19b   :  { %v271_v4 = vpop.xlane.xlu0 %270  ;;  %12936 = vrsqrt.f32 %v302_v62  ;;  %v288_v10 = vmul.f32 0.03125, %v268_v3  ;;  %v329_v54 = vmul.f32 %v12927_v2, %v14085_v0  ;;  %v371_v55 = vadd.f32 %v14163_v43, %v349_v7 }
 0x19c   :  { %v289_v8 = vmul.f32 0.03125, %v271_v4  ;;  %12938 = vrsqrt.f32 %v303_v63  ;;  %v384_v14 = vpack.c.bf16 %v370_v5, %v369_v45  ;;  %v350_v15 = vmul.f32 %v14156_v31, %v328_v6 }
 0x19d   :  { %v12929_v16 = vpop.eup %12928  ;;  %v304_v17 = vadd.f32 1e-05, %v288_v10  ;;  %v351_v27 = vmul.f32 %v14156_v31, %v329_v54  ;;  %v18159_v4 = vmov 0.0  }
 0x19e   :  { %v305_v18 = vadd.f32 1e-05, %v289_v8  ;;  %v12931_v19 = vpop.eup %12930  ;;  %v274_v22 = vpop.xlane.xlu1 %273  ;;  %11695 = vmatmul.mubr.msk.bf16.vlgmr.msra.gmra.mrb[0].mxu0 %vm129_vm0, %v384_v14  ;;  %v372_v12 = vadd.f32 %v14163_v43, %v350_v15  ;;  %v330_v26 = vmul.f32 %v12929_v16, %v14088_v1  ;;  %11710 = vmatprep.subr.bf16.mxu1 %v18159_v4 }
 0x19f   :  { %12940 = vrsqrt.f32 %v304_v17  ;;  %v290_v0 = vmul.f32 0.03125, %v274_v22  ;;  %v331_v30 = vmul.f32 %v12931_v19, %v14097_v11  ;;  %v373_v39 = vadd.f32 %v14163_v43, %v351_v27  ;;  %11734 = vmatprep.subr.bf16.mxu0 %v18159_v4 }
 0x1a0   :  { %12942 = vrsqrt.f32 %v305_v18  ;;  %v385_v32 = vpack.c.bf16 %v372_v12, %v371_v55  ;;  %v352_v33 = vmul.f32 %v14156_v31, %v330_v26 }
 0x1a1   :  { %v12933_v34 = vpop.eup %12932  ;;  %v306_v20 = vadd.f32 1e-05, %v290_v0  ;;  %v353_v41 = vmul.f32 %v14156_v31, %v331_v30 }
 0x1a2   :  { %v12935_v38 = vpop.eup %12934  ;;  %11698 = vmatprep.mubr.msk.bf16.mxu0 %vm129_vm0, %v385_v32  ;;  %v374_v40 = vadd.f32 %v14163_v43, %v352_v33  ;;  %v332_v1 = vmul.f32 %v12933_v34, %v14100_v9 }
 0x1a3   :  { %12944 = vrsqrt.f32 %v306_v20  ;;  %v333_v11 = vmul.f32 %v12935_v38, %v14109_v23  ;;  %v375_v48 = vadd.f32 %v14163_v43, %v353_v41 }
 0x1a4   :  { %v386_v36 = vpack.c.bf16 %v374_v40, %v373_v39  ;;  %v354_v42 = vmul.f32 %v14156_v31, %v332_v1 }
 0x1a5   :  { %v12937_v46 = vpop.eup %12936  ;;  %v355_v9 = vmul.f32 %v14156_v31, %v333_v11 }
 0x1a6   :  { %v12939_v24 = vpop.eup %12938  ;;  %11699 = vmatmul.mubr.msk.bf16.gmra.mrb[4].mxu0 %vm129_vm0, %v386_v36  ;;  %v376_v49 = vadd.f32 %v14163_v43, %v354_v42  ;;  %v334_v50 = vmul.f32 %v12937_v46, %v14112_v13 }
 0x1a7   :  { %v335_v51 = vmul.f32 %v12939_v24, %v14121_v35  ;;  %v377_v29 = vadd.f32 %v14163_v43, %v355_v9  ;;  %11736 = vmatprep.mubr.msk.bf16.mxu0 %vm13848_vm1, %v18159_v4 }
 0x1a8   :  { %v387_v44 = vpack.c.bf16 %v376_v49, %v375_v48  ;;  %v356_v23 = vmul.f32 %v14156_v31, %v334_v50 }
 0x1a9   :  { %v12941_v52 = vpop.eup %12940  ;;  %v357_v57 = vmul.f32 %v14156_v31, %v335_v51 }
 0x1aa   :  { %v12943_v28 = vpop.eup %12942  ;;  %11702 = vmatprep.mubr.msk.bf16.mxu1 %vm129_vm0, %v387_v44  ;;  %v378_v53 = vadd.f32 %v14163_v43, %v356_v23  ;;  %v336_v56 = vmul.f32 %v12941_v52, %v14124_v21 }
 0x1ab   :  { %v337_v13 = vmul.f32 %v12943_v28, %v14133_v47  ;;  %v379_v59 = vadd.f32 %v14163_v43, %v357_v57 }
 0x1ac   :  { %v388_v37 = vpack.c.bf16 %v378_v53, %v377_v29  ;;  %v358_v35 = vmul.f32 %v14156_v31, %v336_v56 }
 0x1ad   :  { %v12945_v58 = vpop.eup %12944  ;;  %v359_v62 = vmul.f32 %v14156_v31, %v337_v13 }
 0x1ae   :  { %11703 = vmatmul.mubr.msk.bf16.vlgmr.msra.gmra.mrb[0].mxu1 %vm129_vm0, %v388_v37  ;;  %v380_v60 = vadd.f32 %v14163_v43, %v358_v35  ;;  %v338_v61 = vmul.f32 %v12945_v58, %v14136_v25 }
 0x1af   :  { %v381_v47 = vadd.f32 %v14163_v43, %v359_v62 }
 0x1b0   :  { %v389_v63 = vpack.c.bf16 %v380_v60, %v379_v59  ;;  %v360_v21 = vmul.f32 %v14156_v31, %v338_v61 }
 0x1b2   :  { %11706 = vmatprep.mubr.msk.bf16.mxu1 %vm129_vm0, %v389_v63  ;;  %v382_v2 = vadd.f32 %v14163_v43, %v360_v21 }
 0x1b4   :  { %v390_v3 = vpack.c.bf16 %v382_v2, %v381_v47 }
 0x1b6   :  { %11707 = vmatmul.mubr.msk.bf16.gmra.mrb[4].mxu1 %vm129_vm0, %v390_v3 }
 0x1b7   :  { %11712 = vmatprep.mubr.msk.bf16.mxu1 %vm13848_vm1, %v18159_v4 }
 0x271   :  { %v11696_v25 = vpop.f32.mrb[0].mxu0 }
 0x272   :  { %v465_v45 = vpop.f32.mrb[1].mxu0 }
 0x273   :  { %v11697_v5 = vpop.f32.mrb[2].mxu0 }
 0x274   :  { %v14224_v31 = vpack.c.bf16 %v11697_v5, %v11696_v25  ;;  %v468_v43 = vpop.f32.mrb[3].mxu0 }
 0x275   :  { %v14226_v6 = vpack.c.bf16 %v468_v43, %v465_v45 }
 0x276   :  { %588 = vrot.lane.b32.xlu1 %v14224_v31, %s13849_s20 }
 0x277   :  { %537 = vrot.lane.b32.xlu0 %v14226_v6, %s13849_s20 }
 0x279   :  { %v11700_v7 = vpop.f32.mrb[4].mxu0 }
 0x27a   :  { %v481_v10 = vpop.f32.mrb[5].mxu0 }
 0x27b   :  { %v11701_v8 = vpop.f32.mrb[6].mxu0 }
 0x27c   :  { %v14232_v54 = vpack.c.bf16 %v11701_v8, %v11700_v7  ;;  %v484_v14 = vpop.f32.mrb[7].mxu0 }
 0x27d   :  { %v14234_v15 = vpack.c.bf16 %v484_v14, %v481_v10 }
 0x27f   :  { %638 = vrot.lane.b32.xlu1 %v14234_v15, %s13849_s20 }
 0x281   :  { %v11704_v16 = vpop.f32.mrb[0].mxu1 }
 0x282   :  { %v497_v17 = vpop.f32.mrb[1].mxu1 }
 0x283   :  { %688 = vrot.lane.b32.xlu1 %v14232_v54, %s13849_s20  ;;  %v11705_v18 = vpop.f32.mrb[2].mxu1 }
 0x284   :  { %v14240_v19 = vpack.c.bf16 %v11705_v18, %v11704_v16  ;;  %v500_v22 = vpop.f32.mrb[3].mxu1 }
 0x285   :  { %v14242_v55 = vpack.c.bf16 %v500_v22, %v497_v17 }
 0x287   :  { %788 = vrot.lane.b32.xlu1 %v14240_v19, %s13849_s20  ;;  %738 = vrot.lane.b32.xlu0 %v14242_v55, %s13849_s20 }
 0x289   :  { %v11708_v12 = vpop.f32.mrb[4].mxu1 }
 0x28a   :  { %v513_v26 = vpop.f32.mrb[5].mxu1 }
 0x28b   :  { %v11709_v27 = vpop.f32.mrb[6].mxu1 }
 0x28c   :  { %v14248_v0 = vpack.c.bf16 %v11709_v27, %v11708_v12  ;;  %v516_v30 = vpop.f32.mrb[7].mxu1 }
 0x28d   :  { %v14250_v32 = vpack.c.bf16 %v516_v30, %v513_v26 }
 0x28e   :  { %888 = vrot.lane.b32.xlu1 %v14248_v0, %s13849_s20 }
 0x28f   :  { %838 = vrot.lane.b32.xlu0 %v14250_v32, %s13849_s20 }
 0x292   :  { %1185 = vrot.lane.b32.xlu1 %v14224_v31, %s13850_s23 }
 0x293   :  { %1138 = vrot.lane.b32.xlu0 %v14226_v6, %s13850_s23 }
 0x296   :  { %1279 = vrot.lane.b32.xlu1 %v14232_v54, %s13850_s23 }
 0x29a   :  { %1232 = vrot.lane.b32.xlu1 %v14234_v15, %s13850_s23 }
 0x2e8   :  { %v589_v20 = vpop.permute.xlu1 %588 }
 0x2e9   :  { %v538_v33 = vpop.permute.xlu0 %537  ;;  %v594_v38 = vsel %vm539_vm2, %v589_v20, 0 }
 0x2ea   :  { %v544_v34 = vsel %vm539_vm2, %v538_v33, 0 }
 0x2eb   :  { %11711 = vmatpush3.bf16.xpose.msra.mxu1 %v544_v34 }
 0x2ec   :  { %11716 = vmatprep.subr.bf16.mxu1 %v18159_v4 }
 0x2f1   :  { %v639_v39 = vpop.permute.xlu1 %638 }
 0x2f2   :  { %11713 = vmatmul.mubr.msk.bf16.vlgmr.msra.gmra.mrb[8].mxu1 %vm539_vm2, %v14226_v6  ;;  %v644_v1 = vsel %vm539_vm2, %v639_v39, 0 }
 0x2f3   :  { %11717 = vmatpush3.bf16.xpose.msra.mxu1 %v594_v38  ;;  %11718 = vmatprep.mubr.msk.bf16.mxu1 %vm13848_vm1, %v18159_v4 }
 0x2f4   :  { %11722 = vmatprep.subr.bf16.mxu1 %v18159_v4 }
 0x2f5   :  { %v689_v11 = vpop.permute.xlu1 %688 }
 0x2f6   :  { %v694_v42 = vsel %vm539_vm2, %v689_v11, 0 }
 0x2f9   :  { %v739_v40 = vpop.permute.xlu0 %738  ;;  %v789_v24 = vpop.permute.xlu1 %788 }
 0x2fa   :  { %v744_v41 = vsel %vm539_vm2, %v739_v40, 0  ;;  %11719 = vmatmul.mubr.msk.bf16.vlgmr.msra.gmra.mrb[12].mxu1 %vm539_vm2, %v14224_v31  ;;  %v794_v48 = vsel %vm539_vm2, %v789_v24, 0 }
 0x2fb   :  { %11723 = vmatpush3.bf16.xpose.msra.mxu1 %v644_v1  ;;  %11735 = vmatpush3.bf16.xpose.msra.mxu0 %v744_v41 }
 0x2fc   :  { %11724 = vmatprep.mubr.msk.bf16.mxu1 %vm13848_vm1, %v18159_v4  ;;  %11728 = vmatprep.subr.bf16.mxu1 %v18159_v4 }
 0x2fd   :  { %11746 = vmatprep.subr.bf16.mxu0 %v18159_v4 }
 0x300   :  { %v889_v50 = vpop.permute.xlu1 %888 }
 0x301   :  { %v839_v36 = vpop.permute.xlu0 %838  ;;  %v894_v9 = vsel %vm539_vm2, %v889_v50, 0 }
 0x302   :  { %v844_v46 = vsel %vm539_vm2, %v839_v36, 0  ;;  %11725 = vmatmul.mubr.msk.bf16.vlgmr.msra.gmra.mrb[16].mxu1 %vm539_vm2, %v14234_v15  ;;  %11737 = vmatmul.mubr.msk.bf16.vlgmr.msra.gmra.mrb[8].mxu0 %vm539_vm2, %v14242_v55 }
 0x303   :  { %11729 = vmatpush3.bf16.xpose.msra.mxu1 %v694_v42  ;;  %11747 = vmatpush3.bf16.xpose.msra.mxu0 %v844_v46 }
 0x304   :  { %11730 = vmatprep.mubr.msk.bf16.mxu1 %vm13848_vm1, %v18159_v4  ;;  %11748 = vmatprep.mubr.msk.bf16.mxu0 %vm13848_vm1, %v18159_v4  ;;  %v1186_v51 = vpop.permute.xlu1 %1185 }
 0x305   :  { %11740 = vmatprep.subr.bf16.mxu1 %v18159_v4  ;;  %11758 = vmatprep.subr.bf16.mxu0 %v18159_v4  ;;  %v1139_v49 = vpop.permute.xlu0 %1138 }
 0x30a   :  { %11731 = vmatmul.mubr.msk.bf16.vlgmr.msra.gmra.mrb[20].mxu1 %vm539_vm2, %v14232_v54  ;;  %11749 = vmatmul.mubr.msk.bf16.vlgmr.msra.gmra.mrb[12].mxu0 %vm539_vm2, %v14250_v32 }
 0x30b   :  { %11741 = vmatpush3.bf16.xpose.msra.mxu1 %v794_v48  ;;  %11759 = vmatpush3.bf16.msra.mxu0 %v1139_v49 }
 0x30c   :  { %11742 = vmatprep.mubr.msk.bf16.mxu1 %vm13848_vm1, %v18159_v4  ;;  %11752 = vmatprep.subr.bf16.mxu1 %v18159_v4 }
 0x30d   :  { %11760 = vmatprep.mubr.msk.bf16.mxu0 %vm13848_vm1, %v18159_v4  ;;  %11770 = vmatprep.subr.bf16.mxu0 %v18159_v4 }
 0x312   :  { %11743 = vmatmul.mubr.msk.bf16.vlgmr.msra.gmra.mrb[24].mxu1 %vm539_vm2, %v14240_v19 }
 0x313   :  { %11753 = vmatpush3.bf16.xpose.msra.mxu1 %v894_v9  ;;  %11754 = vmatprep.mubr.msk.bf16.mxu1 %vm13848_vm1, %v18159_v4 }
 0x314   :  { %11764 = vmatprep.subr.bf16.mxu1 %v18159_v4 }
 0x31a   :  { %11755 = vmatmul.mubr.msk.bf16.vlgmr.msra.gmra.mrb[28].mxu1 %vm539_vm2, %v14248_v0 }
 0x31b   :  { %11765 = vmatpush3.bf16.msra.mxu1 %v1186_v51  ;;  %11766 = vmatprep.mubr.msk.bf16.mxu1 %vm13848_vm1, %v18159_v4 }
 0x31c   :  { %11776 = vmatprep.subr.bf16.mxu1 %v18159_v4 }
 0x3c5   :  { %v580_v44 = vpop.f32.mrb[8].mxu1 }
 0x3c6   :  { %v11714_v23 = vpop.f32.mrb[9].mxu1  ;;  %v14314_v52 = vmul.f32 0.35355338, %v580_v44 }
 0x3c7   :  { %v583_v28 = vpop.f32.mrb[10].mxu1 }
 0x3c8   :  { %v11715_v29 = vpop.f32.mrb[11].mxu1  ;;  %v954_v53 = vsel %vm953_vm3, %v14314_v52, -inf  ;;  %v14318_v56 = vmul.f32 0.35355338, %v583_v28 }
 0x3c9   :  { %955 = vmax.xlane.f32.xlu0 %v954_v53 }
 0x3ca   :  { %v957_v57 = vsel %vm953_vm3, %v14318_v56, -inf }
 0x3cb   :  { %958 = vmax.xlane.f32.xlu1 %v957_v57 }
 0x3cd   :  { %v630_v13 = vpop.f32.mrb[12].mxu1 }
 0x3ce   :  { %v11720_v37 = vpop.f32.mrb[13].mxu1  ;;  %v14324_v2 = vmul.f32 0.35355338, %v630_v13 }
 0x3cf   :  { %v633_v35 = vpop.f32.mrb[14].mxu1 }
 0x3d0   :  { %v11721_v58 = vpop.f32.mrb[15].mxu1  ;;  %v960_v7 = vsel %vm953_vm3, %v14324_v2, -inf  ;;  %v14336_v12 = vmul.f32 0.35355338, %v633_v35 }
 0x3d1   :  { %v14382_v58 = vpop.permute.xlu1 %1279 }
 0x3d2   :  { %v963_v38 = vsel %vm953_vm3, %v14336_v12, -inf }
 0x3d5   :  { %v680_v59 = vpop.f32.mrb[16].mxu1  ;;  %v780_v60 = vpop.f32.mrb[8].mxu0 }
 0x3d6   :  { %v11726_v61 = vpop.f32.mrb[17].mxu1  ;;  %v11738_v62 = vpop.f32.mrb[9].mxu0  ;;  %v14322_v63 = vmul.f32 0.35355338, %v780_v60  ;;  %v14348_v39 = vmul.f32 0.35355338, %v680_v59 }
 0x3d7   :  { %v683_v21 = vpop.f32.mrb[18].mxu1  ;;  %v783_v47 = vpop.f32.mrb[10].mxu0 }
 0x3d8   :  { %v11727_v3 = vpop.f32.mrb[19].mxu1  ;;  %v11739_v25 = vpop.f32.mrb[11].mxu0  ;;  %v978_v45 = vsel %vm953_vm3, %v14322_v63, -inf  ;;  %v14328_v5 = vmul.f32 0.35355338, %v783_v47  ;;  %v966_v46 = vsel %vm953_vm3, %v14348_v39, -inf }
 0x3d9   :  { %979 = vmax.xlane.f32.xlu0 %v978_v45  ;;  %v14344_v20 = vmul.f32 0.35355338, %v683_v21  ;;  %v14384_v59 = vpop.permute.xlu1 %1232 }
 0x3da   :  { %v981_v43 = vsel %vm953_vm3, %v14328_v5, -inf }
 0x3db   :  { %982 = vmax.xlane.f32.xlu1 %v981_v43  ;;  %v969_v41 = vsel %vm953_vm3, %v14344_v20, -inf }
 0x3dd   :  { %v730_v10 = vpop.f32.mrb[20].mxu1  ;;  %961 = vmax.xlane.f32.xlu0 %v960_v7  ;;  %v880_v8 = vpop.f32.mrb[12].mxu0 }
 0x3de   :  { %v11732_v14 = vpop.f32.mrb[21].mxu1  ;;  %v11750_v16 = vpop.f32.mrb[13].mxu0  ;;  %v14334_v17 = vmul.f32 0.35355338, %v880_v8  ;;  %v14356_v24 = vmul.f32 0.35355338, %v730_v10 }
 0x3df   :  { %v733_v18 = vpop.f32.mrb[22].mxu1  ;;  %v883_v22 = vpop.f32.mrb[14].mxu0 }
 0x3e0   :  { %v11733_v26 = vpop.f32.mrb[23].mxu1  ;;  %v11751_v27 = vpop.f32.mrb[15].mxu0  ;;  %v990_v30 = vsel %vm953_vm3, %v14334_v17, -inf  ;;  %v14340_v33 = vmul.f32 0.35355338, %v883_v22  ;;  %v972_v50 = vsel %vm953_vm3, %v14356_v24, -inf }
 0x3e1   :  { %991 = vmax.xlane.f32.xlu0 %v990_v30  ;;  %v14352_v11 = vmul.f32 0.35355338, %v733_v18 }
 0x3e2   :  { %v993_v34 = vsel %vm953_vm3, %v14340_v33, -inf }
 0x3e3   :  { %994 = vmax.xlane.f32.xlu1 %v993_v34  ;;  %v975_v48 = vsel %vm953_vm3, %v14352_v11, -inf }
 0x3e5   :  { %v830_v40 = vpop.f32.mrb[24].mxu1  ;;  %964 = vmax.xlane.f32.xlu0 %v963_v38 }
 0x3e6   :  { %v11744_v1 = vpop.f32.mrb[25].mxu1  ;;  %v14364_v9 = vmul.f32 0.35355338, %v830_v40 }
 0x3e7   :  { %v833_v36 = vpop.f32.mrb[26].mxu1  ;;  %970 = vmax.xlane.f32.xlu1 %v969_v41 }
 0x3e8   :  { %v11745_v42 = vpop.f32.mrb[27].mxu1  ;;  %v14360_v49 = vmul.f32 0.35355338, %v833_v36  ;;  %v984_v53 = vsel %vm953_vm3, %v14364_v9, -inf }
 0x3e9   :  { %967 = vmax.xlane.f32.xlu0 %v966_v46 }
 0x3ea   :  { %v987_v23 = vsel %vm953_vm3, %v14360_v49, -inf }
 0x3eb   :  { %976 = vmax.xlane.f32.xlu1 %v975_v48 }
 0x3ed   :  { %v930_v51 = vpop.f32.mrb[28].mxu1  ;;  %973 = vmax.xlane.f32.xlu0 %v972_v50 }
 0x3ee   :  { %v11756_v44 = vpop.f32.mrb[29].mxu1  ;;  %v14370_v57 = vmul.f32 0.35355338, %v930_v51 }
 0x3ef   :  { %v933_v28 = vpop.f32.mrb[30].mxu1  ;;  %988 = vmax.xlane.f32.xlu1 %v987_v23 }
 0x3f0   :  { %v11757_v29 = vpop.f32.mrb[31].mxu1  ;;  %v996_v13 = vsel %vm953_vm3, %v14370_v57, -inf  ;;  %v14378_v37 = vmul.f32 0.35355338, %v933_v28 }
 0x3f1   :  { %985 = vmax.xlane.f32.xlu0 %v984_v53 }
 0x3f2   :  { %v999_v35 = vsel %vm953_vm3, %v14378_v37, -inf }
 0x3f5   :  { %997 = vmax.xlane.f32.xlu0 %v996_v13 }
 0x400   :  { %1373 = vrot.lane.b32.xlu1 %v14240_v19, %s13850_s23 }
 0x40b   :  { %1326 = vrot.lane.b32.xlu0 %v14242_v55, %s13850_s23 }
 0x424   :  { %1000 = vmax.xlane.f32.xlu1 %v999_v35 }
 0x456   :  { %v956_v60 = vpop.xlane.xlu0 %955 }
 0x457   :  { %v1002_v61 = vsub.f32 %v14314_v52, %v956_v60 }
 0x458   :  { %v959_v62 = vpop.xlane.xlu1 %958 }
 0x459   :  { %v1018_v21 = vmul.f32 1.442695, %v1002_v61  ;;  %v1003_v47 = vsub.f32 %v14318_v56, %v959_v62 }
 0x45b   :  { %12946 = vpow2.f32 %v1018_v21  ;;  %v1020_v3 = vmul.f32 1.442695, %v1003_v47 }
 0x45d   :  { %12948 = vpow2.f32 %v1020_v3 }
 0x465   :  { %v14388_v25 = vpop.eup %12946 }
 0x466   :  { %v980_v45 = vpop.xlane.xlu0 %979  ;;  %v1050_v43 = vsel %vm953_vm3, %v14388_v25, 0.0 }
 0x467   :  { %v14392_v7 = vpop.eup %12948  ;;  %v1010_v10 = vsub.f32 %v14322_v63, %v980_v45  ;;  %1051 = vadd.xlane.f32.xlu0 %v1050_v43 }
 0x468   :  { %v983_v8 = vpop.xlane.xlu1 %982  ;;  %v1053_v52 = vsel %vm953_vm3, %v14392_v7, 0.0 }
 0x469   :  { %v1034_v14 = vmul.f32 1.442695, %v1010_v10  ;;  %v1011_v56 = vsub.f32 %v14328_v5, %v983_v8  ;;  %1054 = vadd.xlane.f32.xlu1 %v1053_v52 }
 0x46a   :  { %v962_v16 = vpop.xlane.xlu0 %961 }
 0x46b   :  { %12950 = vpow2.f32 %v1034_v14  ;;  %v1036_v18 = vmul.f32 1.442695, %v1011_v56  ;;  %v1004_v22 = vsub.f32 %v14324_v2, %v962_v16 }
 0x46d   :  { %12952 = vpow2.f32 %v1036_v18  ;;  %v1022_v26 = vmul.f32 1.442695, %v1004_v22 }
 0x46e   :  { %v992_v27 = vpop.xlane.xlu0 %991 }
 0x46f   :  { %12954 = vpow2.f32 %v1022_v26  ;;  %v1014_v63 = vsub.f32 %v14334_v17, %v992_v27 }
 0x470   :  { %v995_v30 = vpop.xlane.xlu1 %994 }
 0x471   :  { %v1042_v34 = vmul.f32 1.442695, %v1014_v63  ;;  %v1015_v38 = vsub.f32 %v14340_v33, %v995_v30 }
 0x472   :  { %v965_v40 = vpop.xlane.xlu0 %964 }
 0x473   :  { %12956 = vpow2.f32 %v1042_v34  ;;  %v1005_v5 = vsub.f32 %v14336_v12, %v965_v40  ;;  %v1044_v36 = vmul.f32 1.442695, %v1015_v38 }
 0x474   :  { %v971_v1 = vpop.xlane.xlu1 %970 }
 0x475   :  { %v14402_v41 = vpop.eup %12950  ;;  %v1024_v42 = vmul.f32 1.442695, %v1005_v5  ;;  %v1007_v2 = vsub.f32 %v14344_v20, %v971_v1 }
 0x476   :  { %v968_v46 = vpop.xlane.xlu0 %967  ;;  %v1074_v48 = vsel %vm953_vm3, %v14402_v41, 0.0 }
 0x477   :  { %v14407_v17 = vpop.eup %12952  ;;  %12958 = vpow2.f32 %v1024_v42  ;;  %v1006_v33 = vsub.f32 %v14348_v39, %v968_v46  ;;  %1075 = vadd.xlane.f32.xlu0 %v1074_v48  ;;  %v1028_v44 = vmul.f32 1.442695, %v1007_v2 }
 0x478   :  { %v977_v50 = vpop.xlane.xlu1 %976  ;;  %v1077_v12 = vsel %vm953_vm3, %v14407_v17, 0.0  ;;  %12960 = vpow2.f32 %v1044_v36 }
 0x479   :  { %v14412_v51 = vpop.eup %12954  ;;  %v1026_v23 = vmul.f32 1.442695, %v1006_v33  ;;  %v1009_v20 = vsub.f32 %v14352_v11, %v977_v50  ;;  %1078 = vadd.xlane.f32.xlu1 %v1077_v12 }
 0x47a   :  { %v974_v28 = vpop.xlane.xlu0 %973  ;;  %v1056_v29 = vsel %vm953_vm3, %v14412_v51, 0.0 }
 0x47b   :  { %12962 = vpow2.f32 %v1026_v23  ;;  %v1008_v39 = vsub.f32 %v14356_v24, %v974_v28  ;;  %1057 = vadd.xlane.f32.xlu0 %v1056_v29  ;;  %v1032_v13 = vmul.f32 1.442695, %v1009_v20 }
 0x47c   :  { %12964 = vpow2.f32 %v1028_v44  ;;  %v989_v22 = vpop.xlane.xlu1 %988 }
 0x47d   :  { %v14418_v53 = vpop.eup %12956  ;;  %v1030_v35 = vmul.f32 1.442695, %v1008_v39  ;;  %v1013_v27 = vsub.f32 %v14360_v49, %v989_v22 }
 0x47e   :  { %v986_v60 = vpop.xlane.xlu0 %985  ;;  %v1086_v61 = vsel %vm953_vm3, %v14418_v53, 0.0 }
 0x47f   :  { %12966 = vpow2.f32 %v1030_v35  ;;  %v1012_v11 = vsub.f32 %v14364_v9, %v986_v60  ;;  %1087 = vadd.xlane.f32.xlu0 %v1086_v61  ;;  %v1040_v30 = vmul.f32 1.442695, %v1013_v27 }
 0x480   :  { %12968 = vpow2.f32 %v1032_v13  ;;  %v14469_v49 = vpop.permute.xlu1 %1373 }
 0x481   :  { %v14423_v62 = vpop.eup %12958  ;;  %v1038_v21 = vmul.f32 1.442695, %v1012_v11 }
 0x482   :  { %v1059_v24 = vsel %vm953_vm3, %v14423_v62, 0.0  ;;  %v14427_v47 = vpop.eup %12960  ;;  %v998_v26 = vpop.xlane.xlu0 %997 }
 0x483   :  { %12970 = vpow2.f32 %v1038_v21  ;;  %1060 = vadd.xlane.f32.xlu1 %v1059_v24  ;;  %v1089_v45 = vsel %vm953_vm3, %v14427_v47, 0.0  ;;  %v1016_v63 = vsub.f32 %v14370_v57, %v998_v26 }
 0x484   :  { %12972 = vpow2.f32 %v1040_v30 }
 0x485   :  { %v14429_v3 = vpop.eup %12962  ;;  %v1046_v34 = vmul.f32 1.442695, %v1016_v63 }
 0x486   :  { %v1062_v9 = vsel %vm953_vm3, %v14429_v3, 0.0  ;;  %v14435_v43 = vpop.eup %12964  ;;  %v14482_v2 = vpop.permute.xlu0 %1326 }
 0x487   :  { %1090 = vadd.xlane.f32.xlu1 %v1089_v45  ;;  %1063 = vadd.xlane.f32.xlu0 %v1062_v9  ;;  %v1065_v8 = vsel %vm953_vm3, %v14435_v43, 0.0  ;;  %12974 = vpow2.f32 %v1046_v34 }
 0x489   :  { %v14437_v10 = vpop.eup %12966 }
 0x48a   :  { %v1068_v52 = vsel %vm953_vm3, %v14437_v10, 0.0  ;;  %v14443_v14 = vpop.eup %12968 }
 0x48b   :  { %1066 = vadd.xlane.f32.xlu1 %v1065_v8  ;;  %1069 = vadd.xlane.f32.xlu0 %v1068_v52  ;;  %v1071_v16 = vsel %vm953_vm3, %v14443_v14, 0.0 }
 0x48d   :  { %v14445_v56 = vpop.eup %12970 }
 0x48e   :  { %v1080_v18 = vsel %vm953_vm3, %v14445_v56, 0.0  ;;  %v14457_v38 = vpop.eup %12972 }
 0x48f   :  { %1072 = vadd.xlane.f32.xlu1 %v1071_v16  ;;  %1081 = vadd.xlane.f32.xlu0 %v1080_v18  ;;  %v1083_v5 = vsel %vm953_vm3, %v14457_v38, 0.0 }
 0x491   :  { %v14459_v40 = vpop.eup %12974 }
 0x492   :  { %v1092_v1 = vsel %vm953_vm3, %v14459_v40, 0.0 }
 0x4a0   :  { %1467 = vrot.lane.b32.xlu1 %v14248_v0, %s13850_s23 }
 0x4a5   :  { %1420 = vrot.lane.b32.xlu0 %v14250_v32, %s13850_s23 }
 0x4b1   :  { %v1001_v57 = vpop.xlane.xlu1 %1000 }
 0x4b2   :  { %v1017_v36 = vsub.f32 %v14378_v37, %v1001_v57 }
 0x4b4   :  { %v1048_v42 = vmul.f32 1.442695, %v1017_v36 }
 0x4b6   :  { %12976 = vpow2.f32 %v1048_v42 }
 0x4c0   :  { %v14486_v48 = vpop.eup %12976 }
 0x4c1   :  { %v1095_v33 = vsel %vm953_vm3, %v14486_v48, 0.0 }
 0x4c4   :  { %1084 = vadd.xlane.f32.xlu1 %v1083_v5  ;;  %1093 = vadd.xlane.f32.xlu0 %v1092_v1 }
 0x4d5   :  { %1567 = vrot.lane.b32.xlu1 %v14224_v31, %s13851_s24 }
 0x4da   :  { %1516 = vrot.lane.b32.xlu0 %v14226_v6, %s13851_s24 }
 0x4de   :  { %1514 = vrot.lane.b32.xlu0 %v14226_v6, %s13852_s25 }
 0x4e2   :  { %1565 = vrot.lane.b32.xlu0 %v14224_v31, %s13852_s25 }
 0x4e6   :  { %1616 = vrot.lane.b32.xlu0 %v14234_v15, %s13852_s25 }
 0x4ea   :  { %1667 = vrot.lane.b32.xlu0 %v14232_v54, %s13852_s25 }
 0x4ee   :  { %1718 = vrot.lane.b32.xlu0 %v14242_v55, %s13852_s25 }
 0x4f2   :  { %1769 = vrot.lane.b32.xlu0 %v14240_v19, %s13852_s25 }
 0x4f4   :  { %v1052_v46 = vpop.xlane.xlu0 %1051 }
 0x4f5   :  { %12978 = vrcp.f32 %v1052_v46 }
 0x4f6   :  { %v1055_v37 = vpop.xlane.xlu1 %1054  ;;  %1820 = vrot.lane.b32.xlu0 %v14250_v32, %s13852_s25 }
 0x4f7   :  { %12980 = vrcp.f32 %v1055_v37 }
 0x4f9   :  { %1096 = vadd.xlane.f32.xlu1 %v1095_v33 }
 0x4ff   :  { %v12979_v50 = vpop.eup %12978 }
 0x500   :  { %v1114_v44 = vmul.f32 %v12979_v50, %v14388_v25 }
 0x501   :  { %v12981_v12 = vpop.eup %12980 }
 0x502   :  { %v1115_v23 = vmul.f32 %v12981_v12, %v14392_v7 }
 0x504   :  { %v1076_v20 = vpop.xlane.xlu0 %1075  ;;  %v1130_v28 = vpack.c.bf16 %v1115_v23, %v1114_v44 }
 0x506   :  { %11761 = vmatmul.mubr.msk.bf16.vlgmr.msra.gmra.mrb[16].mxu0 %vm953_vm3, %v1130_v28  ;;  %v1079_v39 = vpop.xlane.xlu1 %1078 }
 0x507   :  { %11771 = vmatpush3.bf16.msra.mxu0 %v14384_v59  ;;  %11772 = vmatprep.mubr.msk.bf16.mxu0 %vm13848_vm1, %v18159_v4 }
 0x508   :  { %11782 = vmatprep.subr.bf16.mxu0 %v18159_v4  ;;  %v1058_v29 = vpop.xlane.xlu0 %1057 }
 0x509   :  { %12982 = vrcp.f32 %v1058_v29 }
 0x50a   :  { %1618 = vrot.lane.b32.xlu1 %v14234_v15, %s13851_s24 }
 0x50c   :  { %v1088_v25 = vpop.xlane.xlu0 %1087 }
 0x50e   :  { %1669 = vrot.lane.b32.xlu1 %v14232_v54, %s13851_s24 }
 0x510   :  { %v1061_v7 = vpop.xlane.xlu1 %1060 }
 0x511   :  { %12984 = vrcp.f32 %v1061_v7 }
 0x512   :  { %1720 = vrot.lane.b32.xlu1 %v14242_v55, %s13851_s24 }
 0x513   :  { %v12983_v61 = vpop.eup %12982 }
 0x514   :  { %v1091_v59 = vpop.xlane.xlu1 %1090  ;;  %v1064_v13 = vpop.xlane.xlu0 %1063  ;;  %v1116_v21 = vmul.f32 %v12983_v61, %v14412_v51 }
 0x515   :  { %12986 = vrcp.f32 %v1064_v13 }
 0x516   :  { %1771 = vrot.lane.b32.xlu1 %v14240_v19, %s13851_s24 }
 0x518   :  { %v1067_v35 = vpop.xlane.xlu1 %1066  ;;  %v1070_v60 = vpop.xlane.xlu0 %1069 }
 0x519   :  { %12988 = vrcp.f32 %v1067_v35 }
 0x51a   :  { %1822 = vrot.lane.b32.xlu1 %v14250_v32, %s13851_s24  ;;  %12990 = vrcp.f32 %v1070_v60 }
 0x51b   :  { %v12985_v11 = vpop.eup %12984  ;;  %12992 = vrcp.f32 %v1079_v39 }
 0x51c   :  { %v1117_v24 = vmul.f32 %v12985_v11, %v14423_v62  ;;  %v1073_v45 = vpop.xlane.xlu1 %1072 }
 0x51d   :  { %12994 = vrcp.f32 %v1073_v45 }
 0x51e   :  { %1873 = vrot.lane.b32.xlu1 %v14248_v0, %s13851_s24  ;;  %v1131_v9 = vpack.c.bf16 %v1117_v24, %v1116_v21  ;;  %12996 = vrcp.f32 %v1076_v20 }
 0x51f   :  { %v12987_v8 = vpop.eup %12986  ;;  %12998 = vrcp.f32 %v1091_v59 }
 0x520   :  { %11767 = vmatmul.mubr.msk.bf16.vlgmr.msra.gmra.mrb[32].mxu1 %vm953_vm3, %v1131_v9  ;;  %v1118_v62 = vmul.f32 %v12987_v8, %v14429_v3  ;;  %13000 = vrcp.f32 %v1088_v25  ;;  %v1468_v57 = vpop.permute.xlu1 %1467 }
 0x521   :  { %11777 = vmatpush3.bf16.msra.mxu1 %v14382_v58  ;;  %11778 = vmatprep.mubr.msk.bf16.mxu1 %vm13848_vm1, %v18159_v4 }
 0x522   :  { %1871 = vrot.lane.b32.xlu1 %v14248_v0, %s13852_s25  ;;  %11788 = vmatprep.subr.bf16.mxu1 %v18159_v4 }
 0x523   :  { %v12989_v51 = vpop.eup %12988 }
 0x524   :  { %v1119_v52 = vmul.f32 %v12989_v51, %v14435_v43  ;;  %v12991_v16 = vpop.eup %12990  ;;  %v1082_v43 = vpop.xlane.xlu0 %1081 }
 0x525   :  { %v12993_v18 = vpop.eup %12992  ;;  %v1120_v58 = vmul.f32 %v12991_v16, %v14437_v10  ;;  %13002 = vrcp.f32 %v1082_v43 }
 0x526   :  { %v1132_v22 = vpack.c.bf16 %v1119_v52, %v1118_v62  ;;  %v1123_v3 = vmul.f32 %v12993_v18, %v14407_v17 }
 0x527   :  { %v12995_v26 = vpop.eup %12994 }
 0x528   :  { %v1121_v27 = vmul.f32 %v12995_v26, %v14443_v14  ;;  %11773 = vmatmul.mubr.msk.bf16.vlgmr.msra.gmra.mrb[20].mxu0 %vm953_vm3, %v1132_v22  ;;  %v12997_v63 = vpop.eup %12996  ;;  %v1421_v5 = vpop.permute.xlu0 %1420 }
 0x529   :  { %11783 = vmatpush3.bf16.msra.mxu0 %v14482_v2  ;;  %11784 = vmatprep.mubr.msk.bf16.mxu0 %vm13848_vm1, %v18159_v4  ;;  %v1122_v34 = vmul.f32 %v12997_v63, %v14402_v41  ;;  %v12999_v14 = vpop.eup %12998 }
 0x52a   :  { %v1133_v30 = vpack.c.bf16 %v1121_v27, %v1120_v58  ;;  %11794 = vmatprep.subr.bf16.mxu0 %v18159_v4  ;;  %v13001_v17 = vpop.eup %13000  ;;  %v1127_v41 = vmul.f32 %v12999_v14, %v14427_v47 }
 0x52b   :  { %v1134_v10 = vpack.c.bf16 %v1123_v3, %v1122_v34  ;;  %v1126_v1 = vmul.f32 %v13001_v17, %v14418_v53 }
 0x52c   :  { %11779 = vmatmul.mubr.msk.bf16.vlgmr.msra.gmra.mrb[36].mxu1 %vm953_vm3, %v1133_v30 }
 0x52d   :  { %11789 = vmatpush3.bf16.msra.mxu1 %v14469_v49  ;;  %11790 = vmatprep.mubr.msk.bf16.mxu1 %vm13848_vm1, %v18159_v4  ;;  %v1136_v49 = vpack.c.bf16 %v1127_v41, %v1126_v1 }
 0x52e   :  { %11800 = vmatprep.subr.bf16.mxu1 %v18159_v4 }
 0x52f   :  { %v13003_v47 = vpop.eup %13002 }
 0x530   :  { %11785 = vmatmul.mubr.msk.bf16.vlgmr.msra.gmra.mrb[24].mxu0 %vm953_vm3, %v1134_v10  ;;  %v1124_v53 = vmul.f32 %v13003_v47, %v14445_v56 }
 0x531   :  { %11795 = vmatpush3.bf16.msra.mxu0 %v1421_v5  ;;  %11796 = vmatprep.mubr.msk.bf16.mxu0 %vm13848_vm1, %v18159_v4 }
 0x532   :  { %11806 = vmatprep.subr.bf16.mxu0 %v18159_v4 }
 0x538   :  { %11797 = vmatmul.mubr.msk.bf16.vlgmr.msra.gmra.mrb[28].mxu0 %vm953_vm3, %v1136_v49 }
 0x539   :  { %11808 = vmatprep.mubr.msk.bf16.mxu0 %vm13848_vm1, %v18159_v4 }
 0x551   :  { %v1085_v36 = vpop.xlane.xlu1 %1084  ;;  %v1094_v42 = vpop.xlane.xlu0 %1093 }
 0x552   :  { %13004 = vrcp.f32 %v1085_v36 }
 0x553   :  { %13006 = vrcp.f32 %v1094_v42 }
 0x555   :  { %v1517_v2 = vpop.permute.xlu0 %1516  ;;  %v1568_v44 = vpop.permute.xlu1 %1567 }
 0x556   :  { %v1522_v46 = vsel %vm539_vm2, %v1517_v2, 0  ;;  %v1573_v11 = vsel %vm539_vm2, %v1568_v44, 0 }
 0x557   :  { %11807 = vmatpush3.bf16.xpose.msra.mxu0 %v1522_v46 }
 0x558   :  { %11818 = vmatprep.subr.bf16.mxu0 %v18159_v4 }
 0x559   :  { %v1515_v50 = vpop.permute.xlu0 %1514 }
 0x55c   :  { %v13005_v37 = vpop.eup %13004 }
 0x55d   :  { %v1125_v33 = vmul.f32 %v13005_v37, %v14457_v38  ;;  %v1566_v23 = vpop.permute.xlu0 %1565  ;;  %v13007_v39 = vpop.eup %13006 }
 0x55e   :  { %11809 = vmatmul.mubr.msk.bf16.vlgmr.msra.gmra.mrb[32].mxu0 %vm539_vm2, %v1515_v50  ;;  %v1128_v59 = vmul.f32 %v13007_v39, %v14459_v40 }
 0x55f   :  { %v1135_v12 = vpack.c.bf16 %v1125_v33, %v1124_v53  ;;  %11820 = vmatprep.mubr.msk.bf16.mxu0 %vm13848_vm1, %v18159_v4 }
 0x561   :  { %11791 = vmatmul.mubr.msk.bf16.vlgmr.msra.gmra.mrb[40].mxu1 %vm953_vm3, %v1135_v12  ;;  %v1617_v38 = vpop.permute.xlu0 %1616 }
 0x562   :  { %11801 = vmatpush3.bf16.msra.mxu1 %v1468_v57  ;;  %11802 = vmatprep.mubr.msk.bf16.mxu1 %vm13848_vm1, %v18159_v4 }
 0x563   :  { %11812 = vmatprep.subr.bf16.mxu1 %v18159_v4 }
 0x565   :  { %v1668_v25 = vpop.permute.xlu0 %1667 }
 0x569   :  { %v1719_v21 = vpop.permute.xlu0 %1718 }
 0x56d   :  { %v1770_v45 = vpop.permute.xlu0 %1769 }
 0x571   :  { %v1821_v8 = vpop.permute.xlu0 %1820 }
 0x586   :  { %v1097_v56 = vpop.xlane.xlu1 %1096 }
 0x587   :  { %13008 = vrcp.f32 %v1097_v56 }
 0x58a   :  { %v1619_v20 = vpop.permute.xlu1 %1618 }
 0x58b   :  { %v1624_v28 = vsel %vm539_vm2, %v1619_v20, 0 }
 0x58c   :  { %11819 = vmatpush3.bf16.xpose.msra.mxu0 %v1624_v28 }
 0x58d   :  { %11830 = vmatprep.subr.bf16.mxu0 %v18159_v4 }
 0x58e   :  { %v1670_v29 = vpop.permute.xlu1 %1669 }
 0x58f   :  { %v1675_v9 = vsel %vm539_vm2, %v1670_v29, 0 }
 0x591   :  { %v13009_v7 = vpop.eup %13008 }
 0x592   :  { %v1129_v13 = vmul.f32 %v13009_v7, %v14486_v48  ;;  %v1721_v35 = vpop.permute.xlu1 %1720 }
 0x593   :  { %v1726_v60 = vsel %vm539_vm2, %v1721_v35, 0  ;;  %11821 = vmatmul.mubr.msk.bf16.vlgmr.msra.gmra.mrb[36].mxu0 %vm539_vm2, %v1617_v38 }
 0x594   :  { %11831 = vmatpush3.bf16.xpose.msra.mxu0 %v1726_v60  ;;  %v1137_v61 = vpack.c.bf16 %v1129_v13, %v1128_v59  ;;  %11832 = vmatprep.mubr.msk.bf16.mxu0 %vm13848_vm1, %v18159_v4 }
 0x595   :  { %11842 = vmatprep.subr.bf16.mxu0 %v18159_v4 }
 0x596   :  { %v1772_v24 = vpop.permute.xlu1 %1771  ;;  %11803 = vmatmul.mubr.msk.bf16.vlgmr.msra.gmra.mrb[44].mxu1 %vm953_vm3, %v1137_v61 }
 0x597   :  { %11813 = vmatpush3.bf16.xpose.msra.mxu1 %v1573_v11  ;;  %11814 = vmatprep.mubr.msk.bf16.mxu1 %vm13848_vm1, %v18159_v4  ;;  %v1777_v51 = vsel %vm539_vm2, %v1772_v24, 0 }
 0x598   :  { %11824 = vmatprep.subr.bf16.mxu1 %v18159_v4 }
 0x59a   :  { %v1823_v40 = vpop.permute.xlu1 %1822 }
 0x59b   :  { %v1828_v48 = vsel %vm539_vm2, %v1823_v40, 0  ;;  %11833 = vmatmul.mubr.msk.bf16.vlgmr.msra.gmra.mrb[40].mxu0 %vm539_vm2, %v1719_v21 }
 0x59c   :  { %11843 = vmatpush3.bf16.xpose.msra.mxu0 %v1828_v48  ;;  %11844 = vmatprep.mubr.msk.bf16.mxu0 %vm13848_vm1, %v18159_v4 }
 0x59d   :  { %11854 = vmatprep.subr.bf16.mxu0 %v18159_v4 }
 0x59e   :  { %11815 = vmatmul.mubr.msk.bf16.vlgmr.msra.gmra.mrb[48].mxu1 %vm539_vm2, %v1566_v23  ;;  %v1874_v62 = vpop.permute.xlu1 %1873 }
 0x59f   :  { %11825 = vmatpush3.bf16.xpose.msra.mxu1 %v1675_v9  ;;  %11826 = vmatprep.mubr.msk.bf16.mxu1 %vm13848_vm1, %v18159_v4  ;;  %v1879_v52 = vsel %vm539_vm2, %v1874_v62, 0 }
 0x5a0   :  { %11836 = vmatprep.subr.bf16.mxu1 %v18159_v4 }
 0x5a2   :  { %v1872_v16 = vpop.permute.xlu1 %1871 }
 0x5a3   :  { %11845 = vmatmul.mubr.msk.bf16.vlgmr.msra.gmra.mrb[44].mxu0 %vm539_vm2, %v1821_v8 }
 0x5a4   :  { %11856 = vmatprep.mubr.msk.bf16.mxu0 %vm13848_vm1, %v18159_v4 }
 0x5a6   :  { %11827 = vmatmul.mubr.msk.bf16.vlgmr.msra.gmra.mrb[52].mxu1 %vm539_vm2, %v1668_v25 }
 0x5a7   :  { %11837 = vmatpush3.bf16.xpose.msra.mxu1 %v1777_v51  ;;  %11838 = vmatprep.mubr.msk.bf16.mxu1 %vm13848_vm1, %v18159_v4 }
 0x5a8   :  { %11848 = vmatprep.subr.bf16.mxu1 %v18159_v4 }
 0x5ae   :  { %11839 = vmatmul.mubr.msk.bf16.vlgmr.msra.gmra.mrb[56].mxu1 %vm539_vm2, %v1770_v45 }
 0x5af   :  { %11849 = vmatpush3.bf16.xpose.msra.mxu1 %v1879_v52  ;;  %11850 = vmatprep.mubr.msk.bf16.mxu1 %vm13848_vm1, %v18159_v4 }
 0x5b0   :  { %11860 = vmatprep.subr.bf16.mxu1 %v18159_v4 }
 0x5b6   :  { %11851 = vmatmul.mubr.msk.bf16.vlgmr.msra.gmra.mrb[60].mxu1 %vm539_vm2, %v1872_v16 }
 0x5b7   :  { %11862 = vmatprep.mubr.msk.bf16.mxu1 %vm13848_vm1, %v18159_v4 }
 0x5d9   :  { %v14596_v18 = vpop.f32.mrb[16].mxu0 }
 0x5da   :  { %18181 = vst [vmem:[#allocation16_spill] sm:$0xff] %v14596_v18  ;;  %v11762_v22 = vpop.f32.mrb[17].mxu0 }
 0x5db   :  { %v14598_v26 = vpop.f32.mrb[18].mxu0 }
 0x5dc   :  { %18182 = vst [vmem:[#allocation17_spill] sm:$0xff] %v14598_v26  ;;  %v11763_v58 = vpop.f32.mrb[19].mxu0 }
 0x5f3   :  { %v14600_v27 = vpop.f32.mrb[32].mxu1 }
 0x5f4   :  { %18183 = vst [vmem:[#allocation18_spill] sm:$0xff] %v14600_v27  ;;  %v11768_v63 = vpop.f32.mrb[33].mxu1 }
 0x5f5   :  { %v14602_v3 = vpop.f32.mrb[34].mxu1 }
 0x5f6   :  { %18184 = vst [vmem:[#allocation19_spill] sm:$0xff] %v14602_v3  ;;  %v11769_v43 = vpop.f32.mrb[35].mxu1 }
 0x5fb   :  { %v14604_v30 = vpop.f32.mrb[20].mxu0 }
 0x5fc   :  { %18185 = vst [vmem:[#allocation20_spill] sm:$0xff] %v14604_v30  ;;  %v11774_v34 = vpop.f32.mrb[21].mxu0 }
 0x5fd   :  { %v14606_v10 = vpop.f32.mrb[22].mxu0 }
 0x5fe   :  { %18186 = vst [vmem:[#allocation21_spill] sm:$0xff] %v14606_v10  ;;  %v11775_v14 = vpop.f32.mrb[23].mxu0 }
 0x5ff   :  { %v14608_v5 = vpop.f32.mrb[36].mxu1 }
 0x600   :  { %18187 = vst [vmem:[#allocation22_spill] sm:$0xff] %v14608_v5  ;;  %v11780_v17 = vpop.f32.mrb[37].mxu1 }
 0x601   :  { %v14610_v41 = vpop.f32.mrb[38].mxu1 }
 0x602   :  { %18188 = vst [vmem:[#allocation23_spill] sm:$0xff] %v14610_v41  ;;  %v11781_v1 = vpop.f32.mrb[39].mxu1 }
 0x603   :  { %v14612_v49 = vpop.f32.mrb[24].mxu0 }
 0x604   :  { %18189 = vst [vmem:[#allocation24_spill] sm:$0xff] %v14612_v49  ;;  %v11786_v57 = vpop.f32.mrb[25].mxu0 }
 0x605   :  { %v14614_v36 = vpop.f32.mrb[26].mxu0 }
 0x606   :  { %18190 = vst [vmem:[#allocation25_spill] sm:$0xff] %v14614_v36  ;;  %v11787_v42 = vpop.f32.mrb[27].mxu0 }
 0x60b   :  { %v14616_v2 = vpop.f32.mrb[28].mxu0 }
 0x60c   :  { %18191 = vst [vmem:[#allocation26_spill] sm:$0xff] %v14616_v2  ;;  %v11798_v46 = vpop.f32.mrb[29].mxu0 }
 0x60d   :  { %v14618_v47 = vpop.f32.mrb[30].mxu0 }
 0x60e   :  { %18192 = vst [vmem:[#allocation27_spill] sm:$0xff] %v14618_v47  ;;  %v11799_v37 = vpop.f32.mrb[31].mxu0 }
 0x631   :  { %v1558_v53 = vpop.f32.mrb[32].mxu0 }
 0x632   :  { %v11810_v33 = vpop.f32.mrb[33].mxu0  ;;  %v14620_v50 = vmul.f32 0.35355338, %v1558_v53 }
 0x633   :  { %v1561_v12 = vpop.f32.mrb[34].mxu0 }
 0x634   :  { %v14622_v44 = vmul.f32 0.35355338, %v1561_v12  ;;  %v14624_v23 = vpop.f32.mrb[40].mxu1  ;;  %v11811_v56 = vpop.f32.mrb[35].mxu0  ;;  %v1938_v38 = vsel %vm953_vm3, %v14620_v50, -inf }
 0x635   :  { %18193 = vst [vmem:[#allocation28_spill] sm:$0xff] %v14624_v23  ;;  %v11792_v20 = vpop.f32.mrb[41].mxu1  ;;  %1939 = vmax.xlane.f32.xlu0 %v1938_v38 }
 0x636   :  { %v14628_v28 = vpop.f32.mrb[42].mxu1  ;;  %v1941_v29 = vsel %vm953_vm3, %v14622_v44, -inf }
 0x637   :  { %18194 = vst [vmem:[#allocation29_spill] sm:$0xff] %v14628_v28  ;;  %v11793_v39 = vpop.f32.mrb[43].mxu1  ;;  %1942 = vmax.xlane.f32.xlu1 %v1941_v29 }
 0x648   :  { %2169 = vrot.lane.b32.xlu1 %v14224_v31, %s13853_s26 }
 0x64c   :  { %2216 = vrot.lane.b32.xlu1 %v14234_v15, %s13853_s26 }
 0x650   :  { %2263 = vrot.lane.b32.xlu1 %v14232_v54, %s13853_s26 }
 0x666   :  { %v1660_v25 = vpop.f32.mrb[36].mxu0 }
 0x667   :  { %v11822_v7 = vpop.f32.mrb[37].mxu0  ;;  %v14648_v16 = vmul.f32 0.35355338, %v1660_v25 }
 0x668   :  { %v1663_v59 = vpop.f32.mrb[38].mxu0 }
 0x669   :  { %v14638_v13 = vpop.f32.mrb[44].mxu1  ;;  %v11823_v35 = vpop.f32.mrb[39].mxu0  ;;  %v14642_v24 = vmul.f32 0.35355338, %v1663_v59  ;;  %v1950_v17 = vsel %vm953_vm3, %v14648_v16, -inf }
 0x66a   :  { %18195 = vst [vmem:[#allocation30_spill] sm:$0xff] %v14638_v13  ;;  %v11804_v60 = vpop.f32.mrb[45].mxu1 }
 0x66b   :  { %v14640_v61 = vpop.f32.mrb[46].mxu1  ;;  %v1953_v52 = vsel %vm953_vm3, %v14642_v24, -inf }
 0x66c   :  { %18196 = vst [vmem:[#allocation31_spill] sm:$0xff] %v14640_v61  ;;  %v11805_v11 = vpop.f32.mrb[47].mxu1 }
 0x66e   :  { %v1762_v21 = vpop.f32.mrb[40].mxu0 }
 0x66f   :  { %v11834_v40 = vpop.f32.mrb[41].mxu0 }
 0x670   :  { %v1765_v48 = vpop.f32.mrb[42].mxu0 }
 0x671   :  { %v1609_v45 = vpop.f32.mrb[48].mxu1  ;;  %v11835_v9 = vpop.f32.mrb[43].mxu0  ;;  %v14660_v12 = vmul.f32 0.35355338, %v1765_v48 }
 0x672   :  { %v11816_v8 = vpop.f32.mrb[49].mxu1  ;;  %v14644_v51 = vmul.f32 0.35355338, %v1609_v45 }
 0x673   :  { %v1612_v62 = vpop.f32.mrb[50].mxu1  ;;  %v1965_v29 = vsel %vm953_vm3, %v14660_v12, -inf  ;;  %v14680_v8 = vmul.f32 0.35355338, %v1762_v21 }
 0x674   :  { %v11817_v22 = vpop.f32.mrb[51].mxu1  ;;  %1954 = vmax.xlane.f32.xlu1 %v1953_v52  ;;  %v1944_v58 = vsel %vm953_vm3, %v14644_v51, -inf  ;;  %v14652_v34 = vmul.f32 0.35355338, %v1612_v62 }
 0x675   :  { %1945 = vmax.xlane.f32.xlu0 %v1944_v58  ;;  %v1962_v22 = vsel %vm953_vm3, %v14680_v8, -inf }
 0x676   :  { %v1864_v63 = vpop.f32.mrb[44].mxu0  ;;  %v1947_v33 = vsel %vm953_vm3, %v14652_v34, -inf }
 0x677   :  { %v11846_v43 = vpop.f32.mrb[45].mxu0  ;;  %v14688_v58 = vmul.f32 0.35355338, %v1864_v63 }
 0x678   :  { %v1867_v14 = vpop.f32.mrb[46].mxu0 }
 0x679   :  { %1951 = vmax.xlane.f32.xlu0 %v1950_v17  ;;  %v1711_v1 = vpop.f32.mrb[52].mxu1  ;;  %v11847_v57 = vpop.f32.mrb[47].mxu0  ;;  %v14668_v59 = vmul.f32 0.35355338, %v1867_v14  ;;  %v1974_v17 = vsel %vm953_vm3, %v14688_v58, -inf }
 0x67a   :  { %v11828_v42 = vpop.f32.mrb[53].mxu1  ;;  %v14678_v9 = vmul.f32 0.35355338, %v1711_v1 }
 0x67b   :  { %v1714_v46 = vpop.f32.mrb[54].mxu1  ;;  %v1977_v40 = vsel %vm953_vm3, %v14668_v59, -inf }
 0x67c   :  { %v14656_v37 = vmul.f32 0.35355338, %v1714_v46  ;;  %v11829_v53 = vpop.f32.mrb[55].mxu1  ;;  %v1956_v62 = vsel %vm953_vm3, %v14678_v9, -inf }
 0x67d   :  { %1948 = vmax.xlane.f32.xlu0 %v1947_v33 }
 0x67e   :  { %v1959_v56 = vsel %vm953_vm3, %v14656_v37, -inf }
 0x67f   :  { %1960 = vmax.xlane.f32.xlu1 %v1959_v56 }
 0x681   :  { %v1813_v38 = vpop.f32.mrb[56].mxu1 }
 0x682   :  { %v11840_v20 = vpop.f32.mrb[57].mxu1  ;;  %v14684_v52 = vmul.f32 0.35355338, %v1813_v38 }
 0x683   :  { %1966 = vmax.xlane.f32.xlu1 %v1965_v29  ;;  %v1816_v39 = vpop.f32.mrb[58].mxu1 }
 0x684   :  { %v14666_v25 = vmul.f32 0.35355338, %v1816_v39  ;;  %v11841_v7 = vpop.f32.mrb[59].mxu1  ;;  %v1968_v43 = vsel %vm953_vm3, %v14684_v52, -inf }
 0x686   :  { %v1971_v35 = vsel %vm953_vm3, %v14666_v25, -inf }
 0x687   :  { %1972 = vmax.xlane.f32.xlu1 %v1971_v35 }
 0x689   :  { %v1915_v60 = vpop.f32.mrb[60].mxu1 }
 0x68a   :  { %v11852_v11 = vpop.f32.mrb[61].mxu1  ;;  %v14694_v21 = vmul.f32 0.35355338, %v1915_v60 }
 0x68b   :  { %v1918_v48 = vpop.f32.mrb[62].mxu1  ;;  %1978 = vmax.xlane.f32.xlu1 %v1977_v40 }
 0x68c   :  { %v11853_v45 = vpop.f32.mrb[63].mxu1  ;;  %v14692_v14 = vmul.f32 0.35355338, %v1918_v48  ;;  %v1980_v63 = vsel %vm953_vm3, %v14694_v21, -inf }
 0x68e   :  { %v1983_v1 = vsel %vm953_vm3, %v14692_v14, -inf }
 0x693   :  { %2122 = vrot.lane.b32.xlu0 %v14226_v6, %s13853_s26 }
 0x69c   :  { %2357 = vrot.lane.b32.xlu1 %v14240_v19, %s13853_s26 }
 0x6b2   :  { %1957 = vmax.xlane.f32.xlu0 %v1956_v62 }
 0x6b6   :  { %1963 = vmax.xlane.f32.xlu0 %v1962_v22 }
 0x6ba   :  { %1969 = vmax.xlane.f32.xlu0 %v1968_v43 }
 0x6be   :  { %1975 = vmax.xlane.f32.xlu0 %v1974_v17 }
 0x6c0   :  { %1984 = vmax.xlane.f32.xlu1 %v1983_v1 }
 0x6c2   :  { %1981 = vmax.xlane.f32.xlu0 %v1980_v63  ;;  %v1940_v53 = vpop.xlane.xlu0 %1939 }
 0x6c3   :  { %v1986_v56 = vsub.f32 %v14620_v50, %v1940_v53 }
 0x6c4   :  { %v1943_v57 = vpop.xlane.xlu1 %1942 }
 0x6c5   :  { %v1987_v46 = vsub.f32 %v14622_v44, %v1943_v57  ;;  %v2002_v38 = vmul.f32 1.442695, %v1986_v56 }
 0x6c7   :  { %v2004_v33 = vmul.f32 1.442695, %v1987_v46 }
 0x6c8   :  { %v2170_v42 = vpop.permute.xlu1 %2169 }
 0x6c9   :  { %11861 = vmatpush3.bf16.msra.mxu1 %v2170_v42  ;;  %13010 = vpow2.f32 %v2004_v33 }
 0x6ca   :  { %11872 = vmatprep.subr.bf16.mxu1 %v18159_v4  ;;  %13012 = vpow2.f32 %v2002_v38 }
 0x6cc   :  { %v14719_v44 = vpop.permute.xlu1 %2216 }
 0x6d0   :  { %v14721_v35 = vpop.permute.xlu1 %2263 }
 0x6d1   :  { %2451 = vrot.lane.b32.xlu1 %v14248_v0, %s13853_s26 }
 0x6d3   :  { %v14711_v20 = vpop.eup %13010 }
 0x6d4   :  { %v2037_v29 = vsel %vm953_vm3, %v14711_v20, 0.0  ;;  %v14715_v39 = vpop.eup %13012 }
 0x6d5   :  { %v2034_v7 = vsel %vm953_vm3, %v14715_v39, 0.0 }
 0x6d8   :  { %2310 = vrot.lane.b32.xlu0 %v14242_v55, %s13853_s26 }
 0x6dc   :  { %2404 = vrot.lane.b32.xlu0 %v14250_v32, %s13853_s26 }
 0x6f5   :  { %2038 = vadd.xlane.f32.xlu1 %v2037_v29 }
 0x6fb   :  { %2035 = vadd.xlane.f32.xlu0 %v2034_v7 }
 0x701   :  { %v1955_v40 = vpop.xlane.xlu1 %1954 }
 0x702   :  { %v1946_v50 = vpop.xlane.xlu0 %1945  ;;  %v1991_v62 = vsub.f32 %v14642_v24, %v1955_v40 }
 0x703   :  { %v1988_v60 = vsub.f32 %v14644_v51, %v1946_v50 }
 0x704   :  { %v2012_v63 = vmul.f32 1.442695, %v1991_v62 }
 0x705   :  { %v2006_v11 = vmul.f32 1.442695, %v1988_v60 }
 0x706   :  { %v1952_v48 = vpop.xlane.xlu0 %1951 }
 0x707   :  { %13014 = vpow2.f32 %v2006_v11  ;;  %v1990_v45 = vsub.f32 %v14648_v16, %v1952_v48 }
 0x709   :  { %v2010_v22 = vmul.f32 1.442695, %v1990_v45 }
 0x70a   :  { %v1949_v43 = vpop.xlane.xlu0 %1948 }
 0x70b   :  { %13016 = vpow2.f32 %v2010_v22  ;;  %v1989_v17 = vsub.f32 %v14652_v34, %v1949_v43 }
 0x70c   :  { %v1961_v1 = vpop.xlane.xlu1 %1960 }
 0x70d   :  { %v2008_v57 = vmul.f32 1.442695, %v1989_v17  ;;  %v1993_v42 = vsub.f32 %v14656_v37, %v1961_v1 }
 0x70e   :  { %v2123_v46 = vpop.permute.xlu0 %2122 }
 0x70f   :  { %13018 = vpow2.f32 %v2008_v57  ;;  %11855 = vmatpush3.bf16.msra.mxu0 %v2123_v46  ;;  %v2016_v24 = vmul.f32 1.442695, %v1993_v42 }
 0x710   :  { %v1967_v51 = vpop.xlane.xlu1 %1966  ;;  %11866 = vmatprep.subr.bf16.mxu0 %v18159_v4  ;;  %13020 = vpow2.f32 %v2012_v63 }
 0x711   :  { %v14729_v53 = vpop.eup %13014  ;;  %v1995_v16 = vsub.f32 %v14660_v12, %v1967_v51  ;;  %13022 = vpow2.f32 %v2016_v24 }
 0x712   :  { %v2040_v34 = vsel %vm953_vm3, %v14729_v53, 0.0 }
 0x713   :  { %2041 = vadd.xlane.f32.xlu0 %v2040_v34  ;;  %v2020_v37 = vmul.f32 1.442695, %v1995_v16 }
 0x714   :  { %v1973_v33 = vpop.xlane.xlu1 %1972 }
 0x715   :  { %v14734_v56 = vpop.eup %13016  ;;  %v1997_v38 = vsub.f32 %v14666_v25, %v1973_v33  ;;  %13024 = vpow2.f32 %v2020_v37 }
 0x716   :  { %v2046_v29 = vsel %vm953_vm3, %v14734_v56, 0.0 }
 0x717   :  { %2047 = vadd.xlane.f32.xlu0 %v2046_v29  ;;  %v2024_v12 = vmul.f32 1.442695, %v1997_v38 }
 0x718   :  { %v1979_v7 = vpop.xlane.xlu1 %1978 }
 0x719   :  { %v14739_v50 = vpop.eup %13018  ;;  %v1999_v60 = vsub.f32 %v14668_v59, %v1979_v7  ;;  %13026 = vpow2.f32 %v2024_v12 }
 0x71a   :  { %v2043_v11 = vsel %vm953_vm3, %v14739_v50, 0.0  ;;  %v14744_v40 = vpop.eup %13020 }
 0x71b   :  { %2044 = vadd.xlane.f32.xlu1 %v2043_v11  ;;  %v2028_v48 = vmul.f32 1.442695, %v1999_v60  ;;  %v2049_v25 = vsel %vm953_vm3, %v14744_v40, 0.0  ;;  %v14748_v45 = vpop.eup %13022 }
 0x71c   :  { %v2055_v62 = vsel %vm953_vm3, %v14748_v45, 0.0  ;;  %v14769_v37 = vpop.permute.xlu1 %2357 }
 0x71d   :  { %13028 = vpow2.f32 %v2028_v48 }
 0x71f   :  { %2050 = vadd.xlane.f32.xlu1 %v2049_v25  ;;  %v14752_v22 = vpop.eup %13024 }
 0x720   :  { %v2061_v59 = vsel %vm953_vm3, %v14752_v22, 0.0 }
 0x723   :  { %2056 = vadd.xlane.f32.xlu1 %v2055_v62  ;;  %v14756_v43 = vpop.eup %13026 }
 0x724   :  { %v2067_v17 = vsel %vm953_vm3, %v14756_v43, 0.0 }
 0x727   :  { %2062 = vadd.xlane.f32.xlu1 %v2061_v59  ;;  %v14760_v1 = vpop.eup %13028 }
 0x728   :  { %v2073_v63 = vsel %vm953_vm3, %v14760_v1, 0.0 }
 0x72b   :  { %2068 = vadd.xlane.f32.xlu1 %v2067_v17 }
 0x72f   :  { %2074 = vadd.xlane.f32.xlu1 %v2073_v63 }
 0x73f   :  { %v1958_v57 = vpop.xlane.xlu0 %1957 }
 0x740   :  { %v1992_v42 = vsub.f32 %v14678_v9, %v1958_v57  ;;  %2551 = vrot.lane.b32.xlu1 %v14224_v31, %s13854_s27 }
 0x742   :  { %v2014_v46 = vmul.f32 1.442695, %v1992_v42 }
 0x743   :  { %v1964_v51 = vpop.xlane.xlu0 %1963 }
 0x744   :  { %13030 = vpow2.f32 %v2014_v46  ;;  %v1994_v24 = vsub.f32 %v14680_v8, %v1964_v51 }
 0x746   :  { %v2018_v16 = vmul.f32 1.442695, %v1994_v24 }
 0x747   :  { %v1970_v34 = vpop.xlane.xlu0 %1969 }
 0x748   :  { %13032 = vpow2.f32 %v2018_v16  ;;  %v1996_v33 = vsub.f32 %v14684_v52, %v1970_v34 }
 0x74a   :  { %v2022_v38 = vmul.f32 1.442695, %v1996_v33 }
 0x74b   :  { %v1976_v29 = vpop.xlane.xlu0 %1975 }
 0x74c   :  { %13034 = vpow2.f32 %v2022_v38  ;;  %v1998_v9 = vsub.f32 %v14688_v58, %v1976_v29 }
 0x74d   :  { %v1985_v7 = vpop.xlane.xlu1 %1984 }
 0x74e   :  { %v14772_v12 = vpop.eup %13030  ;;  %v2026_v60 = vmul.f32 1.442695, %v1998_v9  ;;  %v2001_v11 = vsub.f32 %v14692_v14, %v1985_v7 }
 0x74f   :  { %v1982_v48 = vpop.xlane.xlu0 %1981  ;;  %v2052_v8 = vsel %vm953_vm3, %v14772_v12, 0.0 }
 0x750   :  { %13036 = vpow2.f32 %v2026_v60  ;;  %v2000_v52 = vsub.f32 %v14694_v21, %v1982_v48  ;;  %2053 = vadd.xlane.f32.xlu0 %v2052_v8  ;;  %v2032_v62 = vmul.f32 1.442695, %v2001_v11 }
 0x751   :  { %v14810_v16 = vpop.permute.xlu1 %2451 }
 0x752   :  { %v14778_v25 = vpop.eup %13032  ;;  %v2030_v59 = vmul.f32 1.442695, %v2000_v52 }
 0x753   :  { %v2058_v58 = vsel %vm953_vm3, %v14778_v25, 0.0  ;;  %v2311_v24 = vpop.permute.xlu0 %2310 }
 0x754   :  { %13038 = vpow2.f32 %v2030_v59  ;;  %2059 = vadd.xlane.f32.xlu0 %v2058_v58 }
 0x755   :  { %13040 = vpow2.f32 %v2032_v62 }
 0x756   :  { %v14782_v17 = vpop.eup %13034 }
 0x757   :  { %v2064_v14 = vsel %vm953_vm3, %v14782_v17, 0.0  ;;  %v14816_v34 = vpop.permute.xlu0 %2404 }
 0x758   :  { %2065 = vadd.xlane.f32.xlu0 %v2064_v14 }
 0x75a   :  { %v14786_v63 = vpop.eup %13036 }
 0x75b   :  { %v2070_v21 = vsel %vm953_vm3, %v14786_v63, 0.0 }
 0x75c   :  { %2071 = vadd.xlane.f32.xlu0 %v2070_v21 }
 0x75e   :  { %v14790_v57 = vpop.eup %13038 }
 0x75f   :  { %v2076_v42 = vsel %vm953_vm3, %v14790_v57, 0.0  ;;  %v14794_v46 = vpop.eup %13040 }
 0x760   :  { %2077 = vadd.xlane.f32.xlu0 %v2076_v42  ;;  %v2079_v51 = vsel %vm953_vm3, %v14794_v46, 0.0 }
 0x764   :  { %2080 = vadd.xlane.f32.xlu1 %v2079_v51 }
 0x775   :  { %2602 = vrot.lane.b32.xlu1 %v14234_v15, %s13854_s27 }
 0x776   :  { %2500 = vrot.lane.b32.xlu0 %v14226_v6, %s13854_s27 }
 0x779   :  { %2653 = vrot.lane.b32.xlu1 %v14232_v54, %s13854_s27 }
 0x77a   :  { %2498 = vrot.lane.b32.xlu0 %v14226_v6, %s13855_s5 }
 0x77d   :  { %2704 = vrot.lane.b32.xlu1 %v14242_v55, %s13854_s27 }
 0x77e   :  { %2549 = vrot.lane.b32.xlu0 %v14224_v31, %s13855_s5 }
 0x781   :  { %2755 = vrot.lane.b32.xlu1 %v14240_v19, %s13854_s27 }
 0x782   :  { %2600 = vrot.lane.b32.xlu0 %v14234_v15, %s13855_s5  ;;  %v2039_v33 = vpop.xlane.xlu1 %2038 }
 0x783   :  { %13042 = vrcp.f32 %v2039_v33 }
 0x785   :  { %2806 = vrot.lane.b32.xlu1 %v14250_v32, %s13854_s27 }
 0x786   :  { %2651 = vrot.lane.b32.xlu0 %v14232_v54, %s13855_s5 }
 0x788   :  { %v2036_v38 = vpop.xlane.xlu0 %2035 }
 0x789   :  { %13044 = vrcp.f32 %v2036_v38  ;;  %2857 = vrot.lane.b32.xlu1 %v14248_v0, %s13854_s27 }
 0x78a   :  { %2702 = vrot.lane.b32.xlu0 %v14242_v55, %s13855_s5 }
 0x78d   :  { %2855 = vrot.lane.b32.xlu1 %v14248_v0, %s13855_s5  ;;  %v13043_v29 = vpop.eup %13042 }
 0x78e   :  { %2753 = vrot.lane.b32.xlu0 %v14240_v19, %s13855_s5  ;;  %v2099_v7 = vmul.f32 %v13043_v29, %v14711_v20 }
 0x792   :  { %2804 = vrot.lane.b32.xlu0 %v14250_v32, %s13855_s5 }
 0x793   :  { %v13045_v9 = vpop.eup %13044 }
 0x794   :  { %v2098_v60 = vmul.f32 %v13045_v9, %v14715_v39 }
 0x796   :  { %v2114_v11 = vpack.c.bf16 %v2099_v7, %v2098_v60 }
 0x798   :  { %11857 = vmatmul.mubr.msk.bf16.vlgmr.msra.gmra.mrb[48].mxu0 %vm953_vm3, %v2114_v11 }
 0x799   :  { %11867 = vmatpush3.bf16.msra.mxu0 %v14719_v44  ;;  %11868 = vmatprep.mubr.msk.bf16.mxu0 %vm13848_vm1, %v18159_v4 }
 0x79a   :  { %11878 = vmatprep.subr.bf16.mxu0 %v18159_v4 }
 0x7a0   :  { %v2042_v48 = vpop.xlane.xlu0 %2041 }
 0x7a1   :  { %13046 = vrcp.f32 %v2042_v48 }
 0x7a4   :  { %v2048_v8 = vpop.xlane.xlu0 %2047 }
 0x7a8   :  { %v2045_v52 = vpop.xlane.xlu1 %2044 }
 0x7a9   :  { %13048 = vrcp.f32 %v2045_v52 }
 0x7aa   :  { %13050 = vrcp.f32 %v2048_v8 }
 0x7ab   :  { %v13047_v20 = vpop.eup %13046 }
 0x7ac   :  { %v2051_v62 = vpop.xlane.xlu1 %2050  ;;  %v2100_v59 = vmul.f32 %v13047_v20, %v14729_v53 }
 0x7ad   :  { %13052 = vrcp.f32 %v2051_v62 }
 0x7b0   :  { %v2057_v53 = vpop.xlane.xlu1 %2056 }
 0x7b1   :  { %13054 = vrcp.f32 %v2057_v53 }
 0x7b3   :  { %v13049_v39 = vpop.eup %13048 }
 0x7b4   :  { %v2101_v58 = vmul.f32 %v13049_v39, %v14739_v50  ;;  %v13051_v44 = vpop.eup %13050 }
 0x7b5   :  { %v2102_v42 = vmul.f32 %v13051_v44, %v14734_v56  ;;  %v2063_v56 = vpop.xlane.xlu1 %2062 }
 0x7b6   :  { %v2115_v14 = vpack.c.bf16 %v2101_v58, %v2100_v59 }
 0x7b7   :  { %v13053_v21 = vpop.eup %13052 }
 0x7b8   :  { %v2103_v51 = vmul.f32 %v13053_v21, %v14744_v40  ;;  %11863 = vmatmul.mubr.msk.bf16.vlgmr.msra.gmra.mrb[64].mxu1 %vm953_vm3, %v2115_v14 }
 0x7b9   :  { %11873 = vmatpush3.bf16.msra.mxu1 %v14721_v35  ;;  %11874 = vmatprep.mubr.msk.bf16.mxu1 %vm13848_vm1, %v18159_v4  ;;  %v2069_v35 = vpop.xlane.xlu1 %2068 }
 0x7ba   :  { %v2116_v33 = vpack.c.bf16 %v2103_v51, %v2102_v42  ;;  %11884 = vmatprep.subr.bf16.mxu1 %v18159_v4 }
 0x7bb   :  { %v13055_v9 = vpop.eup %13054 }
 0x7bc   :  { %11869 = vmatmul.mubr.msk.bf16.vlgmr.msra.gmra.mrb[52].mxu0 %vm953_vm3, %v2116_v33  ;;  %v2105_v7 = vmul.f32 %v13055_v9, %v14748_v45 }
 0x7bd   :  { %11879 = vmatpush3.bf16.msra.mxu0 %v2311_v24  ;;  %11880 = vmatprep.mubr.msk.bf16.mxu0 %vm13848_vm1, %v18159_v4  ;;  %v2075_v38 = vpop.xlane.xlu1 %2074 }
 0x7be   :  { %11890 = vmatprep.subr.bf16.mxu0 %v18159_v4 }
 0x7c1   :  { %v2552_v20 = vpop.permute.xlu1 %2551 }
 0x7dd   :  { %v2054_v50 = vpop.xlane.xlu0 %2053 }
 0x7de   :  { %13056 = vrcp.f32 %v2054_v50 }
 0x7df   :  { %13058 = vrcp.f32 %v2063_v56 }
 0x7e1   :  { %v2060_v40 = vpop.xlane.xlu0 %2059 }
 0x7e2   :  { %13060 = vrcp.f32 %v2060_v40 }
 0x7e3   :  { %13062 = vrcp.f32 %v2069_v35 }
 0x7e5   :  { %v2066_v29 = vpop.xlane.xlu0 %2065 }
 0x7e6   :  { %13064 = vrcp.f32 %v2066_v29 }
 0x7e7   :  { %13066 = vrcp.f32 %v2075_v38  ;;  %v2557_v38 = vsel %vm539_vm2, %v2552_v20, 0 }
 0x7e8   :  { %v13057_v24 = vpop.eup %13056 }
 0x7e9   :  { %v2104_v60 = vmul.f32 %v13057_v24, %v14772_v12  ;;  %v2072_v11 = vpop.xlane.xlu0 %2071  ;;  %v13059_v48 = vpop.eup %13058 }
 0x7ea   :  { %13068 = vrcp.f32 %v2072_v11  ;;  %v2107_v62 = vmul.f32 %v13059_v48, %v14752_v22 }
 0x7eb   :  { %v2117_v8 = vpack.c.bf16 %v2105_v7, %v2104_v60 }
 0x7ec   :  { %v13061_v52 = vpop.eup %13060 }
 0x7ed   :  { %v2106_v39 = vmul.f32 %v13061_v52, %v14778_v25  ;;  %11875 = vmatmul.mubr.msk.bf16.vlgmr.msra.gmra.mrb[68].mxu1 %vm953_vm3, %v2117_v8  ;;  %v2078_v59 = vpop.xlane.xlu0 %2077  ;;  %v13063_v58 = vpop.eup %13062 }
 0x7ee   :  { %11885 = vmatpush3.bf16.msra.mxu1 %v14769_v37  ;;  %11886 = vmatprep.mubr.msk.bf16.mxu1 %vm13848_vm1, %v18159_v4  ;;  %13070 = vrcp.f32 %v2078_v59  ;;  %v2109_v44 = vmul.f32 %v13063_v58, %v14756_v43 }
 0x7ef   :  { %v2118_v45 = vpack.c.bf16 %v2107_v62, %v2106_v39  ;;  %11896 = vmatprep.subr.bf16.mxu1 %v18159_v4 }
 0x7f0   :  { %v13065_v12 = vpop.eup %13064 }
 0x7f1   :  { %v2108_v22 = vmul.f32 %v13065_v12, %v14782_v17  ;;  %v2081_v14 = vpop.xlane.xlu1 %2080  ;;  %11881 = vmatmul.mubr.msk.bf16.vlgmr.msra.gmra.mrb[56].mxu0 %vm953_vm3, %v2118_v45  ;;  %v2501_v25 = vpop.permute.xlu0 %2500 }
 0x7f2   :  { %v13067_v21 = vpop.eup %13066  ;;  %13072 = vrcp.f32 %v2081_v14  ;;  %11891 = vmatpush3.bf16.msra.mxu0 %v14816_v34  ;;  %11892 = vmatprep.mubr.msk.bf16.mxu0 %vm13848_vm1, %v18159_v4  ;;  %v2506_v56 = vsel %vm539_vm2, %v2501_v25, 0 }
 0x7f3   :  { %v2119_v37 = vpack.c.bf16 %v2109_v44, %v2108_v22  ;;  %11902 = vmatprep.subr.bf16.mxu0 %v18159_v4  ;;  %v2111_v51 = vmul.f32 %v13067_v21, %v14760_v1 }
 0x7f4   :  { %v13069_v42 = vpop.eup %13068 }
 0x7f5   :  { %v2110_v43 = vmul.f32 %v13069_v42, %v14786_v63  ;;  %11887 = vmatmul.mubr.msk.bf16.vlgmr.msra.gmra.mrb[72].mxu1 %vm953_vm3, %v2119_v37  ;;  %v2499_v17 = vpop.permute.xlu0 %2498  ;;  %v2603_v34 = vpop.permute.xlu1 %2602 }
 0x7f6   :  { %11897 = vmatpush3.bf16.msra.mxu1 %v14810_v16  ;;  %11898 = vmatprep.mubr.msk.bf16.mxu1 %vm13848_vm1, %v18159_v4  ;;  %v2608_v9 = vsel %vm539_vm2, %v2603_v34, 0 }
 0x7f7   :  { %v2120_v33 = vpack.c.bf16 %v2111_v51, %v2110_v43  ;;  %11908 = vmatprep.subr.bf16.mxu1 %v18159_v4 }
 0x7f8   :  { %v13071_v53 = vpop.eup %13070 }
 0x7f9   :  { %11893 = vmatmul.mubr.msk.bf16.vlgmr.msra.gmra.mrb[60].mxu0 %vm953_vm3, %v2120_v33  ;;  %v2550_v1 = vpop.permute.xlu0 %2549  ;;  %v2112_v16 = vmul.f32 %v13071_v53, %v14790_v57  ;;  %v2654_v35 = vpop.permute.xlu1 %2653 }
 0x7fa   :  { %11904 = vmatprep.mubr.msk.bf16.mxu0 %vm13848_vm1, %v18159_v4 }
 0x7fb   :  { %11903 = vmatpush3.bf16.xpose.msra.mxu0 %v2506_v56 }
 0x7fc   :  { %v13073_v63 = vpop.eup %13072  ;;  %11914 = vmatprep.subr.bf16.mxu0 %v18159_v4 }
 0x7fd   :  { %v2113_v50 = vmul.f32 %v13073_v63, %v14794_v46  ;;  %v2601_v29 = vpop.permute.xlu0 %2600  ;;  %v2705_v24 = vpop.permute.xlu1 %2704  ;;  %v2659_v46 = vsel %vm539_vm2, %v2654_v35, 0 }
 0x7fe   :  { %v2710_v60 = vsel %vm539_vm2, %v2705_v24, 0 }
 0x7ff   :  { %v2121_v40 = vpack.c.bf16 %v2113_v50, %v2112_v16 }
 0x801   :  { %11899 = vmatmul.mubr.msk.bf16.vlgmr.msra.gmra.mrb[76].mxu1 %vm953_vm3, %v2121_v40  ;;  %v2652_v57 = vpop.permute.xlu0 %2651  ;;  %v2756_v7 = vpop.permute.xlu1 %2755 }
 0x802   :  { %11905 = vmatmul.mubr.msk.bf16.vlgmr.msra.gmra.mrb[64].mxu0 %vm539_vm2, %v2499_v17  ;;  %11909 = vmatpush3.bf16.xpose.msra.mxu1 %v2557_v38  ;;  %v2761_v8 = vsel %vm539_vm2, %v2756_v7, 0 }
 0x803   :  { %11915 = vmatpush3.bf16.xpose.msra.mxu0 %v2608_v9  ;;  %11910 = vmatprep.mubr.msk.bf16.mxu1 %vm13848_vm1, %v18159_v4 }
 0x804   :  { %11916 = vmatprep.mubr.msk.bf16.mxu0 %vm13848_vm1, %v18159_v4  ;;  %11920 = vmatprep.subr.bf16.mxu1 %v18159_v4 }
 0x805   :  { %11926 = vmatprep.subr.bf16.mxu0 %v18159_v4  ;;  %v2703_v11 = vpop.permute.xlu0 %2702  ;;  %v2807_v48 = vpop.permute.xlu1 %2806 }
 0x806   :  { %v2812_v52 = vsel %vm539_vm2, %v2807_v48, 0 }
 0x809   :  { %11911 = vmatmul.mubr.msk.bf16.vlgmr.msra.gmra.mrb[80].mxu1 %vm539_vm2, %v2550_v1  ;;  %v2754_v62 = vpop.permute.xlu0 %2753  ;;  %v2858_v20 = vpop.permute.xlu1 %2857 }
 0x80a   :  { %11917 = vmatmul.mubr.msk.bf16.vlgmr.msra.gmra.mrb[68].mxu0 %vm539_vm2, %v2601_v29  ;;  %11921 = vmatpush3.bf16.xpose.msra.mxu1 %v2659_v46  ;;  %v2863_v39 = vsel %vm539_vm2, %v2858_v20, 0 }
 0x80b   :  { %11927 = vmatpush3.bf16.xpose.msra.mxu0 %v2710_v60  ;;  %11922 = vmatprep.mubr.msk.bf16.mxu1 %vm13848_vm1, %v18159_v4 }
 0x80c   :  { %11928 = vmatprep.mubr.msk.bf16.mxu0 %vm13848_vm1, %v18159_v4  ;;  %11932 = vmatprep.subr.bf16.mxu1 %v18159_v4 }
 0x80d   :  { %11938 = vmatprep.subr.bf16.mxu0 %v18159_v4  ;;  %v2805_v59 = vpop.permute.xlu0 %2804  ;;  %v2856_v58 = vpop.permute.xlu1 %2855 }
 0x811   :  { %11923 = vmatmul.mubr.msk.bf16.vlgmr.msra.gmra.mrb[84].mxu1 %vm539_vm2, %v2652_v57 }
 0x812   :  { %11929 = vmatmul.mubr.msk.bf16.vlgmr.msra.gmra.mrb[72].mxu0 %vm539_vm2, %v2703_v11  ;;  %11933 = vmatpush3.bf16.xpose.msra.mxu1 %v2761_v8 }
 0x813   :  { %11939 = vmatpush3.bf16.xpose.msra.mxu0 %v2812_v52  ;;  %11934 = vmatprep.mubr.msk.bf16.mxu1 %vm13848_vm1, %v18159_v4 }
 0x814   :  { %11940 = vmatprep.mubr.msk.bf16.mxu0 %vm13848_vm1, %v18159_v4  ;;  %11944 = vmatprep.subr.bf16.mxu1 %v18159_v4 }
 0x815   :  { %11950 = vmatprep.subr.bf16.mxu0 %v18159_v4 }
 0x819   :  { %11935 = vmatmul.mubr.msk.bf16.vlgmr.msra.gmra.mrb[88].mxu1 %vm539_vm2, %v2754_v62 }
 0x81a   :  { %11941 = vmatmul.mubr.msk.bf16.vlgmr.msra.gmra.mrb[76].mxu0 %vm539_vm2, %v2805_v59  ;;  %11945 = vmatpush3.bf16.xpose.msra.mxu1 %v2863_v39 }
 0x81b   :  { %11946 = vmatprep.mubr.msk.bf16.mxu1 %vm13848_vm1, %v18159_v4  ;;  %11956 = vmatprep.subr.bf16.mxu1 %v18159_v4 }
 0x81c   :  { %11952 = vmatprep.mubr.msk.bf16.mxu0 %vm13848_vm1, %v18159_v4 }
 0x821   :  { %11947 = vmatmul.mubr.msk.bf16.vlgmr.msra.gmra.mrb[92].mxu1 %vm539_vm2, %v2856_v58 }
 0x822   :  { %11958 = vmatprep.mubr.msk.bf16.mxu1 %vm13848_vm1, %v18159_v4 }
 0x86b   :  { %v14923_v45 = vpop.f32.mrb[48].mxu0 }
 0x86c   :  { %v11858_v12 = vpop.f32.mrb[49].mxu0 }
 0x86d   :  { %v14925_v44 = vpop.f32.mrb[50].mxu0 }
 0x86e   :  { %v11859_v14 = vpop.f32.mrb[51].mxu0 }
 0x88b   :  { %v14929_v25 = vpop.f32.mrb[64].mxu1 }
 0x88c   :  { %v11864_v21 = vpop.f32.mrb[65].mxu1 }
 0x88d   :  { %v14931_v37 = vpop.f32.mrb[66].mxu1 }
 0x88e   :  { %v11865_v51 = vpop.f32.mrb[67].mxu1 }
 0x88f   :  { %v14935_v43 = vpop.f32.mrb[52].mxu0 }
 0x890   :  { %v11870_v17 = vpop.f32.mrb[53].mxu0 }
 0x891   :  { %v14937_v34 = vpop.f32.mrb[54].mxu0 }
 0x892   :  { %v11871_v53 = vpop.f32.mrb[55].mxu0 }
 0x8c0   :  { %v14941_v56 = vpop.f32.mrb[68].mxu1 }
 0x8c1   :  { %v11876_v1 = vpop.f32.mrb[69].mxu1 }
 0x8c2   :  { %v14943_v63 = vpop.f32.mrb[70].mxu1 }
 0x8c3   :  { %v11877_v50 = vpop.f32.mrb[71].mxu1 }
 0x8c4   :  { %v14947_v35 = vpop.f32.mrb[56].mxu0 }
 0x8c5   :  { %v11882_v40 = vpop.f32.mrb[57].mxu0 }
 0x8c6   :  { %v14949_v38 = vpop.f32.mrb[58].mxu0 }
 0x8c7   :  { %v11883_v9 = vpop.f32.mrb[59].mxu0 }
 0x8c8   :  { %v14953_v24 = vpop.f32.mrb[72].mxu1 }
 0x8c9   :  { %v11888_v57 = vpop.f32.mrb[73].mxu1 }
 0x8ca   :  { %v14955_v46 = vpop.f32.mrb[74].mxu1 }
 0x8cb   :  { %v11889_v60 = vpop.f32.mrb[75].mxu1 }
 0x8cc   :  { %v14959_v11 = vpop.f32.mrb[60].mxu0 }
 0x8cd   :  { %v11894_v48 = vpop.f32.mrb[61].mxu0 }
 0x8ce   :  { %v14961_v8 = vpop.f32.mrb[62].mxu0 }
 0x8cf   :  { %v11895_v62 = vpop.f32.mrb[63].mxu0 }
 0x8d4   :  { %v14965_v20 = vpop.f32.mrb[76].mxu1 }
 0x8d5   :  { %v2542_v39 = vpop.f32.mrb[64].mxu0  ;;  %v11900_v59 = vpop.f32.mrb[77].mxu1 }
 0x8d6   :  { %v14967_v58 = vmul.f32 0.35355338, %v2542_v39  ;;  %v11906_v12 = vpop.f32.mrb[65].mxu0  ;;  %v14969_v14 = vpop.f32.mrb[78].mxu1 }
 0x8d7   :  { %v2545_v51 = vpop.f32.mrb[66].mxu0  ;;  %v11901_v17 = vpop.f32.mrb[79].mxu1 }
 0x8d8   :  { %v14973_v53 = vmul.f32 0.35355338, %v2545_v51  ;;  %v11907_v1 = vpop.f32.mrb[67].mxu0  ;;  %v2922_v50 = vsel %vm953_vm3, %v14967_v58, -inf }
 0x8d9   :  { %2923 = vmax.xlane.f32.xlu0 %v2922_v50 }
 0x8da   :  { %v2925_v40 = vsel %vm953_vm3, %v14973_v53, -inf }
 0x8db   :  { %2926 = vmax.xlane.f32.xlu1 %v2925_v40 }
 0x8dc   :  { %v2593_v9 = vpop.f32.mrb[80].mxu1 }
 0x8dd   :  { %v14979_v57 = vmul.f32 0.35355338, %v2593_v9  ;;  %v2644_v60 = vpop.f32.mrb[68].mxu0  ;;  %v11912_v48 = vpop.f32.mrb[81].mxu1 }
 0x8de   :  { %v11918_v62 = vpop.f32.mrb[69].mxu0  ;;  %v2596_v39 = vpop.f32.mrb[82].mxu1  ;;  %v14981_v59 = vmul.f32 0.35355338, %v2644_v60 }
 0x8df   :  { %v2647_v12 = vpop.f32.mrb[70].mxu0  ;;  %v11913_v51 = vpop.f32.mrb[83].mxu1  ;;  %v2928_v17 = vsel %vm953_vm3, %v14979_v57, -inf  ;;  %v14985_v50 = vmul.f32 0.35355338, %v2596_v39 }
 0x8e0   :  { %v11919_v1 = vpop.f32.mrb[71].mxu0  ;;  %2929 = vmax.xlane.f32.xlu0 %v2928_v17  ;;  %v2934_v40 = vsel %vm953_vm3, %v14981_v59, -inf  ;;  %v14999_v22 = vmul.f32 0.35355338, %v2647_v12 }
 0x8e1   :  { %v2931_v51 = vsel %vm953_vm3, %v14985_v50, -inf }
 0x8e4   :  { %2935 = vmax.xlane.f32.xlu0 %v2934_v40  ;;  %v2695_v9 = vpop.f32.mrb[84].mxu1 }
 0x8e5   :  { %v2746_v21 = vpop.f32.mrb[72].mxu0  ;;  %v11924_v48 = vpop.f32.mrb[85].mxu1 }
 0x8e6   :  { %v11930_v62 = vpop.f32.mrb[73].mxu0  ;;  %v2698_v52 = vpop.f32.mrb[86].mxu1  ;;  %v15011_v4 = vmul.f32 0.35355338, %v2746_v21 }
 0x8e7   :  { %v2749_v60 = vpop.f32.mrb[74].mxu0  ;;  %v11925_v7 = vpop.f32.mrb[87].mxu1 }
 0x8e8   :  { %v11931_v16 = vpop.f32.mrb[75].mxu0  ;;  %2932 = vmax.xlane.f32.xlu0 %v2931_v51 }
 0x8ec   :  { %3153 = vrot.lane.b32.xlu1 %v14224_v31, %s13856_s29  ;;  %v2797_v39 = vpop.f32.mrb[88].mxu1 }
 0x8ed   :  { %v2848_v17 = vpop.f32.mrb[76].mxu0  ;;  %v11936_v1 = vpop.f32.mrb[89].mxu1 }
 0x8ee   :  { %v11942_v40 = vpop.f32.mrb[77].mxu0  ;;  %v2800_v42 = vpop.f32.mrb[90].mxu1  ;;  %v15001_v1 = vmul.f32 0.35355338, %v2698_v52 }
 0x8ef   :  { %v2851_v29 = vpop.f32.mrb[78].mxu0  ;;  %v11937_v48 = vpop.f32.mrb[91].mxu1  ;;  %v2937_v40 = vsel %vm953_vm3, %v14999_v22, -inf  ;;  %v15015_v52 = vmul.f32 0.35355338, %v2800_v42 }
 0x8f0   :  { %3200 = vrot.lane.b32.xlu1 %v14234_v15, %s13856_s29  ;;  %v11943_v7 = vpop.f32.mrb[79].mxu0  ;;  %v15005_v48 = vmul.f32 0.35355338, %v2695_v9  ;;  %v15019_v9 = vmul.f32 0.35355338, %v2797_v39 }
 0x8f1   :  { %v15007_v7 = vmul.f32 0.35355338, %v2749_v60  ;;  %v2946_v60 = vsel %vm953_vm3, %v15011_v4, -inf  ;;  %v2955_v21 = vsel %vm953_vm3, %v15015_v52, -inf }
 0x8f2   :  { %v2952_v42 = vsel %vm953_vm3, %v15019_v9, -inf }
 0x8f3   :  { %v2949_v12 = vsel %vm953_vm3, %v15007_v7, -inf }
 0x8f4   :  { %3247 = vrot.lane.b32.xlu1 %v14232_v54, %s13856_s29  ;;  %v2899_v16 = vpop.f32.mrb[92].mxu1 }
 0x8f5   :  { %v11948_v62 = vpop.f32.mrb[93].mxu1 }
 0x8f6   :  { %v2902_v51 = vpop.f32.mrb[94].mxu1  ;;  %v2943_v62 = vsel %vm953_vm3, %v15001_v1, -inf }
 0x8f7   :  { %v11949_v33 = vpop.f32.mrb[95].mxu1 }
 0x8f8   :  { %v2940_v33 = vsel %vm953_vm3, %v15005_v48, -inf }
 0x8fe   :  { %3106 = vrot.lane.b32.xlu0 %v14226_v6, %s13856_s29 }
 0x918   :  { %2938 = vmax.xlane.f32.xlu1 %v2937_v40  ;;  %v15023_v40 = vmul.f32 0.35355338, %v2851_v29 }
 0x91a   :  { %v2961_v39 = vsel %vm953_vm3, %v15023_v40, -inf }
 0x91c   :  { %2944 = vmax.xlane.f32.xlu1 %v2943_v62  ;;  %v15027_v62 = vmul.f32 0.35355338, %v2848_v17  ;;  %v15045_v17 = vmul.f32 0.35355338, %v2902_v51  ;;  %v18197_v51 = vmov 0.0  }
 0x91d   :  { %2941 = vmax.xlane.f32.xlu0 %v2940_v33  ;;  %v15033_v33 = vmul.f32 0.35355338, %v2899_v16 }
 0x91e   :  { %v2958_v29 = vsel %vm953_vm3, %v15027_v62, -inf  ;;  %v2967_v16 = vsel %vm953_vm3, %v15045_v17, -inf }
 0x920   :  { %2950 = vmax.xlane.f32.xlu1 %v2949_v12  ;;  %v2964_v12 = vsel %vm953_vm3, %v15033_v33, -inf }
 0x921   :  { %2947 = vmax.xlane.f32.xlu0 %v2946_v60 }
 0x924   :  { %2956 = vmax.xlane.f32.xlu1 %v2955_v21 }
 0x925   :  { %2953 = vmax.xlane.f32.xlu0 %v2952_v42 }
 0x928   :  { %2962 = vmax.xlane.f32.xlu1 %v2961_v39 }
 0x929   :  { %2959 = vmax.xlane.f32.xlu0 %v2958_v29 }
 0x92d   :  { %2965 = vmax.xlane.f32.xlu0 %v2964_v12 }
 0x939   :  { %3341 = vrot.lane.b32.xlu1 %v14240_v19, %s13856_s29 }
 0x943   :  { %3294 = vrot.lane.b32.xlu0 %v14242_v55, %s13856_s29 }
 0x947   :  { %3388 = vrot.lane.b32.xlu0 %v14250_v32, %s13856_s29 }
 0x95d   :  { %2968 = vmax.xlane.f32.xlu1 %v2967_v16 }
 0x966   :  { %v2924_v60 = vpop.xlane.xlu0 %2923 }
 0x967   :  { %v2970_v21 = vsub.f32 %v14967_v58, %v2924_v60 }
 0x968   :  { %v2927_v42 = vpop.xlane.xlu1 %2926 }
 0x969   :  { %v2986_v39 = vmul.f32 1.442695, %v2970_v21 }
 0x96b   :  { %13074 = vpow2.f32 %v2986_v39 }
 0x96c   :  { %v3154_v29 = vpop.permute.xlu1 %3153 }
 0x96d   :  { %11957 = vmatpush3.bf16.msra.mxu1 %v3154_v29  ;;  %v2930_v12 = vpop.xlane.xlu0 %2929 }
 0x96e   :  { %3435 = vrot.lane.b32.xlu1 %v14248_v0, %s13856_s29  ;;  %v2972_v13 = vsub.f32 %v14979_v57, %v2930_v12  ;;  %11968 = vmatprep.subr.bf16.mxu1 %v18197_v51 }
 0x970   :  { %v2990_v61 = vmul.f32 1.442695, %v2972_v13  ;;  %v2971_v13 = vsub.f32 %v14973_v53, %v2927_v42 }
 0x971   :  { %v2936_v2 = vpop.xlane.xlu0 %2935 }
 0x972   :  { %13076 = vpow2.f32 %v2990_v61  ;;  %v2974_v16 = vsub.f32 %v14981_v59, %v2936_v2  ;;  %v2988_v59 = vmul.f32 1.442695, %v2971_v13 }
 0x974   :  { %v2994_v47 = vmul.f32 1.442695, %v2974_v16 }
 0x975   :  { %v15055_v58 = vpop.eup %13074  ;;  %v2933_v60 = vpop.xlane.xlu0 %2932 }
 0x976   :  { %13078 = vpow2.f32 %v2994_v47  ;;  %v3018_v21 = vsel %vm953_vm3, %v15055_v58, 0.0  ;;  %v2973_v47 = vsub.f32 %v14985_v50, %v2933_v60  ;;  %v15078_v50 = vpop.permute.xlu1 %3200 }
 0x977   :  { %3019 = vadd.xlane.f32.xlu0 %v3018_v21  ;;  %13080 = vpow2.f32 %v2988_v59 }
 0x978   :  { %v2992_v12 = vmul.f32 1.442695, %v2973_v47 }
 0x979   :  { %v3107_v39 = vpop.permute.xlu0 %3106 }
 0x97a   :  { %11951 = vmatpush3.bf16.msra.mxu0 %v3107_v39  ;;  %13082 = vpow2.f32 %v2992_v12  ;;  %v15080_v60 = vpop.permute.xlu1 %3247 }
 0x97b   :  { %11962 = vmatprep.subr.bf16.mxu0 %v18197_v51 }
 0x97c   :  { %v15060_v57 = vpop.eup %13076 }
 0x97d   :  { %v3024_v2 = vsel %vm953_vm3, %v15060_v57, 0.0 }
 0x97e   :  { %3025 = vadd.xlane.f32.xlu0 %v3024_v2 }
 0x980   :  { %v15065_v61 = vpop.eup %13078 }
 0x981   :  { %v3030_v29 = vsel %vm953_vm3, %v15065_v61, 0.0  ;;  %v15070_v16 = vpop.eup %13080 }
 0x982   :  { %3031 = vadd.xlane.f32.xlu0 %v3030_v29  ;;  %v3021_v53 = vsel %vm953_vm3, %v15070_v16, 0.0 }
 0x984   :  { %v15074_v42 = vpop.eup %13082 }
 0x985   :  { %v3027_v21 = vsel %vm953_vm3, %v15074_v42, 0.0 }
 0x992   :  { %3022 = vadd.xlane.f32.xlu1 %v3021_v53 }
 0x996   :  { %3028 = vadd.xlane.f32.xlu1 %v3027_v21 }
 0x9a5   :  { %v2939_v39 = vpop.xlane.xlu1 %2938 }
 0x9a6   :  { %v2975_v13 = vsub.f32 %v14999_v22, %v2939_v39 }
 0x9a8   :  { %v2996_v2 = vmul.f32 1.442695, %v2975_v13 }
 0x9a9   :  { %v2945_v59 = vpop.xlane.xlu1 %2944 }
 0x9aa   :  { %13084 = vpow2.f32 %v2996_v2  ;;  %v2977_v47 = vsub.f32 %v15001_v1, %v2945_v59  ;;  %v2942_v29 = vpop.xlane.xlu0 %2941 }
 0x9ab   :  { %v2976_v12 = vsub.f32 %v15005_v48, %v2942_v29 }
 0x9ac   :  { %v3000_v53 = vmul.f32 1.442695, %v2977_v47 }
 0x9ad   :  { %v2998_v23 = vmul.f32 1.442695, %v2976_v12  ;;  %v2951_v28 = vpop.xlane.xlu1 %2950 }
 0x9ae   :  { %13086 = vpow2.f32 %v3000_v53  ;;  %v2979_v21 = vsub.f32 %v15007_v7, %v2951_v28  ;;  %v2948_v49 = vpop.xlane.xlu0 %2947 }
 0x9af   :  { %13088 = vpow2.f32 %v2998_v23  ;;  %v2978_v36 = vsub.f32 %v15011_v4, %v2948_v49 }
 0x9b0   :  { %v3004_v5 = vmul.f32 1.442695, %v2979_v21 }
 0x9b1   :  { %v3002_v22 = vmul.f32 1.442695, %v2978_v36  ;;  %v2957_v39 = vpop.xlane.xlu1 %2956 }
 0x9b2   :  { %13090 = vpow2.f32 %v3004_v5  ;;  %v2981_v13 = vsub.f32 %v15015_v52, %v2957_v39  ;;  %v2954_v1 = vpop.xlane.xlu0 %2953 }
 0x9b3   :  { %13092 = vpow2.f32 %v3002_v22  ;;  %v2980_v48 = vsub.f32 %v15019_v9, %v2954_v1 }
 0x9b4   :  { %v15089_v2 = vpop.eup %13084  ;;  %v3008_v59 = vmul.f32 1.442695, %v2981_v13 }
 0x9b5   :  { %v3006_v47 = vmul.f32 1.442695, %v2980_v48  ;;  %v2963_v29 = vpop.xlane.xlu1 %2962  ;;  %v3033_v23 = vsel %vm953_vm3, %v15089_v2, 0.0 }
 0x9b6   :  { %13094 = vpow2.f32 %v3008_v59  ;;  %v2983_v4 = vsub.f32 %v15023_v40, %v2963_v29  ;;  %3034 = vadd.xlane.f32.xlu1 %v3033_v23  ;;  %v2960_v49 = vpop.xlane.xlu0 %2959 }
 0x9b7   :  { %13096 = vpow2.f32 %v3006_v47  ;;  %v2982_v5 = vsub.f32 %v15027_v62, %v2960_v49 }
 0x9b8   :  { %v15095_v36 = vpop.eup %13086  ;;  %v3012_v28 = vmul.f32 1.442695, %v2983_v4 }
 0x9b9   :  { %v15097_v7 = vpop.eup %13088  ;;  %v3010_v52 = vmul.f32 1.442695, %v2982_v5  ;;  %v3039_v9 = vsel %vm953_vm3, %v15095_v36, 0.0 }
 0x9ba   :  { %13098 = vpow2.f32 %v3012_v28  ;;  %3040 = vadd.xlane.f32.xlu1 %v3039_v9  ;;  %v2966_v12 = vpop.xlane.xlu0 %2965  ;;  %v3036_v40 = vsel %vm953_vm3, %v15097_v7, 0.0  ;;  %v15138_v28 = vpop.permute.xlu1 %3341 }
 0x9bb   :  { %13100 = vpow2.f32 %v3010_v52  ;;  %v2984_v53 = vsub.f32 %v15033_v33, %v2966_v12  ;;  %3037 = vadd.xlane.f32.xlu0 %v3036_v40 }
 0x9bc   :  { %v15104_v62 = vpop.eup %13090 }
 0x9bd   :  { %v15106_v21 = vpop.eup %13092  ;;  %v3014_v22 = vmul.f32 1.442695, %v2984_v53  ;;  %v3045_v39 = vsel %vm953_vm3, %v15104_v62, 0.0 }
 0x9be   :  { %3046 = vadd.xlane.f32.xlu1 %v3045_v39  ;;  %v3042_v13 = vsel %vm953_vm3, %v15106_v21, 0.0 }
 0x9bf   :  { %13102 = vpow2.f32 %v3014_v22  ;;  %3043 = vadd.xlane.f32.xlu0 %v3042_v13 }
 0x9c0   :  { %v15112_v1 = vpop.eup %13094 }
 0x9c1   :  { %v15114_v48 = vpop.eup %13096  ;;  %v3051_v33 = vsel %vm953_vm3, %v15112_v1, 0.0 }
 0x9c2   :  { %3052 = vadd.xlane.f32.xlu1 %v3051_v33  ;;  %v3048_v59 = vsel %vm953_vm3, %v15114_v48, 0.0 }
 0x9c3   :  { %3049 = vadd.xlane.f32.xlu0 %v3048_v59 }
 0x9c4   :  { %v15120_v47 = vpop.eup %13098 }
 0x9c5   :  { %v15122_v29 = vpop.eup %13100  ;;  %v3057_v23 = vsel %vm953_vm3, %v15120_v47, 0.0 }
 0x9c6   :  { %3058 = vadd.xlane.f32.xlu1 %v3057_v23  ;;  %v3054_v4 = vsel %vm953_vm3, %v15122_v29, 0.0 }
 0x9c7   :  { %3055 = vadd.xlane.f32.xlu0 %v3054_v4 }
 0x9c9   :  { %v15128_v49 = vpop.eup %13102 }
 0x9ca   :  { %v3060_v5 = vsel %vm953_vm3, %v15128_v49, 0.0 }
 0x9cb   :  { %3061 = vadd.xlane.f32.xlu0 %v3060_v5 }
 0x9d7   :  { %3535 = vrot.lane.b32.xlu1 %v14224_v31, %s13857_s30 }
 0x9e1   :  { %3484 = vrot.lane.b32.xlu0 %v14226_v6, %s13857_s30 }
 0x9e5   :  { %3482 = vrot.lane.b32.xlu0 %v14226_v6, %s13858_s15 }
 0x9e9   :  { %3533 = vrot.lane.b32.xlu0 %v14224_v31, %s13858_s15 }
 0x9ea   :  { %v2969_v52 = vpop.xlane.xlu1 %2968 }
 0x9eb   :  { %v2985_v9 = vsub.f32 %v15045_v17, %v2969_v52  ;;  %v3295_v17 = vpop.permute.xlu0 %3294 }
 0x9ed   :  { %v3016_v12 = vmul.f32 1.442695, %v2985_v9  ;;  %3584 = vrot.lane.b32.xlu0 %v14234_v15, %s13858_s15 }
 0x9ee   :  { %v15167_v39 = vpop.permute.xlu1 %3435 }
 0x9ef   :  { %13104 = vpow2.f32 %v3016_v12  ;;  %v15163_v22 = vpop.permute.xlu0 %3388 }
 0x9f1   :  { %3635 = vrot.lane.b32.xlu0 %v14232_v54, %s13858_s15 }
 0x9f5   :  { %3686 = vrot.lane.b32.xlu0 %v14242_v55, %s13858_s15 }
 0x9f9   :  { %v15149_v40 = vpop.eup %13104  ;;  %3737 = vrot.lane.b32.xlu0 %v14240_v19, %s13858_s15 }
 0x9fa   :  { %v3063_v53 = vsel %vm953_vm3, %v15149_v40, 0.0 }
 0x9fb   :  { %3064 = vadd.xlane.f32.xlu1 %v3063_v53 }
 0x9fd   :  { %3788 = vrot.lane.b32.xlu0 %v14250_v32, %s13858_s15 }
 0xa04   :  { %v3020_v13 = vpop.xlane.xlu0 %3019 }
 0xa05   :  { %13106 = vrcp.f32 %v3020_v13 }
 0xa0b   :  { %v3026_v33 = vpop.xlane.xlu0 %3025 }
 0xa0c   :  { %3586 = vrot.lane.b32.xlu1 %v14234_v15, %s13857_s30 }
 0xa0f   :  { %v13107_v4 = vpop.eup %13106 }
 0xa10   :  { %3637 = vrot.lane.b32.xlu1 %v14232_v54, %s13857_s30  ;;  %v3082_v52 = vmul.f32 %v13107_v4, %v15055_v58  ;;  %v3032_v58 = vpop.xlane.xlu0 %3031 }
 0xa14   :  { %3688 = vrot.lane.b32.xlu1 %v14242_v55, %s13857_s30 }
 0xa18   :  { %3739 = vrot.lane.b32.xlu1 %v14240_v19, %s13857_s30 }
 0xa1c   :  { %3790 = vrot.lane.b32.xlu1 %v14250_v32, %s13857_s30 }
 0xa1f   :  { %v3023_v59 = vpop.xlane.xlu1 %3022 }
 0xa20   :  { %13108 = vrcp.f32 %v3023_v59  ;;  %3841 = vrot.lane.b32.xlu1 %v14248_v0, %s13857_s30 }
 0xa21   :  { %13110 = vrcp.f32 %v3026_v33 }
 0xa23   :  { %v3029_v23 = vpop.xlane.xlu1 %3028 }
 0xa24   :  { %13112 = vrcp.f32 %v3029_v23  ;;  %3839 = vrot.lane.b32.xlu1 %v14248_v0, %s13858_s15 }
 0xa25   :  { %13114 = vrcp.f32 %v3032_v58 }
 0xa2a   :  { %v13109_v5 = vpop.eup %13108 }
 0xa2b   :  { %v3083_v9 = vmul.f32 %v13109_v5, %v15070_v16  ;;  %v13111_v12 = vpop.eup %13110 }
 0xa2c   :  { %v3084_v59 = vmul.f32 %v13111_v12, %v15060_v57 }
 0xa2d   :  { %v3098_v53 = vpack.c.bf16 %v3083_v9, %v3082_v52 }
 0xa2e   :  { %v13113_v13 = vpop.eup %13112 }
 0xa2f   :  { %v3085_v41 = vmul.f32 %v13113_v13, %v15074_v42  ;;  %11953 = vmatmul.mubr.msk.bf16.vlgmr.msra.gmra.mrb[80].mxu0 %vm953_vm3, %v3098_v53 }
 0xa30   :  { %11963 = vmatpush3.bf16.msra.mxu0 %v15078_v50  ;;  %11964 = vmatprep.mubr.msk.bf16.mxu0 %vm13848_vm1, %v18197_v51  ;;  %v13115_v50 = vpop.eup %13114 }
 0xa31   :  { %v3099_v33 = vpack.c.bf16 %v3085_v41, %v3084_v59  ;;  %11974 = vmatprep.subr.bf16.mxu0 %v18197_v51 }
 0xa33   :  { %11959 = vmatmul.mubr.msk.bf16.vlgmr.msra.gmra.mrb[96].mxu1 %vm953_vm3, %v3099_v33 }
 0xa34   :  { %11969 = vmatpush3.bf16.msra.mxu1 %v15080_v60  ;;  %11970 = vmatprep.mubr.msk.bf16.mxu1 %vm13848_vm1, %v18197_v51  ;;  %v3086_v60 = vmul.f32 %v13115_v50, %v15065_v61 }
 0xa35   :  { %11980 = vmatprep.subr.bf16.mxu1 %v18197_v51 }
 0xa43   :  { %v3035_v57 = vpop.xlane.xlu1 %3034 }
 0xa44   :  { %13116 = vrcp.f32 %v3035_v57 }
 0xa47   :  { %v3041_v16 = vpop.xlane.xlu1 %3040 }
 0xa48   :  { %13118 = vrcp.f32 %v3041_v16  ;;  %v3038_v42 = vpop.xlane.xlu0 %3037 }
 0xa49   :  { %13120 = vrcp.f32 %v3038_v42 }
 0xa4b   :  { %v3047_v41 = vpop.xlane.xlu1 %3046 }
 0xa4c   :  { %13122 = vrcp.f32 %v3047_v41  ;;  %v3044_v23 = vpop.xlane.xlu0 %3043 }
 0xa4d   :  { %13124 = vrcp.f32 %v3044_v23 }
 0xa4e   :  { %v13117_v4 = vpop.eup %13116 }
 0xa4f   :  { %v3087_v5 = vmul.f32 %v13117_v4, %v15089_v2  ;;  %v3053_v52 = vpop.xlane.xlu1 %3052 }
 0xa50   :  { %13126 = vrcp.f32 %v3053_v52  ;;  %v3050_v9 = vpop.xlane.xlu0 %3049 }
 0xa51   :  { %13128 = vrcp.f32 %v3050_v9  ;;  %v3100_v12 = vpack.c.bf16 %v3087_v5, %v3086_v60 }
 0xa52   :  { %v13119_v53 = vpop.eup %13118 }
 0xa53   :  { %v13121_v13 = vpop.eup %13120  ;;  %v3059_v59 = vpop.xlane.xlu1 %3058  ;;  %11965 = vmatmul.mubr.msk.bf16.vlgmr.msra.gmra.mrb[84].mxu0 %vm953_vm3, %v3100_v12  ;;  %v3089_v33 = vmul.f32 %v13119_v53, %v15095_v36 }
 0xa54   :  { %v3088_v58 = vmul.f32 %v13121_v13, %v15097_v7  ;;  %13130 = vrcp.f32 %v3059_v59  ;;  %11975 = vmatpush3.bf16.msra.mxu0 %v3295_v17  ;;  %v3056_v57 = vpop.xlane.xlu0 %3055  ;;  %11976 = vmatprep.mubr.msk.bf16.mxu0 %vm13848_vm1, %v18197_v51 }
 0xa55   :  { %13132 = vrcp.f32 %v3056_v57  ;;  %11986 = vmatprep.subr.bf16.mxu0 %v18197_v51 }
 0xa56   :  { %v13123_v61 = vpop.eup %13122  ;;  %v3101_v2 = vpack.c.bf16 %v3089_v33, %v3088_v58 }
 0xa57   :  { %v13125_v16 = vpop.eup %13124  ;;  %v3091_v42 = vmul.f32 %v13123_v61, %v15104_v62 }
 0xa58   :  { %v3090_v41 = vmul.f32 %v13125_v16, %v15106_v21  ;;  %11971 = vmatmul.mubr.msk.bf16.vlgmr.msra.gmra.mrb[100].mxu1 %vm953_vm3, %v3101_v2  ;;  %v3062_v4 = vpop.xlane.xlu0 %3061 }
 0xa59   :  { %11981 = vmatpush3.bf16.msra.mxu1 %v15138_v28  ;;  %11982 = vmatprep.mubr.msk.bf16.mxu1 %vm13848_vm1, %v18197_v51  ;;  %13134 = vrcp.f32 %v3062_v4 }
 0xa5a   :  { %v13127_v36 = vpop.eup %13126  ;;  %v3102_v7 = vpack.c.bf16 %v3091_v42, %v3090_v41  ;;  %11992 = vmatprep.subr.bf16.mxu1 %v18197_v51 }
 0xa5b   :  { %v13129_v17 = vpop.eup %13128  ;;  %v3093_v50 = vmul.f32 %v13127_v36, %v15112_v1 }
 0xa5c   :  { %v3092_v23 = vmul.f32 %v13129_v17, %v15114_v48  ;;  %11977 = vmatmul.mubr.msk.bf16.vlgmr.msra.gmra.mrb[88].mxu0 %vm953_vm3, %v3102_v7  ;;  %v3485_v1 = vpop.permute.xlu0 %3484 }
 0xa5d   :  { %11987 = vmatpush3.bf16.msra.mxu0 %v15163_v22  ;;  %11988 = vmatprep.mubr.msk.bf16.mxu0 %vm13848_vm1, %v18197_v51  ;;  %v3490_v22 = vsel %vm539_vm2, %v3485_v1, 0 }
 0xa5e   :  { %v13131_v62 = vpop.eup %13130  ;;  %v3103_v21 = vpack.c.bf16 %v3093_v50, %v3092_v23  ;;  %11998 = vmatprep.subr.bf16.mxu0 %v18197_v51 }
 0xa5f   :  { %v13133_v28 = vpop.eup %13132  ;;  %v3095_v60 = vmul.f32 %v13131_v62, %v15120_v47 }
 0xa60   :  { %v3094_v5 = vmul.f32 %v13133_v28, %v15122_v29  ;;  %11983 = vmatmul.mubr.msk.bf16.vlgmr.msra.gmra.mrb[104].mxu1 %vm953_vm3, %v3103_v21  ;;  %v3483_v47 = vpop.permute.xlu0 %3482  ;;  %v3536_v29 = vpop.permute.xlu1 %3535 }
 0xa61   :  { %11993 = vmatpush3.bf16.msra.mxu1 %v15167_v39  ;;  %11994 = vmatprep.mubr.msk.bf16.mxu1 %vm13848_vm1, %v18197_v51  ;;  %v3541_v41 = vsel %vm539_vm2, %v3536_v29, 0 }
 0xa62   :  { %v3104_v48 = vpack.c.bf16 %v3095_v60, %v3094_v5  ;;  %12004 = vmatprep.subr.bf16.mxu1 %v18197_v51 }
 0xa63   :  { %v13135_v59 = vpop.eup %13134 }
 0xa64   :  { %11989 = vmatmul.mubr.msk.bf16.vlgmr.msra.gmra.mrb[92].mxu0 %vm953_vm3, %v3104_v48  ;;  %v3534_v39 = vpop.permute.xlu0 %3533  ;;  %v3096_v57 = vmul.f32 %v13135_v59, %v15128_v49 }
 0xa65   :  { %12000 = vmatprep.mubr.msk.bf16.mxu0 %vm13848_vm1, %v18197_v51 }
 0xa66   :  { %11999 = vmatpush3.bf16.xpose.msra.mxu0 %v3490_v22 }
 0xa67   :  { %12010 = vmatprep.subr.bf16.mxu0 %v18197_v51 }
 0xa68   :  { %v3585_v9 = vpop.permute.xlu0 %3584 }
 0xa6c   :  { %v3636_v33 = vpop.permute.xlu0 %3635 }
 0xa6d   :  { %12001 = vmatmul.mubr.msk.bf16.vlgmr.msra.gmra.mrb[96].mxu0 %vm539_vm2, %v3483_v47 }
 0xa6e   :  { %12012 = vmatprep.mubr.msk.bf16.mxu0 %vm13848_vm1, %v18197_v51 }
 0xa70   :  { %v3687_v36 = vpop.permute.xlu0 %3686 }
 0xa74   :  { %v3738_v17 = vpop.permute.xlu0 %3737 }
 0xa78   :  { %v3789_v23 = vpop.permute.xlu0 %3788 }
 0xa88   :  { %v3065_v52 = vpop.xlane.xlu1 %3064 }
 0xa89   :  { %13136 = vrcp.f32 %v3065_v52 }
 0xa8c   :  { %v3587_v12 = vpop.permute.xlu1 %3586 }
 0xa8d   :  { %v3592_v53 = vsel %vm539_vm2, %v3587_v12, 0 }
 0xa8e   :  { %12011 = vmatpush3.bf16.xpose.msra.mxu0 %v3592_v53 }
 0xa8f   :  { %12022 = vmatprep.subr.bf16.mxu0 %v18197_v51 }
 0xa90   :  { %v3638_v13 = vpop.permute.xlu1 %3637 }
 0xa91   :  { %v3643_v50 = vsel %vm539_vm2, %v3638_v13, 0 }
 0xa93   :  { %v13137_v58 = vpop.eup %13136 }
 0xa94   :  { %v3097_v61 = vmul.f32 %v13137_v58, %v15149_v40  ;;  %v3689_v2 = vpop.permute.xlu1 %3688 }
 0xa95   :  { %v3694_v16 = vsel %vm539_vm2, %v3689_v2, 0  ;;  %12013 = vmatmul.mubr.msk.bf16.vlgmr.msra.gmra.mrb[100].mxu0 %vm539_vm2, %v3585_v9 }
 0xa96   :  { %12023 = vmatpush3.bf16.xpose.msra.mxu0 %v3694_v16  ;;  %v3105_v42 = vpack.c.bf16 %v3097_v61, %v3096_v57  ;;  %12024 = vmatprep.mubr.msk.bf16.mxu0 %vm13848_vm1, %v18197_v51 }
 0xa97   :  { %12034 = vmatprep.subr.bf16.mxu0 %v18197_v51 }
 0xa98   :  { %v3740_v7 = vpop.permute.xlu1 %3739  ;;  %11995 = vmatmul.mubr.msk.bf16.vlgmr.msra.gmra.mrb[108].mxu1 %vm953_vm3, %v3105_v42 }
 0xa99   :  { %12005 = vmatpush3.bf16.xpose.msra.mxu1 %v3541_v41  ;;  %12006 = vmatprep.mubr.msk.bf16.mxu1 %vm13848_vm1, %v18197_v51  ;;  %v3745_v4 = vsel %vm539_vm2, %v3740_v7, 0 }
 0xa9a   :  { %12016 = vmatprep.subr.bf16.mxu1 %v18197_v51 }
 0xa9c   :  { %v3791_v49 = vpop.permute.xlu1 %3790 }
 0xa9d   :  { %v3796_v40 = vsel %vm539_vm2, %v3791_v49, 0  ;;  %12025 = vmatmul.mubr.msk.bf16.vlgmr.msra.gmra.mrb[104].mxu0 %vm539_vm2, %v3687_v36 }
 0xa9e   :  { %12035 = vmatpush3.bf16.xpose.msra.mxu0 %v3796_v40  ;;  %12036 = vmatprep.mubr.msk.bf16.mxu0 %vm13848_vm1, %v18197_v51 }
 0xa9f   :  { %12046 = vmatprep.subr.bf16.mxu0 %v18197_v51 }
 0xaa0   :  { %12007 = vmatmul.mubr.msk.bf16.vlgmr.msra.gmra.mrb[112].mxu1 %vm539_vm2, %v3534_v39  ;;  %v3842_v62 = vpop.permute.xlu1 %3841 }
 0xaa1   :  { %12017 = vmatpush3.bf16.xpose.msra.mxu1 %v3643_v50  ;;  %12018 = vmatprep.mubr.msk.bf16.mxu1 %vm13848_vm1, %v18197_v51  ;;  %v3847_v21 = vsel %vm539_vm2, %v3842_v62, 0 }
 0xaa2   :  { %12028 = vmatprep.subr.bf16.mxu1 %v18197_v51 }
 0xaa4   :  { %v3840_v28 = vpop.permute.xlu1 %3839 }
 0xaa5   :  { %12037 = vmatmul.mubr.msk.bf16.vlgmr.msra.gmra.mrb[108].mxu0 %vm539_vm2, %v3789_v23 }
 0xaa6   :  { %12048 = vmatprep.mubr.msk.bf16.mxu0 %vm13848_vm1, %v18197_v51 }
 0xaa8   :  { %12019 = vmatmul.mubr.msk.bf16.vlgmr.msra.gmra.mrb[116].mxu1 %vm539_vm2, %v3636_v33 }
 0xaa9   :  { %12029 = vmatpush3.bf16.xpose.msra.mxu1 %v3745_v4  ;;  %12030 = vmatprep.mubr.msk.bf16.mxu1 %vm13848_vm1, %v18197_v51 }
 0xaaa   :  { %12040 = vmatprep.subr.bf16.mxu1 %v18197_v51 }
 0xab0   :  { %12031 = vmatmul.mubr.msk.bf16.vlgmr.msra.gmra.mrb[120].mxu1 %vm539_vm2, %v3738_v17 }
 0xab1   :  { %12041 = vmatpush3.bf16.xpose.msra.mxu1 %v3847_v21  ;;  %12042 = vmatprep.mubr.msk.bf16.mxu1 %vm13848_vm1, %v18197_v51 }
 0xab2   :  { %12052 = vmatprep.subr.bf16.mxu1 %v18197_v51 }
 0xab8   :  { %12043 = vmatmul.mubr.msk.bf16.vlgmr.msra.gmra.mrb[124].mxu1 %vm539_vm2, %v3840_v28 }
 0xab9   :  { %12054 = vmatprep.mubr.msk.bf16.mxu1 %vm13848_vm1, %v18197_v51 }
 0xb02   :  { %v15266_v60 = vpop.f32.mrb[80].mxu0 }
 0xb03   :  { %v11954_v5 = vpop.f32.mrb[81].mxu0 }
 0xb04   :  { %v15268_v1 = vpop.f32.mrb[82].mxu0 }
 0xb05   :  { %v11955_v22 = vpop.f32.mrb[83].mxu0 }
 0xb06   :  { %v15272_v47 = vpop.f32.mrb[96].mxu1 }
 0xb07   :  { %v11960_v29 = vpop.f32.mrb[97].mxu1 }
 0xb08   :  { %v15274_v39 = vpop.f32.mrb[98].mxu1 }
 0xb09   :  { %v11961_v9 = vpop.f32.mrb[99].mxu1 }
 0xb26   :  { %v15278_v12 = vpop.f32.mrb[84].mxu0 }
 0xb27   :  { %v11966_v53 = vpop.f32.mrb[85].mxu0 }
 0xb28   :  { %v15280_v13 = vpop.f32.mrb[86].mxu0 }
 0xb29   :  { %v11967_v33 = vpop.f32.mrb[87].mxu0 }
 0xb2b   :  { %v15284_v58 = vpop.f32.mrb[100].mxu1 }
 0xb2c   :  { %v11972_v57 = vpop.f32.mrb[101].mxu1 }
 0xb2d   :  { %v15286_v61 = vpop.f32.mrb[102].mxu1 }
 0xb2e   :  { %v11973_v16 = vpop.f32.mrb[103].mxu1 }
 0xb2f   :  { %v15290_v42 = vpop.f32.mrb[88].mxu0 }
 0xb30   :  { %v11978_v41 = vpop.f32.mrb[89].mxu0 }
 0xb31   :  { %v15292_v36 = vpop.f32.mrb[90].mxu0 }
 0xb32   :  { %v11979_v49 = vpop.f32.mrb[91].mxu0 }
 0xb33   :  { %v15296_v40 = vpop.f32.mrb[104].mxu1 }
 0xb34   :  { %v11984_v17 = vpop.f32.mrb[105].mxu1 }
 0xb35   :  { %v15298_v50 = vpop.f32.mrb[106].mxu1 }
 0xb36   :  { %v11985_v4 = vpop.f32.mrb[107].mxu1 }
 0xb37   :  { %v15302_v62 = vpop.f32.mrb[92].mxu0 }
 0xb38   :  { %v11990_v21 = vpop.f32.mrb[93].mxu0 }
 0xb39   :  { %v15304_v28 = vpop.f32.mrb[94].mxu0 }
 0xb3a   :  { %v11991_v22 = vpop.f32.mrb[95].mxu0 }
 0xb40   :  { %v3526_v29 = vpop.f32.mrb[96].mxu0 }
 0xb41   :  { %v15308_v9 = vmul.f32 0.35355338, %v3526_v29  ;;  %v12002_v53 = vpop.f32.mrb[97].mxu0 }
 0xb42   :  { %v3529_v33 = vpop.f32.mrb[98].mxu0 }
 0xb43   :  { %v15310_v57 = vmul.f32 0.35355338, %v3529_v33  ;;  %v12003_v16 = vpop.f32.mrb[99].mxu0  ;;  %v3906_v41 = vsel %vm953_vm3, %v15308_v9, -inf }
 0xb44   :  { %3907 = vmax.xlane.f32.xlu0 %v3906_v41 }
 0xb45   :  { %v3909_v49 = vsel %vm953_vm3, %v15310_v57, -inf }
 0xb46   :  { %3910 = vmax.xlane.f32.xlu1 %v3909_v49 }
 0xb68   :  { %v3628_v17 = vpop.f32.mrb[100].mxu0 }
 0xb69   :  { %v12014_v4 = vpop.f32.mrb[101].mxu0 }
 0xb6a   :  { %v3631_v21 = vpop.f32.mrb[102].mxu0 }
 0xb6b   :  { %v15316_v22 = vmul.f32 0.35355338, %v3631_v21  ;;  %v15318_v29 = vpop.f32.mrb[108].mxu1  ;;  %v12015_v53 = vpop.f32.mrb[103].mxu0 }
 0xb6c   :  { %18198 = vst [vmem:[#allocation32_spill] sm:$0xff] %v15318_v29  ;;  %v11996_v5 = vpop.f32.mrb[109].mxu1 }
 0xb6d   :  { %v15320_v33 = vpop.f32.mrb[110].mxu1  ;;  %v3921_v16 = vsel %vm953_vm3, %v15316_v22, -inf }
 0xb6e   :  { %18199 = vst [vmem:[#allocation33_spill] sm:$0xff] %v15320_v33  ;;  %v11997_v23 = vpop.f32.mrb[111].mxu1  ;;  %3922 = vmax.xlane.f32.xlu1 %v3921_v16 }
 0xb6f   :  { %v15332_v23 = vmul.f32 0.35355338, %v3628_v17 }
 0xb70   :  { %v3730_v49 = vpop.f32.mrb[104].mxu0 }
 0xb71   :  { %v12026_v7 = vpop.f32.mrb[105].mxu0 }
 0xb72   :  { %v3733_v4 = vpop.f32.mrb[106].mxu0 }
 0xb73   :  { %v3577_v2 = vpop.f32.mrb[112].mxu1  ;;  %v12027_v21 = vpop.f32.mrb[107].mxu0  ;;  %v15342_v17 = vmul.f32 0.35355338, %v3733_v4 }
 0xb74   :  { %v15326_v52 = vmul.f32 0.35355338, %v3577_v2  ;;  %v12008_v59 = vpop.f32.mrb[113].mxu1 }
 0xb75   :  { %v3580_v53 = vpop.f32.mrb[114].mxu1 }
 0xb76   :  { %v15328_v5 = vmul.f32 0.35355338, %v3580_v53  ;;  %v12009_v48 = vpop.f32.mrb[115].mxu1  ;;  %v3912_v30 = vsel %vm953_vm3, %v15326_v52, -inf }
 0xb77   :  { %3913 = vmax.xlane.f32.xlu0 %v3912_v30  ;;  %v3918_v30 = vsel %vm953_vm3, %v15332_v23, -inf }
 0xb78   :  { %v3832_v10 = vpop.f32.mrb[108].mxu0  ;;  %v3915_v7 = vsel %vm953_vm3, %v15328_v5, -inf }
 0xb79   :  { %v12038_v41 = vpop.f32.mrb[109].mxu0 }
 0xb7a   :  { %v3835_v16 = vpop.f32.mrb[110].mxu0 }
 0xb7b   :  { %3916 = vmax.xlane.f32.xlu0 %v3915_v7  ;;  %v3679_v2 = vpop.f32.mrb[116].mxu1  ;;  %v12039_v21 = vpop.f32.mrb[111].mxu0  ;;  %v15346_v7 = vmul.f32 0.35355338, %v3730_v49 }
 0xb7c   :  { %v12020_v59 = vpop.f32.mrb[117].mxu1  ;;  %v15336_v53 = vmul.f32 0.35355338, %v3679_v2 }
 0xb7d   :  { %v3682_v27 = vpop.f32.mrb[118].mxu1  ;;  %v3930_v49 = vsel %vm953_vm3, %v15346_v7, -inf }
 0xb7e   :  { %v15338_v48 = vmul.f32 0.35355338, %v3682_v27  ;;  %v12021_v3 = vpop.f32.mrb[119].mxu1  ;;  %v3924_v21 = vsel %vm953_vm3, %v15336_v53, -inf }
 0xb7f   :  { %3919 = vmax.xlane.f32.xlu0 %v3918_v30  ;;  %v3933_v3 = vsel %vm953_vm3, %v15342_v17, -inf }
 0xb80   :  { %v3927_v41 = vsel %vm953_vm3, %v15338_v48, -inf }
 0xb81   :  { %3928 = vmax.xlane.f32.xlu1 %v3927_v41  ;;  %v15358_v41 = vmul.f32 0.35355338, %v3835_v16 }
 0xb83   :  { %3925 = vmax.xlane.f32.xlu0 %v3924_v21  ;;  %v3781_v2 = vpop.f32.mrb[120].mxu1 }
 0xb84   :  { %v12032_v27 = vpop.f32.mrb[121].mxu1  ;;  %v15352_v30 = vmul.f32 0.35355338, %v3781_v2 }
 0xb85   :  { %3934 = vmax.xlane.f32.xlu1 %v3933_v3  ;;  %v3784_v59 = vpop.f32.mrb[122].mxu1  ;;  %v15362_v27 = vmul.f32 0.35355338, %v3832_v10 }
 0xb86   :  { %v15354_v4 = vmul.f32 0.35355338, %v3784_v59  ;;  %v12033_v18 = vpop.f32.mrb[123].mxu1  ;;  %v3936_v3 = vsel %vm953_vm3, %v15352_v30, -inf }
 0xb87   :  { %3931 = vmax.xlane.f32.xlu0 %v3930_v49  ;;  %v3945_v18 = vsel %vm953_vm3, %v15358_v41, -inf  ;;  %v3942_v29 = vsel %vm953_vm3, %v15362_v27, -inf }
 0xb88   :  { %v3939_v21 = vsel %vm953_vm3, %v15354_v4, -inf }
 0xb89   :  { %3940 = vmax.xlane.f32.xlu1 %v3939_v21 }
 0xb8b   :  { %3937 = vmax.xlane.f32.xlu0 %v3936_v3  ;;  %v3883_v2 = vpop.f32.mrb[124].mxu1 }
 0xb8c   :  { %v12044_v59 = vpop.f32.mrb[125].mxu1  ;;  %v15368_v49 = vmul.f32 0.35355338, %v3883_v2 }
 0xb8d   :  { %v3886_v26 = vpop.f32.mrb[126].mxu1  ;;  %3946 = vmax.xlane.f32.xlu1 %v3945_v18 }
 0xb8e   :  { %v12045_v16 = vpop.f32.mrb[127].mxu1  ;;  %v3948_v10 = vsel %vm953_vm3, %v15368_v49, -inf }
 0xb8f   :  { %3943 = vmax.xlane.f32.xlu0 %v3942_v29  ;;  %v15384_v29 = vmul.f32 0.35355338, %v3886_v26 }
 0xb91   :  { %v3951_v21 = vsel %vm953_vm3, %v15384_v29, -inf }
 0xb93   :  { %3949 = vmax.xlane.f32.xlu0 %v3948_v10 }
 0xb9e   :  { %4137 = vrot.lane.b32.xlu1 %v14224_v31, %s13859_s6 }
 0xba2   :  { %4184 = vrot.lane.b32.xlu1 %v14234_v15, %s13859_s6 }
 0xba6   :  { %4231 = vrot.lane.b32.xlu1 %v14232_v54, %s13859_s6 }
 0xba9   :  { %4090 = vrot.lane.b32.xlu0 %v14226_v6, %s13859_s6 }
 0xbad   :  { %4278 = vrot.lane.b32.xlu0 %v14242_v55, %s13859_s6 }
 0xbca   :  { %3952 = vmax.xlane.f32.xlu1 %v3951_v21 }
 0xbd1   :  { %v3908_v3 = vpop.xlane.xlu0 %3907 }
 0xbd2   :  { %v3954_v31 = vsub.f32 %v15308_v9, %v3908_v3 }
 0xbd3   :  { %v3911_v15 = vpop.xlane.xlu1 %3910 }
 0xbd4   :  { %v3970_v2 = vmul.f32 1.442695, %v3954_v31  ;;  %v3955_v55 = vsub.f32 %v15310_v57, %v3911_v15 }
 0xbd6   :  { %13138 = vpow2.f32 %v3970_v2  ;;  %v3972_v26 = vmul.f32 1.442695, %v3955_v55 }
 0xbd8   :  { %13140 = vpow2.f32 %v3972_v26 }
 0xbdb   :  { %4325 = vrot.lane.b32.xlu1 %v14240_v19, %s13859_s6 }
 0xbe0   :  { %v15391_v54 = vpop.eup %13138 }
 0xbe1   :  { %v4002_v6 = vsel %vm953_vm3, %v15391_v54, 0.0 }
 0xbe2   :  { %4003 = vadd.xlane.f32.xlu0 %v4002_v6  ;;  %v15396_v59 = vpop.eup %13140 }
 0xbe3   :  { %v4005_v9 = vsel %vm953_vm3, %v15396_v59, 0.0 }
 0xbfb   :  { %v3923_v18 = vpop.xlane.xlu1 %3922 }
 0xbfc   :  { %v3959_v10 = vsub.f32 %v15316_v22, %v3923_v18 }
 0xbfe   :  { %v3980_v57 = vmul.f32 1.442695, %v3959_v10 }
 0xbff   :  { %4006 = vadd.xlane.f32.xlu1 %v4005_v9 }
 0xc04   :  { %v3914_v16 = vpop.xlane.xlu0 %3913 }
 0xc05   :  { %v3956_v19 = vsub.f32 %v15326_v52, %v3914_v16 }
 0xc07   :  { %v3974_v21 = vmul.f32 1.442695, %v3956_v19 }
 0xc08   :  { %v3917_v3 = vpop.xlane.xlu0 %3916 }
 0xc09   :  { %13142 = vpow2.f32 %v3974_v21  ;;  %v3957_v31 = vsub.f32 %v15328_v5, %v3917_v3 }
 0xc0b   :  { %v3976_v2 = vmul.f32 1.442695, %v3957_v31 }
 0xc0c   :  { %v3920_v6 = vpop.xlane.xlu0 %3919 }
 0xc0d   :  { %13144 = vpow2.f32 %v3976_v2  ;;  %v3958_v15 = vsub.f32 %v15332_v23, %v3920_v6 }
 0xc0e   :  { %v3929_v55 = vpop.xlane.xlu1 %3928  ;;  %13146 = vpow2.f32 %v3980_v57 }
 0xc0f   :  { %v3978_v26 = vmul.f32 1.442695, %v3958_v15  ;;  %v3961_v9 = vsub.f32 %v15338_v48, %v3929_v55 }
 0xc10   :  { %v3926_v33 = vpop.xlane.xlu0 %3925 }
 0xc11   :  { %13148 = vpow2.f32 %v3978_v26  ;;  %v3984_v52 = vmul.f32 1.442695, %v3961_v9  ;;  %v3960_v22 = vsub.f32 %v15336_v53, %v3926_v33 }
 0xc12   :  { %v3935_v18 = vpop.xlane.xlu1 %3934 }
 0xc13   :  { %v15406_v16 = vpop.eup %13142  ;;  %13150 = vpow2.f32 %v3984_v52  ;;  %v3982_v5 = vmul.f32 1.442695, %v3960_v22  ;;  %v3963_v19 = vsub.f32 %v15342_v17, %v3935_v18 }
 0xc14   :  { %v3932_v10 = vpop.xlane.xlu0 %3931  ;;  %v4008_v23 = vsel %vm953_vm3, %v15406_v16, 0.0 }
 0xc15   :  { %13152 = vpow2.f32 %v3982_v5  ;;  %v3988_v21 = vmul.f32 1.442695, %v3963_v19  ;;  %v3962_v48 = vsub.f32 %v15346_v7, %v3932_v10  ;;  %4009 = vadd.xlane.f32.xlu0 %v4008_v23 }
 0xc16   :  { %v3941_v3 = vpop.xlane.xlu1 %3940 }
 0xc17   :  { %v15412_v31 = vpop.eup %13144  ;;  %13154 = vpow2.f32 %v3988_v21  ;;  %v3986_v33 = vmul.f32 1.442695, %v3962_v48  ;;  %v3965_v53 = vsub.f32 %v15354_v4, %v3941_v3 }
 0xc18   :  { %v3938_v57 = vpop.xlane.xlu0 %3937  ;;  %v4011_v17 = vsel %vm953_vm3, %v15412_v31, 0.0  ;;  %v15417_v2 = vpop.eup %13146 }
 0xc19   :  { %13156 = vpow2.f32 %v3986_v33  ;;  %v3992_v6 = vmul.f32 1.442695, %v3965_v53  ;;  %v3964_v15 = vsub.f32 %v15352_v30, %v3938_v57  ;;  %4012 = vadd.xlane.f32.xlu1 %v4011_v17  ;;  %v4017_v4 = vsel %vm953_vm3, %v15417_v2, 0.0 }
 0xc1a   :  { %v3947_v7 = vpop.xlane.xlu1 %3946 }
 0xc1b   :  { %v15420_v55 = vpop.eup %13148  ;;  %13158 = vpow2.f32 %v3992_v6  ;;  %v3990_v26 = vmul.f32 1.442695, %v3964_v15  ;;  %v3967_v9 = vsub.f32 %v15358_v41, %v3947_v7 }
 0xc1c   :  { %v3944_v52 = vpop.xlane.xlu0 %3943  ;;  %v4014_v22 = vsel %vm953_vm3, %v15420_v55, 0.0 }
 0xc1d   :  { %v15427_v18 = vpop.eup %13150  ;;  %13160 = vpow2.f32 %v3990_v26  ;;  %v3996_v5 = vmul.f32 1.442695, %v3967_v9  ;;  %v3966_v30 = vsub.f32 %v15362_v27, %v3944_v52  ;;  %4018 = vadd.xlane.f32.xlu1 %v4017_v4  ;;  %4015 = vadd.xlane.f32.xlu0 %v4014_v22 }
 0xc1e   :  { %v4138_v19 = vpop.permute.xlu1 %4137  ;;  %v4023_v21 = vsel %vm953_vm3, %v15427_v18, 0.0 }
 0xc1f   :  { %v15430_v10 = vpop.eup %13152  ;;  %13162 = vpow2.f32 %v3996_v5  ;;  %v3994_v41 = vmul.f32 1.442695, %v3966_v30  ;;  %12053 = vmatpush3.bf16.msra.mxu1 %v4138_v19  ;;  %v18200_v19 = vpack.i.bf16 %v14925_v44, %v14923_v45 }
 0xc20   :  { %v3950_v23 = vpop.xlane.xlu0 %3949  ;;  %v4020_v48 = vsel %vm953_vm3, %v15430_v10, 0.0  ;;  %12064 = vmatprep.subr.bf16.mxu1 %v18197_v51 }
 0xc21   :  { %v15437_v3 = vpop.eup %13154  ;;  %13164 = vpow2.f32 %v3994_v41  ;;  %v3968_v27 = vsub.f32 %v15368_v49, %v3950_v23  ;;  %4024 = vadd.xlane.f32.xlu1 %v4023_v21  ;;  %4021 = vadd.xlane.f32.xlu0 %v4020_v48  ;;  %v18201_v23 = vpack.i.bf16 %v15268_v1, %v15266_v60  ;;  %v18202_v48 = vpack.i.bf16 %v14937_v34, %v14935_v43 }
 0xc22   :  { %v4029_v17 = vsel %vm953_vm3, %v15437_v3, 0.0  ;;  %v4185_v41 = vpop.permute.xlu1 %4184  ;;  %v18204_v60 = vpack.i.bf16 %v14949_v38, %v14947_v35  ;;  %v18205_v34 = vpack.i.bf16 %v14931_v37, %v14929_v25  ;;  %v18206_v35 = vpack.i.bf16 %v15274_v39, %v15272_v47 }
 0xc23   :  { %v15440_v33 = vpop.eup %13156  ;;  %v3998_v53 = vmul.f32 1.442695, %v3968_v27  ;;  %v18209_v37 = vpack.i.bf16 %v14955_v46, %v14953_v24 }
 0xc24   :  { %v4091_v57 = vpop.permute.xlu0 %4090  ;;  %v4026_v6 = vsel %vm953_vm3, %v15440_v33, 0.0 }
 0xc25   :  { %v15446_v15 = vpop.eup %13158  ;;  %13166 = vpow2.f32 %v3998_v53  ;;  %4030 = vadd.xlane.f32.xlu1 %v4029_v17  ;;  %4027 = vadd.xlane.f32.xlu0 %v4026_v6 }
 0xc26   :  { %12047 = vmatpush3.bf16.msra.mxu0 %v4091_v57  ;;  %v4035_v49 = vsel %vm953_vm3, %v15446_v15, 0.0  ;;  %v4232_v21 = vpop.permute.xlu1 %4231 }
 0xc27   :  { %v15448_v7 = vpop.eup %13160  ;;  %12058 = vmatprep.subr.bf16.mxu0 %v18197_v51 }
 0xc28   :  { %v4032_v26 = vsel %vm953_vm3, %v15448_v7, 0.0  ;;  %v4279_v38 = vpop.permute.xlu0 %4278 }
 0xc29   :  { %v15455_v9 = vpop.eup %13162  ;;  %4036 = vadd.xlane.f32.xlu1 %v4035_v49  ;;  %4033 = vadd.xlane.f32.xlu0 %v4032_v26 }
 0xc2a   :  { %v4041_v4 = vsel %vm953_vm3, %v15455_v9, 0.0 }
 0xc2b   :  { %v15457_v52 = vpop.eup %13164 }
 0xc2c   :  { %v4038_v22 = vsel %vm953_vm3, %v15457_v52, 0.0 }
 0xc2d   :  { %4042 = vadd.xlane.f32.xlu1 %v4041_v4  ;;  %4039 = vadd.xlane.f32.xlu0 %v4038_v22 }
 0xc2f   :  { %v15463_v5 = vpop.eup %13166 }
 0xc30   :  { %v4044_v30 = vsel %vm953_vm3, %v15463_v5, 0.0 }
 0xc31   :  { %4045 = vadd.xlane.f32.xlu0 %v4044_v30 }
 0xc47   :  { %4372 = vrot.lane.b32.xlu0 %v14250_v32, %s13859_s6  ;;  %v18203_v32 = vpack.i.bf16 %v15280_v13, %v15278_v12  ;;  %v18207_v12 = vpack.i.bf16 %v14943_v63, %v14941_v56 }
 0xc4b   :  { %12655 = vrot.lane.b32.xlu0 %v18200_v19, %s13844_s18 }
 0xc4f   :  { %12665 = vrot.lane.b32.xlu0 %v18201_v23, %s13839_s13 }
 0xc53   :  { %12675 = vrot.lane.b32.xlu0 %v18202_v48, %s13844_s18 }
 0xc57   :  { %v3953_v27 = vpop.xlane.xlu1 %3952  ;;  %12685 = vrot.lane.b32.xlu0 %v18203_v32, %s13839_s13 }
 0xc58   :  { %v3969_v45 = vsub.f32 %v15384_v29, %v3953_v27 }
 0xc5a   :  { %v4000_v44 = vmul.f32 1.442695, %v3969_v45 }
 0xc5b   :  { %12695 = vrot.lane.b32.xlu0 %v18204_v60, %s13844_s18  ;;  %v15508_v13 = vpop.permute.xlu1 %4325 }
 0xc5c   :  { %13168 = vpow2.f32 %v4000_v44 }
 0xc66   :  { %v15490_v1 = vpop.eup %13168 }
 0xc67   :  { %v4047_v43 = vsel %vm953_vm3, %v15490_v1, 0.0 }
 0xc68   :  { %4048 = vadd.xlane.f32.xlu1 %v4047_v43 }
 0xc6f   :  { %v4004_v29 = vpop.xlane.xlu0 %4003 }
 0xc70   :  { %13170 = vrcp.f32 %v4004_v29 }
 0xc79   :  { %4419 = vrot.lane.b32.xlu1 %v14248_v0, %s13859_s6  ;;  %v18208_v0 = vpack.i.bf16 %v15286_v61, %v15284_v58 }
 0xc7a   :  { %v13171_v47 = vpop.eup %13170 }
 0xc7b   :  { %v4066_v56 = vmul.f32 %v13171_v47, %v15391_v54 }
 0xc7d   :  { %12660 = vrot.lane.b32.xlu1 %v18205_v34, %s13844_s18 }
 0xc81   :  { %12670 = vrot.lane.b32.xlu1 %v18206_v35, %s13839_s13 }
 0xc85   :  { %12680 = vrot.lane.b32.xlu1 %v18207_v12, %s13844_s18 }
 0xc89   :  { %12690 = vrot.lane.b32.xlu1 %v18208_v0, %s13839_s13 }
 0xc8c   :  { %v4007_v25 = vpop.xlane.xlu1 %4006 }
 0xc8d   :  { %13172 = vrcp.f32 %v4007_v25  ;;  %12700 = vrot.lane.b32.xlu1 %v18209_v37, %s13844_s18 }
 0xc97   :  { %v13173_v39 = vpop.eup %13172 }
 0xc98   :  { %v4067_v63 = vmul.f32 %v13173_v39, %v15396_v59 }
 0xc9a   :  { %v4082_v53 = vpack.c.bf16 %v4067_v63, %v4066_v56 }
 0xc9c   :  { %12049 = vmatmul.mubr.msk.bf16.vlgmr.msra.gmra.mrb[112].mxu0 %vm953_vm3, %v4082_v53 }
 0xc9d   :  { %12059 = vmatpush3.bf16.msra.mxu0 %v4185_v41  ;;  %12060 = vmatprep.mubr.msk.bf16.mxu0 %vm13848_vm1, %v18197_v51 }
 0xc9e   :  { %12070 = vmatprep.subr.bf16.mxu0 %v18197_v51 }
 0xca2   :  { %v4010_v58 = vpop.xlane.xlu0 %4009 }
 0xca3   :  { %13174 = vrcp.f32 %v4010_v58  ;;  %v12896_v58 = vld [vmem:[%s18150_s4] sm:$0xff]  }
 0xca6   :  { %v4013_v61 = vpop.xlane.xlu1 %4012 }
 0xca7   :  { %13176 = vrcp.f32 %v4013_v61 }
 0xcaa   :  { %v4019_v24 = vpop.xlane.xlu1 %4018  ;;  %v4016_v46 = vpop.xlane.xlu0 %4015 }
 0xcab   :  { %13178 = vrcp.f32 %v4019_v24 }
 0xcac   :  { %13180 = vrcp.f32 %v4016_v46 }
 0xcad   :  { %v13175_v59 = vpop.eup %13174 }
 0xcae   :  { %v4025_v54 = vpop.xlane.xlu1 %4024  ;;  %v4022_v57 = vpop.xlane.xlu0 %4021  ;;  %v4068_v6 = vmul.f32 %v13175_v59, %v15406_v16 }
 0xcaf   :  { %13182 = vrcp.f32 %v4025_v54 }
 0xcb0   :  { %13184 = vrcp.f32 %v4022_v57 }
 0xcb1   :  { %v13177_v17 = vpop.eup %13176 }
 0xcb2   :  { %v4069_v49 = vmul.f32 %v13177_v17, %v15412_v31  ;;  %v4031_v26 = vpop.xlane.xlu1 %4030  ;;  %v4028_v4 = vpop.xlane.xlu0 %4027 }
 0xcb3   :  { %13186 = vrcp.f32 %v4031_v26 }
 0xcb4   :  { %13188 = vrcp.f32 %v4028_v4  ;;  %v4083_v22 = vpack.c.bf16 %v4069_v49, %v4068_v6 }
 0xcb5   :  { %v13179_v30 = vpop.eup %13178 }
 0xcb6   :  { %v13181_v19 = vpop.eup %13180  ;;  %v4071_v41 = vmul.f32 %v13179_v30, %v15417_v2  ;;  %v4037_v23 = vpop.xlane.xlu1 %4036  ;;  %12055 = vmatmul.mubr.msk.bf16.vlgmr.msra.gmra.mrb[128].mxu1 %vm953_vm3, %v4083_v22 }
 0xcb7   :  { %v4034_v48 = vpop.xlane.xlu0 %4033  ;;  %v4070_v27 = vmul.f32 %v13181_v19, %v15420_v55  ;;  %13190 = vrcp.f32 %v4037_v23  ;;  %12065 = vmatpush3.bf16.msra.mxu1 %v4232_v21  ;;  %12066 = vmatprep.mubr.msk.bf16.mxu1 %vm13848_vm1, %v18197_v51 }
 0xcb8   :  { %13192 = vrcp.f32 %v4034_v48  ;;  %12076 = vmatprep.subr.bf16.mxu1 %v18197_v51 }
 0xcb9   :  { %v13183_v16 = vpop.eup %13182  ;;  %v4084_v31 = vpack.c.bf16 %v4071_v41, %v4070_v27 }
 0xcba   :  { %v13185_v32 = vpop.eup %13184  ;;  %v4073_v45 = vmul.f32 %v13183_v16, %v15427_v18  ;;  %v4043_v2 = vpop.xlane.xlu1 %4042 }
 0xcbb   :  { %v4040_v44 = vpop.xlane.xlu0 %4039  ;;  %v4072_v60 = vmul.f32 %v13185_v32, %v15430_v10  ;;  %13194 = vrcp.f32 %v4043_v2  ;;  %12061 = vmatmul.mubr.msk.bf16.vlgmr.msra.gmra.mrb[116].mxu0 %vm953_vm3, %v4084_v31  ;;  %v18212_v32 = vpack.i.bf16 %v14961_v8, %v14959_v11  ;;  %v18214_v8 = vpack.i.bf16 %v15304_v28, %v15302_v62 }
 0xcbc   :  { %12071 = vmatpush3.bf16.msra.mxu0 %v4279_v38  ;;  %13196 = vrcp.f32 %v4040_v44  ;;  %12072 = vmatprep.mubr.msk.bf16.mxu0 %vm13848_vm1, %v18197_v51 }
 0xcbd   :  { %v13187_v55 = vpop.eup %13186  ;;  %v4085_v21 = vpack.c.bf16 %v4073_v45, %v4072_v60  ;;  %12082 = vmatprep.subr.bf16.mxu0 %v18197_v51 }
 0xcbe   :  { %v13189_v43 = vpop.eup %13188  ;;  %v4075_v34 = vmul.f32 %v13187_v55, %v15437_v3 }
 0xcbf   :  { %v4046_v18 = vpop.xlane.xlu0 %4045  ;;  %v4074_v35 = vmul.f32 %v13189_v43, %v15440_v33  ;;  %12067 = vmatmul.mubr.msk.bf16.vlgmr.msra.gmra.mrb[132].mxu1 %vm953_vm3, %v4085_v21 }
 0xcc0   :  { %12077 = vmatpush3.bf16.msra.mxu1 %v15508_v13  ;;  %12078 = vmatprep.mubr.msk.bf16.mxu1 %vm13848_vm1, %v18197_v51  ;;  %13198 = vrcp.f32 %v4046_v18 }
 0xcc1   :  { %v13191_v10 = vpop.eup %13190  ;;  %v4086_v38 = vpack.c.bf16 %v4075_v34, %v4074_v35  ;;  %12088 = vmatprep.subr.bf16.mxu1 %v18197_v51 }
 0xcc2   :  { %v13193_v12 = vpop.eup %13192  ;;  %v4077_v29 = vmul.f32 %v13191_v10, %v15446_v15 }
 0xcc3   :  { %v4373_v0 = vpop.permute.xlu0 %4372  ;;  %v4076_v3 = vmul.f32 %v13193_v12, %v15448_v7  ;;  %12073 = vmatmul.mubr.msk.bf16.vlgmr.msra.gmra.mrb[120].mxu0 %vm953_vm3, %v4086_v38 }
 0xcc4   :  { %12083 = vmatpush3.bf16.msra.mxu0 %v4373_v0  ;;  %12084 = vmatprep.mubr.msk.bf16.mxu0 %vm13848_vm1, %v18197_v51 }
 0xcc5   :  { %v13195_v33 = vpop.eup %13194  ;;  %v4087_v13 = vpack.c.bf16 %v4077_v29, %v4076_v3  ;;  %12094 = vmatprep.subr.bf16.mxu0 %v12896_v58 }
 0xcc6   :  { %v13197_v25 = vpop.eup %13196  ;;  %v4079_v37 = vmul.f32 %v13195_v33, %v15455_v9 }
 0xcc7   :  { %v4078_v47 = vmul.f32 %v13197_v25, %v15457_v52  ;;  %12079 = vmatmul.mubr.msk.bf16.vlgmr.msra.gmra.mrb[136].mxu1 %vm953_vm3, %v4087_v13  ;;  %v12656_v29 = vpop.permute.xlu0 %12655 }
 0xcc8   :  { %12090 = vmatprep.mubr.msk.bf16.mxu1 %vm13848_vm1, %v18197_v51 }
 0xcc9   :  { %v4088_v15 = vpack.c.bf16 %v4079_v37, %v4078_v47 }
 0xcca   :  { %v13199_v56 = vpop.eup %13198 }
 0xccb   :  { %12085 = vmatmul.mubr.msk.bf16.vlgmr.msra.gmra.mrb[124].mxu0 %vm953_vm3, %v4088_v15  ;;  %v4080_v53 = vmul.f32 %v13199_v56, %v15463_v5  ;;  %v18210_v5 = vpack.i.bf16 %v15292_v36, %v15290_v42  ;;  %v18211_v36 = vpack.i.bf16 %v15298_v50, %v15296_v40  ;;  %v18213_v50 = vpack.i.bf16 %v14969_v14, %v14965_v20  ;;  %v18215_v20 = vld [vmem:[#allocation33_spill] sm:$0xff]  ;;  %v18216_v14 = vld [vmem:[#allocation32_spill] sm:$0xff]  ;;  %v12666_v0 = vpop.permute.xlu0 %12665 }
 0xccc   :  { %12095 = vmatpush3.bf16.msra.mxu0 %v12896_v58  ;;  %v18217_v12 = vpack.i.bf16 %v18215_v20, %v18216_v14  ;;  %v12658_v15 = vunpack.i.h.bf16 %v12656_v29  ;;  %v12667_v56 = vunpack.i.l.bf16 %v12666_v0  ;;  %v18219_v58 = vld [vmem:[#allocation16_spill] sm:$0xff] }
 0xccf   :  { %v12676_v3 = vpop.permute.xlu0 %12675 }
 0xcd3   :  { %v12686_v37 = vpop.permute.xlu0 %12685 }
 0xcd7   :  { %v15597_v47 = vpop.permute.xlu0 %12695 }
 0xcf5   :  { %v4049_v7 = vpop.xlane.xlu1 %4048 }
 0xcf6   :  { %13200 = vrcp.f32 %v4049_v7  ;;  %v12657_v7 = vunpack.i.l.bf16 %v12656_v29 }
 0xcf9   :  { %v4420_v39 = vpop.permute.xlu1 %4419 }
 0xcfa   :  { %12089 = vmatpush3.bf16.msra.mxu1 %v4420_v39  ;;  %v12668_v39 = vunpack.i.h.bf16 %v12666_v0 }
 0xd00   :  { %v13201_v63 = vpop.eup %13200 }
 0xd01   :  { %v4081_v9 = vmul.f32 %v13201_v63, %v15490_v1  ;;  %v12897_v1 = vld [vmem:[%s18150_s4 + $0x8] sm:$0xff]   ;;  %v12661_v63 = vpop.permute.xlu1 %12660 }
 0xd02   :  { %12096 = vmatprep.subr.bf16.mxu0 %v12897_v1 }
 0xd03   :  { %v4089_v52 = vpack.c.bf16 %v4081_v9, %v4080_v53  ;;  %12097 = vmatpush3.bf16.msra.mxu0 %v12897_v1  ;;  %v18218_v9 = vld [vmem:[#allocation17_spill] sm:$0xff] }
 0xd05   :  { %12091 = vmatmul.mubr.msk.bf16.vlgmr.msra.gmra.mrb[140].mxu1 %vm953_vm3, %v4089_v52  ;;  %v4659_v52 = vsel %vm539_vm2, %v18218_v9, %v12658_v15 }
 0xd6f   :  { %v4130_v61 = vpop.f32.mrb[112].mxu0 }
 0xd70   :  { %v12050_v24 = vpop.f32.mrb[113].mxu0 }
 0xd71   :  { %v4133_v46 = vpop.f32.mrb[114].mxu0 }
 0xd72   :  { %v12704_v54 = vpack.i.bf16 %v4133_v46, %v4130_v61  ;;  %v12051_v57 = vpop.f32.mrb[115].mxu0  ;;  %v4658_v61 = vsel %vm539_vm2, %v18219_v58, %v12657_v7  ;;  %v18224_v7 = vld [vmem:[#allocation23_spill] sm:$0xff] }
 0xd73   :  { %v4675_v57 = vsel %vm953_vm3, %v4659_v52, %v12668_v39 }
 0xd74   :  { %12705 = vrot.lane.b32.xlu0 %v12704_v54, %s13860_s14  ;;  %v4674_v54 = vsel %vm953_vm3, %v4658_v61, %v12667_v56  ;;  %v18225_v56 = vld [vmem:[#allocation22_spill] sm:$0xff] }
 0xd78   :  { %12710 = vrot.lane.b32.xlu0 %v18210_v5, %s13839_s13 }
 0xd89   :  { %v4177_v59 = vpop.f32.mrb[128].mxu1 }
 0xd8a   :  { %v12056_v17 = vpop.f32.mrb[129].mxu1 }
 0xd8b   :  { %v4180_v6 = vpop.f32.mrb[130].mxu1 }
 0xd8c   :  { %v12714_v49 = vpack.i.bf16 %v4180_v6, %v4177_v59  ;;  %v12057_v26 = vpop.f32.mrb[131].mxu1  ;;  %v12671_v59 = vpop.permute.xlu1 %12670 }
 0xd8e   :  { %v4224_v4 = vpop.f32.mrb[116].mxu0  ;;  %12715 = vrot.lane.b32.xlu1 %v12714_v49, %s13860_s14 }
 0xd8f   :  { %v12062_v22 = vpop.f32.mrb[117].mxu0 }
 0xd90   :  { %v4227_v30 = vpop.f32.mrb[118].mxu0  ;;  %v12681_v6 = vpop.permute.xlu1 %12680  ;;  %v12662_v22 = vunpack.i.l.bf16 %v12661_v63 }
 0xd91   :  { %v12724_v19 = vpack.i.bf16 %v4227_v30, %v4224_v4  ;;  %v12063_v41 = vpop.f32.mrb[119].mxu0  ;;  %v12663_v4 = vunpack.i.h.bf16 %v12661_v63  ;;  %v12673_v30 = vunpack.i.h.bf16 %v12671_v59 }
 0xd92   :  { %v4271_v42 = vpop.f32.mrb[132].mxu1  ;;  %12720 = vrot.lane.b32.xlu1 %v18211_v36, %s13839_s13  ;;  %v12678_v41 = vunpack.i.h.bf16 %v12676_v3 }
 0xd93   :  { %12725 = vrot.lane.b32.xlu0 %v12724_v19, %s13860_s14  ;;  %v12068_v23 = vpop.f32.mrb[133].mxu1  ;;  %v12672_v19 = vunpack.i.l.bf16 %v12671_v59 }
 0xd94   :  { %v4274_v48 = vpop.f32.mrb[134].mxu1  ;;  %v12691_v49 = vpop.permute.xlu1 %12690  ;;  %v18220_v23 = vld [vmem:[#allocation19_spill] sm:$0xff] }
 0xd95   :  { %v12734_v27 = vpack.i.bf16 %v4274_v48, %v4271_v42  ;;  %v12069_v16 = vpop.f32.mrb[135].mxu1  ;;  %v12677_v42 = vunpack.i.l.bf16 %v12676_v3  ;;  %v4661_v48 = vsel %vm539_vm2, %v18220_v23, %v12663_v4  ;;  %v12693_v0 = vunpack.i.h.bf16 %v12691_v49 }
 0xd96   :  { %v4318_v31 = vpop.f32.mrb[120].mxu0  ;;  %v12692_v3 = vunpack.i.l.bf16 %v12691_v49  ;;  %v18227_v49 = vld [vmem:[#allocation24_spill] sm:$0xff] }
 0xd97   :  { %12730 = vrot.lane.b32.xlu0 %v18212_v32, %s13844_s18  ;;  %12735 = vrot.lane.b32.xlu1 %v12734_v27, %s13860_s14  ;;  %v12074_v45 = vpop.f32.mrb[121].mxu0  ;;  %v18221_v27 = vld [vmem:[#allocation18_spill] sm:$0xff] }
 0xd98   :  { %v4321_v2 = vpop.f32.mrb[122].mxu0  ;;  %v15608_v26 = vpop.permute.xlu1 %12700  ;;  %v4660_v16 = vsel %vm539_vm2, %v18221_v27, %v12662_v22 }
 0xd99   :  { %v12744_v44 = vpack.i.bf16 %v4321_v2, %v4318_v31  ;;  %v12075_v60 = vpop.f32.mrb[123].mxu0  ;;  %v4676_v2 = vsel %vm953_vm3, %v4660_v16, %v12672_v19  ;;  %v18229_v16 = vld [vmem:[#allocation28_spill] sm:$0xff] }
 0xd9a   :  { %v4365_v40 = vpop.f32.mrb[136].mxu1  ;;  %v12688_v60 = vunpack.i.h.bf16 %v12686_v37 }
 0xd9b   :  { %12740 = vrot.lane.b32.xlu1 %v18213_v50, %s13844_s18  ;;  %12745 = vrot.lane.b32.xlu0 %v12744_v44, %s13860_s14  ;;  %v12080_v55 = vpop.f32.mrb[137].mxu1  ;;  %v4677_v44 = vsel %vm953_vm3, %v4661_v48, %v12673_v30  ;;  %v18228_v48 = vld [vmem:[#allocation29_spill] sm:$0xff] }
 0xd9c   :  { %v4368_v21 = vpop.f32.mrb[138].mxu1 }
 0xd9d   :  { %v12754_v43 = vpack.i.bf16 %v4368_v21, %v4365_v40  ;;  %v12081_v34 = vpop.f32.mrb[139].mxu1  ;;  %v12687_v40 = vunpack.i.l.bf16 %v12686_v37 }
 0xd9e   :  { %v4412_v11 = vpop.f32.mrb[124].mxu0  ;;  %v18222_v34 = vld [vmem:[#allocation21_spill] sm:$0xff] }
 0xd9f   :  { %12750 = vrot.lane.b32.xlu0 %v18214_v8, %s13839_s13  ;;  %12755 = vrot.lane.b32.xlu1 %v12754_v43, %s13860_s14  ;;  %v12086_v18 = vpop.f32.mrb[125].mxu0  ;;  %v18223_v8 = vld [vmem:[#allocation20_spill] sm:$0xff] }
 0xda0   :  { %v4415_v35 = vpop.f32.mrb[126].mxu0  ;;  %v4662_v18 = vsel %vm539_vm2, %v18223_v8, %v12677_v42 }
 0xda1   :  { %v12764_v10 = vpack.i.bf16 %v4415_v35, %v4412_v11  ;;  %v12087_v38 = vpop.f32.mrb[127].mxu0  ;;  %v4663_v11 = vsel %vm539_vm2, %v18222_v34, %v12678_v41 }
 0xda2   :  { %v12682_v38 = vunpack.i.l.bf16 %v12681_v6  ;;  %v4679_v29 = vsel %vm953_vm3, %v4663_v11, %v12688_v60 }
 0xda3   :  { %12760 = vrot.lane.b32.xlu1 %v18217_v12, %s13839_s13  ;;  %12765 = vrot.lane.b32.xlu0 %v12764_v10, %s13860_s14  ;;  %v12683_v10 = vunpack.i.h.bf16 %v12681_v6  ;;  %v4678_v12 = vsel %vm953_vm3, %v4662_v18, %v12687_v40 }
 0xda4   :  { %v4664_v63 = vsel %vm539_vm2, %v18225_v56, %v12682_v38  ;;  %v18232_v56 = vld [vmem:[#allocation31_spill] sm:$0xff] }
 0xda5   :  { %v4665_v39 = vsel %vm539_vm2, %v18224_v7, %v12683_v10  ;;  %v4680_v52 = vsel %vm953_vm3, %v4664_v63, %v12692_v3  ;;  %v18230_v10 = vld [vmem:[#allocation27_spill] sm:$0xff] }
 0xda6   :  { %v4681_v58 = vsel %vm953_vm3, %v4665_v39, %v12693_v0 }
 0xdd8   :  { %v4459_v33 = vpop.f32.mrb[140].mxu1 }
 0xdd9   :  { %v12092_v13 = vpop.f32.mrb[141].mxu1 }
 0xdda   :  { %v4462_v62 = vpop.f32.mrb[142].mxu1 }
 0xddb   :  { %v12769_v28 = vpack.i.bf16 %v4462_v62, %v4459_v33  ;;  %v12093_v25 = vpop.f32.mrb[143].mxu1  ;;  %v12698_v62 = vunpack.i.h.bf16 %v15597_v47 }
 0xddd   :  { %12770 = vrot.lane.b32.xlu1 %v12769_v28, %s13860_s14  ;;  %v12697_v28 = vunpack.i.l.bf16 %v15597_v47 }
 0xddf   :  { %v4666_v4 = vsel %vm539_vm2, %v18227_v49, %v12697_v28 }
 0xde6   :  { %v12706_v53 = vpop.permute.xlu0 %12705 }
 0xde7   :  { %v12708_v24 = vunpack.i.h.bf16 %v12706_v53  ;;  %v12707_v46 = vunpack.i.l.bf16 %v12706_v53 }
 0xde9   :  { %v4691_v5 = vsel %vm4690_vm4, %v4674_v54, %v12707_v46  ;;  %v4692_v1 = vsel %vm4690_vm4, %v4675_v57, %v12708_v24  ;;  %v12703_v54 = vunpack.i.h.bf16 %v15608_v26  ;;  %v12702_v57 = vunpack.i.l.bf16 %v15608_v26 }
 0xdea   :  { %v4707_v17 = vpack.c.bf16 %v4692_v1, %v4691_v5  ;;  %v12711_v31 = vpop.permute.xlu0 %12710 }
 0xdeb   :  { %v12713_v61 = vunpack.i.h.bf16 %v12711_v31  ;;  %v12712_v24 = vunpack.i.l.bf16 %v12711_v31  ;;  %v4669_v27 = vsel %vm539_vm2, %v18228_v48, %v12703_v54  ;;  %v4668_v31 = vsel %vm539_vm2, %v18229_v16, %v12702_v57  ;;  %v15677_v57 = vld [vmem:[#allocation5] ss:$0 sm:$0xff]  ;;  %v13685_v16 = vld [vmem:[#allocation2 + $0x18] sm:$0xff] }
 0xdec   :  { %12098 = vmatprep.mubr.msk.bf16.mxu0 %vm129_vm0, %v4707_v17  ;;  %v18226_v17 = vld [vmem:[#allocation25_spill] sm:$0xff] }
 0xded   :  { %v4667_v6 = vsel %vm539_vm2, %v18226_v17, %v12698_v62  ;;  %v4682_v19 = vsel %vm953_vm3, %v4666_v4, %v12712_v24  ;;  %v13682_v4 = vld [vmem:[#allocation2] sm:$0xff] }
 0xdee   :  { %v4683_v41 = vsel %vm953_vm3, %v4667_v6, %v12713_v61 }
 0xe00   :  { %v12716_v36 = vpop.permute.xlu1 %12715 }
 0xe01   :  { %v12718_v32 = vunpack.i.h.bf16 %v12716_v36  ;;  %v12717_v45 = vunpack.i.l.bf16 %v12716_v36 }
 0xe03   :  { %v4694_v50 = vsel %vm4690_vm4, %v4677_v44, %v12718_v32  ;;  %v4693_v55 = vsel %vm4690_vm4, %v4676_v2, %v12717_v45 }
 0xe04   :  { %v4708_v21 = vpack.c.bf16 %v4694_v50, %v4693_v55  ;;  %v12721_v43 = vpop.permute.xlu1 %12720 }
 0xe05   :  { %v12726_v35 = vpop.permute.xlu0 %12725  ;;  %v12723_v42 = vunpack.i.h.bf16 %v12721_v43  ;;  %v12722_v36 = vunpack.i.l.bf16 %v12721_v43 }
 0xe06   :  { %v12728_v20 = vunpack.i.h.bf16 %v12726_v35  ;;  %v12727_v14 = vunpack.i.l.bf16 %v12726_v35  ;;  %12099 = vmatmul.mubr.msk.bf16.vlgmr.msra.gmra.mrb[128].mxu0 %vm129_vm0, %v4708_v21 }
 0xe07   :  { %v4685_v55 = vsel %vm953_vm3, %v4669_v27, %v12723_v42  ;;  %v4684_v21 = vsel %vm953_vm3, %v4668_v31, %v12722_v36  ;;  %v13684_v36 = vld [vmem:[#allocation2 + $0x8] sm:$0xff] }
 0xe08   :  { %v4695_v33 = vsel %vm4690_vm4, %v4678_v12, %v12727_v14  ;;  %v4696_v13 = vsel %vm4690_vm4, %v4679_v29, %v12728_v20  ;;  %v18231_v20 = vld [vmem:[#allocation26_spill] sm:$0xff] }
 0xe09   :  { %v12736_v25 = vpop.permute.xlu1 %12735  ;;  %v12731_v37 = vpop.permute.xlu0 %12730  ;;  %v4709_v15 = vpack.c.bf16 %v4696_v13, %v4695_v33 }
 0xe0a   :  { %v12738_v53 = vunpack.i.h.bf16 %v12736_v25  ;;  %v12737_v9 = vunpack.i.l.bf16 %v12736_v25  ;;  %v12733_v44 = vunpack.i.h.bf16 %v12731_v37  ;;  %v12732_v60 = vunpack.i.l.bf16 %v12731_v37 }
 0xe0b   :  { %12102 = vmatprep.mubr.msk.bf16.mxu0 %vm129_vm0, %v4709_v15 }
 0xe0c   :  { %v4698_v47 = vsel %vm4690_vm4, %v4681_v58, %v12738_v53  ;;  %v4697_v46 = vsel %vm4690_vm4, %v4680_v52, %v12737_v9  ;;  %v4671_v38 = vsel %vm539_vm2, %v18230_v10, %v12733_v44  ;;  %v4670_v14 = vsel %vm539_vm2, %v18231_v20, %v12732_v60  ;;  %v18233_v53 = vld [vmem:[#allocation30_spill] sm:$0xff]  ;;  %v13689_v20 = vld [vmem:[#allocation2 + $0x30] sm:$0xff] }
 0xe0d   :  { %v12741_v5 = vpop.permute.xlu1 %12740  ;;  %v12746_v1 = vpop.permute.xlu0 %12745  ;;  %v4710_v59 = vpack.c.bf16 %v4698_v47, %v4697_v46 }
 0xe0e   :  { %v12748_v22 = vunpack.i.h.bf16 %v12746_v1  ;;  %v12747_v30 = vunpack.i.l.bf16 %v12746_v1  ;;  %v12743_v25 = vunpack.i.h.bf16 %v12741_v5  ;;  %v12742_v37 = vunpack.i.l.bf16 %v12741_v5 }
 0xe0f   :  { %12103 = vmatmul.mubr.msk.bf16.gmra.mrb[132].mxu0 %vm129_vm0, %v4710_v59 }
 0xe10   :  { %v4699_v26 = vsel %vm4690_vm4, %v4682_v19, %v12747_v30  ;;  %v4700_v23 = vsel %vm4690_vm4, %v4683_v41, %v12748_v22  ;;  %v4673_v63 = vsel %vm539_vm2, %v18232_v56, %v12743_v25  ;;  %v4672_v9 = vsel %vm539_vm2, %v18233_v53, %v12742_v37  ;;  %v13683_v19 = vld [vmem:[#allocation2 + $0x10] sm:$0xff]  ;;  %v13690_v37 = vld [vmem:[#allocation2 + $0x40] sm:$0xff] }
 0xe11   :  { %v12756_v32 = vpop.permute.xlu1 %12755  ;;  %v12751_v45 = vpop.permute.xlu0 %12750  ;;  %v4711_v2 = vpack.c.bf16 %v4700_v23, %v4699_v26 }
 0xe12   :  { %v12758_v40 = vunpack.i.h.bf16 %v12756_v32  ;;  %v12757_v50 = vunpack.i.l.bf16 %v12756_v32  ;;  %v12753_v43 = vunpack.i.h.bf16 %v12751_v45  ;;  %v12752_v34 = vunpack.i.l.bf16 %v12751_v45 }
 0xe13   :  { %12106 = vmatprep.mubr.msk.bf16.mxu0 %vm129_vm0, %v4711_v2 }
 0xe14   :  { %v4702_v11 = vsel %vm4690_vm4, %v4685_v55, %v12758_v40  ;;  %v4701_v8 = vsel %vm4690_vm4, %v4684_v21, %v12757_v50  ;;  %v4686_v0 = vsel %vm953_vm3, %v4670_v14, %v12752_v34  ;;  %v4687_v3 = vsel %vm953_vm3, %v4671_v38, %v12753_v43  ;;  %v13686_v21 = vld [vmem:[#allocation2 + $0x20] sm:$0xff] }
 0xe15   :  { %v12766_v18 = vpop.permute.xlu0 %12765  ;;  %v4712_v35 = vpack.c.bf16 %v4702_v11, %v4701_v8  ;;  %v12761_v28 = vpop.permute.xlu1 %12760  ;;  %v13687_v11 = vld [vmem:[#allocation2 + $0x28] sm:$0xff] }
 0xe16   :  { %v12768_v12 = vunpack.i.h.bf16 %v12766_v18  ;;  %v12767_v29 = vunpack.i.l.bf16 %v12766_v18  ;;  %v12763_v15 = vunpack.i.h.bf16 %v12761_v28  ;;  %v12762_v7 = vunpack.i.l.bf16 %v12761_v28  ;;  %v13688_v18 = vld [vmem:[#allocation2 + $0x38] sm:$0xff] }
 0xe17   :  { %12107 = vmatmul.mubr.msk.bf16.gmra.mrb[136].mxu0 %vm129_vm0, %v4712_v35 }
 0xe18   :  { %v4703_v33 = vsel %vm4690_vm4, %v4686_v0, %v12767_v29  ;;  %v4704_v13 = vsel %vm4690_vm4, %v4687_v3, %v12768_v12  ;;  %v4689_v61 = vsel %vm953_vm3, %v4673_v63, %v12763_v15  ;;  %v4688_v24 = vsel %vm953_vm3, %v4672_v9, %v12762_v7  ;;  %v13692_v63 = vld [vmem:[#allocation2 + $0x58] sm:$0xff] }
 0xe19   :  { %v4713_v62 = vpack.c.bf16 %v4704_v13, %v4703_v33 }
 0xe1b   :  { %12110 = vmatprep.mubr.msk.bf16.mxu0 %vm129_vm0, %v4713_v62 }
 0xe4f   :  { %v12771_v39 = vpop.permute.xlu1 %12770 }
 0xe50   :  { %v12773_v52 = vunpack.i.h.bf16 %v12771_v39  ;;  %v12772_v58 = vunpack.i.l.bf16 %v12771_v39  ;;  %v13691_v39 = vld [vmem:[#allocation2 + $0x48] sm:$0xff] }
 0xe52   :  { %v4706_v47 = vsel %vm4690_vm4, %v4689_v61, %v12773_v52  ;;  %v4705_v46 = vsel %vm4690_vm4, %v4688_v24, %v12772_v58  ;;  %v13693_v52 = vld [vmem:[#allocation2 + $0x50] sm:$0xff] }
 0xe53   :  { %v4714_v54 = vpack.c.bf16 %v4706_v47, %v4705_v46 }
 0xe55   :  { %12111 = vmatmul.mubr.msk.bf16.gmra.mrb[140].mxu0 %vm129_vm0, %v4714_v54 }
 0xed9   :  { %v12100_v5 = vpop.f32.mrb[128].mxu0 }
 0xeda   :  { %v4796_v1 = vpop.f32.mrb[129].mxu0  ;;  %v4805_v59 = vadd.f32 %v12100_v5, %v15677_v57 }
 0xedb   :  { %v4797_v17 = vadd.f32 %v15677_v57, %v4796_v1  ;;  %v12101_v6 = vpop.f32.mrb[130].mxu0 }
 0xedc   :  { %v4799_v49 = vpop.f32.mrb[131].mxu0  ;;  %v15684_v41 = vadd.f32 %v13683_v19, %v4805_v59  ;;  %v4808_v42 = vadd.f32 %v12101_v6, %v15677_v57  ;;  %v13694_v6 = vld [vmem:[#allocation2 + $0x60] sm:$0xff]  ;;  %v13695_v19 = vld [vmem:[#allocation2 + $0x70] sm:$0xff] }
 0xedd   :  { %v15681_v22 = vadd.f32 %v13682_v4, %v4797_v17  ;;  %v4800_v30 = vadd.f32 %v15677_v57, %v4799_v49 }
 0xede   :  { %v15693_v31 = vadd.f32 %v13685_v16, %v4808_v42  ;;  %v4883_v45 = vsel %vm129_vm0, %v15684_v41, 0.0 }
 0xedf   :  { %v15687_v26 = vadd.f32 %v13684_v36, %v4800_v30  ;;  %v4877_v23 = vsel %vm129_vm0, %v15681_v22, 0.0  ;;  %v13696_v36 = vld [vmem:[#allocation2 + $0x68] sm:$0xff] }
 0xee0   :  { %4878 = vadd.xlane.f32.xlu0 %v4877_v23  ;;  %v4886_v34 = vsel %vm129_vm0, %v15693_v31, 0.0 }
 0xee1   :  { %v4880_v48 = vsel %vm129_vm0, %v15687_v26, 0.0 }
 0xee2   :  { %v12104_v27 = vpop.f32.mrb[132].mxu0  ;;  %4881 = vadd.xlane.f32.xlu1 %v4880_v48 }
 0xee3   :  { %v4812_v32 = vpop.f32.mrb[133].mxu0  ;;  %v4821_v55 = vadd.f32 %v12104_v27, %v15677_v57  ;;  %v13697_v27 = vld [vmem:[#allocation2 + $0x78] sm:$0xff] }
 0xee4   :  { %v4813_v2 = vadd.f32 %v15677_v57, %v4812_v32  ;;  %v12105_v44 = vpop.f32.mrb[134].mxu0  ;;  %4884 = vadd.xlane.f32.xlu0 %v4883_v45 }
 0xee5   :  { %v4815_v60 = vpop.f32.mrb[135].mxu0  ;;  %v4824_v40 = vadd.f32 %v12105_v44, %v15677_v57  ;;  %v15711_v14 = vadd.f32 %v13689_v20, %v4821_v55 }
 0xee6   :  { %v4816_v50 = vadd.f32 %v15677_v57, %v4815_v60  ;;  %v15701_v43 = vadd.f32 %v13686_v21, %v4813_v2 }
 0xee7   :  { %v15707_v35 = vadd.f32 %v13688_v18, %v4824_v40  ;;  %v4895_v7 = vsel %vm129_vm0, %v15711_v14, 0.0 }
 0xee8   :  { %v15705_v8 = vadd.f32 %v13687_v11, %v4816_v50  ;;  %4887 = vadd.xlane.f32.xlu0 %v4886_v34  ;;  %v4889_v29 = vsel %vm129_vm0, %v15701_v43, 0.0 }
 0xee9   :  { %v4898_v28 = vsel %vm129_vm0, %v15707_v35, 0.0 }
 0xeea   :  { %v12108_v10 = vpop.f32.mrb[136].mxu0  ;;  %v4892_v38 = vsel %vm129_vm0, %v15705_v8, 0.0 }
 0xeeb   :  { %v4828_v12 = vpop.f32.mrb[137].mxu0  ;;  %4893 = vadd.xlane.f32.xlu1 %v4892_v38  ;;  %v4837_v25 = vadd.f32 %v12108_v10, %v15677_v57 }
 0xeec   :  { %v4829_v0 = vadd.f32 %v15677_v57, %v4828_v12  ;;  %v12109_v3 = vpop.f32.mrb[138].mxu0  ;;  %4890 = vadd.xlane.f32.xlu0 %v4889_v29 }
 0xeed   :  { %v4831_v33 = vpop.f32.mrb[139].mxu0  ;;  %v4840_v13 = vadd.f32 %v12109_v3, %v15677_v57  ;;  %v15731_v58 = vadd.f32 %v13693_v52, %v4837_v25 }
 0xeee   :  { %v4832_v62 = vadd.f32 %v15677_v57, %v4831_v33  ;;  %v15721_v15 = vadd.f32 %v13690_v37, %v4829_v0 }
 0xeef   :  { %4899 = vadd.xlane.f32.xlu1 %v4898_v28  ;;  %v15727_v53 = vadd.f32 %v13692_v63, %v4840_v13  ;;  %v4907_v47 = vsel %vm129_vm0, %v15731_v58, 0.0 }
 0xef0   :  { %v15725_v56 = vadd.f32 %v13691_v39, %v4832_v62  ;;  %4896 = vadd.xlane.f32.xlu0 %v4895_v7  ;;  %v4901_v61 = vsel %vm129_vm0, %v15721_v15, 0.0 }
 0xef1   :  { %v4910_v24 = vsel %vm129_vm0, %v15727_v53, 0.0 }
 0xef2   :  { %v4904_v9 = vsel %vm129_vm0, %v15725_v56, 0.0 }
 0xef3   :  { %4905 = vadd.xlane.f32.xlu1 %v4904_v9 }
 0xef4   :  { %4902 = vadd.xlane.f32.xlu0 %v4901_v61 }
 0xef7   :  { %4911 = vadd.xlane.f32.xlu1 %v4910_v24 }
 0xef8   :  { %4908 = vadd.xlane.f32.xlu0 %v4907_v47 }
 0xf28   :  { %v12112_v46 = vpop.f32.mrb[140].mxu0 }
 0xf29   :  { %v4844_v54 = vpop.f32.mrb[141].mxu0  ;;  %v4853_v5 = vadd.f32 %v12112_v46, %v15677_v57 }
 0xf2a   :  { %v4845_v1 = vadd.f32 %v15677_v57, %v4844_v54  ;;  %v12113_v59 = vpop.f32.mrb[142].mxu0 }
 0xf2b   :  { %v4847_v17 = vpop.f32.mrb[143].mxu0  ;;  %v4856_v4 = vadd.f32 %v12113_v59, %v15677_v57  ;;  %v15745_v42 = vadd.f32 %v13695_v19, %v4853_v5 }
 0xf2c   :  { %v15741_v49 = vadd.f32 %v13694_v6, %v4845_v1  ;;  %v4848_v30 = vadd.f32 %v15677_v57, %v4847_v17 }
 0xf2d   :  { %v15751_v16 = vadd.f32 %v13697_v27, %v4856_v4  ;;  %v4919_v57 = vsel %vm129_vm0, %v15745_v42, 0.0 }
 0xf2e   :  { %v15747_v23 = vadd.f32 %v13696_v36, %v4848_v30  ;;  %v4913_v48 = vsel %vm129_vm0, %v15741_v49, 0.0 }
 0xf2f   :  { %4914 = vadd.xlane.f32.xlu0 %v4913_v48  ;;  %v4922_v45 = vsel %vm129_vm0, %v15751_v16, 0.0 }
 0xf30   :  { %v4916_v32 = vsel %vm129_vm0, %v15747_v23, 0.0 }
 0xf31   :  { %4917 = vadd.xlane.f32.xlu1 %v4916_v32 }
 0xf33   :  { %4920 = vadd.xlane.f32.xlu0 %v4919_v57 }
 0xf35   :  { %4923 = vadd.xlane.f32.xlu1 %v4922_v45 }
 0xf6d   :  { %v4879_v2 = vpop.xlane.xlu0 %4878 }
 0xf6e   :  { %v4925_v44 = vmul.f32 0.03125, %v4879_v2 }
 0xf6f   :  { %v4882_v60 = vpop.xlane.xlu1 %4881 }
 0xf70   :  { %v15760_v40 = vsub.f32 %v15681_v22, %v4925_v44  ;;  %v4926_v50 = vmul.f32 0.03125, %v4882_v60 }
 0xf71   :  { %v4885_v55 = vpop.xlane.xlu0 %4884 }
 0xf72   :  { %v15763_v21 = vsub.f32 %v15687_v26, %v4926_v50  ;;  %v4927_v34 = vmul.f32 0.03125, %v4885_v55  ;;  %v4957_v11 = vmul.f32 %v15760_v40, %v15760_v40 }
 0xf74   :  { %v15768_v18 = vsub.f32 %v15684_v41, %v4927_v34  ;;  %v4973_v10 = vsel %vm129_vm0, %v4957_v11, 0.0  ;;  %v4958_v38 = vmul.f32 %v15763_v21, %v15763_v21 }
 0xf75   :  { %4974 = vadd.xlane.f32.xlu0 %v4973_v10  ;;  %v4888_v20 = vpop.xlane.xlu0 %4887 }
 0xf76   :  { %v4928_v12 = vmul.f32 0.03125, %v4888_v20  ;;  %v4976_v29 = vsel %vm129_vm0, %v4958_v38, 0.0  ;;  %v4959_v0 = vmul.f32 %v15768_v18, %v15768_v18 }
 0xf77   :  { %4977 = vadd.xlane.f32.xlu1 %v4976_v29 }
 0xf78   :  { %v15777_v3 = vsub.f32 %v15693_v31, %v4928_v12  ;;  %v4894_v33 = vpop.xlane.xlu1 %4893  ;;  %v4979_v13 = vsel %vm129_vm0, %v4959_v0, 0.0 }
 0xf79   :  { %v4930_v62 = vmul.f32 0.03125, %v4894_v33  ;;  %4980 = vadd.xlane.f32.xlu0 %v4979_v13  ;;  %v4891_v28 = vpop.xlane.xlu0 %4890  ;;  %v12898_v33 = vld [vmem:[%s18154_s8] sm:$0xff]   ;;  %v12899_v13 = vld [vmem:[%s18154_s8 + $0x8] sm:$0xff]  }
 0xf7a   :  { %v4929_v25 = vmul.f32 0.03125, %v4891_v28  ;;  %v4960_v37 = vmul.f32 %v15777_v3, %v15777_v3  ;;  %12114 = vmatprep.subr.bf16.mxu1 %v12898_v33 }
 0xf7b   :  { %v15783_v7 = vsub.f32 %v15705_v8, %v4930_v62  ;;  %12115 = vmatpush3.bf16.msra.mxu1 %v12898_v33 }
 0xf7c   :  { %v15786_v39 = vsub.f32 %v15701_v43, %v4929_v25  ;;  %v4900_v63 = vpop.xlane.xlu1 %4899  ;;  %v4982_v9 = vsel %vm129_vm0, %v4960_v37, 0.0  ;;  %12116 = vmatprep.subr.bf16.mxu1 %v12899_v13 }
 0xf7d   :  { %v4932_v52 = vmul.f32 0.03125, %v4900_v63  ;;  %4983 = vadd.xlane.f32.xlu1 %v4982_v9  ;;  %v4897_v61 = vpop.xlane.xlu0 %4896  ;;  %v4962_v24 = vmul.f32 %v15783_v7, %v15783_v7 }
 0xf7e   :  { %v4931_v47 = vmul.f32 0.03125, %v4897_v61  ;;  %v4961_v46 = vmul.f32 %v15786_v39, %v15786_v39 }
 0xf7f   :  { %v15794_v54 = vsub.f32 %v15707_v35, %v4932_v52  ;;  %v4988_v59 = vsel %vm129_vm0, %v4962_v24, 0.0  ;;  %12117 = vmatpush3.bf16.msra.mxu1 %v12899_v13 }
 0xf80   :  { %v15797_v5 = vsub.f32 %v15711_v14, %v4931_v47  ;;  %v4906_v1 = vpop.xlane.xlu1 %4905  ;;  %v4985_v17 = vsel %vm129_vm0, %v4961_v46, 0.0 }
 0xf81   :  { %v4934_v6 = vmul.f32 0.03125, %v4906_v1  ;;  %4989 = vadd.xlane.f32.xlu1 %v4988_v59  ;;  %4986 = vadd.xlane.f32.xlu0 %v4985_v17  ;;  %v4903_v4 = vpop.xlane.xlu0 %4902  ;;  %v4964_v30 = vmul.f32 %v15794_v54, %v15794_v54 }
 0xf82   :  { %v4933_v19 = vmul.f32 0.03125, %v4903_v4  ;;  %v4963_v36 = vmul.f32 %v15797_v5, %v15797_v5 }
 0xf83   :  { %v15806_v48 = vsub.f32 %v15725_v56, %v4934_v6  ;;  %v4994_v57 = vsel %vm129_vm0, %v4964_v30, 0.0 }
 0xf84   :  { %v15809_v27 = vsub.f32 %v15721_v15, %v4933_v19  ;;  %v4912_v32 = vpop.xlane.xlu1 %4911  ;;  %v4991_v45 = vsel %vm129_vm0, %v4963_v36, 0.0 }
 0xf85   :  { %v4936_v2 = vmul.f32 0.03125, %v4912_v32  ;;  %4995 = vadd.xlane.f32.xlu1 %v4994_v57  ;;  %4992 = vadd.xlane.f32.xlu0 %v4991_v45  ;;  %v4909_v44 = vpop.xlane.xlu0 %4908  ;;  %v4966_v60 = vmul.f32 %v15806_v48, %v15806_v48 }
 0xf86   :  { %v4935_v50 = vmul.f32 0.03125, %v4909_v44  ;;  %v4965_v55 = vmul.f32 %v15809_v27, %v15809_v27 }
 0xf87   :  { %v15818_v34 = vsub.f32 %v15727_v53, %v4936_v2  ;;  %v5000_v10 = vsel %vm129_vm0, %v4966_v60, 0.0 }
 0xf88   :  { %v15821_v11 = vsub.f32 %v15731_v58, %v4935_v50  ;;  %v4997_v38 = vsel %vm129_vm0, %v4965_v55, 0.0 }
 0xf89   :  { %5001 = vadd.xlane.f32.xlu1 %v5000_v10  ;;  %4998 = vadd.xlane.f32.xlu0 %v4997_v38  ;;  %v4968_v20 = vmul.f32 %v15818_v34, %v15818_v34 }
 0xf8a   :  { %v4967_v12 = vmul.f32 %v15821_v11, %v15821_v11 }
 0xf8b   :  { %v5006_v29 = vsel %vm129_vm0, %v4968_v20, 0.0 }
 0xf8c   :  { %v5003_v0 = vsel %vm129_vm0, %v4967_v12, 0.0 }
 0xf8d   :  { %5007 = vadd.xlane.f32.xlu1 %v5006_v29  ;;  %5004 = vadd.xlane.f32.xlu0 %v5003_v0 }
 0xfbc   :  { %v4915_v62 = vpop.xlane.xlu0 %4914 }
 0xfbd   :  { %v4937_v28 = vmul.f32 0.03125, %v4915_v62 }
 0xfbe   :  { %v4918_v25 = vpop.xlane.xlu1 %4917 }
 0xfbf   :  { %v15838_v37 = vsub.f32 %v15741_v49, %v4937_v28  ;;  %v4938_v63 = vmul.f32 0.03125, %v4918_v25  ;;  %v15861_v25 = vld [vmem:[#allocation7] ss:$0 sm:$0xff] }
 0xfc0   :  { %v4921_v9 = vpop.xlane.xlu0 %4920 }
 0xfc1   :  { %v15841_v52 = vsub.f32 %v15747_v23, %v4938_v63  ;;  %v4939_v61 = vmul.f32 0.03125, %v4921_v9  ;;  %v4969_v24 = vmul.f32 %v15838_v37, %v15838_v37 }
 0xfc2   :  { %v4924_v47 = vpop.xlane.xlu1 %4923 }
 0xfc3   :  { %v15846_v46 = vsub.f32 %v15745_v42, %v4939_v61  ;;  %v4940_v1 = vmul.f32 0.03125, %v4924_v47  ;;  %v5009_v59 = vsel %vm129_vm0, %v4969_v24, 0.0  ;;  %v4970_v17 = vmul.f32 %v15841_v52, %v15841_v52 }
 0xfc4   :  { %5010 = vadd.xlane.f32.xlu0 %v5009_v59 }
 0xfc5   :  { %v15852_v6 = vsub.f32 %v15751_v16, %v4940_v1  ;;  %v5012_v4 = vsel %vm129_vm0, %v4970_v17, 0.0  ;;  %v4971_v30 = vmul.f32 %v15846_v46, %v15846_v46 }
 0xfc6   :  { %5013 = vadd.xlane.f32.xlu1 %v5012_v4 }
 0xfc7   :  { %v5015_v19 = vsel %vm129_vm0, %v4971_v30, 0.0  ;;  %v4972_v36 = vmul.f32 %v15852_v6, %v15852_v6 }
 0xfc8   :  { %5016 = vadd.xlane.f32.xlu0 %v5015_v19 }
 0xfc9   :  { %v5018_v32 = vsel %vm129_vm0, %v4972_v36, 0.0 }
 0xfca   :  { %5019 = vadd.xlane.f32.xlu1 %v5018_v32 }
0x1002   :  { %v4975_v57 = vpop.xlane.xlu0 %4974 }
0x1003   :  { %v5021_v45 = vmul.f32 0.03125, %v4975_v57  ;;  %v15866_v57 = vld [vmem:[#allocation8] ss:$0 sm:$0xff] }
0x1004   :  { %v4978_v2 = vpop.xlane.xlu1 %4977 }
0x1005   :  { %v5037_v44 = vadd.f32 1e-05, %v5021_v45  ;;  %v5022_v60 = vmul.f32 0.03125, %v4978_v2 }
0x1006   :  { %v4981_v50 = vpop.xlane.xlu0 %4980 }
0x1007   :  { %13202 = vrsqrt.f32 %v5037_v44  ;;  %v5038_v55 = vadd.f32 1e-05, %v5022_v60  ;;  %v5023_v10 = vmul.f32 0.03125, %v4981_v50 }
0x1009   :  { %13204 = vrsqrt.f32 %v5038_v55  ;;  %v5039_v38 = vadd.f32 1e-05, %v5023_v10 }
0x100a   :  { %v4984_v20 = vpop.xlane.xlu1 %4983 }
0x100b   :  { %13206 = vrsqrt.f32 %v5039_v38  ;;  %v5024_v12 = vmul.f32 0.03125, %v4984_v20 }
0x100d   :  { %v5040_v29 = vadd.f32 1e-05, %v5024_v12 }
0x100e   :  { %v4990_v0 = vpop.xlane.xlu1 %4989  ;;  %v4987_v33 = vpop.xlane.xlu0 %4986 }
0x100f   :  { %13208 = vrsqrt.f32 %v5040_v29  ;;  %v5026_v13 = vmul.f32 0.03125, %v4990_v0  ;;  %v5025_v62 = vmul.f32 0.03125, %v4987_v33 }
0x1011   :  { %v13203_v28 = vpop.eup %13202  ;;  %v5042_v63 = vadd.f32 1e-05, %v5026_v13  ;;  %v5041_v9 = vadd.f32 1e-05, %v5025_v62 }
0x1012   :  { %v4996_v61 = vpop.xlane.xlu1 %4995  ;;  %v4993_v24 = vpop.xlane.xlu0 %4992  ;;  %v5069_v47 = vmul.f32 %v13203_v28, %v15760_v40 }
0x1013   :  { %v13205_v1 = vpop.eup %13204  ;;  %13210 = vrsqrt.f32 %v5042_v63  ;;  %v5028_v59 = vmul.f32 0.03125, %v4996_v61  ;;  %v5027_v17 = vmul.f32 0.03125, %v4993_v24 }
0x1014   :  { %13212 = vrsqrt.f32 %v5041_v9  ;;  %v5070_v4 = vmul.f32 %v13205_v1, %v15763_v21  ;;  %v5091_v30 = vmul.f32 %v15861_v25, %v5069_v47 }
0x1015   :  { %v13207_v19 = vpop.eup %13206  ;;  %v5044_v36 = vadd.f32 1e-05, %v5028_v59  ;;  %v5043_v32 = vadd.f32 1e-05, %v5027_v17 }
0x1016   :  { %v5071_v45 = vmul.f32 %v13207_v19, %v15768_v18  ;;  %v5002_v2 = vpop.xlane.xlu1 %5001  ;;  %v4999_v44 = vpop.xlane.xlu0 %4998  ;;  %v5092_v40 = vmul.f32 %v15861_v25, %v5070_v4  ;;  %v5113_v55 = vadd.f32 %v15866_v57, %v5091_v30 }
0x1017   :  { %13214 = vrsqrt.f32 %v5044_v36  ;;  %v5030_v60 = vmul.f32 0.03125, %v5002_v2  ;;  %v5029_v50 = vmul.f32 0.03125, %v4999_v44 }
0x1018   :  { %13216 = vrsqrt.f32 %v5043_v32  ;;  %v5114_v21 = vadd.f32 %v15866_v57, %v5092_v40  ;;  %v5093_v12 = vmul.f32 %v15861_v25, %v5071_v45 }
0x1019   :  { %v13209_v10 = vpop.eup %13208  ;;  %v5046_v38 = vadd.f32 1e-05, %v5030_v60  ;;  %v5045_v20 = vadd.f32 1e-05, %v5029_v50 }
0x101a   :  { %v5072_v29 = vmul.f32 %v13209_v10, %v15777_v3  ;;  %v5008_v18 = vpop.xlane.xlu1 %5007  ;;  %v5005_v0 = vpop.xlane.xlu0 %5004  ;;  %v5129_v33 = vpack.c.bf16 %v5114_v21, %v5113_v55  ;;  %v5115_v47 = vadd.f32 %v15866_v57, %v5093_v12 }
0x101b   :  { %13218 = vrsqrt.f32 %v5046_v38  ;;  %v5032_v13 = vmul.f32 0.03125, %v5008_v18  ;;  %v5031_v62 = vmul.f32 0.03125, %v5005_v0 }
0x101c   :  { %v5094_v28 = vmul.f32 %v15861_v25, %v5072_v29  ;;  %13220 = vrsqrt.f32 %v5045_v20  ;;  %12118 = vmatprep.mubr.msk.bf16.mxu1 %vm129_vm0, %v5129_v33 }
0x101d   :  { %v13211_v63 = vpop.eup %13210  ;;  %v5048_v9 = vadd.f32 1e-05, %v5032_v13  ;;  %v5047_v61 = vadd.f32 1e-05, %v5031_v62 }
0x101e   :  { %v13213_v24 = vpop.eup %13212  ;;  %v5116_v1 = vadd.f32 %v15866_v57, %v5094_v28  ;;  %v5074_v3 = vmul.f32 %v13211_v63, %v15783_v7 }
0x101f   :  { %13222 = vrsqrt.f32 %v5048_v9  ;;  %v5073_v59 = vmul.f32 %v13213_v24, %v15786_v39 }
0x1020   :  { %13224 = vrsqrt.f32 %v5047_v61  ;;  %v5130_v17 = vpack.c.bf16 %v5116_v1, %v5115_v47  ;;  %v5096_v4 = vmul.f32 %v15861_v25, %v5074_v3 }
0x1021   :  { %v13215_v30 = vpop.eup %13214  ;;  %v5095_v19 = vmul.f32 %v15861_v25, %v5073_v59 }
0x1022   :  { %v13217_v36 = vpop.eup %13216  ;;  %12119 = vmatmul.mubr.msk.bf16.vlgmr.msra.gmra.mrb[144].mxu1 %vm129_vm0, %v5130_v17  ;;  %v5118_v32 = vadd.f32 %v15866_v57, %v5096_v4  ;;  %v5076_v45 = vmul.f32 %v13215_v30, %v15794_v54 }
0x1023   :  { %v5117_v2 = vadd.f32 %v15866_v57, %v5095_v19  ;;  %v5075_v7 = vmul.f32 %v13217_v36, %v15797_v5 }
0x1024   :  { %v5098_v39 = vmul.f32 %v15861_v25, %v5076_v45 }
0x1025   :  { %v13219_v44 = vpop.eup %13218  ;;  %v5131_v40 = vpack.c.bf16 %v5118_v32, %v5117_v2  ;;  %v5097_v60 = vmul.f32 %v15861_v25, %v5075_v7 }
0x1026   :  { %v13221_v50 = vpop.eup %13220  ;;  %v5120_v55 = vadd.f32 %v15866_v57, %v5098_v39  ;;  %v5078_v21 = vmul.f32 %v13219_v44, %v15806_v48 }
0x1027   :  { %12122 = vmatprep.mubr.msk.bf16.mxu1 %vm129_vm0, %v5131_v40  ;;  %v5119_v10 = vadd.f32 %v15866_v57, %v5097_v60  ;;  %v5077_v54 = vmul.f32 %v13221_v50, %v15809_v27 }
0x1028   :  { %v5100_v38 = vmul.f32 %v15861_v25, %v5078_v21 }
0x1029   :  { %v13223_v5 = vpop.eup %13222  ;;  %v5132_v20 = vpack.c.bf16 %v5120_v55, %v5119_v10  ;;  %v5099_v12 = vmul.f32 %v15861_v25, %v5077_v54 }
0x102a   :  { %v13225_v29 = vpop.eup %13224  ;;  %v5122_v18 = vadd.f32 %v15866_v57, %v5100_v38  ;;  %v5080_v0 = vmul.f32 %v13223_v5, %v15818_v34 }
0x102b   :  { %12123 = vmatmul.mubr.msk.bf16.gmra.mrb[148].mxu1 %vm129_vm0, %v5132_v20  ;;  %v5121_v48 = vadd.f32 %v15866_v57, %v5099_v12  ;;  %v5079_v33 = vmul.f32 %v13225_v29, %v15821_v11  ;;  %v15934_v20 = vld [vmem:[#allocation10] ss:$0 sm:$0xff] }
0x102c   :  { %v5102_v13 = vmul.f32 %v15861_v25, %v5080_v0 }
0x102d   :  { %v5133_v27 = vpack.c.bf16 %v5122_v18, %v5121_v48  ;;  %v5101_v62 = vmul.f32 %v15861_v25, %v5079_v33 }
0x102e   :  { %v5124_v28 = vadd.f32 %v15866_v57, %v5102_v13 }
0x102f   :  { %12126 = vmatprep.mubr.msk.bf16.mxu1 %vm129_vm0, %v5133_v27  ;;  %v5123_v63 = vadd.f32 %v15866_v57, %v5101_v62 }
0x1031   :  { %v5134_v9 = vpack.c.bf16 %v5124_v28, %v5123_v63 }
0x1033   :  { %12127 = vmatmul.mubr.msk.bf16.gmra.mrb[152].mxu1 %vm129_vm0, %v5134_v9 }
0x1051   :  { %v5011_v34 = vpop.xlane.xlu0 %5010 }
0x1052   :  { %v5033_v61 = vmul.f32 0.03125, %v5011_v34 }
0x1053   :  { %v5014_v24 = vpop.xlane.xlu1 %5013 }
0x1054   :  { %v5049_v47 = vadd.f32 1e-05, %v5033_v61  ;;  %v5034_v1 = vmul.f32 0.03125, %v5014_v24 }
0x1055   :  { %v5017_v11 = vpop.xlane.xlu0 %5016 }
0x1056   :  { %13226 = vrsqrt.f32 %v5049_v47  ;;  %v5050_v3 = vadd.f32 1e-05, %v5034_v1  ;;  %v5035_v59 = vmul.f32 0.03125, %v5017_v11 }
0x1057   :  { %v5020_v17 = vpop.xlane.xlu1 %5019 }
0x1058   :  { %13228 = vrsqrt.f32 %v5050_v3  ;;  %v5051_v4 = vadd.f32 1e-05, %v5035_v59  ;;  %v5036_v30 = vmul.f32 0.03125, %v5020_v17 }
0x105a   :  { %13230 = vrsqrt.f32 %v5051_v4  ;;  %v5052_v19 = vadd.f32 1e-05, %v5036_v30 }
0x105c   :  { %13232 = vrsqrt.f32 %v5052_v19 }
0x1060   :  { %v13227_v36 = vpop.eup %13226 }
0x1061   :  { %v5081_v32 = vmul.f32 %v13227_v36, %v15838_v37 }
0x1062   :  { %v13229_v45 = vpop.eup %13228 }
0x1063   :  { %v5082_v2 = vmul.f32 %v13229_v45, %v15841_v52  ;;  %v5103_v7 = vmul.f32 %v15861_v25, %v5081_v32 }
0x1064   :  { %v13231_v39 = vpop.eup %13230 }
0x1065   :  { %v5104_v44 = vmul.f32 %v15861_v25, %v5082_v2  ;;  %v5083_v40 = vmul.f32 %v13231_v39, %v15846_v46  ;;  %v5125_v50 = vadd.f32 %v15866_v57, %v5103_v7  ;;  %v12900_v46 = vld [vmem:[%s18156_s10] sm:$0xff]  }
0x1066   :  { %v13233_v60 = vpop.eup %13232  ;;  %12134 = vmatprep.subr.bf16.mxu0 %v12900_v46 }
0x1067   :  { %v5126_v55 = vadd.f32 %v15866_v57, %v5104_v44  ;;  %v5084_v21 = vmul.f32 %v13233_v60, %v15852_v6  ;;  %v5105_v10 = vmul.f32 %v15861_v25, %v5083_v40  ;;  %12135 = vmatpush3.bf16.msra.mxu0 %v12900_v46  ;;  %v12901_v6 = vld [vmem:[%s18156_s10 + $0x8] sm:$0xff]  }
0x1068   :  { %12136 = vmatprep.subr.bf16.mxu0 %v12901_v6 }
0x1069   :  { %v5135_v37 = vpack.c.bf16 %v5126_v55, %v5125_v50  ;;  %v5106_v54 = vmul.f32 %v15861_v25, %v5084_v21  ;;  %v5127_v52 = vadd.f32 %v15866_v57, %v5105_v10  ;;  %v12902_v25 = vld [vmem:[%s18156_s10 + $0x10] sm:$0xff]  }
0x106b   :  { %12130 = vmatprep.mubr.msk.bf16.mxu1 %vm129_vm0, %v5135_v37  ;;  %v5128_v38 = vadd.f32 %v15866_v57, %v5106_v54  ;;  %12137 = vmatpush3.bf16.msra.mxu0 %v12901_v6  ;;  %v12903_v57 = vld [vmem:[%s18156_s10 + $0x18] sm:$0xff]  }
0x106c   :  { %12138 = vmatprep.subr.bf16.mxu0 %v12902_v25 }
0x106d   :  { %v5136_v5 = vpack.c.bf16 %v5128_v38, %v5127_v52 }
0x106f   :  { %12131 = vmatmul.mubr.msk.bf16.gmra.mrb[156].mxu1 %vm129_vm0, %v5136_v5  ;;  %12139 = vmatpush3.bf16.msra.mxu0 %v12902_v25 }
0x1070   :  { %12140 = vmatprep.subr.bf16.mxu0 %v12903_v57 }
0x1073   :  { %12141 = vmatpush3.bf16.msra.mxu0 %v12903_v57 }
0x1074   :  { %12178 = vmatprep.subr.bf16.mxu0 %v18197_v51 }
0x10f5   :  { %v12120_v12 = vpop.f32.mrb[144].mxu1 }
0x10f6   :  { %v15937_v29 = vadd.f32 %v12120_v12, %v15934_v20  ;;  %v5218_v18 = vpop.f32.mrb[145].mxu1 }
0x10f7   :  { %v15940_v0 = vadd.f32 %v15934_v20, %v5218_v18  ;;  %v12121_v48 = vpop.f32.mrb[146].mxu1 }
0x10f8   :  { %v11171_v33 = vmul.f32 -1.442695, %v15937_v29  ;;  %v15944_v13 = vadd.f32 %v12121_v48, %v15934_v20  ;;  %v5221_v27 = vpop.f32.mrb[147].mxu1 }
0x10f9   :  { %v11169_v62 = vmul.f32 -1.442695, %v15940_v0  ;;  %v15948_v28 = vadd.f32 %v15934_v20, %v5221_v27 }
0x10fa   :  { %13234 = vpow2.f32 %v11171_v33  ;;  %v11172_v63 = vmul.f32 -1.442695, %v15944_v13 }
0x10fb   :  { %13236 = vpow2.f32 %v11169_v62  ;;  %v11170_v9 = vmul.f32 -1.442695, %v15948_v28 }
0x10fc   :  { %13238 = vpow2.f32 %v11172_v63 }
0x10fd   :  { %13240 = vpow2.f32 %v11170_v9 }
0x10fe   :  { %v12124_v34 = vpop.f32.mrb[148].mxu1 }
0x10ff   :  { %v15953_v61 = vadd.f32 %v12124_v34, %v15934_v20  ;;  %v5234_v24 = vpop.f32.mrb[149].mxu1 }
0x1100   :  { %v15956_v47 = vadd.f32 %v15934_v20, %v5234_v24  ;;  %v12125_v1 = vpop.f32.mrb[150].mxu1 }
0x1101   :  { %v11175_v11 = vmul.f32 -1.442695, %v15953_v61  ;;  %v15960_v3 = vadd.f32 %v12125_v1, %v15934_v20  ;;  %v5237_v59 = vpop.f32.mrb[151].mxu1 }
0x1102   :  { %v11173_v17 = vmul.f32 -1.442695, %v15956_v47  ;;  %v15964_v4 = vadd.f32 %v15934_v20, %v5237_v59 }
0x1103   :  { %13242 = vpow2.f32 %v11175_v11  ;;  %v11176_v30 = vmul.f32 -1.442695, %v15960_v3 }
0x1104   :  { %v13235_v19 = vpop.eup %13234  ;;  %13244 = vpow2.f32 %v11173_v17  ;;  %v11174_v36 = vmul.f32 -1.442695, %v15964_v4 }
0x1105   :  { %v13237_v32 = vpop.eup %13236  ;;  %v5331_v45 = vadd.f32 1.0, %v13235_v19  ;;  %13246 = vpow2.f32 %v11176_v30 }
0x1106   :  { %v13239_v2 = vpop.eup %13238  ;;  %v5329_v7 = vadd.f32 1.0, %v13237_v32  ;;  %13248 = vpow2.f32 %v11174_v36  ;;  %v12128_v39 = vpop.f32.mrb[152].mxu1 }
0x1107   :  { %v13241_v44 = vpop.eup %13240  ;;  %13250 = vrcp.f32 %v5331_v45  ;;  %v5332_v40 = vadd.f32 1.0, %v13239_v2  ;;  %v15969_v60 = vadd.f32 %v12128_v39, %v15934_v20  ;;  %v5250_v50 = vpop.f32.mrb[153].mxu1 }
0x1108   :  { %13252 = vrcp.f32 %v5329_v7  ;;  %v5330_v55 = vadd.f32 1.0, %v13241_v44  ;;  %v15972_v21 = vadd.f32 %v15934_v20, %v5250_v50  ;;  %v12129_v10 = vpop.f32.mrb[154].mxu1 }
0x1109   :  { %13254 = vrcp.f32 %v5332_v40  ;;  %v11179_v37 = vmul.f32 -1.442695, %v15969_v60  ;;  %v15976_v54 = vadd.f32 %v12129_v10, %v15934_v20  ;;  %v5253_v52 = vpop.f32.mrb[155].mxu1 }
0x110a   :  { %13256 = vrcp.f32 %v5330_v55  ;;  %v11177_v38 = vmul.f32 -1.442695, %v15972_v21  ;;  %v15980_v5 = vadd.f32 %v15934_v20, %v5253_v52 }
0x110b   :  { %13258 = vpow2.f32 %v11179_v37  ;;  %v11180_v46 = vmul.f32 -1.442695, %v15976_v54 }
0x110c   :  { %13260 = vpow2.f32 %v11177_v38  ;;  %v11178_v6 = vmul.f32 -1.442695, %v15980_v5 }
0x110d   :  { %v13243_v25 = vpop.eup %13242  ;;  %13262 = vpow2.f32 %v11180_v46 }
0x110e   :  { %v13245_v57 = vpop.eup %13244  ;;  %v5335_v12 = vadd.f32 1.0, %v13243_v25  ;;  %13264 = vpow2.f32 %v11178_v6 }
0x110f   :  { %v13247_v18 = vpop.eup %13246  ;;  %v5333_v48 = vadd.f32 1.0, %v13245_v57 }
0x1110   :  { %v13249_v33 = vpop.eup %13248  ;;  %13266 = vrcp.f32 %v5335_v12  ;;  %v5336_v27 = vadd.f32 1.0, %v13247_v18 }
0x1111   :  { %v13251_v62 = vpop.eup %13250  ;;  %13268 = vrcp.f32 %v5333_v48  ;;  %v5334_v63 = vadd.f32 1.0, %v13249_v33 }
0x1112   :  { %v13253_v9 = vpop.eup %13252  ;;  %13270 = vrcp.f32 %v5336_v27  ;;  %v5379_v1 = vmul.f32 %v13251_v62, %v15937_v29 }
0x1113   :  { %v13255_v34 = vpop.eup %13254  ;;  %13272 = vrcp.f32 %v5334_v63  ;;  %v5377_v17 = vmul.f32 %v13253_v9, %v15940_v0 }
0x1114   :  { %v13257_v24 = vpop.eup %13256  ;;  %v5380_v11 = vmul.f32 %v13255_v34, %v15944_v13 }
0x1115   :  { %v13259_v59 = vpop.eup %13258  ;;  %v5378_v30 = vmul.f32 %v13257_v24, %v15948_v28 }
0x1116   :  { %v13261_v19 = vpop.eup %13260  ;;  %v5394_v36 = vpack.c.bf16 %v5380_v11, %v5379_v1  ;;  %v5339_v32 = vadd.f32 1.0, %v13259_v59 }
0x1117   :  { %v13263_v45 = vpop.eup %13262  ;;  %v5393_v2 = vpack.c.bf16 %v5378_v30, %v5377_v17  ;;  %v5337_v7 = vadd.f32 1.0, %v13261_v19 }
0x1118   :  { %v13265_v39 = vpop.eup %13264  ;;  %13274 = vrcp.f32 %v5339_v32  ;;  %v5340_v44 = vadd.f32 1.0, %v13263_v45 }
0x1119   :  { %13276 = vrcp.f32 %v5337_v7  ;;  %v5338_v40 = vadd.f32 1.0, %v13265_v39  ;;  %12142 = vmatprep.mubr.msk.bf16.mxu0 %vm5440_vm5, %v5393_v2 }
0x111a   :  { %v13267_v29 = vpop.eup %13266  ;;  %13278 = vrcp.f32 %v5340_v44  ;;  %12143 = vmatmul.mubr.msk.bf16.vlgmr.msra.gmra.mrb[144].mxu0 %vm5440_vm5, %v5394_v36 }
0x111b   :  { %v13269_v0 = vpop.eup %13268  ;;  %13280 = vrcp.f32 %v5338_v40  ;;  %v5383_v50 = vmul.f32 %v13267_v29, %v15953_v61 }
0x111c   :  { %v13271_v13 = vpop.eup %13270  ;;  %v5381_v10 = vmul.f32 %v13269_v0, %v15956_v47 }
0x111d   :  { %v13273_v28 = vpop.eup %13272  ;;  %v5384_v55 = vmul.f32 %v13271_v13, %v15960_v3 }
0x111e   :  { %v5382_v37 = vmul.f32 %v13273_v28, %v15964_v4  ;;  %v16013_v28 = vld [vmem:[%s18157_s11] ss:$0 sm:$0xff] }
0x111f   :  { %v5396_v52 = vpack.c.bf16 %v5384_v55, %v5383_v50 }
0x1120   :  { %v5395_v38 = vpack.c.bf16 %v5382_v37, %v5381_v10 }
0x1122   :  { %v13275_v46 = vpop.eup %13274  ;;  %12146 = vmatprep.mubr.msk.bf16.mxu0 %vm5440_vm5, %v5395_v38 }
0x1123   :  { %v13277_v6 = vpop.eup %13276  ;;  %12147 = vmatmul.mubr.msk.bf16.gmra.mrb[148].mxu0 %vm5440_vm5, %v5396_v52  ;;  %v5387_v12 = vmul.f32 %v13275_v46, %v15969_v60 }
0x1124   :  { %v13279_v25 = vpop.eup %13278  ;;  %v5385_v3 = vmul.f32 %v13277_v6, %v15972_v21 }
0x1125   :  { %v13281_v57 = vpop.eup %13280  ;;  %v5388_v61 = vmul.f32 %v13279_v25, %v15976_v54 }
0x1126   :  { %v5386_v47 = vmul.f32 %v13281_v57, %v15980_v5 }
0x1127   :  { %v5398_v18 = vpack.c.bf16 %v5388_v61, %v5387_v12 }
0x1128   :  { %v5397_v4 = vpack.c.bf16 %v5386_v47, %v5385_v3 }
0x112a   :  { %12150 = vmatprep.mubr.msk.bf16.mxu0 %vm5440_vm5, %v5397_v4 }
0x112b   :  { %12151 = vmatmul.mubr.msk.bf16.gmra.mrb[152].mxu0 %vm5440_vm5, %v5398_v18 }
0x1142   :  { %v12132_v48 = vpop.f32.mrb[156].mxu1 }
0x1143   :  { %v5275_v33 = vadd.f32 %v12132_v48, %v15934_v20  ;;  %v5266_v27 = vpop.f32.mrb[157].mxu1 }
0x1144   :  { %v5267_v62 = vadd.f32 %v15934_v20, %v5266_v27  ;;  %v12133_v63 = vpop.f32.mrb[158].mxu1 }
0x1145   :  { %v11183_v60 = vmul.f32 -1.442695, %v5275_v33  ;;  %v5278_v54 = vadd.f32 %v12133_v63, %v15934_v20  ;;  %v5269_v9 = vpop.f32.mrb[159].mxu1 }
0x1146   :  { %v11181_v21 = vmul.f32 -1.442695, %v5267_v62  ;;  %v5270_v5 = vadd.f32 %v15934_v20, %v5269_v9 }
0x1147   :  { %13282 = vpow2.f32 %v11183_v60  ;;  %v11184_v34 = vmul.f32 -1.442695, %v5278_v54 }
0x1148   :  { %13284 = vpow2.f32 %v11181_v21  ;;  %v11182_v24 = vmul.f32 -1.442695, %v5270_v5 }
0x1149   :  { %13286 = vpow2.f32 %v11184_v34 }
0x114a   :  { %13288 = vpow2.f32 %v11182_v24 }
0x1151   :  { %v13283_v1 = vpop.eup %13282 }
0x1152   :  { %v13285_v11 = vpop.eup %13284  ;;  %v5343_v59 = vadd.f32 1.0, %v13283_v1 }
0x1153   :  { %v13287_v17 = vpop.eup %13286  ;;  %v5341_v30 = vadd.f32 1.0, %v13285_v11 }
0x1154   :  { %v13289_v19 = vpop.eup %13288  ;;  %13290 = vrcp.f32 %v5343_v59  ;;  %v5344_v36 = vadd.f32 1.0, %v13287_v17 }
0x1155   :  { %13292 = vrcp.f32 %v5341_v30  ;;  %v5342_v32 = vadd.f32 1.0, %v13289_v19 }
0x1156   :  { %13294 = vrcp.f32 %v5344_v36 }
0x1157   :  { %13296 = vrcp.f32 %v5342_v32 }
0x115e   :  { %v13291_v45 = vpop.eup %13290 }
0x115f   :  { %v13293_v20 = vpop.eup %13292  ;;  %v5391_v39 = vmul.f32 %v13291_v45, %v5275_v33 }
0x1160   :  { %v13295_v2 = vpop.eup %13294  ;;  %v5389_v40 = vmul.f32 %v13293_v20, %v5267_v62 }
0x1161   :  { %v13297_v7 = vpop.eup %13296  ;;  %v5392_v44 = vmul.f32 %v13295_v2, %v5278_v54 }
0x1162   :  { %v5390_v29 = vmul.f32 %v13297_v7, %v5270_v5 }
0x1163   :  { %v5400_v0 = vpack.c.bf16 %v5392_v44, %v5391_v39 }
0x1164   :  { %v5399_v13 = vpack.c.bf16 %v5390_v29, %v5389_v40 }
0x1166   :  { %12154 = vmatprep.mubr.msk.bf16.mxu0 %vm5440_vm5, %v5399_v13 }
0x1167   :  { %12155 = vmatmul.mubr.msk.bf16.gmra.mrb[156].mxu0 %vm5440_vm5, %v5400_v0 }
0x1168   :  { %12180 = vmatprep.mubr.msk.bf16.mxu0 %vm13848_vm1, %v18197_v51 }
0x11ed   :  { %v12144_v50 = vpop.f32.mrb[144].mxu0 }
0x11ee   :  { %v5499_v55 = vpop.f32.mrb[145].mxu0  ;;  %v5508_v10 = vadd.f32 %v12144_v50, %v16013_v28 }
0x11ef   :  { %v5500_v37 = vadd.f32 %v16013_v28, %v5499_v55  ;;  %v12145_v52 = vpop.f32.mrb[146].mxu0 }
0x11f0   :  { %v5502_v38 = vpop.f32.mrb[147].mxu0  ;;  %v5511_v6 = vadd.f32 %v12145_v52, %v16013_v28  ;;  %v16023_v57 = vadd.f32 %v5508_v10, %v15684_v41 }
0x11f1   :  { %v16018_v46 = vadd.f32 %v5500_v37, %v15681_v22  ;;  %v5503_v25 = vadd.f32 %v16013_v28, %v5502_v38 }
0x11f2   :  { %18235 = vst [vmem:[#allocation32_spill] sm:$0xff] %v16023_v57  ;;  %v16031_v3 = vadd.f32 %v5511_v6, %v15693_v31  ;;  %v5588_v41 = vsel %vm129_vm0, %v16023_v57, 0.0 }
0x11f3   :  { %18234 = vst [vmem:[#allocation33_spill] sm:$0xff] %v16018_v46  ;;  %v16026_v12 = vadd.f32 %v5503_v25, %v15687_v26  ;;  %v5582_v61 = vsel %vm129_vm0, %v16018_v46, 0.0 }
0x11f4   :  { %5583 = vadd.xlane.f32.xlu0 %v5582_v61  ;;  %18237 = vst [vmem:[#allocation16_spill] sm:$0xff] %v16031_v3  ;;  %v5591_v31 = vsel %vm129_vm0, %v16031_v3, 0.0 }
0x11f5   :  { %18236 = vst [vmem:[#allocation17_spill] sm:$0xff] %v16026_v12  ;;  %v5585_v22 = vsel %vm129_vm0, %v16026_v12, 0.0 }
0x11f6   :  { %v12148_v47 = vpop.f32.mrb[148].mxu0  ;;  %5586 = vadd.xlane.f32.xlu1 %v5585_v22 }
0x11f7   :  { %v5515_v18 = vpop.f32.mrb[149].mxu0  ;;  %v5524_v4 = vadd.f32 %v12148_v47, %v16013_v28 }
0x11f8   :  { %v5516_v26 = vadd.f32 %v16013_v28, %v5515_v18  ;;  %v12149_v48 = vpop.f32.mrb[150].mxu0  ;;  %5589 = vadd.xlane.f32.xlu0 %v5588_v41 }
0x11f9   :  { %v5518_v33 = vpop.f32.mrb[151].mxu0  ;;  %v5527_v62 = vadd.f32 %v12149_v48, %v16013_v28  ;;  %v16047_v60 = vadd.f32 %v5524_v4, %v15711_v14 }
0x11fa   :  { %v16042_v27 = vadd.f32 %v5516_v26, %v15701_v43  ;;  %v5519_v63 = vadd.f32 %v16013_v28, %v5518_v33  ;;  %5592 = vadd.xlane.f32.xlu1 %v5591_v31 }
0x11fb   :  { %18239 = vst [vmem:[#allocation18_spill] sm:$0xff] %v16047_v60  ;;  %v16055_v21 = vadd.f32 %v5527_v62, %v15707_v35 }
0x11fc   :  { %18238 = vst [vmem:[#allocation19_spill] sm:$0xff] %v16042_v27  ;;  %v16050_v54 = vadd.f32 %v5519_v63, %v15705_v8  ;;  %v5594_v9 = vsel %vm129_vm0, %v16042_v27, 0.0  ;;  %v5600_v8 = vsel %vm129_vm0, %v16047_v60, 0.0 }
0x11fd   :  { %5595 = vadd.xlane.f32.xlu0 %v5594_v9  ;;  %18241 = vst [vmem:[#allocation20_spill] sm:$0xff] %v16055_v21  ;;  %v5603_v30 = vsel %vm129_vm0, %v16055_v21, 0.0 }
0x11fe   :  { %18240 = vst [vmem:[#allocation21_spill] sm:$0xff] %v16050_v54  ;;  %v12152_v43 = vpop.f32.mrb[152].mxu0  ;;  %v5597_v5 = vsel %vm129_vm0, %v16050_v54, 0.0 }
0x11ff   :  { %5598 = vadd.xlane.f32.xlu1 %v5597_v5  ;;  %v5531_v34 = vpop.f32.mrb[153].mxu0  ;;  %v5540_v24 = vadd.f32 %v12152_v43, %v16013_v28 }
0x1200   :  { %v5532_v14 = vadd.f32 %v16013_v28, %v5531_v34  ;;  %v12153_v1 = vpop.f32.mrb[154].mxu0 }
0x1201   :  { %5601 = vadd.xlane.f32.xlu0 %v5600_v8  ;;  %v5534_v11 = vpop.f32.mrb[155].mxu0  ;;  %v5543_v35 = vadd.f32 %v12153_v1, %v16013_v28  ;;  %v16071_v19 = vadd.f32 %v5540_v24, %v15731_v58 }
0x1202   :  { %v16064_v59 = vadd.f32 %v5532_v14, %v15721_v15  ;;  %v5535_v17 = vadd.f32 %v16013_v28, %v5534_v11 }
0x1203   :  { %5604 = vadd.xlane.f32.xlu1 %v5603_v30  ;;  %18243 = vst [vmem:[#allocation22_spill] sm:$0xff] %v16071_v19  ;;  %v16079_v15 = vadd.f32 %v5543_v35, %v15727_v53  ;;  %v5612_v20 = vsel %vm129_vm0, %v16071_v19, 0.0 }
0x1204   :  { %18242 = vst [vmem:[#allocation23_spill] sm:$0xff] %v16064_v59  ;;  %v16074_v36 = vadd.f32 %v5535_v17, %v15725_v56  ;;  %v5606_v32 = vsel %vm129_vm0, %v16064_v59, 0.0 }
0x1205   :  { %5607 = vadd.xlane.f32.xlu0 %v5606_v32  ;;  %18245 = vst [vmem:[#allocation24_spill] sm:$0xff] %v16079_v15  ;;  %v5615_v58 = vsel %vm129_vm0, %v16079_v15, 0.0 }
0x1206   :  { %18244 = vst [vmem:[#allocation25_spill] sm:$0xff] %v16074_v36  ;;  %v5609_v45 = vsel %vm129_vm0, %v16074_v36, 0.0 }
0x1207   :  { %5610 = vadd.xlane.f32.xlu1 %v5609_v45 }
0x1209   :  { %5613 = vadd.xlane.f32.xlu0 %v5612_v20 }
0x120b   :  { %5616 = vadd.xlane.f32.xlu1 %v5615_v58 }
0x123a   :  { %v12156_v56 = vpop.f32.mrb[156].mxu0 }
0x123b   :  { %v5547_v2 = vpop.f32.mrb[157].mxu0  ;;  %v5556_v7 = vadd.f32 %v12156_v56, %v16013_v28 }
0x123c   :  { %v5548_v39 = vadd.f32 %v16013_v28, %v5547_v2  ;;  %v12157_v53 = vpop.f32.mrb[158].mxu0 }
0x123d   :  { %v5550_v44 = vpop.f32.mrb[159].mxu0  ;;  %v5559_v29 = vadd.f32 %v12157_v53, %v16013_v28  ;;  %v16095_v13 = vadd.f32 %v5556_v7, %v15745_v42 }
0x123e   :  { %v16090_v40 = vadd.f32 %v5548_v39, %v15741_v49  ;;  %v5551_v0 = vadd.f32 %v16013_v28, %v5550_v44 }
0x123f   :  { %18247 = vst [vmem:[#allocation28_spill] sm:$0xff] %v16095_v13  ;;  %v16103_v10 = vadd.f32 %v5559_v29, %v15751_v16  ;;  %v5624_v28 = vsel %vm129_vm0, %v16095_v13, 0.0 }
0x1240   :  { %18246 = vst [vmem:[#allocation29_spill] sm:$0xff] %v16090_v40  ;;  %v16098_v50 = vadd.f32 %v5551_v0, %v15747_v23  ;;  %v5618_v55 = vsel %vm129_vm0, %v16090_v40, 0.0 }
0x1241   :  { %5619 = vadd.xlane.f32.xlu0 %v5618_v55  ;;  %18249 = vst [vmem:[#allocation26_spill] sm:$0xff] %v16103_v10  ;;  %v5627_v42 = vsel %vm129_vm0, %v16103_v10, 0.0 }
0x1242   :  { %18248 = vst [vmem:[#allocation27_spill] sm:$0xff] %v16098_v50  ;;  %v5621_v49 = vsel %vm129_vm0, %v16098_v50, 0.0 }
0x1243   :  { %5622 = vadd.xlane.f32.xlu1 %v5621_v49 }
0x1245   :  { %5625 = vadd.xlane.f32.xlu0 %v5624_v28 }
0x1247   :  { %5628 = vadd.xlane.f32.xlu1 %v5627_v42 }
0x1281   :  { %v5584_v23 = vpop.xlane.xlu0 %5583 }
0x1282   :  { %v5630_v37 = vmul.f32 0.03125, %v5584_v23 }
0x1283   :  { %v5587_v52 = vpop.xlane.xlu1 %5586 }
0x1284   :  { %v16112_v38 = vsub.f32 %v16018_v46, %v5630_v37  ;;  %v5631_v16 = vmul.f32 0.03125, %v5587_v52 }
0x1285   :  { %v5590_v6 = vpop.xlane.xlu0 %5589 }
0x1286   :  { %v16115_v25 = vsub.f32 %v16026_v12, %v5631_v16  ;;  %v5632_v61 = vmul.f32 0.03125, %v5590_v6  ;;  %v5662_v22 = vmul.f32 %v16112_v38, %v16112_v38 }
0x1287   :  { %v5593_v47 = vpop.xlane.xlu1 %5592 }
0x1288   :  { %v16120_v18 = vsub.f32 %v16023_v57, %v5632_v61  ;;  %v5633_v41 = vmul.f32 0.03125, %v5593_v47  ;;  %v5678_v4 = vsel %vm129_vm0, %v5662_v22, 0.0  ;;  %v5663_v26 = vmul.f32 %v16115_v25, %v16115_v25 }
0x1289   :  { %5679 = vadd.xlane.f32.xlu0 %v5678_v4 }
0x128a   :  { %v16126_v48 = vsub.f32 %v16031_v3, %v5633_v41  ;;  %v5596_v33 = vpop.xlane.xlu0 %5595  ;;  %v5681_v31 = vsel %vm129_vm0, %v5663_v26, 0.0  ;;  %v5664_v62 = vmul.f32 %v16120_v18, %v16120_v18 }
0x128b   :  { %v5634_v63 = vmul.f32 0.03125, %v5596_v33  ;;  %5682 = vadd.xlane.f32.xlu1 %v5681_v31 }
0x128c   :  { %v5599_v9 = vpop.xlane.xlu1 %5598  ;;  %v5684_v43 = vsel %vm129_vm0, %v5664_v62, 0.0  ;;  %v5665_v5 = vmul.f32 %v16126_v48, %v16126_v48  ;;  %v12904_v62 = vld [vmem:[%s18149_s3 + $0x10] sm:$0xff]  }
0x128d   :  { %v16135_v34 = vsub.f32 %v16042_v27, %v5634_v63  ;;  %v5635_v24 = vmul.f32 0.03125, %v5599_v9  ;;  %5685 = vadd.xlane.f32.xlu0 %v5684_v43  ;;  %12158 = vmatprep.subr.bf16.mxu1 %v12904_v62  ;;  %v12905_v63 = vld [vmem:[%s18149_s3 + $0x18] sm:$0xff]  }
0x128e   :  { %v5602_v14 = vpop.xlane.xlu0 %5601  ;;  %v5687_v1 = vsel %vm129_vm0, %v5665_v5, 0.0  ;;  %12159 = vmatpush3.bf16.msra.mxu1 %v12904_v62 }
0x128f   :  { %v16139_v8 = vsub.f32 %v16050_v54, %v5635_v24  ;;  %v5636_v11 = vmul.f32 0.03125, %v5602_v14  ;;  %5688 = vadd.xlane.f32.xlu1 %v5687_v1  ;;  %v5666_v35 = vmul.f32 %v16135_v34, %v16135_v34  ;;  %12160 = vmatprep.subr.bf16.mxu1 %v12905_v63 }
0x1290   :  { %v5605_v17 = vpop.xlane.xlu1 %5604 }
0x1291   :  { %v16144_v30 = vsub.f32 %v16047_v60, %v5636_v11  ;;  %v5637_v32 = vmul.f32 0.03125, %v5605_v17  ;;  %v5690_v45 = vsel %vm129_vm0, %v5666_v35, 0.0  ;;  %v5667_v20 = vmul.f32 %v16139_v8, %v16139_v8 }
0x1292   :  { %5691 = vadd.xlane.f32.xlu0 %v5690_v45  ;;  %v5608_v58 = vpop.xlane.xlu0 %5607  ;;  %12161 = vmatpush3.bf16.msra.mxu1 %v12905_v63 }
0x1293   :  { %v16150_v56 = vsub.f32 %v16055_v21, %v5637_v32  ;;  %v5638_v2 = vmul.f32 0.03125, %v5608_v58  ;;  %v5693_v7 = vsel %vm129_vm0, %v5667_v20, 0.0  ;;  %v5668_v39 = vmul.f32 %v16144_v30, %v16144_v30  ;;  %12184 = vmatprep.subr.bf16.mxu1 %v18197_v51 }
0x1294   :  { %v5611_v53 = vpop.xlane.xlu1 %5610  ;;  %5694 = vadd.xlane.f32.xlu1 %v5693_v7 }
0x1295   :  { %v16156_v44 = vsub.f32 %v16064_v59, %v5638_v2  ;;  %v5639_v29 = vmul.f32 0.03125, %v5611_v53  ;;  %v5696_v0 = vsel %vm129_vm0, %v5668_v39, 0.0  ;;  %v5669_v55 = vmul.f32 %v16150_v56, %v16150_v56 }
0x1296   :  { %5697 = vadd.xlane.f32.xlu0 %v5696_v0  ;;  %v5614_v49 = vpop.xlane.xlu0 %5613 }
0x1297   :  { %v16162_v28 = vsub.f32 %v16074_v36, %v5639_v29  ;;  %v5640_v42 = vmul.f32 0.03125, %v5614_v49  ;;  %v5699_v23 = vsel %vm129_vm0, %v5669_v55, 0.0  ;;  %v5670_v37 = vmul.f32 %v16156_v44, %v16156_v44 }
0x1298   :  { %v5617_v52 = vpop.xlane.xlu1 %5616  ;;  %5700 = vadd.xlane.f32.xlu1 %v5699_v23 }
0x1299   :  { %v16168_v16 = vsub.f32 %v16071_v19, %v5640_v42  ;;  %v5641_v6 = vmul.f32 0.03125, %v5617_v52  ;;  %v5702_v61 = vsel %vm129_vm0, %v5670_v37, 0.0  ;;  %v5671_v22 = vmul.f32 %v16162_v28, %v16162_v28 }
0x129a   :  { %5703 = vadd.xlane.f32.xlu0 %v5702_v61 }
0x129b   :  { %v16174_v47 = vsub.f32 %v16079_v15, %v5641_v6  ;;  %v5705_v41 = vsel %vm129_vm0, %v5671_v22, 0.0  ;;  %v5672_v4 = vmul.f32 %v16168_v16, %v16168_v16 }
0x129c   :  { %5706 = vadd.xlane.f32.xlu1 %v5705_v41 }
0x129d   :  { %v5708_v26 = vsel %vm129_vm0, %v5672_v4, 0.0  ;;  %v5673_v33 = vmul.f32 %v16174_v47, %v16174_v47 }
0x129e   :  { %5709 = vadd.xlane.f32.xlu0 %v5708_v26 }
0x129f   :  { %v5711_v31 = vsel %vm129_vm0, %v5673_v33, 0.0 }
0x12a0   :  { %5712 = vadd.xlane.f32.xlu1 %v5711_v31 }
0x12ce   :  { %v5620_v9 = vpop.xlane.xlu0 %5619 }
0x12cf   :  { %v5642_v43 = vmul.f32 0.03125, %v5620_v9 }
0x12d0   :  { %v5623_v5 = vpop.xlane.xlu1 %5622 }
0x12d1   :  { %v16191_v24 = vsub.f32 %v16090_v40, %v5642_v43  ;;  %v5643_v14 = vmul.f32 0.03125, %v5623_v5 }
0x12d2   :  { %v5626_v1 = vpop.xlane.xlu0 %5625 }
0x12d3   :  { %v16194_v11 = vsub.f32 %v16098_v50, %v5643_v14  ;;  %v5644_v35 = vmul.f32 0.03125, %v5626_v1  ;;  %v5674_v17 = vmul.f32 %v16191_v24, %v16191_v24 }
0x12d4   :  { %v5629_v32 = vpop.xlane.xlu1 %5628 }
0x12d5   :  { %v16199_v45 = vsub.f32 %v16095_v13, %v5644_v35  ;;  %v5645_v20 = vmul.f32 0.03125, %v5629_v32  ;;  %v5714_v58 = vsel %vm129_vm0, %v5674_v17, 0.0  ;;  %v5675_v2 = vmul.f32 %v16194_v11, %v16194_v11  ;;  %v16217_v32 = vld [vmem:[%s18147_s1 + $0x1] ss:$0 sm:$0xff] }
0x12d6   :  { %5715 = vadd.xlane.f32.xlu0 %v5714_v58 }
0x12d7   :  { %v16205_v7 = vsub.f32 %v16103_v10, %v5645_v20  ;;  %v5717_v39 = vsel %vm129_vm0, %v5675_v2, 0.0  ;;  %v5676_v53 = vmul.f32 %v16199_v45, %v16199_v45 }
0x12d8   :  { %5718 = vadd.xlane.f32.xlu1 %v5717_v39 }
0x12d9   :  { %v5720_v29 = vsel %vm129_vm0, %v5676_v53, 0.0  ;;  %v5677_v0 = vmul.f32 %v16205_v7, %v16205_v7 }
0x12da   :  { %5721 = vadd.xlane.f32.xlu0 %v5720_v29 }
0x12db   :  { %v5723_v55 = vsel %vm129_vm0, %v5677_v0, 0.0 }
0x12dc   :  { %5724 = vadd.xlane.f32.xlu1 %v5723_v55 }
0x1316   :  { %v5680_v49 = vpop.xlane.xlu0 %5679 }
0x1317   :  { %v5726_v42 = vmul.f32 0.03125, %v5680_v49 }
0x1318   :  { %v5683_v23 = vpop.xlane.xlu1 %5682 }
0x1319   :  { %v5742_v37 = vadd.f32 1e-05, %v5726_v42  ;;  %v5727_v52 = vmul.f32 0.03125, %v5683_v23 }
0x131a   :  { %v5686_v6 = vpop.xlane.xlu0 %5685 }
0x131b   :  { %13298 = vrsqrt.f32 %v5742_v37  ;;  %v5743_v61 = vadd.f32 1e-05, %v5727_v52  ;;  %v5728_v22 = vmul.f32 0.03125, %v5686_v6  ;;  %v16225_v37 = vld [vmem:[%s18148_s2 + $0x1] ss:$0 sm:$0xff] }
0x131c   :  { %v5689_v41 = vpop.xlane.xlu1 %5688 }
0x131d   :  { %13300 = vrsqrt.f32 %v5743_v61  ;;  %v5744_v4 = vadd.f32 1e-05, %v5728_v22  ;;  %v5729_v26 = vmul.f32 0.03125, %v5689_v41 }
0x131f   :  { %13302 = vrsqrt.f32 %v5744_v4  ;;  %v5745_v33 = vadd.f32 1e-05, %v5729_v26  ;;  %v5692_v31 = vpop.xlane.xlu0 %5691 }
0x1320   :  { %v5730_v62 = vmul.f32 0.03125, %v5692_v31 }
0x1321   :  { %13304 = vrsqrt.f32 %v5745_v33  ;;  %v5695_v63 = vpop.xlane.xlu1 %5694 }
0x1322   :  { %v5746_v9 = vadd.f32 1e-05, %v5730_v62  ;;  %v5731_v43 = vmul.f32 0.03125, %v5695_v63 }
0x1323   :  { %v5698_v5 = vpop.xlane.xlu0 %5697 }
0x1324   :  { %13306 = vrsqrt.f32 %v5746_v9  ;;  %v5747_v14 = vadd.f32 1e-05, %v5731_v43  ;;  %v5732_v1 = vmul.f32 0.03125, %v5698_v5 }
0x1325   :  { %v13299_v35 = vpop.eup %13298  ;;  %v5701_v17 = vpop.xlane.xlu1 %5700 }
0x1326   :  { %13308 = vrsqrt.f32 %v5747_v14  ;;  %v5748_v20 = vadd.f32 1e-05, %v5732_v1  ;;  %v5733_v58 = vmul.f32 0.03125, %v5701_v17  ;;  %v5774_v2 = vmul.f32 %v13299_v35, %v16112_v38 }
0x1327   :  { %v13301_v39 = vpop.eup %13300  ;;  %v5704_v53 = vpop.xlane.xlu0 %5703 }
0x1328   :  { %13310 = vrsqrt.f32 %v5748_v20  ;;  %v5749_v29 = vadd.f32 1e-05, %v5733_v58  ;;  %v5734_v0 = vmul.f32 0.03125, %v5704_v53  ;;  %v5775_v55 = vmul.f32 %v13301_v39, %v16115_v25 }
0x1329   :  { %v13303_v49 = vpop.eup %13302  ;;  %v5707_v42 = vpop.xlane.xlu1 %5706  ;;  %v5796_v23 = vmul.f32 %v16217_v32, %v5774_v2 }
0x132a   :  { %v5776_v52 = vmul.f32 %v13303_v49, %v16120_v18  ;;  %13312 = vrsqrt.f32 %v5749_v29  ;;  %v5750_v38 = vadd.f32 1e-05, %v5734_v0  ;;  %v5735_v6 = vmul.f32 0.03125, %v5707_v42 }
0x132b   :  { %v13305_v61 = vpop.eup %13304  ;;  %v5710_v22 = vpop.xlane.xlu0 %5709  ;;  %v5797_v41 = vmul.f32 %v16217_v32, %v5775_v55  ;;  %v5818_v62 = vadd.f32 %v16225_v37, %v5796_v23 }
0x132c   :  { %v5798_v25 = vmul.f32 %v16217_v32, %v5776_v52  ;;  %v5777_v4 = vmul.f32 %v13305_v61, %v16126_v48  ;;  %13314 = vrsqrt.f32 %v5750_v38  ;;  %v5751_v26 = vadd.f32 1e-05, %v5735_v6 }
0x132d   :  { %v5736_v33 = vmul.f32 0.03125, %v5710_v22  ;;  %v5713_v31 = vpop.xlane.xlu1 %5712  ;;  %v5819_v63 = vadd.f32 %v16225_v37, %v5797_v41 }
0x132e   :  { %v13307_v18 = vpop.eup %13306  ;;  %v5799_v9 = vmul.f32 %v16217_v32, %v5777_v4  ;;  %13316 = vrsqrt.f32 %v5751_v26  ;;  %v5737_v43 = vmul.f32 0.03125, %v5713_v31  ;;  %v5820_v48 = vadd.f32 %v16225_v37, %v5798_v25 }
0x132f   :  { %v5752_v5 = vadd.f32 1e-05, %v5736_v33  ;;  %v5834_v14 = vpack.c.bf16 %v5819_v63, %v5818_v62  ;;  %v5778_v1 = vmul.f32 %v13307_v18, %v16135_v34 }
0x1330   :  { %v13309_v35 = vpop.eup %13308  ;;  %v5821_v17 = vadd.f32 %v16225_v37, %v5799_v9  ;;  %v5753_v20 = vadd.f32 1e-05, %v5737_v43 }
0x1331   :  { %13318 = vrsqrt.f32 %v5752_v5  ;;  %12162 = vmatprep.mubr.msk.bf16.mxu1 %vm129_vm0, %v5834_v14  ;;  %v5779_v58 = vmul.f32 %v13309_v35, %v16139_v8  ;;  %v5800_v2 = vmul.f32 %v16217_v32, %v5778_v1 }
0x1332   :  { %v13311_v39 = vpop.eup %13310  ;;  %13320 = vrsqrt.f32 %v5753_v20  ;;  %v5835_v53 = vpack.c.bf16 %v5821_v17, %v5820_v48 }
0x1333   :  { %v5801_v29 = vmul.f32 %v16217_v32, %v5779_v58  ;;  %v5780_v34 = vmul.f32 %v13311_v39, %v16144_v30  ;;  %v5822_v55 = vadd.f32 %v16225_v37, %v5800_v2 }
0x1334   :  { %v13313_v0 = vpop.eup %13312  ;;  %12163 = vmatmul.mubr.msk.bf16.vlgmr.msra.gmra.mrb[160].mxu1 %vm129_vm0, %v5835_v53 }
0x1335   :  { %v5823_v49 = vadd.f32 %v16225_v37, %v5801_v29  ;;  %v5781_v42 = vmul.f32 %v13313_v0, %v16150_v56  ;;  %v5802_v8 = vmul.f32 %v16217_v32, %v5780_v34 }
0x1336   :  { %v13315_v23 = vpop.eup %13314 }
0x1337   :  { %v5836_v52 = vpack.c.bf16 %v5823_v49, %v5822_v55  ;;  %v5803_v38 = vmul.f32 %v16217_v32, %v5781_v42  ;;  %v5782_v6 = vmul.f32 %v13315_v23, %v16156_v44  ;;  %v5824_v30 = vadd.f32 %v16225_v37, %v5802_v8 }
0x1338   :  { %v13317_v61 = vpop.eup %13316 }
0x1339   :  { %12166 = vmatprep.mubr.msk.bf16.mxu1 %vm129_vm0, %v5836_v52  ;;  %v5825_v22 = vadd.f32 %v16225_v37, %v5803_v38  ;;  %v5783_v41 = vmul.f32 %v13317_v61, %v16162_v28  ;;  %v5804_v25 = vmul.f32 %v16217_v32, %v5782_v6 }
0x133b   :  { %v13319_v56 = vpop.eup %13318  ;;  %v5837_v4 = vpack.c.bf16 %v5825_v22, %v5824_v30  ;;  %v5805_v26 = vmul.f32 %v16217_v32, %v5783_v41  ;;  %v5826_v44 = vadd.f32 %v16225_v37, %v5804_v25 }
0x133c   :  { %v13321_v33 = vpop.eup %13320  ;;  %v5784_v31 = vmul.f32 %v13319_v56, %v16168_v16 }
0x133d   :  { %12167 = vmatmul.mubr.msk.bf16.gmra.mrb[164].mxu1 %vm129_vm0, %v5837_v4  ;;  %v5827_v62 = vadd.f32 %v16225_v37, %v5805_v26  ;;  %v5785_v63 = vmul.f32 %v13321_v33, %v16174_v47 }
0x133e   :  { %v5806_v18 = vmul.f32 %v16217_v32, %v5784_v31 }
0x133f   :  { %v5838_v28 = vpack.c.bf16 %v5827_v62, %v5826_v44  ;;  %v5807_v9 = vmul.f32 %v16217_v32, %v5785_v63 }
0x1340   :  { %v5828_v43 = vadd.f32 %v16225_v37, %v5806_v18 }
0x1341   :  { %12170 = vmatprep.mubr.msk.bf16.mxu1 %vm129_vm0, %v5838_v28  ;;  %v5829_v5 = vadd.f32 %v16225_v37, %v5807_v9 }
0x1343   :  { %v5839_v16 = vpack.c.bf16 %v5829_v5, %v5828_v43 }
0x1345   :  { %12171 = vmatmul.mubr.msk.bf16.gmra.mrb[168].mxu1 %vm129_vm0, %v5839_v16 }
0x1363   :  { %v5716_v14 = vpop.xlane.xlu0 %5715 }
0x1364   :  { %v5738_v1 = vmul.f32 0.03125, %v5716_v14 }
0x1365   :  { %v5719_v35 = vpop.xlane.xlu1 %5718 }
0x1366   :  { %v5754_v48 = vadd.f32 1e-05, %v5738_v1  ;;  %v5739_v17 = vmul.f32 0.03125, %v5719_v35 }
0x1367   :  { %v5722_v47 = vpop.xlane.xlu0 %5721 }
0x1368   :  { %13322 = vrsqrt.f32 %v5754_v48  ;;  %v5755_v20 = vadd.f32 1e-05, %v5739_v17  ;;  %v5740_v58 = vmul.f32 0.03125, %v5722_v47 }
0x1369   :  { %v5725_v2 = vpop.xlane.xlu1 %5724 }
0x136a   :  { %13324 = vrsqrt.f32 %v5755_v20  ;;  %v5756_v39 = vadd.f32 1e-05, %v5740_v58  ;;  %v5741_v53 = vmul.f32 0.03125, %v5725_v2 }
0x136c   :  { %13326 = vrsqrt.f32 %v5756_v39  ;;  %v5757_v29 = vadd.f32 1e-05, %v5741_v53 }
0x136e   :  { %13328 = vrsqrt.f32 %v5757_v29 }
0x1372   :  { %v13323_v34 = vpop.eup %13322 }
0x1373   :  { %v5786_v0 = vmul.f32 %v13323_v34, %v16191_v24 }
0x1374   :  { %v13325_v55 = vpop.eup %13324 }
0x1375   :  { %v5787_v49 = vmul.f32 %v13325_v55, %v16194_v11  ;;  %v5808_v42 = vmul.f32 %v16217_v32, %v5786_v0 }
0x1376   :  { %v13327_v8 = vpop.eup %13326 }
0x1377   :  { %v5809_v23 = vmul.f32 %v16217_v32, %v5787_v49  ;;  %v5788_v52 = vmul.f32 %v13327_v8, %v16199_v45  ;;  %v5830_v6 = vadd.f32 %v16225_v37, %v5808_v42 }
0x1378   :  { %v13329_v38 = vpop.eup %13328 }
0x1379   :  { %v5831_v61 = vadd.f32 %v16225_v37, %v5809_v23  ;;  %v5789_v30 = vmul.f32 %v13329_v38, %v16205_v7  ;;  %v5810_v22 = vmul.f32 %v16217_v32, %v5788_v52 }
0x137b   :  { %v5840_v24 = vpack.c.bf16 %v5831_v61, %v5830_v6  ;;  %v5811_v41 = vmul.f32 %v16217_v32, %v5789_v30  ;;  %v5832_v11 = vadd.f32 %v16225_v37, %v5810_v22 }
0x137d   :  { %12174 = vmatprep.mubr.msk.bf16.mxu1 %vm129_vm0, %v5840_v24  ;;  %v5833_v25 = vadd.f32 %v16225_v37, %v5811_v41 }
0x137f   :  { %v5841_v56 = vpack.c.bf16 %v5833_v25, %v5832_v11 }
0x1381   :  { %12175 = vmatmul.mubr.msk.bf16.gmra.mrb[172].mxu1 %vm129_vm0, %v5841_v56 }
0x1382   :  { %12186 = vmatprep.mubr.msk.bf16.mxu1 %vm13848_vm1, %v18197_v51 }
0x1407   :  { %v12164_v45 = vpop.f32.mrb[160].mxu1 }
0x1408   :  { %v5917_v4 = vpop.f32.mrb[161].mxu1 }
0x1409   :  { %v12165_v7 = vpop.f32.mrb[162].mxu1 }
0x140a   :  { %v16282_v26 = vpack.c.bf16 %v12165_v7, %v12164_v45  ;;  %v5920_v33 = vpop.f32.mrb[163].mxu1 }
0x140b   :  { %v16284_v31 = vpack.c.bf16 %v5920_v33, %v5917_v4 }
0x140c   :  { %6039 = vrot.lane.b32.xlu1 %v16282_v26, %s13849_s20 }
0x140d   :  { %5989 = vrot.lane.b32.xlu0 %v16284_v31, %s13849_s20 }
0x1410   :  { %v12168_v32 = vpop.f32.mrb[164].mxu1 }
0x1411   :  { %v5933_v37 = vpop.f32.mrb[165].mxu1 }
0x1412   :  { %v12169_v44 = vpop.f32.mrb[166].mxu1 }
0x1413   :  { %v16290_v62 = vpack.c.bf16 %v12169_v44, %v12168_v32  ;;  %v5936_v63 = vpop.f32.mrb[167].mxu1 }
0x1414   :  { %v16292_v18 = vpack.c.bf16 %v5936_v63, %v5933_v37 }
0x1416   :  { %6089 = vrot.lane.b32.xlu1 %v16292_v18, %s13849_s20 }
0x1418   :  { %v12172_v28 = vpop.f32.mrb[168].mxu1 }
0x1419   :  { %v5949_v9 = vpop.f32.mrb[169].mxu1 }
0x141a   :  { %6139 = vrot.lane.b32.xlu1 %v16290_v62, %s13849_s20  ;;  %v12173_v43 = vpop.f32.mrb[170].mxu1 }
0x141b   :  { %v16298_v5 = vpack.c.bf16 %v12173_v43, %v12172_v28  ;;  %v5952_v16 = vpop.f32.mrb[171].mxu1 }
0x141c   :  { %v16300_v14 = vpack.c.bf16 %v5952_v16, %v5949_v9 }
0x141e   :  { %6239 = vrot.lane.b32.xlu1 %v16298_v5, %s13849_s20  ;;  %6189 = vrot.lane.b32.xlu0 %v16300_v14, %s13849_s20 }
0x1454   :  { %v12176_v1 = vpop.f32.mrb[172].mxu1 }
0x1455   :  { %v5965_v35 = vpop.f32.mrb[173].mxu1 }
0x1456   :  { %v12177_v48 = vpop.f32.mrb[174].mxu1 }
0x1457   :  { %v16306_v17 = vpack.c.bf16 %v12177_v48, %v12176_v1  ;;  %v5968_v47 = vpop.f32.mrb[175].mxu1 }
0x1458   :  { %v16308_v20 = vpack.c.bf16 %v5968_v47, %v5965_v35 }
0x1459   :  { %6339 = vrot.lane.b32.xlu1 %v16306_v17, %s13849_s20 }
0x145a   :  { %6289 = vrot.lane.b32.xlu0 %v16308_v20, %s13849_s20 }
0x147e   :  { %v6040_v58 = vpop.permute.xlu1 %6039 }
0x147f   :  { %v6045_v2 = vsel %vm539_vm2, %v6040_v58, 0  ;;  %v5990_v39 = vpop.permute.xlu0 %5989 }
0x1480   :  { %v5995_v53 = vsel %vm539_vm2, %v5990_v39, 0  ;;  %12185 = vmatpush3.bf16.xpose.msra.mxu1 %v6045_v2 }
0x1481   :  { %12179 = vmatpush3.bf16.xpose.msra.mxu0 %v5995_v53  ;;  %12196 = vmatprep.subr.bf16.mxu1 %v18197_v51 }
0x1482   :  { %12190 = vmatprep.subr.bf16.mxu0 %v18197_v51 }
0x1487   :  { %12187 = vmatmul.mubr.msk.bf16.vlgmr.msra.gmra.mrb[176].mxu1 %vm539_vm2, %v16282_v26 }
0x1488   :  { %v6090_v29 = vpop.permute.xlu1 %6089  ;;  %12181 = vmatmul.mubr.msk.bf16.vlgmr.msra.gmra.mrb[160].mxu0 %vm539_vm2, %v16284_v31  ;;  %12198 = vmatprep.mubr.msk.bf16.mxu1 %vm13848_vm1, %v18197_v51 }
0x1489   :  { %v6095_v34 = vsel %vm539_vm2, %v6090_v29, 0  ;;  %12192 = vmatprep.mubr.msk.bf16.mxu0 %vm13848_vm1, %v18197_v51 }
0x148a   :  { %12191 = vmatpush3.bf16.xpose.msra.mxu0 %v6095_v34 }
0x148b   :  { %12202 = vmatprep.subr.bf16.mxu0 %v18197_v51 }
0x148c   :  { %v6140_v0 = vpop.permute.xlu1 %6139 }
0x148d   :  { %v6145_v55 = vsel %vm539_vm2, %v6140_v0, 0 }
0x148e   :  { %12197 = vmatpush3.bf16.xpose.msra.mxu1 %v6145_v55 }
0x148f   :  { %12208 = vmatprep.subr.bf16.mxu1 %v18197_v51 }
0x1490   :  { %v6190_v49 = vpop.permute.xlu0 %6189  ;;  %v6240_v8 = vpop.permute.xlu1 %6239 }
0x1491   :  { %v6195_v42 = vsel %vm539_vm2, %v6190_v49, 0  ;;  %12193 = vmatmul.mubr.msk.bf16.vlgmr.msra.gmra.mrb[164].mxu0 %vm539_vm2, %v16292_v18  ;;  %v6245_v23 = vsel %vm539_vm2, %v6240_v8, 0 }
0x1492   :  { %12203 = vmatpush3.bf16.xpose.msra.mxu0 %v6195_v42  ;;  %12204 = vmatprep.mubr.msk.bf16.mxu0 %vm13848_vm1, %v18197_v51 }
0x1493   :  { %12214 = vmatprep.subr.bf16.mxu0 %v18197_v51 }
0x1495   :  { %12199 = vmatmul.mubr.msk.bf16.vlgmr.msra.gmra.mrb[180].mxu1 %vm539_vm2, %v16290_v62 }
0x1496   :  { %12209 = vmatpush3.bf16.xpose.msra.mxu1 %v6245_v23  ;;  %12210 = vmatprep.mubr.msk.bf16.mxu1 %vm13848_vm1, %v18197_v51 }
0x1497   :  { %12220 = vmatprep.subr.bf16.mxu1 %v18197_v51 }
0x1499   :  { %12205 = vmatmul.mubr.msk.bf16.vlgmr.msra.gmra.mrb[168].mxu0 %vm539_vm2, %v16300_v14 }
0x149a   :  { %12216 = vmatprep.mubr.msk.bf16.mxu0 %vm13848_vm1, %v18197_v51 }
0x149d   :  { %12211 = vmatmul.mubr.msk.bf16.vlgmr.msra.gmra.mrb[184].mxu1 %vm539_vm2, %v16298_v5 }
0x149e   :  { %12222 = vmatprep.mubr.msk.bf16.mxu1 %vm13848_vm1, %v18197_v51 }
0x14cb   :  { %v6340_v52 = vpop.permute.xlu1 %6339 }
0x14cc   :  { %v6345_v38 = vsel %vm539_vm2, %v6340_v52, 0  ;;  %v6290_v6 = vpop.permute.xlu0 %6289 }
0x14cd   :  { %v6295_v61 = vsel %vm539_vm2, %v6290_v6, 0  ;;  %12221 = vmatpush3.bf16.xpose.msra.mxu1 %v6345_v38 }
0x14ce   :  { %12215 = vmatpush3.bf16.xpose.msra.mxu0 %v6295_v61  ;;  %12232 = vmatprep.subr.bf16.mxu1 %v18197_v51 }
0x14cf   :  { %12226 = vmatprep.subr.bf16.mxu0 %v18197_v51 }
0x14d4   :  { %12223 = vmatmul.mubr.msk.bf16.vlgmr.msra.gmra.mrb[188].mxu1 %vm539_vm2, %v16306_v17 }
0x14d5   :  { %12217 = vmatmul.mubr.msk.bf16.vlgmr.msra.gmra.mrb[172].mxu0 %vm539_vm2, %v16308_v20  ;;  %12234 = vmatprep.mubr.msk.bf16.mxu1 %vm13848_vm1, %v18197_v51 }
0x14d6   :  { %12228 = vmatprep.mubr.msk.bf16.mxu0 %vm13848_vm1, %v18197_v51 }
0x155a   :  { %v6081_v30 = vpop.f32.mrb[176].mxu1 }
0x155b   :  { %v16362_v22 = vmul.f32 0.35355338, %v6081_v30  ;;  %v6031_v24 = vpop.f32.mrb[160].mxu0  ;;  %v12188_v41 = vpop.f32.mrb[177].mxu1 }
0x155c   :  { %v12182_v11 = vpop.f32.mrb[161].mxu0  ;;  %v6084_v25 = vpop.f32.mrb[178].mxu1  ;;  %v16364_v56 = vmul.f32 0.35355338, %v6031_v24 }
0x155d   :  { %v6034_v45 = vpop.f32.mrb[162].mxu0  ;;  %v12189_v4 = vpop.f32.mrb[179].mxu1  ;;  %v6410_v7 = vsel %vm953_vm3, %v16362_v22, -inf  ;;  %v16372_v44 = vmul.f32 0.35355338, %v6084_v25 }
0x155e   :  { %v16368_v33 = vmul.f32 0.35355338, %v6034_v45  ;;  %6411 = vmax.xlane.f32.xlu0 %v6410_v7  ;;  %v12183_v32 = vpop.f32.mrb[163].mxu0  ;;  %v6404_v63 = vsel %vm953_vm3, %v16364_v56, -inf }
0x155f   :  { %v6413_v43 = vsel %vm953_vm3, %v16372_v44, -inf }
0x1560   :  { %v6407_v37 = vsel %vm953_vm3, %v16368_v33, -inf }
0x1561   :  { %6408 = vmax.xlane.f32.xlu1 %v6407_v37 }
0x1562   :  { %6405 = vmax.xlane.f32.xlu0 %v6404_v63 }
0x1564   :  { %v6131_v28 = vpop.f32.mrb[164].mxu0 }
0x1565   :  { %v12194_v9 = vpop.f32.mrb[165].mxu0  ;;  %v16380_v2 = vmul.f32 0.35355338, %v6131_v28 }
0x1566   :  { %v6134_v16 = vpop.f32.mrb[166].mxu0  ;;  %6414 = vmax.xlane.f32.xlu0 %v6413_v43 }
0x1567   :  { %v12195_v1 = vpop.f32.mrb[167].mxu0  ;;  %v16386_v0 = vmul.f32 0.35355338, %v6134_v16  ;;  %v6416_v23 = vsel %vm953_vm3, %v16380_v2, -inf }
0x1568   :  { %v6181_v35 = vpop.f32.mrb[180].mxu1 }
0x1569   :  { %v16378_v48 = vmul.f32 0.35355338, %v6181_v35  ;;  %v12200_v47 = vpop.f32.mrb[181].mxu1  ;;  %v6419_v61 = vsel %vm953_vm3, %v16386_v0, -inf }
0x156a   :  { %v6184_v58 = vpop.f32.mrb[182].mxu1 }
0x156b   :  { %v16382_v39 = vmul.f32 0.35355338, %v6184_v58  ;;  %v12201_v53 = vpop.f32.mrb[183].mxu1  ;;  %v6422_v29 = vsel %vm953_vm3, %v16378_v48, -inf }
0x156c   :  { %6423 = vmax.xlane.f32.xlu0 %v6422_v29  ;;  %v6231_v34 = vpop.f32.mrb[168].mxu0 }
0x156d   :  { %v12206_v55 = vpop.f32.mrb[169].mxu0  ;;  %v6425_v49 = vsel %vm953_vm3, %v16382_v39, -inf  ;;  %v16396_v24 = vmul.f32 0.35355338, %v6231_v34 }
0x156e   :  { %6426 = vmax.xlane.f32.xlu1 %v6425_v49  ;;  %v6234_v42 = vpop.f32.mrb[170].mxu0 }
0x156f   :  { %v12207_v8 = vpop.f32.mrb[171].mxu0  ;;  %v16402_v45 = vmul.f32 0.35355338, %v6234_v42  ;;  %v6428_v7 = vsel %vm953_vm3, %v16396_v24, -inf }
0x1570   :  { %v6281_v52 = vpop.f32.mrb[184].mxu1  ;;  %6417 = vmax.xlane.f32.xlu0 %v6416_v23 }
0x1571   :  { %v16392_v38 = vmul.f32 0.35355338, %v6281_v52  ;;  %v12212_v6 = vpop.f32.mrb[185].mxu1  ;;  %v6431_v32 = vsel %vm953_vm3, %v16402_v45, -inf }
0x1572   :  { %v6284_v30 = vpop.f32.mrb[186].mxu1  ;;  %6420 = vmax.xlane.f32.xlu1 %v6419_v61 }
0x1573   :  { %v16398_v41 = vmul.f32 0.35355338, %v6284_v30  ;;  %v12213_v11 = vpop.f32.mrb[187].mxu1  ;;  %v6434_v25 = vsel %vm953_vm3, %v16392_v38, -inf }
0x1574   :  { %6435 = vmax.xlane.f32.xlu0 %v6434_v25 }
0x1575   :  { %v6437_v4 = vsel %vm953_vm3, %v16398_v41, -inf }
0x1576   :  { %6438 = vmax.xlane.f32.xlu1 %v6437_v4 }
0x1578   :  { %6429 = vmax.xlane.f32.xlu0 %v6428_v7 }
0x157a   :  { %6432 = vmax.xlane.f32.xlu1 %v6431_v32 }
0x158b   :  { %6635 = vrot.lane.b32.xlu1 %v16282_v26, %s13850_s23 }
0x158f   :  { %6682 = vrot.lane.b32.xlu1 %v16292_v18, %s13850_s23 }
0x1593   :  { %6729 = vrot.lane.b32.xlu1 %v16290_v62, %s13850_s23 }
0x1597   :  { %6823 = vrot.lane.b32.xlu1 %v16298_v5, %s13850_s23 }
0x15a7   :  { %v6381_v37 = vpop.f32.mrb[188].mxu1 }
0x15a8   :  { %v16418_v63 = vmul.f32 0.35355338, %v6381_v37  ;;  %v6331_v28 = vpop.f32.mrb[172].mxu0  ;;  %v12224_v9 = vpop.f32.mrb[189].mxu1 }
0x15a9   :  { %v12218_v43 = vpop.f32.mrb[173].mxu0  ;;  %v6384_v16 = vpop.f32.mrb[190].mxu1  ;;  %v16420_v1 = vmul.f32 0.35355338, %v6331_v28 }
0x15aa   :  { %v6334_v35 = vpop.f32.mrb[174].mxu0  ;;  %v12225_v47 = vpop.f32.mrb[191].mxu1  ;;  %v6446_v58 = vsel %vm953_vm3, %v16418_v63, -inf  ;;  %v16426_v34 = vmul.f32 0.35355338, %v6384_v16 }
0x15ab   :  { %6447 = vmax.xlane.f32.xlu0 %v6446_v58  ;;  %v12219_v53 = vpop.f32.mrb[175].mxu0  ;;  %v6440_v29 = vsel %vm953_vm3, %v16420_v1, -inf  ;;  %v16428_v55 = vmul.f32 0.35355338, %v6334_v35 }
0x15ac   :  { %v6449_v49 = vsel %vm953_vm3, %v16426_v34, -inf }
0x15ad   :  { %v6443_v42 = vsel %vm953_vm3, %v16428_v55, -inf }
0x15af   :  { %6441 = vmax.xlane.f32.xlu0 %v6440_v29 }
0x15bb   :  { %6450 = vmax.xlane.f32.xlu1 %v6449_v49 }
0x15bf   :  { %6444 = vmax.xlane.f32.xlu1 %v6443_v42 }
0x15c5   :  { %6588 = vrot.lane.b32.xlu0 %v16284_v31, %s13850_s23 }
0x15c9   :  { %6776 = vrot.lane.b32.xlu0 %v16300_v14, %s13850_s23 }
0x15cd   :  { %6870 = vrot.lane.b32.xlu0 %v16308_v20, %s13850_s23 }
0x15d0   :  { %6917 = vrot.lane.b32.xlu1 %v16306_v17, %s13850_s23 }
0x15eb   :  { %v6412_v8 = vpop.xlane.xlu0 %6411 }
0x15ec   :  { %v6454_v23 = vsub.f32 %v16362_v22, %v6412_v8 }
0x15ee   :  { %v6472_v52 = vmul.f32 1.442695, %v6454_v23  ;;  %v6409_v6 = vpop.xlane.xlu1 %6408 }
0x15ef   :  { %v6406_v61 = vpop.xlane.xlu0 %6405  ;;  %v6453_v11 = vsub.f32 %v16368_v33, %v6409_v6 }
0x15f0   :  { %13330 = vpow2.f32 %v6472_v52  ;;  %v6452_v30 = vsub.f32 %v16364_v56, %v6406_v61 }
0x15f1   :  { %v6470_v32 = vmul.f32 1.442695, %v6453_v11 }
0x15f2   :  { %v6468_v25 = vmul.f32 1.442695, %v6452_v30 }
0x15f3   :  { %v6415_v4 = vpop.xlane.xlu0 %6414 }
0x15f4   :  { %13332 = vpow2.f32 %v6468_v25  ;;  %v6455_v7 = vsub.f32 %v16372_v44, %v6415_v4 }
0x15f6   :  { %v6474_v37 = vmul.f32 1.442695, %v6455_v7 }
0x15f8   :  { %13334 = vpow2.f32 %v6474_v37 }
0x15f9   :  { %v6424_v28 = vpop.xlane.xlu0 %6423  ;;  %13336 = vpow2.f32 %v6470_v32 }
0x15fa   :  { %v16446_v9 = vpop.eup %13330  ;;  %v6458_v22 = vsub.f32 %v16378_v48, %v6424_v28 }
0x15fb   :  { %v6427_v43 = vpop.xlane.xlu1 %6426  ;;  %v6506_v56 = vsel %vm953_vm3, %v16446_v9, 0.0 }
0x15fc   :  { %v6480_v16 = vmul.f32 1.442695, %v6458_v22  ;;  %v6459_v33 = vsub.f32 %v16382_v39, %v6427_v43  ;;  %6507 = vadd.xlane.f32.xlu0 %v6506_v56 }
0x15fd   :  { %v6418_v35 = vpop.xlane.xlu0 %6417 }
0x15fe   :  { %v16452_v47 = vpop.eup %13332  ;;  %13338 = vpow2.f32 %v6480_v16  ;;  %v6482_v44 = vmul.f32 1.442695, %v6459_v33  ;;  %v6456_v58 = vsub.f32 %v16380_v2, %v6418_v35 }
0x15ff   :  { %v6421_v53 = vpop.xlane.xlu1 %6420  ;;  %v6500_v29 = vsel %vm953_vm3, %v16452_v47, 0.0 }
0x1600   :  { %13340 = vpow2.f32 %v6482_v44  ;;  %v6476_v48 = vmul.f32 1.442695, %v6456_v58  ;;  %v6457_v49 = vsub.f32 %v16386_v0, %v6421_v53  ;;  %6501 = vadd.xlane.f32.xlu0 %v6500_v29 }
0x1601   :  { %v6436_v42 = vpop.xlane.xlu0 %6435 }
0x1602   :  { %v16458_v8 = vpop.eup %13334  ;;  %13342 = vpow2.f32 %v6476_v48  ;;  %v6478_v39 = vmul.f32 1.442695, %v6457_v49  ;;  %v6462_v23 = vsub.f32 %v16392_v38, %v6436_v42 }
0x1603   :  { %v6439_v52 = vpop.xlane.xlu1 %6438  ;;  %v6509_v2 = vsel %vm953_vm3, %v16458_v8, 0.0  ;;  %v16463_v6 = vpop.eup %13336 }
0x1604   :  { %13344 = vpow2.f32 %v6478_v39  ;;  %v6488_v61 = vmul.f32 1.442695, %v6462_v23  ;;  %v6463_v30 = vsub.f32 %v16398_v41, %v6439_v52  ;;  %6510 = vadd.xlane.f32.xlu1 %v6509_v2  ;;  %v6503_v38 = vsel %vm953_vm3, %v16463_v6, 0.0 }
0x1605   :  { %v6430_v0 = vpop.xlane.xlu0 %6429 }
0x1606   :  { %13346 = vpow2.f32 %v6488_v61  ;;  %v6490_v11 = vmul.f32 1.442695, %v6463_v30  ;;  %v6460_v25 = vsub.f32 %v16396_v24, %v6430_v0 }
0x1607   :  { %v6433_v4 = vpop.xlane.xlu1 %6432 }
0x1608   :  { %v16469_v7 = vpop.eup %13338  ;;  %13348 = vpow2.f32 %v6490_v11  ;;  %v6484_v32 = vmul.f32 1.442695, %v6460_v25  ;;  %v6461_v37 = vsub.f32 %v16402_v45, %v6433_v4  ;;  %6504 = vadd.xlane.f32.xlu1 %v6503_v38 }
0x1609   :  { %v6518_v41 = vsel %vm953_vm3, %v16469_v7, 0.0 }
0x160a   :  { %v16474_v28 = vpop.eup %13340  ;;  %13350 = vpow2.f32 %v6484_v32  ;;  %v6486_v22 = vmul.f32 1.442695, %v6461_v37  ;;  %6519 = vadd.xlane.f32.xlu0 %v6518_v41 }
0x160b   :  { %v6636_v24 = vpop.permute.xlu1 %6635  ;;  %v6521_v43 = vsel %vm953_vm3, %v16474_v28, 0.0 }
0x160c   :  { %v16478_v56 = vpop.eup %13342  ;;  %13352 = vpow2.f32 %v6486_v22  ;;  %12233 = vmatpush3.bf16.msra.mxu1 %v6636_v24  ;;  %6522 = vadd.xlane.f32.xlu1 %v6521_v43 }
0x160d   :  { %v6512_v45 = vsel %vm953_vm3, %v16478_v56, 0.0  ;;  %12244 = vmatprep.subr.bf16.mxu1 %v18197_v51 }
0x160e   :  { %v16483_v16 = vpop.eup %13344  ;;  %6513 = vadd.xlane.f32.xlu0 %v6512_v45 }
0x160f   :  { %v6515_v33 = vsel %vm953_vm3, %v16483_v16, 0.0  ;;  %v16505_v39 = vpop.permute.xlu1 %6682 }
0x1610   :  { %v16487_v35 = vpop.eup %13346  ;;  %6516 = vadd.xlane.f32.xlu1 %v6515_v33 }
0x1611   :  { %v6530_v44 = vsel %vm953_vm3, %v16487_v35, 0.0 }
0x1612   :  { %v16491_v58 = vpop.eup %13348  ;;  %6531 = vadd.xlane.f32.xlu0 %v6530_v44 }
0x1613   :  { %v6533_v53 = vsel %vm953_vm3, %v16491_v58, 0.0  ;;  %v16509_v0 = vpop.permute.xlu1 %6729 }
0x1614   :  { %v16495_v29 = vpop.eup %13350  ;;  %6534 = vadd.xlane.f32.xlu1 %v6533_v53 }
0x1615   :  { %v6524_v48 = vsel %vm953_vm3, %v16495_v29, 0.0 }
0x1616   :  { %v16499_v49 = vpop.eup %13352  ;;  %6525 = vadd.xlane.f32.xlu0 %v6524_v48 }
0x1617   :  { %v6527_v42 = vsel %vm953_vm3, %v16499_v49, 0.0  ;;  %v16512_v4 = vpop.permute.xlu1 %6823 }
0x1618   :  { %6528 = vadd.xlane.f32.xlu1 %v6527_v42 }
0x1629   :  { %7017 = vrot.lane.b32.xlu1 %v16282_v26, %s13851_s24 }
0x1638   :  { %v6448_v23 = vpop.xlane.xlu0 %6447 }
0x1639   :  { %v6466_v52 = vsub.f32 %v16418_v63, %v6448_v23 }
0x163b   :  { %v6496_v2 = vmul.f32 1.442695, %v6466_v52 }
0x163c   :  { %v6442_v61 = vpop.xlane.xlu0 %6441 }
0x163d   :  { %13354 = vpow2.f32 %v6496_v2  ;;  %v6464_v30 = vsub.f32 %v16420_v1, %v6442_v61 }
0x163f   :  { %v6492_v11 = vmul.f32 1.442695, %v6464_v30 }
0x1640   :  { %v6589_v25 = vpop.permute.xlu0 %6588 }
0x1641   :  { %13356 = vpow2.f32 %v6492_v11  ;;  %12227 = vmatpush3.bf16.msra.mxu0 %v6589_v25 }
0x1642   :  { %12238 = vmatprep.subr.bf16.mxu0 %v18197_v51 }
0x1647   :  { %v16514_v38 = vpop.eup %13354 }
0x1648   :  { %v6451_v32 = vpop.xlane.xlu1 %6450  ;;  %v6542_v63 = vsel %vm953_vm3, %v16514_v38, 0.0 }
0x1649   :  { %v6467_v37 = vsub.f32 %v16426_v34, %v6451_v32  ;;  %6543 = vadd.xlane.f32.xlu0 %v6542_v63 }
0x164b   :  { %v16519_v1 = vpop.eup %13356  ;;  %v6498_v41 = vmul.f32 1.442695, %v6467_v37 }
0x164c   :  { %v6445_v22 = vpop.xlane.xlu1 %6444  ;;  %v6536_v24 = vsel %vm953_vm3, %v16519_v1, 0.0 }
0x164d   :  { %13358 = vpow2.f32 %v6498_v41  ;;  %v6465_v43 = vsub.f32 %v16428_v55, %v6445_v22  ;;  %6537 = vadd.xlane.f32.xlu0 %v6536_v24  ;;  %v16558_v55 = vpop.permute.xlu0 %6776 }
0x164f   :  { %v6494_v45 = vmul.f32 1.442695, %v6465_v43 }
0x1650   :  { %v16566_v23 = vpop.permute.xlu1 %6917 }
0x1651   :  { %13360 = vpow2.f32 %v6494_v45  ;;  %v16564_v48 = vpop.permute.xlu0 %6870 }
0x1657   :  { %v16524_v33 = vpop.eup %13358 }
0x1658   :  { %v6545_v44 = vsel %vm953_vm3, %v16524_v33, 0.0 }
0x1659   :  { %6546 = vadd.xlane.f32.xlu1 %v6545_v44 }
0x165b   :  { %v16528_v34 = vpop.eup %13360 }
0x165c   :  { %v6539_v53 = vsel %vm953_vm3, %v16528_v34, 0.0 }
0x165d   :  { %6540 = vadd.xlane.f32.xlu1 %v6539_v53 }
0x1663   :  { %6966 = vrot.lane.b32.xlu0 %v16284_v31, %s13851_s24 }
0x1667   :  { %6964 = vrot.lane.b32.xlu0 %v16284_v31, %s13852_s25 }
0x166b   :  { %7015 = vrot.lane.b32.xlu0 %v16282_v26, %s13852_s25 }
0x166e   :  { %7068 = vrot.lane.b32.xlu1 %v16292_v18, %s13851_s24 }
0x166f   :  { %7066 = vrot.lane.b32.xlu0 %v16292_v18, %s13852_s25 }
0x1672   :  { %7119 = vrot.lane.b32.xlu1 %v16290_v62, %s13851_s24 }
0x1673   :  { %7117 = vrot.lane.b32.xlu0 %v16290_v62, %s13852_s25 }
0x1676   :  { %7170 = vrot.lane.b32.xlu1 %v16300_v14, %s13851_s24 }
0x1677   :  { %7168 = vrot.lane.b32.xlu0 %v16300_v14, %s13852_s25 }
0x167a   :  { %7221 = vrot.lane.b32.xlu1 %v16298_v5, %s13851_s24 }
0x167b   :  { %7219 = vrot.lane.b32.xlu0 %v16298_v5, %s13852_s25 }
0x167e   :  { %7272 = vrot.lane.b32.xlu1 %v16308_v20, %s13851_s24 }
0x167f   :  { %7270 = vrot.lane.b32.xlu0 %v16308_v20, %s13852_s25 }
0x1682   :  { %7323 = vrot.lane.b32.xlu1 %v16306_v17, %s13851_s24 }
0x1686   :  { %7321 = vrot.lane.b32.xlu1 %v16306_v17, %s13852_s25 }
0x1689   :  { %v6508_v42 = vpop.xlane.xlu0 %6507 }
0x168a   :  { %13362 = vrcp.f32 %v6508_v42 }
0x168d   :  { %v6502_v52 = vpop.xlane.xlu0 %6501 }
0x1691   :  { %v6511_v2 = vpop.xlane.xlu1 %6510 }
0x1692   :  { %13364 = vrcp.f32 %v6511_v2 }
0x1693   :  { %13366 = vrcp.f32 %v6502_v52 }
0x1694   :  { %v13363_v25 = vpop.eup %13362 }
0x1695   :  { %v6505_v61 = vpop.xlane.xlu1 %6504  ;;  %v6566_v37 = vmul.f32 %v13363_v25, %v16446_v9 }
0x1696   :  { %13368 = vrcp.f32 %v6505_v61 }
0x1697   :  { %v6520_v30 = vpop.xlane.xlu0 %6519 }
0x1698   :  { %13370 = vrcp.f32 %v6520_v30 }
0x1699   :  { %v6523_v11 = vpop.xlane.xlu1 %6522 }
0x169a   :  { %13372 = vrcp.f32 %v6523_v11 }
0x169b   :  { %v6514_v32 = vpop.xlane.xlu0 %6513 }
0x169c   :  { %v13365_v63 = vpop.eup %13364  ;;  %13374 = vrcp.f32 %v6514_v32 }
0x169d   :  { %v6567_v41 = vmul.f32 %v13365_v63, %v16458_v8  ;;  %v6517_v22 = vpop.xlane.xlu1 %6516  ;;  %v13367_v24 = vpop.eup %13366 }
0x169e   :  { %13376 = vrcp.f32 %v6517_v22  ;;  %v6564_v53 = vmul.f32 %v13367_v24, %v16452_v47 }
0x169f   :  { %v6532_v43 = vpop.xlane.xlu0 %6531  ;;  %v6581_v45 = vpack.c.bf16 %v6567_v41, %v6566_v37 }
0x16a0   :  { %v13369_v44 = vpop.eup %13368  ;;  %13378 = vrcp.f32 %v6532_v43 }
0x16a1   :  { %v6565_v42 = vmul.f32 %v13369_v44, %v16463_v6  ;;  %v6535_v52 = vpop.xlane.xlu1 %6534  ;;  %12235 = vmatmul.mubr.msk.bf16.vlgmr.msra.gmra.mrb[192].mxu1 %vm953_vm3, %v6581_v45 }
0x16a2   :  { %v13371_v2 = vpop.eup %13370  ;;  %13380 = vrcp.f32 %v6535_v52  ;;  %12245 = vmatpush3.bf16.msra.mxu1 %v16509_v0  ;;  %12246 = vmatprep.mubr.msk.bf16.mxu1 %vm13848_vm1, %v18197_v51 }
0x16a3   :  { %v6526_v9 = vpop.xlane.xlu0 %6525  ;;  %v6580_v8 = vpack.c.bf16 %v6565_v42, %v6564_v53  ;;  %12256 = vmatprep.subr.bf16.mxu1 %v18197_v51  ;;  %v6570_v47 = vmul.f32 %v13371_v2, %v16469_v7 }
0x16a4   :  { %v13373_v61 = vpop.eup %13372  ;;  %13382 = vrcp.f32 %v6526_v9 }
0x16a5   :  { %v6571_v6 = vmul.f32 %v13373_v61, %v16474_v28  ;;  %v6529_v30 = vpop.xlane.xlu1 %6528  ;;  %12229 = vmatmul.mubr.msk.bf16.vlgmr.msra.gmra.mrb[176].mxu0 %vm953_vm3, %v6580_v8 }
0x16a6   :  { %v13375_v11 = vpop.eup %13374  ;;  %13384 = vrcp.f32 %v6529_v30  ;;  %12239 = vmatpush3.bf16.msra.mxu0 %v16505_v39  ;;  %12240 = vmatprep.mubr.msk.bf16.mxu0 %vm13848_vm1, %v18197_v51 }
0x16a7   :  { %v6583_v0 = vpack.c.bf16 %v6571_v6, %v6570_v47  ;;  %12250 = vmatprep.subr.bf16.mxu0 %v18197_v51  ;;  %v6568_v32 = vmul.f32 %v13375_v11, %v16478_v56 }
0x16a8   :  { %v13377_v25 = vpop.eup %13376 }
0x16a9   :  { %v6569_v7 = vmul.f32 %v13377_v25, %v16483_v16  ;;  %12247 = vmatmul.mubr.msk.bf16.vlgmr.msra.gmra.mrb[196].mxu1 %vm953_vm3, %v6583_v0 }
0x16aa   :  { %v13379_v28 = vpop.eup %13378  ;;  %12257 = vmatpush3.bf16.msra.mxu1 %v16512_v4  ;;  %12258 = vmatprep.mubr.msk.bf16.mxu1 %vm13848_vm1, %v18197_v51 }
0x16ab   :  { %v6582_v39 = vpack.c.bf16 %v6569_v7, %v6568_v32  ;;  %12268 = vmatprep.subr.bf16.mxu1 %v18197_v51  ;;  %v6574_v37 = vmul.f32 %v13379_v28, %v16487_v35 }
0x16ac   :  { %v13381_v63 = vpop.eup %13380 }
0x16ad   :  { %v6575_v41 = vmul.f32 %v13381_v63, %v16491_v58  ;;  %12241 = vmatmul.mubr.msk.bf16.vlgmr.msra.gmra.mrb[180].mxu0 %vm953_vm3, %v6582_v39 }
0x16ae   :  { %v13383_v56 = vpop.eup %13382  ;;  %12251 = vmatpush3.bf16.msra.mxu0 %v16558_v55  ;;  %12252 = vmatprep.mubr.msk.bf16.mxu0 %vm13848_vm1, %v18197_v51 }
0x16af   :  { %v6585_v16 = vpack.c.bf16 %v6575_v41, %v6574_v37  ;;  %12262 = vmatprep.subr.bf16.mxu0 %v18197_v51  ;;  %v6572_v22 = vmul.f32 %v13383_v56, %v16495_v29  ;;  %v7018_v29 = vpop.permute.xlu1 %7017 }
0x16b0   :  { %v13385_v4 = vpop.eup %13384  ;;  %v7023_v6 = vsel %vm539_vm2, %v7018_v29, 0 }
0x16b1   :  { %v6573_v24 = vmul.f32 %v13385_v4, %v16499_v49  ;;  %12259 = vmatmul.mubr.msk.bf16.vlgmr.msra.gmra.mrb[200].mxu1 %vm953_vm3, %v6585_v16 }
0x16b2   :  { %12269 = vmatpush3.bf16.msra.mxu1 %v16566_v23  ;;  %12270 = vmatprep.mubr.msk.bf16.mxu1 %vm13848_vm1, %v18197_v51 }
0x16b3   :  { %v6584_v35 = vpack.c.bf16 %v6573_v24, %v6572_v22  ;;  %12280 = vmatprep.subr.bf16.mxu1 %v18197_v51 }
0x16b5   :  { %12253 = vmatmul.mubr.msk.bf16.vlgmr.msra.gmra.mrb[184].mxu0 %vm953_vm3, %v6584_v35 }
0x16b6   :  { %12263 = vmatpush3.bf16.msra.mxu0 %v16564_v48  ;;  %12264 = vmatprep.mubr.msk.bf16.mxu0 %vm13848_vm1, %v18197_v51 }
0x16b7   :  { %12274 = vmatprep.subr.bf16.mxu0 %v18197_v51 }
0x16d6   :  { %v6544_v58 = vpop.xlane.xlu0 %6543 }
0x16d7   :  { %13386 = vrcp.f32 %v6544_v58 }
0x16da   :  { %v6538_v49 = vpop.xlane.xlu0 %6537 }
0x16de   :  { %v6967_v23 = vpop.permute.xlu0 %6966 }
0x16df   :  { %v6972_v0 = vsel %vm539_vm2, %v6967_v23, 0 }
0x16e1   :  { %v13387_v44 = vpop.eup %13386 }
0x16e2   :  { %v6965_v53 = vpop.permute.xlu0 %6964  ;;  %v6578_v48 = vmul.f32 %v13387_v44, %v16514_v38 }
0x16e6   :  { %v6547_v55 = vpop.xlane.xlu1 %6546  ;;  %v7016_v47 = vpop.permute.xlu0 %7015 }
0x16e7   :  { %13388 = vrcp.f32 %v6547_v55 }
0x16e8   :  { %13390 = vrcp.f32 %v6538_v49 }
0x16ea   :  { %v6541_v43 = vpop.xlane.xlu1 %6540  ;;  %v7067_v25 = vpop.permute.xlu0 %7066 }
0x16eb   :  { %13392 = vrcp.f32 %v6541_v43 }
0x16ee   :  { %v7069_v45 = vpop.permute.xlu1 %7068  ;;  %v7118_v32 = vpop.permute.xlu0 %7117 }
0x16ef   :  { %v7074_v7 = vsel %vm539_vm2, %v7069_v45, 0 }
0x16f1   :  { %v13389_v42 = vpop.eup %13388 }
0x16f2   :  { %v6579_v52 = vmul.f32 %v13389_v42, %v16524_v33  ;;  %v13391_v2 = vpop.eup %13390  ;;  %v7120_v9 = vpop.permute.xlu1 %7119 }
0x16f3   :  { %v6576_v30 = vmul.f32 %v13391_v2, %v16519_v1  ;;  %v7125_v1 = vsel %vm539_vm2, %v7120_v9, 0  ;;  %v7169_v63 = vpop.permute.xlu0 %7168 }
0x16f4   :  { %v6587_v8 = vpack.c.bf16 %v6579_v52, %v6578_v48 }
0x16f5   :  { %v13393_v61 = vpop.eup %13392 }
0x16f6   :  { %v6577_v11 = vmul.f32 %v13393_v61, %v16528_v34  ;;  %12271 = vmatmul.mubr.msk.bf16.vlgmr.msra.gmra.mrb[204].mxu1 %vm953_vm3, %v6587_v8  ;;  %v7171_v33 = vpop.permute.xlu1 %7170 }
0x16f7   :  { %12281 = vmatpush3.bf16.xpose.msra.mxu1 %v7023_v6  ;;  %12282 = vmatprep.mubr.msk.bf16.mxu1 %vm13848_vm1, %v18197_v51  ;;  %v7176_v37 = vsel %vm539_vm2, %v7171_v33, 0  ;;  %v7220_v56 = vpop.permute.xlu0 %7219 }
0x16f8   :  { %v6586_v38 = vpack.c.bf16 %v6577_v11, %v6576_v30  ;;  %12292 = vmatprep.subr.bf16.mxu1 %v18197_v51 }
0x16fa   :  { %12265 = vmatmul.mubr.msk.bf16.vlgmr.msra.gmra.mrb[188].mxu0 %vm953_vm3, %v6586_v38  ;;  %v7222_v34 = vpop.permute.xlu1 %7221 }
0x16fb   :  { %12275 = vmatpush3.bf16.xpose.msra.mxu0 %v6972_v0  ;;  %12276 = vmatprep.mubr.msk.bf16.mxu0 %vm13848_vm1, %v18197_v51  ;;  %v7227_v39 = vsel %vm539_vm2, %v7222_v34, 0  ;;  %v7271_v24 = vpop.permute.xlu0 %7270 }
0x16fc   :  { %12286 = vmatprep.subr.bf16.mxu0 %v18197_v51 }
0x16fe   :  { %12283 = vmatmul.mubr.msk.bf16.vlgmr.msra.gmra.mrb[208].mxu1 %vm539_vm2, %v7016_v47  ;;  %v7273_v28 = vpop.permute.xlu1 %7272 }
0x16ff   :  { %12293 = vmatpush3.bf16.xpose.msra.mxu1 %v7125_v1  ;;  %12294 = vmatprep.mubr.msk.bf16.mxu1 %vm13848_vm1, %v18197_v51  ;;  %v7278_v4 = vsel %vm539_vm2, %v7273_v28, 0 }
0x1700   :  { %12304 = vmatprep.subr.bf16.mxu1 %v18197_v51 }
0x1702   :  { %12277 = vmatmul.mubr.msk.bf16.vlgmr.msra.gmra.mrb[192].mxu0 %vm539_vm2, %v6965_v53  ;;  %v7324_v41 = vpop.permute.xlu1 %7323 }
0x1703   :  { %12287 = vmatpush3.bf16.xpose.msra.mxu0 %v7074_v7  ;;  %12288 = vmatprep.mubr.msk.bf16.mxu0 %vm13848_vm1, %v18197_v51  ;;  %v7329_v16 = vsel %vm539_vm2, %v7324_v41, 0 }
0x1704   :  { %12298 = vmatprep.subr.bf16.mxu0 %v18197_v51 }
0x1706   :  { %12295 = vmatmul.mubr.msk.bf16.vlgmr.msra.gmra.mrb[212].mxu1 %vm539_vm2, %v7118_v32  ;;  %v7322_v22 = vpop.permute.xlu1 %7321 }
0x1707   :  { %12305 = vmatpush3.bf16.xpose.msra.mxu1 %v7227_v39  ;;  %12306 = vmatprep.mubr.msk.bf16.mxu1 %vm13848_vm1, %v18197_v51 }
0x1708   :  { %12316 = vmatprep.subr.bf16.mxu1 %v18197_v51 }
0x170a   :  { %12289 = vmatmul.mubr.msk.bf16.vlgmr.msra.gmra.mrb[196].mxu0 %vm539_vm2, %v7067_v25 }
0x170b   :  { %12299 = vmatpush3.bf16.xpose.msra.mxu0 %v7176_v37  ;;  %12300 = vmatprep.mubr.msk.bf16.mxu0 %vm13848_vm1, %v18197_v51 }
0x170c   :  { %12310 = vmatprep.subr.bf16.mxu0 %v18197_v51 }
0x170e   :  { %12307 = vmatmul.mubr.msk.bf16.vlgmr.msra.gmra.mrb[216].mxu1 %vm539_vm2, %v7220_v56 }
0x170f   :  { %12317 = vmatpush3.bf16.xpose.msra.mxu1 %v7329_v16  ;;  %12318 = vmatprep.mubr.msk.bf16.mxu1 %vm13848_vm1, %v18197_v51 }
0x1710   :  { %12328 = vmatprep.subr.bf16.mxu1 %v18197_v51 }
0x1712   :  { %12301 = vmatmul.mubr.msk.bf16.vlgmr.msra.gmra.mrb[200].mxu0 %vm539_vm2, %v7169_v63 }
0x1713   :  { %12311 = vmatpush3.bf16.xpose.msra.mxu0 %v7278_v4  ;;  %12312 = vmatprep.mubr.msk.bf16.mxu0 %vm13848_vm1, %v18197_v51 }
0x1714   :  { %12322 = vmatprep.subr.bf16.mxu0 %v18197_v51 }
0x1716   :  { %12319 = vmatmul.mubr.msk.bf16.vlgmr.msra.gmra.mrb[220].mxu1 %vm539_vm2, %v7322_v22 }
0x1717   :  { %12330 = vmatprep.mubr.msk.bf16.mxu1 %vm13848_vm1, %v18197_v51 }
0x171a   :  { %12313 = vmatmul.mubr.msk.bf16.vlgmr.msra.gmra.mrb[204].mxu0 %vm539_vm2, %v7271_v24 }
0x171b   :  { %12324 = vmatprep.mubr.msk.bf16.mxu0 %vm13848_vm1, %v18197_v51 }
0x1774   :  { %v16660_v35 = vpop.f32.mrb[192].mxu1 }
0x1775   :  { %18250 = vst [vmem:[#allocation31_spill] sm:$0xff] %v16660_v35  ;;  %v12236_v58 = vpop.f32.mrb[193].mxu1 }
0x1776   :  { %v16662_v29 = vpop.f32.mrb[194].mxu1 }
0x1777   :  { %18251 = vst [vmem:[#allocation30_spill] sm:$0xff] %v16662_v29  ;;  %v12237_v49 = vpop.f32.mrb[195].mxu1 }
0x1778   :  { %v16664_v55 = vpop.f32.mrb[176].mxu0 }
0x1779   :  { %18252 = vst [vmem:[#allocation34_spill] sm:$0xff] %v16664_v55  ;;  %v12230_v23 = vpop.f32.mrb[177].mxu0 }
0x177a   :  { %v16666_v43 = vpop.f32.mrb[178].mxu0 }
0x177b   :  { %18253 = vst [vmem:[#allocation35_spill] sm:$0xff] %v16666_v43  ;;  %v12231_v45 = vpop.f32.mrb[179].mxu0 }
0x177c   :  { %v16668_v44 = vpop.f32.mrb[196].mxu1 }
0x177d   :  { %18254 = vst [vmem:[#allocation36_spill] sm:$0xff] %v16668_v44  ;;  %v12248_v53 = vpop.f32.mrb[197].mxu1 }
0x177e   :  { %v16670_v42 = vpop.f32.mrb[198].mxu1 }
0x177f   :  { %18255 = vst [vmem:[#allocation37_spill] sm:$0xff] %v16670_v42  ;;  %v12249_v48 = vpop.f32.mrb[199].mxu1 }
0x1780   :  { %v16672_v52 = vpop.f32.mrb[180].mxu0 }
0x1781   :  { %18256 = vst [vmem:[#allocation38_spill] sm:$0xff] %v16672_v52  ;;  %v12242_v2 = vpop.f32.mrb[181].mxu0 }
0x1782   :  { %v16674_v9 = vpop.f32.mrb[182].mxu0 }
0x1783   :  { %18257 = vst [vmem:[#allocation39_spill] sm:$0xff] %v16674_v9  ;;  %v12243_v8 = vpop.f32.mrb[183].mxu0 }
0x1784   :  { %v16676_v61 = vpop.f32.mrb[200].mxu1 }
0x1785   :  { %18258 = vst [vmem:[#allocation40_spill] sm:$0xff] %v16676_v61  ;;  %v12260_v47 = vpop.f32.mrb[201].mxu1 }
0x1786   :  { %v16678_v6 = vpop.f32.mrb[202].mxu1 }
0x1787   :  { %18259 = vst [vmem:[#allocation41_spill] sm:$0xff] %v16678_v6  ;;  %v12261_v30 = vpop.f32.mrb[203].mxu1 }
0x1788   :  { %v16680_v11 = vpop.f32.mrb[184].mxu0 }
0x1789   :  { %18260 = vst [vmem:[#allocation42_spill] sm:$0xff] %v16680_v11  ;;  %v12254_v38 = vpop.f32.mrb[185].mxu0 }
0x178a   :  { %v16682_v33 = vpop.f32.mrb[186].mxu0 }
0x178b   :  { %18261 = vst [vmem:[#allocation43_spill] sm:$0xff] %v16682_v33  ;;  %v12255_v0 = vpop.f32.mrb[187].mxu0 }
0x17c9   :  { %v16684_v25 = vpop.f32.mrb[204].mxu1 }
0x17ca   :  { %18262 = vst [vmem:[#allocation44_spill] sm:$0xff] %v16684_v25  ;;  %v12272_v1 = vpop.f32.mrb[205].mxu1 }
0x17cb   :  { %v16686_v34 = vpop.f32.mrb[206].mxu1 }
0x17cc   :  { %18263 = vst [vmem:[#allocation45_spill] sm:$0xff] %v16686_v34  ;;  %v12273_v32 = vpop.f32.mrb[207].mxu1 }
0x17cd   :  { %v16688_v7 = vpop.f32.mrb[188].mxu0 }
0x17ce   :  { %18264 = vst [vmem:[#allocation46_spill] sm:$0xff] %v16688_v7  ;;  %v12266_v28 = vpop.f32.mrb[189].mxu0 }
0x17cf   :  { %v16690_v39 = vpop.f32.mrb[190].mxu0 }
0x17d0   :  { %18265 = vst [vmem:[#allocation47_spill] sm:$0xff] %v16690_v39  ;;  %v12267_v63 = vpop.f32.mrb[191].mxu0 }
0x17d1   :  { %v7059_v37 = vpop.f32.mrb[208].mxu1 }
0x17d2   :  { %v16692_v41 = vmul.f32 0.35355338, %v7059_v37  ;;  %v12284_v56 = vpop.f32.mrb[209].mxu1 }
0x17d3   :  { %v7062_v16 = vpop.f32.mrb[210].mxu1 }
0x17d4   :  { %v12285_v4 = vpop.f32.mrb[211].mxu1  ;;  %v7394_v22 = vsel %vm953_vm3, %v16692_v41, -inf  ;;  %v16698_v45 = vmul.f32 0.35355338, %v7062_v16 }
0x17d5   :  { %v7008_v24 = vpop.f32.mrb[192].mxu0  ;;  %7395 = vmax.xlane.f32.xlu0 %v7394_v22 }
0x17d6   :  { %v16696_v58 = vmul.f32 0.35355338, %v7008_v24  ;;  %v12278_v49 = vpop.f32.mrb[193].mxu0  ;;  %v7397_v28 = vsel %vm953_vm3, %v16698_v45, -inf }
0x17d7   :  { %v7011_v23 = vpop.f32.mrb[194].mxu0 }
0x17d8   :  { %v16700_v53 = vmul.f32 0.35355338, %v7011_v23  ;;  %v12279_v48 = vpop.f32.mrb[195].mxu0  ;;  %v7388_v2 = vsel %vm953_vm3, %v16696_v58, -inf }
0x17d9   :  { %7389 = vmax.xlane.f32.xlu0 %v7388_v2  ;;  %v7161_v8 = vpop.f32.mrb[212].mxu1 }
0x17da   :  { %v12296_v47 = vpop.f32.mrb[213].mxu1  ;;  %v7391_v30 = vsel %vm953_vm3, %v16700_v53, -inf  ;;  %v16706_v0 = vmul.f32 0.35355338, %v7161_v8 }
0x17db   :  { %7392 = vmax.xlane.f32.xlu1 %v7391_v30  ;;  %v7164_v38 = vpop.f32.mrb[214].mxu1 }
0x17dc   :  { %v16708_v1 = vmul.f32 0.35355338, %v7164_v38  ;;  %v12297_v32 = vpop.f32.mrb[215].mxu1  ;;  %v7406_v49 = vsel %vm953_vm3, %v16706_v0, -inf }
0x17dd   :  { %7398 = vmax.xlane.f32.xlu0 %v7397_v28  ;;  %v7110_v63 = vpop.f32.mrb[196].mxu0 }
0x17de   :  { %v12290_v37 = vpop.f32.mrb[197].mxu0  ;;  %v7409_v56 = vsel %vm953_vm3, %v16708_v1, -inf  ;;  %v16714_v4 = vmul.f32 0.35355338, %v7110_v63 }
0x17df   :  { %v7113_v16 = vpop.f32.mrb[198].mxu0  ;;  %7410 = vmax.xlane.f32.xlu1 %v7409_v56 }
0x17e0   :  { %v16716_v22 = vmul.f32 0.35355338, %v7113_v16  ;;  %v12291_v24 = vpop.f32.mrb[199].mxu0  ;;  %v7400_v32 = vsel %vm953_vm3, %v16714_v4, -inf }
0x17e1   :  { %7407 = vmax.xlane.f32.xlu0 %v7406_v49  ;;  %v7263_v23 = vpop.f32.mrb[216].mxu1 }
0x17e2   :  { %v12308_v48 = vpop.f32.mrb[217].mxu1  ;;  %v7403_v2 = vsel %vm953_vm3, %v16716_v22, -inf  ;;  %v16722_v47 = vmul.f32 0.35355338, %v7263_v23 }
0x17e3   :  { %7404 = vmax.xlane.f32.xlu1 %v7403_v2  ;;  %v7266_v8 = vpop.f32.mrb[218].mxu1 }
0x17e4   :  { %v16724_v30 = vmul.f32 0.35355338, %v7266_v8  ;;  %v12309_v38 = vpop.f32.mrb[219].mxu1  ;;  %v7418_v23 = vsel %vm953_vm3, %v16722_v47, -inf }
0x17e5   :  { %7401 = vmax.xlane.f32.xlu0 %v7400_v32  ;;  %v7212_v28 = vpop.f32.mrb[200].mxu0 }
0x17e6   :  { %v12302_v63 = vpop.f32.mrb[201].mxu0  ;;  %v7421_v37 = vsel %vm953_vm3, %v16724_v30, -inf  ;;  %v16730_v16 = vmul.f32 0.35355338, %v7212_v28 }
0x17e7   :  { %v7215_v56 = vpop.f32.mrb[202].mxu0  ;;  %7422 = vmax.xlane.f32.xlu1 %v7421_v37 }
0x17e8   :  { %v16732_v24 = vmul.f32 0.35355338, %v7215_v56  ;;  %v12303_v49 = vpop.f32.mrb[203].mxu0  ;;  %v7412_v28 = vsel %vm953_vm3, %v16730_v16, -inf }
0x17e9   :  { %7419 = vmax.xlane.f32.xlu0 %v7418_v23  ;;  %v7365_v48 = vpop.f32.mrb[220].mxu1 }
0x17ea   :  { %v12320_v2 = vpop.f32.mrb[221].mxu1  ;;  %v7415_v8 = vsel %vm953_vm3, %v16732_v24, -inf  ;;  %v16738_v32 = vmul.f32 0.35355338, %v7365_v48 }
0x17eb   :  { %7416 = vmax.xlane.f32.xlu1 %v7415_v8  ;;  %v7368_v38 = vpop.f32.mrb[222].mxu1 }
0x17ec   :  { %v12321_v63 = vpop.f32.mrb[223].mxu1  ;;  %v7430_v2 = vsel %vm953_vm3, %v16738_v32, -inf  ;;  %v16762_v48 = vmul.f32 0.35355338, %v7368_v38 }
0x17ed   :  { %7413 = vmax.xlane.f32.xlu0 %v7412_v28  ;;  %v7314_v37 = vpop.f32.mrb[204].mxu0 }
0x17ee   :  { %v12314_v56 = vpop.f32.mrb[205].mxu0  ;;  %v16742_v10 = vmul.f32 0.35355338, %v7314_v37  ;;  %v7433_v28 = vsel %vm953_vm3, %v16762_v48, -inf }
0x17ef   :  { %v7317_v49 = vpop.f32.mrb[206].mxu0 }
0x17f0   :  { %v12315_v23 = vpop.f32.mrb[207].mxu0  ;;  %v7424_v8 = vsel %vm953_vm3, %v16742_v10, -inf  ;;  %v16764_v63 = vmul.f32 0.35355338, %v7317_v49 }
0x17f1   :  { %7431 = vmax.xlane.f32.xlu0 %v7430_v2 }
0x17f2   :  { %v7427_v37 = vsel %vm953_vm3, %v16764_v63, -inf }
0x17f5   :  { %7425 = vmax.xlane.f32.xlu0 %v7424_v8 }
0x17fc   :  { %7619 = vrot.lane.b32.xlu1 %v16282_v26, %s13853_s26 }
0x1800   :  { %7666 = vrot.lane.b32.xlu1 %v16292_v18, %s13853_s26 }
0x1804   :  { %7713 = vrot.lane.b32.xlu1 %v16290_v62, %s13853_s26 }
0x1808   :  { %7807 = vrot.lane.b32.xlu1 %v16298_v5, %s13853_s26 }
0x180b   :  { %7572 = vrot.lane.b32.xlu0 %v16284_v31, %s13853_s26 }
0x180f   :  { %7760 = vrot.lane.b32.xlu0 %v16300_v14, %s13853_s26 }
0x1813   :  { %7854 = vrot.lane.b32.xlu0 %v16308_v20, %s13853_s26 }
0x182c   :  { %7434 = vmax.xlane.f32.xlu1 %v7433_v28 }
0x1830   :  { %7428 = vmax.xlane.f32.xlu1 %v7427_v37 }
0x1841   :  { %7901 = vrot.lane.b32.xlu1 %v16306_v17, %s13853_s26 }
0x1862   :  { %v7396_v56 = vpop.xlane.xlu0 %7395 }
0x1863   :  { %v7438_v23 = vsub.f32 %v16692_v41, %v7396_v56 }
0x1865   :  { %v7456_v2 = vmul.f32 1.442695, %v7438_v23 }
0x1866   :  { %v7390_v8 = vpop.xlane.xlu0 %7389 }
0x1867   :  { %13394 = vpow2.f32 %v7456_v2  ;;  %v7436_v38 = vsub.f32 %v16696_v58, %v7390_v8 }
0x1868   :  { %v7393_v49 = vpop.xlane.xlu1 %7392 }
0x1869   :  { %v7452_v50 = vmul.f32 1.442695, %v7436_v38  ;;  %v7437_v13 = vsub.f32 %v16700_v53, %v7393_v49 }
0x186a   :  { %v7399_v28 = vpop.xlane.xlu0 %7398 }
0x186b   :  { %13396 = vpow2.f32 %v7452_v50  ;;  %v7439_v40 = vsub.f32 %v16698_v45, %v7399_v28  ;;  %v7454_v19 = vmul.f32 1.442695, %v7437_v13 }
0x186c   :  { %v7411_v37 = vpop.xlane.xlu1 %7410 }
0x186d   :  { %v7458_v15 = vmul.f32 1.442695, %v7439_v40  ;;  %v7443_v36 = vsub.f32 %v16708_v1, %v7411_v37 }
0x186e   :  { %v7408_v59 = vpop.xlane.xlu0 %7407 }
0x186f   :  { %13398 = vpow2.f32 %v7458_v15  ;;  %v7442_v41 = vsub.f32 %v16706_v0, %v7408_v59  ;;  %v7466_v58 = vmul.f32 1.442695, %v7443_v36 }
0x1870   :  { %v7405_v56 = vpop.xlane.xlu1 %7404  ;;  %13400 = vpow2.f32 %v7454_v19 }
0x1871   :  { %v16778_v23 = vpop.eup %13394  ;;  %v7464_v2 = vmul.f32 1.442695, %v7442_v41  ;;  %v7441_v53 = vsub.f32 %v16716_v22, %v7405_v56 }
0x1872   :  { %v7402_v50 = vpop.xlane.xlu0 %7401  ;;  %v7490_v45 = vsel %vm953_vm3, %v16778_v23, 0.0 }
0x1873   :  { %13402 = vpow2.f32 %v7464_v2  ;;  %v7440_v40 = vsub.f32 %v16714_v4, %v7402_v50  ;;  %7491 = vadd.xlane.f32.xlu0 %v7490_v45  ;;  %v7462_v59 = vmul.f32 1.442695, %v7441_v53 }
0x1874   :  { %v7423_v13 = vpop.xlane.xlu1 %7422  ;;  %13404 = vpow2.f32 %v7466_v58 }
0x1875   :  { %v16784_v15 = vpop.eup %13396  ;;  %v7460_v0 = vmul.f32 1.442695, %v7440_v40  ;;  %v7447_v19 = vsub.f32 %v16724_v30, %v7423_v13 }
0x1876   :  { %v7420_v36 = vpop.xlane.xlu0 %7419  ;;  %v7484_v1 = vsel %vm953_vm3, %v16784_v15, 0.0 }
0x1877   :  { %13406 = vpow2.f32 %v7460_v0  ;;  %v7446_v22 = vsub.f32 %v16722_v47, %v7420_v36  ;;  %7485 = vadd.xlane.f32.xlu0 %v7484_v1  ;;  %v7474_v4 = vmul.f32 1.442695, %v7447_v19 }
0x1878   :  { %v7417_v8 = vpop.xlane.xlu1 %7416  ;;  %13408 = vpow2.f32 %v7462_v59 }
0x1879   :  { %v16790_v38 = vpop.eup %13398  ;;  %v7472_v49 = vmul.f32 1.442695, %v7446_v22  ;;  %v7445_v28 = vsub.f32 %v16732_v24, %v7417_v8 }
0x187a   :  { %v7414_v37 = vpop.xlane.xlu0 %7413  ;;  %v7493_v30 = vsel %vm953_vm3, %v16790_v38, 0.0  ;;  %v16795_v41 = vpop.eup %13400 }
0x187b   :  { %13410 = vpow2.f32 %v7472_v49  ;;  %v7444_v56 = vsub.f32 %v16730_v16, %v7414_v37  ;;  %7494 = vadd.xlane.f32.xlu1 %v7493_v30  ;;  %v7470_v2 = vmul.f32 1.442695, %v7445_v28  ;;  %v7487_v24 = vsel %vm953_vm3, %v16795_v41, 0.0 }
0x187c   :  { %v7620_v47 = vpop.permute.xlu1 %7619  ;;  %13412 = vpow2.f32 %v7474_v4 }
0x187d   :  { %v16798_v58 = vpop.eup %13402  ;;  %v7468_v53 = vmul.f32 1.442695, %v7444_v56  ;;  %12329 = vmatpush3.bf16.msra.mxu1 %v7620_v47 }
0x187e   :  { %v7432_v50 = vpop.xlane.xlu0 %7431  ;;  %v7502_v45 = vsel %vm953_vm3, %v16798_v58, 0.0  ;;  %12340 = vmatprep.subr.bf16.mxu1 %v18197_v51  ;;  %v16805_v40 = vpop.eup %13404 }
0x187f   :  { %13414 = vpow2.f32 %v7468_v53  ;;  %v7450_v16 = vsub.f32 %v16738_v32, %v7432_v50  ;;  %7488 = vadd.xlane.f32.xlu1 %v7487_v24  ;;  %7503 = vadd.xlane.f32.xlu0 %v7502_v45  ;;  %v7505_v19 = vsel %vm953_vm3, %v16805_v40, 0.0 }
0x1880   :  { %13416 = vpow2.f32 %v7470_v2 }
0x1881   :  { %v16808_v13 = vpop.eup %13406  ;;  %v7480_v59 = vmul.f32 1.442695, %v7450_v16  ;;  %v16846_v16 = vpop.permute.xlu1 %7666 }
0x1882   :  { %v7426_v0 = vpop.xlane.xlu0 %7425  ;;  %v7496_v36 = vsel %vm953_vm3, %v16808_v13, 0.0  ;;  %v16814_v1 = vpop.eup %13408 }
0x1883   :  { %13418 = vpow2.f32 %v7480_v59  ;;  %v7448_v22 = vsub.f32 %v16742_v10, %v7426_v0  ;;  %7506 = vadd.xlane.f32.xlu1 %v7505_v19  ;;  %7497 = vadd.xlane.f32.xlu0 %v7496_v36  ;;  %v7499_v49 = vsel %vm953_vm3, %v16814_v1, 0.0 }
0x1885   :  { %v16817_v32 = vpop.eup %13410  ;;  %v7476_v8 = vmul.f32 1.442695, %v7448_v22  ;;  %v16852_v59 = vpop.permute.xlu1 %7713 }
0x1886   :  { %v7573_v4 = vpop.permute.xlu0 %7572  ;;  %v7514_v28 = vsel %vm953_vm3, %v16817_v32, 0.0  ;;  %v16823_v37 = vpop.eup %13412 }
0x1887   :  { %13420 = vpow2.f32 %v7476_v8  ;;  %7500 = vadd.xlane.f32.xlu1 %v7499_v49  ;;  %7515 = vadd.xlane.f32.xlu0 %v7514_v28  ;;  %v7517_v10 = vsel %vm953_vm3, %v16823_v37, 0.0 }
0x1888   :  { %12323 = vmatpush3.bf16.msra.mxu0 %v7573_v4 }
0x1889   :  { %v16825_v30 = vpop.eup %13414  ;;  %12334 = vmatprep.subr.bf16.mxu0 %v18197_v51  ;;  %v16856_v0 = vpop.permute.xlu1 %7807 }
0x188a   :  { %v7508_v56 = vsel %vm953_vm3, %v16825_v30, 0.0  ;;  %v16832_v47 = vpop.eup %13416 }
0x188b   :  { %7518 = vadd.xlane.f32.xlu1 %v7517_v10  ;;  %7509 = vadd.xlane.f32.xlu0 %v7508_v56  ;;  %v7511_v53 = vsel %vm953_vm3, %v16832_v47, 0.0 }
0x188d   :  { %v16834_v2 = vpop.eup %13418 }
0x188e   :  { %v7526_v50 = vsel %vm953_vm3, %v16834_v2, 0.0 }
0x188f   :  { %7512 = vadd.xlane.f32.xlu1 %v7511_v53  ;;  %7527 = vadd.xlane.f32.xlu0 %v7526_v50 }
0x1891   :  { %v16840_v24 = vpop.eup %13420 }
0x1892   :  { %v7520_v45 = vsel %vm953_vm3, %v16840_v24, 0.0 }
0x1893   :  { %7521 = vadd.xlane.f32.xlu0 %v7520_v45 }
0x18a0   :  { %8001 = vrot.lane.b32.xlu1 %v16282_v26, %s13854_s27 }
0x18a9   :  { %7950 = vrot.lane.b32.xlu0 %v16284_v31, %s13854_s27 }
0x18ad   :  { %7948 = vrot.lane.b32.xlu0 %v16284_v31, %s13855_s5 }
0x18b1   :  { %7999 = vrot.lane.b32.xlu0 %v16282_v26, %s13855_s5 }
0x18b5   :  { %8050 = vrot.lane.b32.xlu0 %v16292_v18, %s13855_s5 }
0x18b9   :  { %v7435_v19 = vpop.xlane.xlu1 %7434  ;;  %8101 = vrot.lane.b32.xlu0 %v16290_v62, %s13855_s5 }
0x18ba   :  { %v7451_v36 = vsub.f32 %v16762_v48, %v7435_v19 }
0x18bc   :  { %v7482_v22 = vmul.f32 1.442695, %v7451_v36 }
0x18bd   :  { %v7429_v8 = vpop.xlane.xlu1 %7428  ;;  %8152 = vrot.lane.b32.xlu0 %v16300_v14, %s13855_s5 }
0x18be   :  { %13422 = vpow2.f32 %v7482_v22  ;;  %v7449_v4 = vsub.f32 %v16764_v63, %v7429_v8  ;;  %v16892_v63 = vpop.permute.xlu0 %7760 }
0x18c0   :  { %v7478_v49 = vmul.f32 1.442695, %v7449_v4 }
0x18c1   :  { %8203 = vrot.lane.b32.xlu0 %v16298_v5, %s13855_s5  ;;  %v16896_v45 = vpop.permute.xlu1 %7901 }
0x18c2   :  { %13424 = vpow2.f32 %v7478_v49  ;;  %v16894_v53 = vpop.permute.xlu0 %7854 }
0x18c5   :  { %8254 = vrot.lane.b32.xlu0 %v16308_v20, %s13855_s5 }
0x18c8   :  { %v16870_v28 = vpop.eup %13422 }
0x18c9   :  { %v7529_v48 = vsel %vm953_vm3, %v16870_v28, 0.0 }
0x18ca   :  { %7530 = vadd.xlane.f32.xlu1 %v7529_v48 }
0x18cc   :  { %v16874_v10 = vpop.eup %13424 }
0x18cd   :  { %v7523_v56 = vsel %vm953_vm3, %v16874_v10, 0.0 }
0x18ce   :  { %7524 = vadd.xlane.f32.xlu1 %v7523_v56 }
0x18df   :  { %8052 = vrot.lane.b32.xlu1 %v16292_v18, %s13854_s27 }
0x18e3   :  { %8103 = vrot.lane.b32.xlu1 %v16290_v62, %s13854_s27 }
0x18e7   :  { %8154 = vrot.lane.b32.xlu1 %v16300_v14, %s13854_s27 }
0x18eb   :  { %8205 = vrot.lane.b32.xlu1 %v16298_v5, %s13854_s27 }
0x18ef   :  { %8256 = vrot.lane.b32.xlu1 %v16308_v20, %s13854_s27 }
0x18f3   :  { %8307 = vrot.lane.b32.xlu1 %v16306_v17, %s13854_s27 }
0x18f7   :  { %8305 = vrot.lane.b32.xlu1 %v16306_v17, %s13855_s5 }
0x1900   :  { %v7492_v50 = vpop.xlane.xlu0 %7491 }
0x1901   :  { %13426 = vrcp.f32 %v7492_v50 }
0x1904   :  { %v7486_v19 = vpop.xlane.xlu0 %7485 }
0x1908   :  { %v7495_v36 = vpop.xlane.xlu1 %7494 }
0x1909   :  { %13428 = vrcp.f32 %v7495_v36 }
0x190a   :  { %13430 = vrcp.f32 %v7486_v19 }
0x190b   :  { %v13427_v48 = vpop.eup %13426 }
0x190c   :  { %v7489_v22 = vpop.xlane.xlu1 %7488  ;;  %v7504_v8 = vpop.xlane.xlu0 %7503  ;;  %v7550_v60 = vmul.f32 %v13427_v48, %v16778_v23 }
0x190d   :  { %13432 = vrcp.f32 %v7489_v22 }
0x190e   :  { %13434 = vrcp.f32 %v7504_v8 }
0x1910   :  { %v7507_v4 = vpop.xlane.xlu1 %7506  ;;  %v7498_v49 = vpop.xlane.xlu0 %7497 }
0x1911   :  { %13436 = vrcp.f32 %v7507_v4 }
0x1912   :  { %13438 = vrcp.f32 %v7498_v49 }
0x1913   :  { %v13429_v56 = vpop.eup %13428 }
0x1914   :  { %v7551_v21 = vmul.f32 %v13429_v56, %v16790_v38  ;;  %v7501_v54 = vpop.xlane.xlu1 %7500  ;;  %v7516_v50 = vpop.xlane.xlu0 %7515 }
0x1915   :  { %v13431_v27 = vpop.eup %13430  ;;  %13440 = vrcp.f32 %v7501_v54 }
0x1916   :  { %v7565_v36 = vpack.c.bf16 %v7551_v21, %v7550_v60  ;;  %13442 = vrcp.f32 %v7516_v50  ;;  %v7548_v22 = vmul.f32 %v13431_v27, %v16784_v15 }
0x1917   :  { %v13433_v19 = vpop.eup %13432 }
0x1918   :  { %v7549_v8 = vmul.f32 %v13433_v19, %v16795_v41  ;;  %v7519_v3 = vpop.xlane.xlu1 %7518  ;;  %12331 = vmatmul.mubr.msk.bf16.vlgmr.msra.gmra.mrb[224].mxu1 %vm953_vm3, %v7565_v36  ;;  %v7510_v4 = vpop.xlane.xlu0 %7509 }
0x1919   :  { %v13435_v49 = vpop.eup %13434  ;;  %13444 = vrcp.f32 %v7519_v3  ;;  %12341 = vmatpush3.bf16.msra.mxu1 %v16852_v59  ;;  %12342 = vmatprep.mubr.msk.bf16.mxu1 %vm13848_vm1, %v18197_v51 }
0x191a   :  { %v7564_v23 = vpack.c.bf16 %v7549_v8, %v7548_v22  ;;  %12352 = vmatprep.subr.bf16.mxu1 %v18197_v51  ;;  %13446 = vrcp.f32 %v7510_v4  ;;  %v7554_v27 = vmul.f32 %v13435_v49, %v16798_v58 }
0x191b   :  { %v13437_v60 = vpop.eup %13436 }
0x191c   :  { %v7555_v54 = vmul.f32 %v13437_v60, %v16805_v40  ;;  %v7513_v21 = vpop.xlane.xlu1 %7512  ;;  %12325 = vmatmul.mubr.msk.bf16.vlgmr.msra.gmra.mrb[208].mxu0 %vm953_vm3, %v7564_v23  ;;  %v13439_v15 = vpop.eup %13438 }
0x191d   :  { %13448 = vrcp.f32 %v7513_v21  ;;  %12335 = vmatpush3.bf16.msra.mxu0 %v16846_v16  ;;  %12336 = vmatprep.mubr.msk.bf16.mxu0 %vm13848_vm1, %v18197_v51  ;;  %v7552_v41 = vmul.f32 %v13439_v15, %v16808_v13 }
0x191e   :  { %v7567_v3 = vpack.c.bf16 %v7555_v54, %v7554_v27  ;;  %12346 = vmatprep.subr.bf16.mxu0 %v18197_v51 }
0x191f   :  { %v13441_v38 = vpop.eup %13440 }
0x1920   :  { %v7553_v58 = vmul.f32 %v13441_v38, %v16814_v1  ;;  %12343 = vmatmul.mubr.msk.bf16.vlgmr.msra.gmra.mrb[228].mxu1 %vm953_vm3, %v7567_v3  ;;  %v13443_v40 = vpop.eup %13442 }
0x1921   :  { %12353 = vmatpush3.bf16.msra.mxu1 %v16856_v0  ;;  %12354 = vmatprep.mubr.msk.bf16.mxu1 %vm13848_vm1, %v18197_v51  ;;  %v7558_v48 = vmul.f32 %v13443_v40, %v16817_v32 }
0x1922   :  { %v7566_v16 = vpack.c.bf16 %v7553_v58, %v7552_v41  ;;  %12364 = vmatprep.subr.bf16.mxu1 %v18197_v51 }
0x1923   :  { %v13445_v59 = vpop.eup %13444 }
0x1924   :  { %v7559_v56 = vmul.f32 %v13445_v59, %v16823_v37  ;;  %12337 = vmatmul.mubr.msk.bf16.vlgmr.msra.gmra.mrb[212].mxu0 %vm953_vm3, %v7566_v16  ;;  %v13447_v13 = vpop.eup %13446  ;;  %v7528_v37 = vpop.xlane.xlu0 %7527 }
0x1925   :  { %12347 = vmatpush3.bf16.msra.mxu0 %v16892_v63  ;;  %12348 = vmatprep.mubr.msk.bf16.mxu0 %vm13848_vm1, %v18197_v51  ;;  %v7556_v50 = vmul.f32 %v13447_v13, %v16825_v30  ;;  %v8002_v30 = vpop.permute.xlu1 %8001  ;;  %13450 = vrcp.f32 %v7528_v37 }
0x1926   :  { %v7569_v1 = vpack.c.bf16 %v7559_v56, %v7558_v48  ;;  %12358 = vmatprep.subr.bf16.mxu0 %v18197_v51  ;;  %v8007_v3 = vsel %vm539_vm2, %v8002_v30, 0 }
0x1927   :  { %v13449_v0 = vpop.eup %13448 }
0x1928   :  { %v7557_v36 = vmul.f32 %v13449_v0, %v16832_v47  ;;  %12355 = vmatmul.mubr.msk.bf16.vlgmr.msra.gmra.mrb[232].mxu1 %vm953_vm3, %v7569_v1  ;;  %v7522_v47 = vpop.xlane.xlu0 %7521 }
0x1929   :  { %12365 = vmatpush3.bf16.msra.mxu1 %v16896_v45  ;;  %12366 = vmatprep.mubr.msk.bf16.mxu1 %vm13848_vm1, %v18197_v51 }
0x192a   :  { %v7568_v32 = vpack.c.bf16 %v7557_v36, %v7556_v50  ;;  %12376 = vmatprep.subr.bf16.mxu1 %v18197_v51 }
0x192c   :  { %12349 = vmatmul.mubr.msk.bf16.vlgmr.msra.gmra.mrb[216].mxu0 %vm953_vm3, %v7568_v32  ;;  %v7951_v45 = vpop.permute.xlu0 %7950 }
0x192d   :  { %12359 = vmatpush3.bf16.msra.mxu0 %v16894_v53  ;;  %12360 = vmatprep.mubr.msk.bf16.mxu0 %vm13848_vm1, %v18197_v51  ;;  %v7956_v58 = vsel %vm539_vm2, %v7951_v45, 0 }
0x192e   :  { %12370 = vmatprep.subr.bf16.mxu0 %v18197_v51 }
0x192f   :  { %v13451_v8 = vpop.eup %13450 }
0x1930   :  { %v7949_v4 = vpop.permute.xlu0 %7948  ;;  %v7562_v53 = vmul.f32 %v13451_v8, %v16834_v2 }
0x1934   :  { %v8000_v15 = vpop.permute.xlu0 %7999 }
0x1938   :  { %v8051_v40 = vpop.permute.xlu0 %8050 }
0x193c   :  { %v8102_v16 = vpop.permute.xlu0 %8101 }
0x1940   :  { %v8153_v13 = vpop.permute.xlu0 %8152 }
0x1944   :  { %v8204_v50 = vpop.permute.xlu0 %8203 }
0x1948   :  { %v8255_v30 = vpop.permute.xlu0 %8254 }
0x1957   :  { %v7531_v63 = vpop.xlane.xlu1 %7530 }
0x1958   :  { %13452 = vrcp.f32 %v7531_v63 }
0x1959   :  { %13454 = vrcp.f32 %v7522_v47 }
0x195b   :  { %v7525_v19 = vpop.xlane.xlu1 %7524 }
0x195c   :  { %13456 = vrcp.f32 %v7525_v19 }
0x195f   :  { %v8053_v22 = vpop.permute.xlu1 %8052 }
0x1960   :  { %v8058_v59 = vsel %vm539_vm2, %v8053_v22, 0 }
0x1962   :  { %v13453_v49 = vpop.eup %13452 }
0x1963   :  { %v7563_v23 = vmul.f32 %v13453_v49, %v16870_v28  ;;  %v13455_v60 = vpop.eup %13454  ;;  %v8104_v27 = vpop.permute.xlu1 %8103 }
0x1964   :  { %v7560_v38 = vmul.f32 %v13455_v60, %v16840_v24  ;;  %v8109_v24 = vsel %vm539_vm2, %v8104_v27, 0 }
0x1965   :  { %v7571_v54 = vpack.c.bf16 %v7563_v23, %v7562_v53 }
0x1966   :  { %v13457_v21 = vpop.eup %13456 }
0x1967   :  { %v7561_v41 = vmul.f32 %v13457_v21, %v16874_v10  ;;  %12367 = vmatmul.mubr.msk.bf16.vlgmr.msra.gmra.mrb[236].mxu1 %vm953_vm3, %v7571_v54  ;;  %v8155_v28 = vpop.permute.xlu1 %8154 }
0x1968   :  { %12377 = vmatpush3.bf16.xpose.msra.mxu1 %v8007_v3  ;;  %12378 = vmatprep.mubr.msk.bf16.mxu1 %vm13848_vm1, %v18197_v51  ;;  %v8160_v1 = vsel %vm539_vm2, %v8155_v28, 0 }
0x1969   :  { %v7570_v2 = vpack.c.bf16 %v7561_v41, %v7560_v38  ;;  %12388 = vmatprep.subr.bf16.mxu1 %v18197_v51 }
0x196b   :  { %12361 = vmatmul.mubr.msk.bf16.vlgmr.msra.gmra.mrb[220].mxu0 %vm953_vm3, %v7570_v2  ;;  %v8206_v10 = vpop.permute.xlu1 %8205 }
0x196c   :  { %12371 = vmatpush3.bf16.xpose.msra.mxu0 %v7956_v58  ;;  %12372 = vmatprep.mubr.msk.bf16.mxu0 %vm13848_vm1, %v18197_v51  ;;  %v8211_v56 = vsel %vm539_vm2, %v8206_v10, 0 }
0x196d   :  { %12382 = vmatprep.subr.bf16.mxu0 %v18197_v51 }
0x196f   :  { %12379 = vmatmul.mubr.msk.bf16.vlgmr.msra.gmra.mrb[240].mxu1 %vm539_vm2, %v8000_v15  ;;  %v8257_v48 = vpop.permute.xlu1 %8256 }
0x1970   :  { %12389 = vmatpush3.bf16.xpose.msra.mxu1 %v8109_v24  ;;  %12390 = vmatprep.mubr.msk.bf16.mxu1 %vm13848_vm1, %v18197_v51  ;;  %v8262_v32 = vsel %vm539_vm2, %v8257_v48, 0 }
0x1971   :  { %12400 = vmatprep.subr.bf16.mxu1 %v18197_v51 }
0x1973   :  { %12373 = vmatmul.mubr.msk.bf16.vlgmr.msra.gmra.mrb[224].mxu0 %vm539_vm2, %v7949_v4  ;;  %v8308_v0 = vpop.permute.xlu1 %8307 }
0x1974   :  { %12383 = vmatpush3.bf16.xpose.msra.mxu0 %v8058_v59  ;;  %12384 = vmatprep.mubr.msk.bf16.mxu0 %vm13848_vm1, %v18197_v51  ;;  %v8313_v36 = vsel %vm539_vm2, %v8308_v0, 0 }
0x1975   :  { %12394 = vmatprep.subr.bf16.mxu0 %v18197_v51 }
0x1977   :  { %12391 = vmatmul.mubr.msk.bf16.vlgmr.msra.gmra.mrb[244].mxu1 %vm539_vm2, %v8102_v16  ;;  %v8306_v37 = vpop.permute.xlu1 %8305 }
0x1978   :  { %12401 = vmatpush3.bf16.xpose.msra.mxu1 %v8211_v56  ;;  %12402 = vmatprep.mubr.msk.bf16.mxu1 %vm13848_vm1, %v18197_v51 }
0x1979   :  { %12412 = vmatprep.subr.bf16.mxu1 %v18197_v51 }
0x197b   :  { %12385 = vmatmul.mubr.msk.bf16.vlgmr.msra.gmra.mrb[228].mxu0 %vm539_vm2, %v8051_v40 }
0x197c   :  { %12395 = vmatpush3.bf16.xpose.msra.mxu0 %v8160_v1  ;;  %12396 = vmatprep.mubr.msk.bf16.mxu0 %vm13848_vm1, %v18197_v51 }
0x197d   :  { %12406 = vmatprep.subr.bf16.mxu0 %v18197_v51 }
0x197f   :  { %12403 = vmatmul.mubr.msk.bf16.vlgmr.msra.gmra.mrb[248].mxu1 %vm539_vm2, %v8204_v50 }
0x1980   :  { %12413 = vmatpush3.bf16.xpose.msra.mxu1 %v8313_v36  ;;  %12414 = vmatprep.mubr.msk.bf16.mxu1 %vm13848_vm1, %v18197_v51 }
0x1981   :  { %12424 = vmatprep.subr.bf16.mxu1 %v18197_v51 }
0x1983   :  { %12397 = vmatmul.mubr.msk.bf16.vlgmr.msra.gmra.mrb[232].mxu0 %vm539_vm2, %v8153_v13 }
0x1984   :  { %12407 = vmatpush3.bf16.xpose.msra.mxu0 %v8262_v32  ;;  %12408 = vmatprep.mubr.msk.bf16.mxu0 %vm13848_vm1, %v18197_v51 }
0x1985   :  { %12418 = vmatprep.subr.bf16.mxu0 %v18197_v51 }
0x1987   :  { %12415 = vmatmul.mubr.msk.bf16.vlgmr.msra.gmra.mrb[252].mxu1 %vm539_vm2, %v8306_v37 }
0x1988   :  { %12426 = vmatprep.mubr.msk.bf16.mxu1 %vm13848_vm1, %v18197_v51 }
0x198b   :  { %12409 = vmatmul.mubr.msk.bf16.vlgmr.msra.gmra.mrb[236].mxu0 %vm539_vm2, %v8255_v30 }
0x198c   :  { %12420 = vmatprep.mubr.msk.bf16.mxu0 %vm13848_vm1, %v18197_v51 }
0x19eb   :  { %v16990_v47 = vpop.f32.mrb[224].mxu1 }
0x19ec   :  { %v12332_v63 = vpop.f32.mrb[225].mxu1 }
0x19ed   :  { %v16992_v45 = vpop.f32.mrb[226].mxu1 }
0x19ee   :  { %v12333_v22 = vpop.f32.mrb[227].mxu1 }
0x19ef   :  { %v16996_v8 = vpop.f32.mrb[208].mxu0 }
0x19f0   :  { %v12326_v4 = vpop.f32.mrb[209].mxu0 }
0x19f1   :  { %v16998_v49 = vpop.f32.mrb[210].mxu0 }
0x19f2   :  { %v12327_v23 = vpop.f32.mrb[211].mxu0 }
0x19f3   :  { %v17002_v60 = vpop.f32.mrb[228].mxu1 }
0x19f4   :  { %v12344_v27 = vpop.f32.mrb[229].mxu1 }
0x19f5   :  { %v17004_v54 = vpop.f32.mrb[230].mxu1 }
0x19f6   :  { %v12345_v15 = vpop.f32.mrb[231].mxu1 }
0x19f7   :  { %v17008_v3 = vpop.f32.mrb[212].mxu0 }
0x19f8   :  { %v12338_v38 = vpop.f32.mrb[213].mxu0 }
0x19f9   :  { %v17010_v41 = vpop.f32.mrb[214].mxu0 }
0x19fa   :  { %v12339_v28 = vpop.f32.mrb[215].mxu0 }
0x19fb   :  { %v17014_v58 = vpop.f32.mrb[232].mxu1 }
0x19fc   :  { %v12356_v40 = vpop.f32.mrb[233].mxu1 }
0x19fd   :  { %v17016_v24 = vpop.f32.mrb[234].mxu1 }
0x19fe   :  { %v12357_v16 = vpop.f32.mrb[235].mxu1 }
0x19ff   :  { %v17020_v59 = vpop.f32.mrb[216].mxu0 }
0x1a00   :  { %v12350_v48 = vpop.f32.mrb[217].mxu0 }
0x1a01   :  { %v17022_v56 = vpop.f32.mrb[218].mxu0 }
0x1a02   :  { %v12351_v1 = vpop.f32.mrb[219].mxu0 }
0x1a3a   :  { %v17026_v0 = vpop.f32.mrb[236].mxu1 }
0x1a3b   :  { %v12368_v50 = vpop.f32.mrb[237].mxu1 }
0x1a3c   :  { %v17028_v36 = vpop.f32.mrb[238].mxu1 }
0x1a3d   :  { %v12369_v37 = vpop.f32.mrb[239].mxu1 }
0x1a3e   :  { %v17032_v30 = vpop.f32.mrb[220].mxu0 }
0x1a3f   :  { %v12362_v63 = vpop.f32.mrb[221].mxu0 }
0x1a40   :  { %v17034_v22 = vpop.f32.mrb[222].mxu0 }
0x1a41   :  { %v12363_v23 = vpop.f32.mrb[223].mxu0 }
0x1a42   :  { %v8043_v27 = vpop.f32.mrb[240].mxu1 }
0x1a43   :  { %v17038_v15 = vmul.f32 0.35355338, %v8043_v27  ;;  %v12380_v38 = vpop.f32.mrb[241].mxu1 }
0x1a44   :  { %v8046_v28 = vpop.f32.mrb[242].mxu1 }
0x1a45   :  { %v12381_v40 = vpop.f32.mrb[243].mxu1  ;;  %v8378_v16 = vsel %vm953_vm3, %v17038_v15, -inf  ;;  %v17044_v63 = vmul.f32 0.35355338, %v8046_v28 }
0x1a46   :  { %v7992_v48 = vpop.f32.mrb[224].mxu0  ;;  %8379 = vmax.xlane.f32.xlu0 %v8378_v16 }
0x1a47   :  { %v17042_v1 = vmul.f32 0.35355338, %v7992_v48  ;;  %v12374_v50 = vpop.f32.mrb[225].mxu0 }
0x1a48   :  { %v7995_v37 = vpop.f32.mrb[226].mxu0 }
0x1a49   :  { %v17046_v32 = vmul.f32 0.35355338, %v7995_v37  ;;  %v12375_v23 = vpop.f32.mrb[227].mxu0  ;;  %v8372_v27 = vsel %vm953_vm3, %v17042_v1, -inf  ;;  %v8381_v37 = vsel %vm953_vm3, %v17044_v63, -inf }
0x1a4a   :  { %8373 = vmax.xlane.f32.xlu0 %v8372_v27  ;;  %v8145_v38 = vpop.f32.mrb[244].mxu1 }
0x1a4b   :  { %v12392_v40 = vpop.f32.mrb[245].mxu1  ;;  %v8375_v4 = vsel %vm953_vm3, %v17046_v32, -inf  ;;  %v17052_v48 = vmul.f32 0.35355338, %v8145_v38 }
0x1a4c   :  { %8376 = vmax.xlane.f32.xlu1 %v8375_v4  ;;  %v8148_v16 = vpop.f32.mrb[246].mxu1 }
0x1a4d   :  { %v17054_v50 = vmul.f32 0.35355338, %v8148_v16  ;;  %v12393_v28 = vpop.f32.mrb[247].mxu1  ;;  %v8390_v16 = vsel %vm953_vm3, %v17052_v48, -inf }
0x1a4e   :  { %8382 = vmax.xlane.f32.xlu0 %v8381_v37  ;;  %v8094_v23 = vpop.f32.mrb[228].mxu0 }
0x1a4f   :  { %v12386_v10 = vpop.f32.mrb[229].mxu0  ;;  %v8393_v27 = vsel %vm953_vm3, %v17054_v50, -inf  ;;  %v17060_v21 = vmul.f32 0.35355338, %v8094_v23 }
0x1a50   :  { %v8097_v40 = vpop.f32.mrb[230].mxu0  ;;  %8394 = vmax.xlane.f32.xlu1 %v8393_v27 }
0x1a51   :  { %v17062_v4 = vmul.f32 0.35355338, %v8097_v40  ;;  %v12387_v38 = vpop.f32.mrb[231].mxu0  ;;  %v8384_v27 = vsel %vm953_vm3, %v17060_v21, -inf }
0x1a52   :  { %8391 = vmax.xlane.f32.xlu0 %v8390_v16  ;;  %v8247_v28 = vpop.f32.mrb[248].mxu1 }
0x1a53   :  { %v12404_v19 = vpop.f32.mrb[249].mxu1  ;;  %v8387_v37 = vsel %vm953_vm3, %v17062_v4, -inf  ;;  %v17068_v13 = vmul.f32 0.35355338, %v8247_v28 }
0x1a54   :  { %8388 = vmax.xlane.f32.xlu1 %v8387_v37  ;;  %v8250_v10 = vpop.f32.mrb[250].mxu1 }
0x1a55   :  { %v17070_v2 = vmul.f32 0.35355338, %v8250_v10  ;;  %v12405_v23 = vpop.f32.mrb[251].mxu1  ;;  %v8402_v10 = vsel %vm953_vm3, %v17068_v13, -inf }
0x1a56   :  { %8385 = vmax.xlane.f32.xlu0 %v8384_v27  ;;  %v8196_v40 = vpop.f32.mrb[232].mxu0 }
0x1a57   :  { %v12398_v38 = vpop.f32.mrb[233].mxu0  ;;  %v8405_v16 = vsel %vm953_vm3, %v17070_v2, -inf  ;;  %v17076_v53 = vmul.f32 0.35355338, %v8196_v40 }
0x1a58   :  { %v8199_v19 = vpop.f32.mrb[234].mxu0  ;;  %8406 = vmax.xlane.f32.xlu1 %v8405_v16 }
0x1a59   :  { %v17078_v37 = vmul.f32 0.35355338, %v8199_v19  ;;  %v12399_v28 = vpop.f32.mrb[235].mxu0  ;;  %v8396_v40 = vsel %vm953_vm3, %v17076_v53, -inf }
0x1a5a   :  { %8403 = vmax.xlane.f32.xlu0 %v8402_v10  ;;  %v8349_v23 = vpop.f32.mrb[252].mxu1 }
0x1a5b   :  { %v12416_v12 = vpop.f32.mrb[253].mxu1  ;;  %v8399_v27 = vsel %vm953_vm3, %v17078_v37, -inf  ;;  %v17084_v57 = vmul.f32 0.35355338, %v8349_v23 }
0x1a5c   :  { %8400 = vmax.xlane.f32.xlu1 %v8399_v27  ;;  %v8352_v38 = vpop.f32.mrb[254].mxu1 }
0x1a5d   :  { %v12417_v46 = vpop.f32.mrb[255].mxu1  ;;  %v8414_v12 = vsel %vm953_vm3, %v17084_v57, -inf }
0x1a5e   :  { %8397 = vmax.xlane.f32.xlu0 %v8396_v40  ;;  %v8298_v16 = vpop.f32.mrb[236].mxu0  ;;  %v17108_v46 = vmul.f32 0.35355338, %v8352_v38 }
0x1a5f   :  { %v12410_v19 = vpop.f32.mrb[237].mxu0  ;;  %v17088_v7 = vmul.f32 0.35355338, %v8298_v16 }
0x1a60   :  { %v8301_v28 = vpop.f32.mrb[238].mxu0  ;;  %v8417_v40 = vsel %vm953_vm3, %v17108_v46, -inf }
0x1a61   :  { %v12411_v10 = vpop.f32.mrb[239].mxu0  ;;  %v8408_v27 = vsel %vm953_vm3, %v17088_v7, -inf  ;;  %v17110_v23 = vmul.f32 0.35355338, %v8301_v28 }
0x1a62   :  { %8415 = vmax.xlane.f32.xlu0 %v8414_v12 }
0x1a63   :  { %v8411_v16 = vsel %vm953_vm3, %v17110_v23, -inf }
0x1a66   :  { %8409 = vmax.xlane.f32.xlu0 %v8408_v27 }
0x1a6d   :  { %8603 = vrot.lane.b32.xlu1 %v16282_v26, %s13856_s29 }
0x1a71   :  { %8650 = vrot.lane.b32.xlu1 %v16292_v18, %s13856_s29 }
0x1a75   :  { %8697 = vrot.lane.b32.xlu1 %v16290_v62, %s13856_s29 }
0x1a79   :  { %8791 = vrot.lane.b32.xlu1 %v16298_v5, %s13856_s29 }
0x1a7c   :  { %8556 = vrot.lane.b32.xlu0 %v16284_v31, %s13856_s29 }
0x1a80   :  { %8744 = vrot.lane.b32.xlu0 %v16300_v14, %s13856_s29 }
0x1a84   :  { %8838 = vrot.lane.b32.xlu0 %v16308_v20, %s13856_s29 }
0x1a9d   :  { %8418 = vmax.xlane.f32.xlu1 %v8417_v40 }
0x1aa1   :  { %8412 = vmax.xlane.f32.xlu1 %v8411_v16 }
0x1ab2   :  { %8885 = vrot.lane.b32.xlu1 %v16306_v17, %s13856_s29 }
0x1ad3   :  { %v8380_v19 = vpop.xlane.xlu0 %8379 }
0x1ad4   :  { %v8422_v10 = vsub.f32 %v17038_v15, %v8380_v19 }
0x1ad6   :  { %v8440_v12 = vmul.f32 1.442695, %v8422_v10 }
0x1ad7   :  { %v8374_v27 = vpop.xlane.xlu0 %8373 }
0x1ad8   :  { %13458 = vpow2.f32 %v8440_v12  ;;  %v8420_v38 = vsub.f32 %v17042_v1, %v8374_v27 }
0x1ad9   :  { %v8377_v28 = vpop.xlane.xlu1 %8376 }
0x1ada   :  { %v8436_v39 = vmul.f32 1.442695, %v8420_v38  ;;  %v8421_v25 = vsub.f32 %v17046_v32, %v8377_v28 }
0x1adb   :  { %v8383_v40 = vpop.xlane.xlu0 %8382 }
0x1adc   :  { %13460 = vpow2.f32 %v8436_v39  ;;  %v8423_v34 = vsub.f32 %v17044_v63, %v8383_v40  ;;  %v8438_v11 = vmul.f32 1.442695, %v8421_v25 }
0x1add   :  { %v8395_v16 = vpop.xlane.xlu1 %8394 }
0x1ade   :  { %v8442_v33 = vmul.f32 1.442695, %v8423_v34  ;;  %v8427_v61 = vsub.f32 %v17054_v50, %v8395_v16 }
0x1adf   :  { %v8392_v6 = vpop.xlane.xlu0 %8391 }
0x1ae0   :  { %13462 = vpow2.f32 %v8442_v33  ;;  %v8426_v15 = vsub.f32 %v17052_v48, %v8392_v6  ;;  %v8450_v1 = vmul.f32 1.442695, %v8427_v61 }
0x1ae1   :  { %v8389_v19 = vpop.xlane.xlu1 %8388  ;;  %13464 = vpow2.f32 %v8438_v11 }
0x1ae2   :  { %v17124_v10 = vpop.eup %13458  ;;  %v8448_v12 = vmul.f32 1.442695, %v8426_v15  ;;  %v8425_v32 = vsub.f32 %v17062_v4, %v8389_v19 }
0x1ae3   :  { %v8386_v39 = vpop.xlane.xlu0 %8385  ;;  %v8474_v63 = vsel %vm953_vm3, %v17124_v10, 0.0 }
0x1ae4   :  { %13466 = vpow2.f32 %v8448_v12  ;;  %v8424_v25 = vsub.f32 %v17060_v21, %v8386_v39  ;;  %8475 = vadd.xlane.f32.xlu0 %v8474_v63  ;;  %v8446_v6 = vmul.f32 1.442695, %v8425_v32 }
0x1ae5   :  { %v8407_v34 = vpop.xlane.xlu1 %8406  ;;  %13468 = vpow2.f32 %v8450_v1 }
0x1ae6   :  { %v17130_v33 = vpop.eup %13460  ;;  %v8444_v48 = vmul.f32 1.442695, %v8424_v25  ;;  %v8431_v11 = vsub.f32 %v17070_v2, %v8407_v34 }
0x1ae7   :  { %v8404_v61 = vpop.xlane.xlu0 %8403  ;;  %v8468_v50 = vsel %vm953_vm3, %v17130_v33, 0.0 }
0x1ae8   :  { %13470 = vpow2.f32 %v8444_v48  ;;  %v8430_v4 = vsub.f32 %v17068_v13, %v8404_v61  ;;  %8469 = vadd.xlane.f32.xlu0 %v8468_v50  ;;  %v8458_v21 = vmul.f32 1.442695, %v8431_v11 }
0x1ae9   :  { %v8401_v27 = vpop.xlane.xlu1 %8400  ;;  %13472 = vpow2.f32 %v8446_v6 }
0x1aea   :  { %v17136_v38 = vpop.eup %13462  ;;  %v8456_v28 = vmul.f32 1.442695, %v8430_v4  ;;  %v8429_v40 = vsub.f32 %v17078_v37, %v8401_v27 }
0x1aeb   :  { %v8398_v16 = vpop.xlane.xlu0 %8397  ;;  %v8477_v2 = vsel %vm953_vm3, %v17136_v38, 0.0  ;;  %v17141_v15 = vpop.eup %13464 }
0x1aec   :  { %13474 = vpow2.f32 %v8456_v28  ;;  %v8428_v19 = vsub.f32 %v17076_v53, %v8398_v16  ;;  %8478 = vadd.xlane.f32.xlu1 %v8477_v2  ;;  %v8454_v12 = vmul.f32 1.442695, %v8429_v40  ;;  %v8471_v37 = vsel %vm953_vm3, %v17141_v15, 0.0 }
0x1aed   :  { %v8604_v13 = vpop.permute.xlu1 %8603  ;;  %13476 = vpow2.f32 %v8458_v21 }
0x1aee   :  { %v17144_v1 = vpop.eup %13466  ;;  %v8452_v32 = vmul.f32 1.442695, %v8428_v19  ;;  %12425 = vmatpush3.bf16.msra.mxu1 %v8604_v13 }
0x1aef   :  { %v8416_v39 = vpop.xlane.xlu0 %8415  ;;  %v8486_v63 = vsel %vm953_vm3, %v17144_v1, 0.0  ;;  %12436 = vmatprep.subr.bf16.mxu1 %v18197_v51  ;;  %v17151_v25 = vpop.eup %13468 }
0x1af0   :  { %13478 = vpow2.f32 %v8452_v32  ;;  %v8434_v53 = vsub.f32 %v17084_v57, %v8416_v39  ;;  %8472 = vadd.xlane.f32.xlu1 %v8471_v37  ;;  %8487 = vadd.xlane.f32.xlu0 %v8486_v63  ;;  %v8489_v11 = vsel %vm953_vm3, %v17151_v25, 0.0 }
0x1af1   :  { %13480 = vpow2.f32 %v8454_v12 }
0x1af2   :  { %v17154_v34 = vpop.eup %13470  ;;  %v8464_v6 = vmul.f32 1.442695, %v8434_v53  ;;  %v17192_v53 = vpop.permute.xlu1 %8650 }
0x1af3   :  { %v8410_v48 = vpop.xlane.xlu0 %8409  ;;  %v8480_v61 = vsel %vm953_vm3, %v17154_v34, 0.0  ;;  %v17160_v50 = vpop.eup %13472 }
0x1af4   :  { %13482 = vpow2.f32 %v8464_v6  ;;  %v8432_v4 = vsub.f32 %v17088_v7, %v8410_v48  ;;  %8490 = vadd.xlane.f32.xlu1 %v8489_v11  ;;  %8481 = vadd.xlane.f32.xlu0 %v8480_v61  ;;  %v8483_v28 = vsel %vm953_vm3, %v17160_v50, 0.0 }
0x1af6   :  { %v17163_v57 = vpop.eup %13474  ;;  %v8460_v27 = vmul.f32 1.442695, %v8432_v4  ;;  %v17198_v6 = vpop.permute.xlu1 %8697 }
0x1af7   :  { %v8557_v21 = vpop.permute.xlu0 %8556  ;;  %v8498_v40 = vsel %vm953_vm3, %v17163_v57, 0.0  ;;  %v17169_v16 = vpop.eup %13476 }
0x1af8   :  { %13484 = vpow2.f32 %v8460_v27  ;;  %8484 = vadd.xlane.f32.xlu1 %v8483_v28  ;;  %8499 = vadd.xlane.f32.xlu0 %v8498_v40  ;;  %v8501_v7 = vsel %vm953_vm3, %v17169_v16, 0.0 }
0x1af9   :  { %12419 = vmatpush3.bf16.msra.mxu0 %v8557_v21 }
0x1afa   :  { %v17171_v2 = vpop.eup %13478  ;;  %12430 = vmatprep.subr.bf16.mxu0 %v18197_v51  ;;  %v17202_v48 = vpop.permute.xlu1 %8791 }
0x1afb   :  { %v8492_v19 = vsel %vm953_vm3, %v17171_v2, 0.0  ;;  %v17178_v13 = vpop.eup %13480 }
0x1afc   :  { %8502 = vadd.xlane.f32.xlu1 %v8501_v7  ;;  %8493 = vadd.xlane.f32.xlu0 %v8492_v19  ;;  %v8495_v32 = vsel %vm953_vm3, %v17178_v13, 0.0 }
0x1afe   :  { %v17180_v12 = vpop.eup %13482 }
0x1aff   :  { %v8510_v39 = vsel %vm953_vm3, %v17180_v12, 0.0 }
0x1b00   :  { %8496 = vadd.xlane.f32.xlu1 %v8495_v32  ;;  %8511 = vadd.xlane.f32.xlu0 %v8510_v39 }
0x1b02   :  { %v17186_v37 = vpop.eup %13484 }
0x1b03   :  { %v8504_v63 = vsel %vm953_vm3, %v17186_v37, 0.0 }
0x1b04   :  { %8505 = vadd.xlane.f32.xlu0 %v8504_v63 }
0x1b11   :  { %8985 = vrot.lane.b32.xlu1 %v16282_v26, %s13857_s30 }
0x1b1a   :  { %8934 = vrot.lane.b32.xlu0 %v16284_v31, %s13857_s30 }
0x1b1e   :  { %8932 = vrot.lane.b32.xlu0 %v16284_v31, %s13858_s15 }
0x1b22   :  { %8983 = vrot.lane.b32.xlu0 %v16282_v26, %s13858_s15 }
0x1b26   :  { %9034 = vrot.lane.b32.xlu0 %v16292_v18, %s13858_s15 }
0x1b2a   :  { %v8419_v11 = vpop.xlane.xlu1 %8418  ;;  %9085 = vrot.lane.b32.xlu0 %v16290_v62, %s13858_s15 }
0x1b2b   :  { %v8435_v61 = vsub.f32 %v17108_v46, %v8419_v11 }
0x1b2d   :  { %v8466_v4 = vmul.f32 1.442695, %v8435_v61 }
0x1b2e   :  { %v8413_v27 = vpop.xlane.xlu1 %8412  ;;  %9136 = vrot.lane.b32.xlu0 %v16300_v14, %s13858_s15 }
0x1b2f   :  { %13486 = vpow2.f32 %v8466_v4  ;;  %v8433_v21 = vsub.f32 %v17110_v23, %v8413_v27  ;;  %v17238_v23 = vpop.permute.xlu0 %8744 }
0x1b31   :  { %v8462_v28 = vmul.f32 1.442695, %v8433_v21 }
0x1b32   :  { %9187 = vrot.lane.b32.xlu0 %v16298_v5, %s13858_s15  ;;  %v17242_v63 = vpop.permute.xlu1 %8885 }
0x1b33   :  { %13488 = vpow2.f32 %v8462_v28  ;;  %v17240_v32 = vpop.permute.xlu0 %8838 }
0x1b36   :  { %9238 = vrot.lane.b32.xlu0 %v16308_v20, %s13858_s15 }
0x1b39   :  { %v17216_v40 = vpop.eup %13486 }
0x1b3a   :  { %v8513_v46 = vsel %vm953_vm3, %v17216_v40, 0.0 }
0x1b3b   :  { %8514 = vadd.xlane.f32.xlu1 %v8513_v46 }
0x1b3d   :  { %v17220_v7 = vpop.eup %13488 }
0x1b3e   :  { %v8507_v19 = vsel %vm953_vm3, %v17220_v7, 0.0 }
0x1b3f   :  { %8508 = vadd.xlane.f32.xlu1 %v8507_v19 }
0x1b50   :  { %9036 = vrot.lane.b32.xlu1 %v16292_v18, %s13857_s30 }
0x1b54   :  { %9087 = vrot.lane.b32.xlu1 %v16290_v62, %s13857_s30 }
0x1b58   :  { %9138 = vrot.lane.b32.xlu1 %v16300_v14, %s13857_s30 }
0x1b5c   :  { %9189 = vrot.lane.b32.xlu1 %v16298_v5, %s13857_s30 }
0x1b60   :  { %9240 = vrot.lane.b32.xlu1 %v16308_v20, %s13857_s30 }
0x1b64   :  { %9291 = vrot.lane.b32.xlu1 %v16306_v17, %s13857_s30 }
0x1b68   :  { %9289 = vrot.lane.b32.xlu1 %v16306_v17, %s13858_s15 }
0x1b71   :  { %v8476_v39 = vpop.xlane.xlu0 %8475 }
0x1b72   :  { %13490 = vrcp.f32 %v8476_v39 }
0x1b75   :  { %v8470_v11 = vpop.xlane.xlu0 %8469 }
0x1b79   :  { %v8479_v61 = vpop.xlane.xlu1 %8478 }
0x1b7a   :  { %13492 = vrcp.f32 %v8479_v61 }
0x1b7b   :  { %13494 = vrcp.f32 %v8470_v11 }
0x1b7c   :  { %v13491_v46 = vpop.eup %13490 }
0x1b7d   :  { %v8473_v4 = vpop.xlane.xlu1 %8472  ;;  %v8488_v27 = vpop.xlane.xlu0 %8487  ;;  %v8534_v52 = vmul.f32 %v13491_v46, %v17124_v10 }
0x1b7e   :  { %13496 = vrcp.f32 %v8473_v4 }
0x1b7f   :  { %13498 = vrcp.f32 %v8488_v27 }
0x1b81   :  { %v8491_v21 = vpop.xlane.xlu1 %8490  ;;  %v8482_v28 = vpop.xlane.xlu0 %8481 }
0x1b82   :  { %13500 = vrcp.f32 %v8491_v21 }
0x1b83   :  { %13502 = vrcp.f32 %v8482_v28 }
0x1b84   :  { %v13493_v19 = vpop.eup %13492 }
0x1b85   :  { %v8535_v9 = vmul.f32 %v13493_v19, %v17136_v38  ;;  %v8485_v44 = vpop.xlane.xlu1 %8484  ;;  %v8500_v39 = vpop.xlane.xlu0 %8499 }
0x1b86   :  { %v13495_v42 = vpop.eup %13494  ;;  %13504 = vrcp.f32 %v8485_v44 }
0x1b87   :  { %v8549_v61 = vpack.c.bf16 %v8535_v9, %v8534_v52  ;;  %13506 = vrcp.f32 %v8500_v39  ;;  %v8532_v4 = vmul.f32 %v13495_v42, %v17130_v33 }
0x1b88   :  { %v13497_v11 = vpop.eup %13496 }
0x1b89   :  { %v8533_v27 = vmul.f32 %v13497_v11, %v17141_v15  ;;  %v8503_v55 = vpop.xlane.xlu1 %8502  ;;  %12427 = vmatmul.mubr.msk.bf16.vlgmr.msra.gmra.mrb[0].mxu1 %vm953_vm3, %v8549_v61  ;;  %v8494_v21 = vpop.xlane.xlu0 %8493 }
0x1b8a   :  { %v13499_v28 = vpop.eup %13498  ;;  %13508 = vrcp.f32 %v8503_v55  ;;  %12437 = vmatpush3.bf16.msra.mxu1 %v17198_v6  ;;  %12438 = vmatprep.mubr.msk.bf16.mxu1 %vm13848_vm1, %v18197_v51 }
0x1b8b   :  { %v8548_v10 = vpack.c.bf16 %v8533_v27, %v8532_v4  ;;  %12448 = vmatprep.subr.bf16.mxu1 %v18197_v51  ;;  %13510 = vrcp.f32 %v8494_v21  ;;  %v8538_v42 = vmul.f32 %v13499_v28, %v17144_v1 }
0x1b8c   :  { %v13501_v44 = vpop.eup %13500 }
0x1b8d   :  { %v8539_v52 = vmul.f32 %v13501_v44, %v17151_v25  ;;  %v8497_v9 = vpop.xlane.xlu1 %8496  ;;  %12421 = vmatmul.mubr.msk.bf16.vlgmr.msra.gmra.mrb[240].mxu0 %vm953_vm3, %v8548_v10  ;;  %v13503_v33 = vpop.eup %13502 }
0x1b8e   :  { %13512 = vrcp.f32 %v8497_v9  ;;  %12431 = vmatpush3.bf16.msra.mxu0 %v17192_v53  ;;  %12432 = vmatprep.mubr.msk.bf16.mxu0 %vm13848_vm1, %v18197_v51  ;;  %v8536_v15 = vmul.f32 %v13503_v33, %v17154_v34 }
0x1b8f   :  { %v8551_v55 = vpack.c.bf16 %v8539_v52, %v8538_v42  ;;  %12442 = vmatprep.subr.bf16.mxu0 %v18197_v51 }
0x1b90   :  { %v13505_v38 = vpop.eup %13504 }
0x1b91   :  { %v8537_v1 = vmul.f32 %v13505_v38, %v17160_v50  ;;  %12439 = vmatmul.mubr.msk.bf16.vlgmr.msra.gmra.mrb[4].mxu1 %vm953_vm3, %v8551_v55  ;;  %v13507_v25 = vpop.eup %13506 }
0x1b92   :  { %12449 = vmatpush3.bf16.msra.mxu1 %v17202_v48  ;;  %12450 = vmatprep.mubr.msk.bf16.mxu1 %vm13848_vm1, %v18197_v51  ;;  %v8542_v46 = vmul.f32 %v13507_v25, %v17163_v57 }
0x1b93   :  { %v8550_v53 = vpack.c.bf16 %v8537_v1, %v8536_v15  ;;  %12460 = vmatprep.subr.bf16.mxu1 %v18197_v51 }
0x1b94   :  { %v13509_v6 = vpop.eup %13508 }
0x1b95   :  { %v8543_v19 = vmul.f32 %v13509_v6, %v17169_v16  ;;  %12433 = vmatmul.mubr.msk.bf16.vlgmr.msra.gmra.mrb[244].mxu0 %vm953_vm3, %v8550_v53  ;;  %v13511_v34 = vpop.eup %13510  ;;  %v8512_v16 = vpop.xlane.xlu0 %8511 }
0x1b96   :  { %12443 = vmatpush3.bf16.msra.mxu0 %v17238_v23  ;;  %12444 = vmatprep.mubr.msk.bf16.mxu0 %vm13848_vm1, %v18197_v51  ;;  %v8540_v39 = vmul.f32 %v13511_v34, %v17171_v2  ;;  %v8986_v2 = vpop.permute.xlu1 %8985  ;;  %13514 = vrcp.f32 %v8512_v16 }
0x1b97   :  { %v8553_v50 = vpack.c.bf16 %v8543_v19, %v8542_v46  ;;  %12454 = vmatprep.subr.bf16.mxu0 %v18197_v51  ;;  %v8991_v55 = vsel %vm539_vm2, %v8986_v2, 0 }
0x1b98   :  { %v13513_v48 = vpop.eup %13512 }
0x1b99   :  { %v8541_v61 = vmul.f32 %v13513_v48, %v17178_v13  ;;  %12451 = vmatmul.mubr.msk.bf16.vlgmr.msra.gmra.mrb[8].mxu1 %vm953_vm3, %v8553_v50  ;;  %v8506_v13 = vpop.xlane.xlu0 %8505 }
0x1b9a   :  { %12461 = vmatpush3.bf16.msra.mxu1 %v17242_v63  ;;  %12462 = vmatprep.mubr.msk.bf16.mxu1 %vm13848_vm1, %v18197_v51 }
0x1b9b   :  { %v8552_v57 = vpack.c.bf16 %v8541_v61, %v8540_v39  ;;  %12472 = vmatprep.subr.bf16.mxu1 %v18197_v51 }
0x1b9d   :  { %12445 = vmatmul.mubr.msk.bf16.vlgmr.msra.gmra.mrb[248].mxu0 %vm953_vm3, %v8552_v57  ;;  %v8935_v63 = vpop.permute.xlu0 %8934 }
0x1b9e   :  { %12455 = vmatpush3.bf16.msra.mxu0 %v17240_v32  ;;  %12456 = vmatprep.mubr.msk.bf16.mxu0 %vm13848_vm1, %v18197_v51  ;;  %v8940_v1 = vsel %vm539_vm2, %v8935_v63, 0 }
0x1b9f   :  { %12466 = vmatprep.subr.bf16.mxu0 %v18197_v51 }
0x1ba0   :  { %v13515_v27 = vpop.eup %13514 }
0x1ba1   :  { %v8933_v21 = vpop.permute.xlu0 %8932  ;;  %v8546_v32 = vmul.f32 %v13515_v27, %v17180_v12 }
0x1ba5   :  { %v8984_v33 = vpop.permute.xlu0 %8983 }
0x1ba9   :  { %v9035_v25 = vpop.permute.xlu0 %9034 }
0x1bad   :  { %v9086_v53 = vpop.permute.xlu0 %9085 }
0x1bb1   :  { %v9137_v34 = vpop.permute.xlu0 %9136 }
0x1bb5   :  { %v9188_v39 = vpop.permute.xlu0 %9187 }
0x1bb9   :  { %v9239_v2 = vpop.permute.xlu0 %9238 }
0x1bc8   :  { %v8515_v23 = vpop.xlane.xlu1 %8514 }
0x1bc9   :  { %13516 = vrcp.f32 %v8515_v23 }
0x1bca   :  { %13518 = vrcp.f32 %v8506_v13 }
0x1bcc   :  { %v8509_v11 = vpop.xlane.xlu1 %8508 }
0x1bcd   :  { %13520 = vrcp.f32 %v8509_v11 }
0x1bd0   :  { %v9037_v4 = vpop.permute.xlu1 %9036 }
0x1bd1   :  { %v9042_v6 = vsel %vm539_vm2, %v9037_v4, 0 }
0x1bd3   :  { %v13517_v28 = vpop.eup %13516 }
0x1bd4   :  { %v8547_v10 = vmul.f32 %v13517_v28, %v17216_v40  ;;  %v13519_v44 = vpop.eup %13518  ;;  %v9088_v42 = vpop.permute.xlu1 %9087 }
0x1bd5   :  { %v8544_v38 = vmul.f32 %v13519_v44, %v17186_v37  ;;  %v9093_v37 = vsel %vm539_vm2, %v9088_v42, 0 }
0x1bd6   :  { %v8555_v52 = vpack.c.bf16 %v8547_v10, %v8546_v32 }
0x1bd7   :  { %v13521_v9 = vpop.eup %13520 }
0x1bd8   :  { %v8545_v15 = vmul.f32 %v13521_v9, %v17220_v7  ;;  %12463 = vmatmul.mubr.msk.bf16.vlgmr.msra.gmra.mrb[12].mxu1 %vm953_vm3, %v8555_v52  ;;  %v9139_v40 = vpop.permute.xlu1 %9138 }
0x1bd9   :  { %12473 = vmatpush3.bf16.xpose.msra.mxu1 %v8991_v55  ;;  %12474 = vmatprep.mubr.msk.bf16.mxu1 %vm13848_vm1, %v18197_v51  ;;  %v9144_v50 = vsel %vm539_vm2, %v9139_v40, 0 }
0x1bda   :  { %v8554_v12 = vpack.c.bf16 %v8545_v15, %v8544_v38  ;;  %12484 = vmatprep.subr.bf16.mxu1 %v18197_v51 }
0x1bdc   :  { %12457 = vmatmul.mubr.msk.bf16.vlgmr.msra.gmra.mrb[252].mxu0 %vm953_vm3, %v8554_v12  ;;  %v9190_v7 = vpop.permute.xlu1 %9189 }
0x1bdd   :  { %12467 = vmatpush3.bf16.xpose.msra.mxu0 %v8940_v1  ;;  %12468 = vmatprep.mubr.msk.bf16.mxu0 %vm13848_vm1, %v18197_v51  ;;  %v9195_v19 = vsel %vm539_vm2, %v9190_v7, 0 }
0x1bde   :  { %12478 = vmatprep.subr.bf16.mxu0 %v18197_v51 }
0x1be0   :  { %12475 = vmatmul.mubr.msk.bf16.vlgmr.msra.gmra.mrb[16].mxu1 %vm539_vm2, %v8984_v33  ;;  %v9241_v46 = vpop.permute.xlu1 %9240 }
0x1be1   :  { %12485 = vmatpush3.bf16.xpose.msra.mxu1 %v9093_v37  ;;  %12486 = vmatprep.mubr.msk.bf16.mxu1 %vm13848_vm1, %v18197_v51  ;;  %v9246_v57 = vsel %vm539_vm2, %v9241_v46, 0 }
0x1be2   :  { %12496 = vmatprep.subr.bf16.mxu1 %v18197_v51 }
0x1be4   :  { %12469 = vmatmul.mubr.msk.bf16.vlgmr.msra.gmra.mrb[0].mxu0 %vm539_vm2, %v8933_v21  ;;  %v9292_v48 = vpop.permute.xlu1 %9291 }
0x1be5   :  { %12479 = vmatpush3.bf16.xpose.msra.mxu0 %v9042_v6  ;;  %12480 = vmatprep.mubr.msk.bf16.mxu0 %vm13848_vm1, %v18197_v51  ;;  %v9297_v61 = vsel %vm539_vm2, %v9292_v48, 0 }
0x1be6   :  { %12490 = vmatprep.subr.bf16.mxu0 %v18197_v51 }
0x1be8   :  { %12487 = vmatmul.mubr.msk.bf16.vlgmr.msra.gmra.mrb[20].mxu1 %vm539_vm2, %v9086_v53  ;;  %v9290_v16 = vpop.permute.xlu1 %9289 }
0x1be9   :  { %12497 = vmatpush3.bf16.xpose.msra.mxu1 %v9195_v19  ;;  %12498 = vmatprep.mubr.msk.bf16.mxu1 %vm13848_vm1, %v18197_v51 }
0x1bea   :  { %12508 = vmatprep.subr.bf16.mxu1 %v18197_v51 }
0x1bec   :  { %12481 = vmatmul.mubr.msk.bf16.vlgmr.msra.gmra.mrb[4].mxu0 %vm539_vm2, %v9035_v25 }
0x1bed   :  { %12491 = vmatpush3.bf16.xpose.msra.mxu0 %v9144_v50  ;;  %12492 = vmatprep.mubr.msk.bf16.mxu0 %vm13848_vm1, %v18197_v51 }
0x1bee   :  { %12502 = vmatprep.subr.bf16.mxu0 %v18197_v51 }
0x1bf0   :  { %12499 = vmatmul.mubr.msk.bf16.vlgmr.msra.gmra.mrb[24].mxu1 %vm539_vm2, %v9188_v39 }
0x1bf1   :  { %12509 = vmatpush3.bf16.xpose.msra.mxu1 %v9297_v61  ;;  %12510 = vmatprep.mubr.msk.bf16.mxu1 %vm13848_vm1, %v18197_v51 }
0x1bf2   :  { %12520 = vmatprep.subr.bf16.mxu1 %v18197_v51 }
0x1bf4   :  { %12493 = vmatmul.mubr.msk.bf16.vlgmr.msra.gmra.mrb[8].mxu0 %vm539_vm2, %v9137_v34 }
0x1bf5   :  { %12503 = vmatpush3.bf16.xpose.msra.mxu0 %v9246_v57  ;;  %12504 = vmatprep.mubr.msk.bf16.mxu0 %vm13848_vm1, %v18197_v51 }
0x1bf6   :  { %12514 = vmatprep.subr.bf16.mxu0 %v18197_v51 }
0x1bf8   :  { %12511 = vmatmul.mubr.msk.bf16.vlgmr.msra.gmra.mrb[28].mxu1 %vm539_vm2, %v9290_v16 }
0x1bf9   :  { %12522 = vmatprep.mubr.msk.bf16.mxu1 %vm13848_vm1, %v18197_v51 }
0x1bfc   :  { %12505 = vmatmul.mubr.msk.bf16.vlgmr.msra.gmra.mrb[12].mxu0 %vm539_vm2, %v9239_v2 }
0x1bfd   :  { %12516 = vmatprep.mubr.msk.bf16.mxu0 %vm13848_vm1, %v18197_v51 }
0x1c5c   :  { %v17336_v13 = vpop.f32.mrb[0].mxu1 }
0x1c5d   :  { %v12428_v23 = vpop.f32.mrb[1].mxu1 }
0x1c5e   :  { %v17338_v63 = vpop.f32.mrb[2].mxu1 }
0x1c5f   :  { %v12429_v4 = vpop.f32.mrb[3].mxu1 }
0x1c60   :  { %v17342_v27 = vpop.f32.mrb[240].mxu0 }
0x1c61   :  { %v12422_v21 = vpop.f32.mrb[241].mxu0 }
0x1c62   :  { %v17344_v28 = vpop.f32.mrb[242].mxu0 }
0x1c63   :  { %v12423_v10 = vpop.f32.mrb[243].mxu0 }
0x1c64   :  { %v17348_v44 = vpop.f32.mrb[4].mxu1 }
0x1c65   :  { %v12440_v42 = vpop.f32.mrb[5].mxu1 }
0x1c66   :  { %v17350_v52 = vpop.f32.mrb[6].mxu1 }
0x1c67   :  { %v12441_v33 = vpop.f32.mrb[7].mxu1 }
0x1c68   :  { %v17354_v55 = vpop.f32.mrb[244].mxu0 }
0x1c69   :  { %v12434_v38 = vpop.f32.mrb[245].mxu0 }
0x1c6a   :  { %v17356_v15 = vpop.f32.mrb[246].mxu0 }
0x1c6b   :  { %v12435_v40 = vpop.f32.mrb[247].mxu0 }
0x1c6c   :  { %v17360_v1 = vpop.f32.mrb[8].mxu1 }
0x1c6d   :  { %v12452_v25 = vpop.f32.mrb[9].mxu1 }
0x1c6e   :  { %v17362_v37 = vpop.f32.mrb[10].mxu1 }
0x1c6f   :  { %v12453_v53 = vpop.f32.mrb[11].mxu1 }
0x1c70   :  { %v17366_v6 = vpop.f32.mrb[248].mxu0 }
0x1c71   :  { %v12446_v46 = vpop.f32.mrb[249].mxu0 }
0x1c72   :  { %v17368_v19 = vpop.f32.mrb[250].mxu0 }
0x1c73   :  { %v12447_v50 = vpop.f32.mrb[251].mxu0 }
0x1cab   :  { %v17372_v48 = vpop.f32.mrb[12].mxu1 }
0x1cac   :  { %v12464_v39 = vpop.f32.mrb[13].mxu1 }
0x1cad   :  { %v17374_v61 = vpop.f32.mrb[14].mxu1 }
0x1cae   :  { %v12465_v16 = vpop.f32.mrb[15].mxu1 }
0x1caf   :  { %v17378_v2 = vpop.f32.mrb[252].mxu0 }
0x1cb0   :  { %18266 = vst [vmem:[#allocation48_spill] sm:$0xff] %v17378_v2  ;;  %v12458_v23 = vpop.f32.mrb[253].mxu0 }
0x1cb1   :  { %v17380_v4 = vpop.f32.mrb[254].mxu0 }
0x1cb2   :  { %18267 = vst [vmem:[#allocation49_spill] sm:$0xff] %v17380_v4  ;;  %v12459_v10 = vpop.f32.mrb[255].mxu0 }
0x1cb3   :  { %v9027_v42 = vpop.f32.mrb[16].mxu1 }
0x1cb4   :  { %v17384_v33 = vmul.f32 0.35355338, %v9027_v42  ;;  %v12476_v38 = vpop.f32.mrb[17].mxu1 }
0x1cb5   :  { %v9030_v40 = vpop.f32.mrb[18].mxu1 }
0x1cb6   :  { %v12477_v25 = vpop.f32.mrb[19].mxu1  ;;  %v9362_v53 = vsel %vm953_vm3, %v17384_v33, -inf  ;;  %v17390_v23 = vmul.f32 0.35355338, %v9030_v40 }
0x1cb7   :  { %v8976_v46 = vpop.f32.mrb[0].mxu0  ;;  %9363 = vmax.xlane.f32.xlu0 %v9362_v53 }
0x1cb8   :  { %v17388_v50 = vmul.f32 0.35355338, %v8976_v46  ;;  %v12470_v39 = vpop.f32.mrb[1].mxu0 }
0x1cb9   :  { %v8979_v16 = vpop.f32.mrb[2].mxu0 }
0x1cba   :  { %v17392_v57 = vmul.f32 0.35355338, %v8979_v16  ;;  %v12471_v10 = vpop.f32.mrb[3].mxu0  ;;  %v9356_v42 = vsel %vm953_vm3, %v17388_v50, -inf  ;;  %v9365_v16 = vsel %vm953_vm3, %v17390_v23, -inf }
0x1cbb   :  { %9357 = vmax.xlane.f32.xlu0 %v9356_v42  ;;  %v9129_v38 = vpop.f32.mrb[20].mxu1 }
0x1cbc   :  { %v12488_v25 = vpop.f32.mrb[21].mxu1  ;;  %v9359_v21 = vsel %vm953_vm3, %v17392_v57, -inf  ;;  %v17398_v46 = vmul.f32 0.35355338, %v9129_v38 }
0x1cbd   :  { %9360 = vmax.xlane.f32.xlu1 %v9359_v21  ;;  %v9132_v53 = vpop.f32.mrb[22].mxu1 }
0x1cbe   :  { %v17400_v39 = vmul.f32 0.35355338, %v9132_v53  ;;  %v12489_v40 = vpop.f32.mrb[23].mxu1  ;;  %v9374_v53 = vsel %vm953_vm3, %v17398_v46, -inf }
0x1cbf   :  { %9366 = vmax.xlane.f32.xlu0 %v9365_v16  ;;  %v9078_v10 = vpop.f32.mrb[4].mxu0 }
0x1cc0   :  { %v12482_v34 = vpop.f32.mrb[5].mxu0  ;;  %v9377_v42 = vsel %vm953_vm3, %v17400_v39, -inf  ;;  %v17406_v7 = vmul.f32 0.35355338, %v9078_v10 }
0x1cc1   :  { %v9081_v25 = vpop.f32.mrb[6].mxu0  ;;  %9378 = vmax.xlane.f32.xlu1 %v9377_v42 }
0x1cc2   :  { %v17408_v21 = vmul.f32 0.35355338, %v9081_v25  ;;  %v12483_v38 = vpop.f32.mrb[7].mxu0  ;;  %v9368_v42 = vsel %vm953_vm3, %v17406_v7, -inf }
0x1cc3   :  { %9375 = vmax.xlane.f32.xlu0 %v9374_v53  ;;  %v9231_v40 = vpop.f32.mrb[24].mxu1 }
0x1cc4   :  { %v12500_v9 = vpop.f32.mrb[25].mxu1  ;;  %v9371_v16 = vsel %vm953_vm3, %v17408_v21, -inf  ;;  %v17414_v11 = vmul.f32 0.35355338, %v9231_v40 }
0x1cc5   :  { %9372 = vmax.xlane.f32.xlu1 %v9371_v16  ;;  %v9234_v34 = vpop.f32.mrb[26].mxu1 }
0x1cc6   :  { %v17416_v12 = vmul.f32 0.35355338, %v9234_v34  ;;  %v12501_v10 = vpop.f32.mrb[27].mxu1  ;;  %v9386_v34 = vsel %vm953_vm3, %v17414_v11, -inf }
0x1cc7   :  { %9369 = vmax.xlane.f32.xlu0 %v9368_v42  ;;  %v9180_v25 = vpop.f32.mrb[8].mxu0 }
0x1cc8   :  { %v12494_v38 = vpop.f32.mrb[9].mxu0  ;;  %v9389_v53 = vsel %vm953_vm3, %v17416_v12, -inf  ;;  %v17422_v32 = vmul.f32 0.35355338, %v9180_v25 }
0x1cc9   :  { %v9183_v9 = vpop.f32.mrb[10].mxu0  ;;  %9390 = vmax.xlane.f32.xlu1 %v9389_v53 }
0x1cca   :  { %v17424_v16 = vmul.f32 0.35355338, %v9183_v9  ;;  %v12495_v40 = vpop.f32.mrb[11].mxu0  ;;  %v9380_v25 = vsel %vm953_vm3, %v17422_v32, -inf }
0x1ccb   :  { %9387 = vmax.xlane.f32.xlu0 %v9386_v34  ;;  %v9333_v10 = vpop.f32.mrb[28].mxu1 }
0x1ccc   :  { %v12512_v43 = vpop.f32.mrb[29].mxu1  ;;  %v9383_v42 = vsel %vm953_vm3, %v17424_v16, -inf  ;;  %v17430_v35 = vmul.f32 0.35355338, %v9333_v10 }
0x1ccd   :  { %9384 = vmax.xlane.f32.xlu1 %v9383_v42  ;;  %v9336_v38 = vpop.f32.mrb[30].mxu1 }
0x1cce   :  { %v12513_v29 = vpop.f32.mrb[31].mxu1  ;;  %v9398_v43 = vsel %vm953_vm3, %v17430_v35, -inf }
0x1ccf   :  { %9381 = vmax.xlane.f32.xlu0 %v9380_v25  ;;  %v9282_v53 = vpop.f32.mrb[12].mxu0  ;;  %v17450_v29 = vmul.f32 0.35355338, %v9336_v38 }
0x1cd0   :  { %v12506_v9 = vpop.f32.mrb[13].mxu0  ;;  %v17434_v2 = vmul.f32 0.35355338, %v9282_v53 }
0x1cd1   :  { %v9285_v40 = vpop.f32.mrb[14].mxu0  ;;  %v9401_v25 = vsel %vm953_vm3, %v17450_v29, -inf }
0x1cd2   :  { %v12507_v34 = vpop.f32.mrb[15].mxu0  ;;  %v9392_v42 = vsel %vm953_vm3, %v17434_v2, -inf  ;;  %v17452_v10 = vmul.f32 0.35355338, %v9285_v40 }
0x1cd3   :  { %9399 = vmax.xlane.f32.xlu0 %v9398_v43 }
0x1cd7   :  { %9393 = vmax.xlane.f32.xlu0 %v9392_v42 }
0x1cde   :  { %9587 = vrot.lane.b32.xlu1 %v16282_v26, %s13859_s6  ;;  %v9395_v26 = vsel %vm953_vm3, %v17452_v10, -inf }
0x1ce2   :  { %9634 = vrot.lane.b32.xlu1 %v16292_v18, %s13859_s6 }
0x1ce6   :  { %9681 = vrot.lane.b32.xlu1 %v16290_v62, %s13859_s6 }
0x1ced   :  { %9540 = vrot.lane.b32.xlu0 %v16284_v31, %s13859_s6 }
0x1cf1   :  { %9728 = vrot.lane.b32.xlu0 %v16300_v14, %s13859_s6 }
0x1d0a   :  { %9402 = vmax.xlane.f32.xlu1 %v9401_v25 }
0x1d0e   :  { %9396 = vmax.xlane.f32.xlu1 %v9395_v26 }
0x1d1f   :  { %9775 = vrot.lane.b32.xlu1 %v16298_v5, %s13859_s6 }
0x1d44   :  { %v9364_v62 = vpop.xlane.xlu0 %9363 }
0x1d45   :  { %v9406_v31 = vsub.f32 %v17384_v33, %v9364_v62 }
0x1d47   :  { %v9424_v18 = vmul.f32 1.442695, %v9406_v31 }
0x1d48   :  { %v9358_v14 = vpop.xlane.xlu0 %9357 }
0x1d49   :  { %13522 = vpow2.f32 %v9424_v18  ;;  %v9404_v38 = vsub.f32 %v17388_v50, %v9358_v14 }
0x1d4a   :  { %v9361_v53 = vpop.xlane.xlu1 %9360 }
0x1d4b   :  { %v9420_v9 = vmul.f32 1.442695, %v9404_v38  ;;  %v9405_v40 = vsub.f32 %v17392_v57, %v9361_v53 }
0x1d4c   :  { %v9367_v34 = vpop.xlane.xlu0 %9366 }
0x1d4d   :  { %13524 = vpow2.f32 %v9420_v9  ;;  %v9407_v43 = vsub.f32 %v17390_v23, %v9367_v34  ;;  %v9422_v25 = vmul.f32 1.442695, %v9405_v40 }
0x1d4e   :  { %v9379_v42 = vpop.xlane.xlu1 %9378 }
0x1d4f   :  { %v9426_v26 = vmul.f32 1.442695, %v9407_v43  ;;  %v9411_v5 = vsub.f32 %v17400_v39, %v9379_v42 }
0x1d50   :  { %v9376_v4 = vpop.xlane.xlu0 %9375 }
0x1d51   :  { %13526 = vpow2.f32 %v9426_v26  ;;  %v9410_v33 = vsub.f32 %v17398_v46, %v9376_v4  ;;  %v9434_v50 = vmul.f32 1.442695, %v9411_v5 }
0x1d52   :  { %v9373_v62 = vpop.xlane.xlu1 %9372  ;;  %13528 = vpow2.f32 %v9422_v25 }
0x1d53   :  { %v17466_v31 = vpop.eup %13522  ;;  %v9432_v18 = vmul.f32 1.442695, %v9410_v33  ;;  %v9409_v57 = vsub.f32 %v17408_v21, %v9373_v62 }
0x1d54   :  { %v9370_v14 = vpop.xlane.xlu0 %9369  ;;  %v9458_v23 = vsel %vm953_vm3, %v17466_v31, 0.0 }
0x1d55   :  { %13530 = vpow2.f32 %v9432_v18  ;;  %v9408_v38 = vsub.f32 %v17406_v7, %v9370_v14  ;;  %9459 = vadd.xlane.f32.xlu0 %v9458_v23  ;;  %v9430_v4 = vmul.f32 1.442695, %v9409_v57 }
0x1d56   :  { %v9391_v39 = vpop.xlane.xlu1 %9390  ;;  %13532 = vpow2.f32 %v9434_v50 }
0x1d57   :  { %v17472_v53 = vpop.eup %13524  ;;  %v9428_v46 = vmul.f32 1.442695, %v9408_v38  ;;  %v9415_v9 = vsub.f32 %v17416_v12, %v9391_v39 }
0x1d58   :  { %v9388_v40 = vpop.xlane.xlu0 %9387  ;;  %v9452_v21 = vsel %vm953_vm3, %v17472_v53, 0.0 }
0x1d59   :  { %13534 = vpow2.f32 %v9428_v46  ;;  %v9414_v34 = vsub.f32 %v17414_v11, %v9388_v40  ;;  %9453 = vadd.xlane.f32.xlu0 %v9452_v21  ;;  %v9442_v7 = vmul.f32 1.442695, %v9415_v9 }
0x1d5a   :  { %v9385_v43 = vpop.xlane.xlu1 %9384  ;;  %13536 = vpow2.f32 %v9430_v4 }
0x1d5b   :  { %v17478_v42 = vpop.eup %13526  ;;  %v9440_v25 = vmul.f32 1.442695, %v9414_v34  ;;  %v9413_v26 = vsub.f32 %v17424_v16, %v9385_v43 }
0x1d5c   :  { %v9382_v5 = vpop.xlane.xlu0 %9381  ;;  %v9461_v12 = vsel %vm953_vm3, %v17478_v42, 0.0  ;;  %v17483_v33 = vpop.eup %13528 }
0x1d5d   :  { %13538 = vpow2.f32 %v9440_v25  ;;  %v9412_v62 = vsub.f32 %v17422_v32, %v9382_v5  ;;  %9462 = vadd.xlane.f32.xlu1 %v9461_v12  ;;  %v9438_v18 = vmul.f32 1.442695, %v9413_v26  ;;  %v9455_v16 = vsel %vm953_vm3, %v17483_v33, 0.0 }
0x1d5e   :  { %v9588_v11 = vpop.permute.xlu1 %9587  ;;  %13540 = vpow2.f32 %v9442_v7 }
0x1d5f   :  { %v17486_v50 = vpop.eup %13530  ;;  %v9436_v57 = vmul.f32 1.442695, %v9412_v62  ;;  %12521 = vmatpush3.bf16.msra.mxu1 %v9588_v11 }
0x1d60   :  { %v9400_v14 = vpop.xlane.xlu0 %9399  ;;  %v9470_v23 = vsel %vm953_vm3, %v17486_v50, 0.0  ;;  %12532 = vmatprep.subr.bf16.mxu1 %v18197_v51  ;;  %v17493_v38 = vpop.eup %13532 }
0x1d61   :  { %13542 = vpow2.f32 %v9436_v57  ;;  %v9418_v32 = vsub.f32 %v17430_v35, %v9400_v14  ;;  %9456 = vadd.xlane.f32.xlu1 %v9455_v16  ;;  %9471 = vadd.xlane.f32.xlu0 %v9470_v23  ;;  %v9473_v9 = vsel %vm953_vm3, %v17493_v38, 0.0 }
0x1d62   :  { %13544 = vpow2.f32 %v9438_v18 }
0x1d63   :  { %v17496_v39 = vpop.eup %13534  ;;  %v9448_v4 = vmul.f32 1.442695, %v9418_v32  ;;  %v17534_v32 = vpop.permute.xlu1 %9634 }
0x1d64   :  { %v9394_v46 = vpop.xlane.xlu0 %9393  ;;  %v9464_v40 = vsel %vm953_vm3, %v17496_v39, 0.0  ;;  %v17502_v21 = vpop.eup %13536 }
0x1d65   :  { %13546 = vpow2.f32 %v9448_v4  ;;  %v9416_v34 = vsub.f32 %v17434_v2, %v9394_v46  ;;  %9474 = vadd.xlane.f32.xlu1 %v9473_v9  ;;  %9465 = vadd.xlane.f32.xlu0 %v9464_v40  ;;  %v9467_v25 = vsel %vm953_vm3, %v17502_v21, 0.0  ;;  %v18268_v4 = vpack.i.bf16 %v16998_v49, %v16996_v8 }
0x1d66   :  { %v18269_v9 = vpack.i.bf16 %v17344_v28, %v17342_v27  ;;  %v18271_v8 = vpack.i.bf16 %v17356_v15, %v17354_v55  ;;  %v18272_v28 = vpack.i.bf16 %v17022_v56, %v17020_v59  ;;  %v18273_v59 = vpack.i.bf16 %v16992_v45, %v16990_v47 }
0x1d67   :  { %v17505_v35 = vpop.eup %13538  ;;  %v9444_v43 = vmul.f32 1.442695, %v9416_v34  ;;  %v9682_v46 = vpop.permute.xlu1 %9681  ;;  %v18270_v34 = vpack.i.bf16 %v17010_v41, %v17008_v3  ;;  %v18274_v56 = vpack.i.bf16 %v17338_v63, %v17336_v13  ;;  %v18275_v15 = vpack.i.bf16 %v17004_v54, %v17002_v60 }
0x1d68   :  { %v9541_v7 = vpop.permute.xlu0 %9540  ;;  %v9482_v26 = vsel %vm953_vm3, %v17505_v35, 0.0  ;;  %v17511_v5 = vpop.eup %13540 }
0x1d69   :  { %13548 = vpow2.f32 %v9444_v43  ;;  %9468 = vadd.xlane.f32.xlu1 %v9467_v25  ;;  %9483 = vadd.xlane.f32.xlu0 %v9482_v26  ;;  %v9485_v2 = vsel %vm953_vm3, %v17511_v5, 0.0 }
0x1d6a   :  { %12515 = vmatpush3.bf16.msra.mxu0 %v9541_v7 }
0x1d6b   :  { %v17513_v12 = vpop.eup %13542  ;;  %12526 = vmatprep.subr.bf16.mxu0 %v18197_v51 }
0x1d6c   :  { %v9476_v62 = vsel %vm953_vm3, %v17513_v12, 0.0  ;;  %v17520_v11 = vpop.eup %13544  ;;  %v17588_v47 = vpop.permute.xlu0 %9728 }
0x1d6d   :  { %9486 = vadd.xlane.f32.xlu1 %v9485_v2  ;;  %9477 = vadd.xlane.f32.xlu0 %v9476_v62  ;;  %v9479_v57 = vsel %vm953_vm3, %v17520_v11, 0.0 }
0x1d6f   :  { %v17522_v18 = vpop.eup %13546 }
0x1d70   :  { %v9494_v14 = vsel %vm953_vm3, %v17522_v18, 0.0 }
0x1d71   :  { %9480 = vadd.xlane.f32.xlu1 %v9479_v57  ;;  %9495 = vadd.xlane.f32.xlu0 %v9494_v14 }
0x1d73   :  { %v17528_v16 = vpop.eup %13548 }
0x1d74   :  { %v9488_v23 = vsel %vm953_vm3, %v17528_v16, 0.0 }
0x1d75   :  { %9489 = vadd.xlane.f32.xlu0 %v9488_v23 }
0x1d8b   :  { %9822 = vrot.lane.b32.xlu0 %v16308_v20, %s13859_s6 }
0x1d8f   :  { %12775 = vrot.lane.b32.xlu0 %v18268_v4, %s13844_s18 }
0x1d93   :  { %12785 = vrot.lane.b32.xlu0 %v18269_v9, %s13839_s13 }
0x1d97   :  { %v9403_v40 = vpop.xlane.xlu1 %9402  ;;  %12795 = vrot.lane.b32.xlu0 %v18270_v34, %s13844_s18 }
0x1d98   :  { %v9419_v20 = vsub.f32 %v17450_v29, %v9403_v40 }
0x1d9a   :  { %v9450_v43 = vmul.f32 1.442695, %v9419_v20 }
0x1d9b   :  { %v9397_v7 = vpop.xlane.xlu1 %9396  ;;  %12805 = vrot.lane.b32.xlu0 %v18271_v8, %s13839_s13 }
0x1d9c   :  { %13550 = vpow2.f32 %v9450_v43  ;;  %v9417_v49 = vsub.f32 %v17452_v10, %v9397_v7  ;;  %v18276_v10 = vpack.i.bf16 %v17350_v52, %v17348_v44 }
0x1d9e   :  { %v9446_v27 = vmul.f32 1.442695, %v9417_v49 }
0x1d9f   :  { %12815 = vrot.lane.b32.xlu0 %v18272_v28, %s13844_s18  ;;  %v9776_v13 = vpop.permute.xlu1 %9775 }
0x1da0   :  { %13552 = vpow2.f32 %v9446_v27 }
0x1da6   :  { %v17558_v3 = vpop.eup %13550 }
0x1da7   :  { %v9497_v41 = vsel %vm953_vm3, %v17558_v3, 0.0 }
0x1da8   :  { %9498 = vadd.xlane.f32.xlu1 %v9497_v41 }
0x1daa   :  { %v17562_v29 = vpop.eup %13552 }
0x1dab   :  { %v9491_v55 = vsel %vm953_vm3, %v17562_v29, 0.0 }
0x1dac   :  { %9492 = vadd.xlane.f32.xlu1 %v9491_v55 }
0x1dbd   :  { %9869 = vrot.lane.b32.xlu1 %v16306_v17, %s13859_s6  ;;  %v18277_v17 = vpack.i.bf16 %v17016_v24, %v17014_v58 }
0x1dc1   :  { %12780 = vrot.lane.b32.xlu1 %v18273_v59, %s13844_s18 }
0x1dc5   :  { %12790 = vrot.lane.b32.xlu1 %v18274_v56, %s13839_s13 }
0x1dc9   :  { %12800 = vrot.lane.b32.xlu1 %v18275_v15, %s13844_s18 }
0x1dcd   :  { %12810 = vrot.lane.b32.xlu1 %v18276_v10, %s13839_s13 }
0x1dd1   :  { %12820 = vrot.lane.b32.xlu1 %v18277_v17, %s13844_s18 }
0x1de2   :  { %v9460_v45 = vpop.xlane.xlu0 %9459 }
0x1de3   :  { %13554 = vrcp.f32 %v9460_v45 }
0x1de6   :  { %v9454_v63 = vpop.xlane.xlu0 %9453 }
0x1dea   :  { %v9463_v25 = vpop.xlane.xlu1 %9462 }
0x1deb   :  { %13556 = vrcp.f32 %v9463_v25 }
0x1dec   :  { %13558 = vrcp.f32 %v9454_v63 }
0x1ded   :  { %v13555_v26 = vpop.eup %13554 }
0x1dee   :  { %v9457_v60 = vpop.xlane.xlu1 %9456  ;;  %v9472_v54 = vpop.xlane.xlu0 %9471  ;;  %v9518_v58 = vmul.f32 %v13555_v26, %v17466_v31 }
0x1def   :  { %13560 = vrcp.f32 %v9457_v60 }
0x1df0   :  { %13562 = vrcp.f32 %v9472_v54 }
0x1df2   :  { %v9475_v44 = vpop.xlane.xlu1 %9474  ;;  %v9466_v52 = vpop.xlane.xlu0 %9465 }
0x1df3   :  { %13564 = vrcp.f32 %v9475_v44 }
0x1df4   :  { %13566 = vrcp.f32 %v9466_v52 }
0x1df5   :  { %v13557_v2 = vpop.eup %13556 }
0x1df6   :  { %v9519_v24 = vmul.f32 %v13557_v2, %v17478_v42  ;;  %v9469_v62 = vpop.xlane.xlu1 %9468  ;;  %v9484_v57 = vpop.xlane.xlu0 %9483  ;;  %v12906_v2 = vld [vmem:[%s18150_s4 + $0x10] sm:$0xff]  }
0x1df7   :  { %v13559_v14 = vpop.eup %13558  ;;  %13568 = vrcp.f32 %v9469_v62 }
0x1df8   :  { %v9533_v23 = vpack.c.bf16 %v9519_v24, %v9518_v58  ;;  %13570 = vrcp.f32 %v9484_v57  ;;  %v9516_v9 = vmul.f32 %v13559_v14, %v17472_v53 }
0x1df9   :  { %v13561_v4 = vpop.eup %13560 }
0x1dfa   :  { %v9517_v40 = vmul.f32 %v13561_v4, %v17483_v33  ;;  %v9487_v34 = vpop.xlane.xlu1 %9486  ;;  %12523 = vmatmul.mubr.msk.bf16.vlgmr.msra.gmra.mrb[32].mxu1 %vm953_vm3, %v9533_v23  ;;  %v9478_v20 = vpop.xlane.xlu0 %9477 }
0x1dfb   :  { %v13563_v43 = vpop.eup %13562  ;;  %13572 = vrcp.f32 %v9487_v34  ;;  %12533 = vmatpush3.bf16.msra.mxu1 %v9682_v46  ;;  %12534 = vmatprep.mubr.msk.bf16.mxu1 %vm13848_vm1, %v18197_v51 }
0x1dfc   :  { %v9532_v31 = vpack.c.bf16 %v9517_v40, %v9516_v9  ;;  %12544 = vmatprep.subr.bf16.mxu1 %v18197_v51  ;;  %13574 = vrcp.f32 %v9478_v20  ;;  %v9522_v7 = vmul.f32 %v13563_v43, %v17486_v50  ;;  %v18278_v40 = vpack.i.bf16 %v17362_v37, %v17360_v1 }
0x1dfd   :  { %v13565_v42 = vpop.eup %13564  ;;  %v18280_v37 = vpack.i.bf16 %v17028_v36, %v17026_v0  ;;  %v18282_v0 = vpack.i.bf16 %v17374_v61, %v17372_v48  ;;  %v18283_v36 = vld [vmem:[#allocation49_spill] sm:$0xff] }
0x1dfe   :  { %v9523_v53 = vmul.f32 %v13565_v42, %v17493_v38  ;;  %v9481_v33 = vpop.xlane.xlu1 %9480  ;;  %12517 = vmatmul.mubr.msk.bf16.vlgmr.msra.gmra.mrb[16].mxu0 %vm953_vm3, %v9532_v31  ;;  %v13567_v8 = vpop.eup %13566 }
0x1dff   :  { %13576 = vrcp.f32 %v9481_v33  ;;  %12527 = vmatpush3.bf16.msra.mxu0 %v17534_v32  ;;  %12528 = vmatprep.mubr.msk.bf16.mxu0 %vm13848_vm1, %v18197_v51  ;;  %v9520_v27 = vmul.f32 %v13567_v8, %v17496_v39  ;;  %v9496_v28 = vpop.xlane.xlu0 %9495 }
0x1e00   :  { %v9535_v46 = vpack.c.bf16 %v9523_v53, %v9522_v7  ;;  %12538 = vmatprep.subr.bf16.mxu0 %v18197_v51  ;;  %13578 = vrcp.f32 %v9496_v28  ;;  %v18279_v7 = vpack.i.bf16 %v17368_v19, %v17366_v6  ;;  %v18281_v19 = vpack.i.bf16 %v17034_v22, %v17032_v30 }
0x1e01   :  { %v13569_v49 = vpop.eup %13568 }
0x1e02   :  { %v9521_v50 = vmul.f32 %v13569_v49, %v17502_v21  ;;  %12535 = vmatmul.mubr.msk.bf16.vlgmr.msra.gmra.mrb[36].mxu1 %vm953_vm3, %v9535_v46  ;;  %v13571_v38 = vpop.eup %13570 }
0x1e03   :  { %12545 = vmatpush3.bf16.msra.mxu1 %v9776_v13  ;;  %12546 = vmatprep.mubr.msk.bf16.mxu1 %vm13848_vm1, %v18197_v51  ;;  %v9526_v55 = vmul.f32 %v13571_v38, %v17505_v35  ;;  %v9490_v56 = vpop.xlane.xlu0 %9489 }
0x1e04   :  { %v9534_v32 = vpack.c.bf16 %v9521_v50, %v9520_v27  ;;  %12556 = vmatprep.subr.bf16.mxu1 %v18197_v51 }
0x1e05   :  { %v13573_v41 = vpop.eup %13572 }
0x1e06   :  { %v9527_v59 = vmul.f32 %v13573_v41, %v17511_v5  ;;  %12529 = vmatmul.mubr.msk.bf16.vlgmr.msra.gmra.mrb[20].mxu0 %vm953_vm3, %v9534_v32  ;;  %v13575_v39 = vpop.eup %13574 }
0x1e07   :  { %12539 = vmatpush3.bf16.msra.mxu0 %v17588_v47  ;;  %12540 = vmatprep.mubr.msk.bf16.mxu0 %vm13848_vm1, %v18197_v51  ;;  %v9524_v10 = vmul.f32 %v13575_v39, %v17513_v12  ;;  %v9823_v5 = vpop.permute.xlu0 %9822 }
0x1e08   :  { %v9537_v21 = vpack.c.bf16 %v9527_v59, %v9526_v55  ;;  %12550 = vmatprep.subr.bf16.mxu0 %v18197_v51  ;;  %v18284_v59 = vld [vmem:[#allocation48_spill] sm:$0xff] }
0x1e09   :  { %v13577_v15 = vpop.eup %13576  ;;  %v18285_v39 = vpack.i.bf16 %v18283_v36, %v18284_v59  ;;  %v18290_v36 = vld [vmem:[#allocation37_spill] sm:$0xff] }
0x1e0a   :  { %v9525_v17 = vmul.f32 %v13577_v15, %v17520_v11  ;;  %12547 = vmatmul.mubr.msk.bf16.vlgmr.msra.gmra.mrb[40].mxu1 %vm953_vm3, %v9537_v21  ;;  %v13579_v45 = vpop.eup %13578 }
0x1e0b   :  { %12558 = vmatprep.mubr.msk.bf16.mxu1 %vm13848_vm1, %v18197_v51  ;;  %v9530_v63 = vmul.f32 %v13579_v45, %v17522_v18  ;;  %v12907_v18 = vld [vmem:[%s18150_s4 + $0x18] sm:$0xff]  }
0x1e0c   :  { %v9536_v35 = vpack.c.bf16 %v9525_v17, %v9524_v10 }
0x1e0e   :  { %12541 = vmatmul.mubr.msk.bf16.vlgmr.msra.gmra.mrb[24].mxu0 %vm953_vm3, %v9536_v35 }
0x1e0f   :  { %12551 = vmatpush3.bf16.msra.mxu0 %v9823_v5  ;;  %12552 = vmatprep.mubr.msk.bf16.mxu0 %vm13848_vm1, %v18197_v51 }
0x1e10   :  { %12562 = vmatprep.subr.bf16.mxu0 %v12906_v2 }
0x1e35   :  { %v9499_v47 = vpop.xlane.xlu1 %9498 }
0x1e36   :  { %13580 = vrcp.f32 %v9499_v47  ;;  %v12776_v47 = vpop.permute.xlu0 %12775 }
0x1e37   :  { %13582 = vrcp.f32 %v9490_v56 }
0x1e39   :  { %v9493_v12 = vpop.xlane.xlu1 %9492 }
0x1e3a   :  { %13584 = vrcp.f32 %v9493_v12 }
0x1e3d   :  { %v9870_v11 = vpop.permute.xlu1 %9869 }
0x1e3e   :  { %12557 = vmatpush3.bf16.msra.mxu1 %v9870_v11  ;;  %v12786_v11 = vpop.permute.xlu0 %12785 }
0x1e40   :  { %v13581_v13 = vpop.eup %13580 }
0x1e41   :  { %v9531_v25 = vmul.f32 %v13581_v13, %v17558_v3  ;;  %v13583_v60 = vpop.eup %13582  ;;  %v12781_v61 = vpop.permute.xlu1 %12780 }
0x1e42   :  { %v9528_v52 = vmul.f32 %v13583_v60, %v17528_v16  ;;  %v12796_v13 = vpop.permute.xlu0 %12795 }
0x1e43   :  { %v9539_v54 = vpack.c.bf16 %v9531_v25, %v9530_v63 }
0x1e44   :  { %v13585_v44 = vpop.eup %13584 }
0x1e45   :  { %v9529_v51 = vmul.f32 %v13585_v44, %v17562_v29  ;;  %12559 = vmatmul.mubr.msk.bf16.vlgmr.msra.gmra.mrb[44].mxu1 %vm953_vm3, %v9539_v54  ;;  %v12791_v12 = vpop.permute.xlu1 %12790  ;;  %v12783_v54 = vunpack.i.h.bf16 %v12781_v61  ;;  %v12782_v44 = vunpack.i.l.bf16 %v12781_v61 }
0x1e46   :  { %v17670_v25 = vpop.permute.xlu0 %12805 }
0x1e47   :  { %v9538_v26 = vpack.c.bf16 %v9529_v51, %v9528_v52  ;;  %v12793_v52 = vunpack.i.h.bf16 %v12791_v12  ;;  %v12792_v51 = vunpack.i.l.bf16 %v12791_v12 }
0x1e49   :  { %12553 = vmatmul.mubr.msk.bf16.vlgmr.msra.gmra.mrb[28].mxu0 %vm953_vm3, %v9538_v26  ;;  %v12801_v45 = vpop.permute.xlu1 %12800  ;;  %v12778_v26 = vunpack.i.h.bf16 %v12776_v47 }
0x1e4a   :  { %12563 = vmatpush3.bf16.msra.mxu0 %v12906_v2  ;;  %v12777_v2 = vunpack.i.l.bf16 %v12776_v47  ;;  %v18293_v47 = vld [vmem:[#allocation38_spill] sm:$0xff] }
0x1e4b   :  { %12564 = vmatprep.subr.bf16.mxu0 %v12907_v18 }
0x1e4d   :  { %v12811_v63 = vpop.permute.xlu1 %12810 }
0x1e4e   :  { %12565 = vmatpush3.bf16.msra.mxu0 %v12907_v18  ;;  %v17674_v18 = vpop.permute.xlu0 %12815 }
0x1e51   :  { %v17672_v60 = vpop.permute.xlu1 %12820 }
0x1ecd   :  { %v9627_v3 = vpop.f32.mrb[32].mxu1 }
0x1ece   :  { %v12524_v16 = vpop.f32.mrb[33].mxu1 }
0x1ecf   :  { %v9630_v29 = vpop.f32.mrb[34].mxu1  ;;  %v18286_v16 = vld [vmem:[#allocation30_spill] sm:$0xff] }
0x1ed0   :  { %v12824_v58 = vpack.i.bf16 %v9630_v29, %v9627_v3  ;;  %v12525_v24 = vpop.f32.mrb[35].mxu1  ;;  %v10111_v29 = vsel %vm539_vm2, %v18286_v16, %v12783_v54 }
0x1ed1   :  { %v9580_v62 = vpop.f32.mrb[16].mxu0 }
0x1ed2   :  { %12825 = vrot.lane.b32.xlu1 %v12824_v58, %s13860_s14  ;;  %v12518_v57 = vpop.f32.mrb[17].mxu0  ;;  %v18287_v58 = vld [vmem:[#allocation31_spill] sm:$0xff] }
0x1ed3   :  { %v9583_v14 = vpop.f32.mrb[18].mxu0  ;;  %v10110_v24 = vsel %vm539_vm2, %v18287_v58, %v12782_v44  ;;  %v12817_v58 = vunpack.i.l.bf16 %v17674_v18 }
0x1ed4   :  { %v12829_v23 = vpack.i.bf16 %v9583_v14, %v9580_v62  ;;  %v12519_v4 = vpop.f32.mrb[19].mxu0  ;;  %v12788_v14 = vunpack.i.h.bf16 %v12786_v11 }
0x1ed5   :  { %v9721_v9 = vpop.f32.mrb[36].mxu1  ;;  %v10126_v4 = vsel %vm953_vm3, %v10110_v24, %v12792_v51 }
0x1ed6   :  { %12840 = vrot.lane.b32.xlu1 %v18278_v40, %s13839_s13  ;;  %12830 = vrot.lane.b32.xlu0 %v12829_v23, %s13860_s14  ;;  %v12536_v34 = vpop.f32.mrb[37].mxu1  ;;  %v12787_v23 = vunpack.i.l.bf16 %v12786_v11 }
0x1ed7   :  { %v9724_v20 = vpop.f32.mrb[38].mxu1 }
0x1ed8   :  { %v12844_v43 = vpack.i.bf16 %v9724_v20, %v9721_v9  ;;  %v12537_v31 = vpop.f32.mrb[39].mxu1  ;;  %v10127_v9 = vsel %vm953_vm3, %v10111_v29, %v12793_v52  ;;  %v18288_v20 = vld [vmem:[#allocation35_spill] sm:$0xff]  ;;  %v12818_v29 = vunpack.i.h.bf16 %v17674_v18 }
0x1ed9   :  { %v9674_v42 = vpop.f32.mrb[20].mxu0  ;;  %v18289_v31 = vld [vmem:[#allocation34_spill] sm:$0xff] }
0x1eda   :  { %12835 = vrot.lane.b32.xlu0 %v18279_v7, %s13839_s13  ;;  %12845 = vrot.lane.b32.xlu1 %v12844_v43, %s13860_s14  ;;  %v12530_v53 = vpop.f32.mrb[21].mxu0  ;;  %v10109_v43 = vsel %vm539_vm2, %v18288_v20, %v12778_v26 }
0x1edb   :  { %v9677_v33 = vpop.f32.mrb[22].mxu0 }
0x1edc   :  { %v12849_v8 = vpack.i.bf16 %v9677_v33, %v9674_v42  ;;  %v12531_v46 = vpop.f32.mrb[23].mxu0  ;;  %v10108_v42 = vsel %vm539_vm2, %v18289_v31, %v12777_v2 }
0x1edd   :  { %v9815_v1 = vpop.f32.mrb[40].mxu1  ;;  %v12802_v46 = vunpack.i.l.bf16 %v12801_v45 }
0x1ede   :  { %12860 = vrot.lane.b32.xlu1 %v18280_v37, %s13844_s18  ;;  %12850 = vrot.lane.b32.xlu0 %v12849_v8, %s13860_s14  ;;  %v12548_v49 = vpop.f32.mrb[41].mxu1  ;;  %v12803_v8 = vunpack.i.h.bf16 %v12801_v45 }
0x1edf   :  { %v9818_v27 = vpop.f32.mrb[42].mxu1  ;;  %v10124_v49 = vsel %vm953_vm3, %v10108_v42, %v12787_v23  ;;  %v18295_v23 = vld [vmem:[#allocation40_spill] sm:$0xff] }
0x1ee0   :  { %v12864_v50 = vpack.i.bf16 %v9818_v27, %v9815_v1  ;;  %v12549_v28 = vpop.f32.mrb[43].mxu1  ;;  %v10125_v27 = vsel %vm953_vm3, %v10109_v43, %v12788_v14  ;;  %v10115_v59 = vsel %vm539_vm2, %v18290_v36, %v12803_v8 }
0x1ee1   :  { %v9768_v6 = vpop.f32.mrb[24].mxu0  ;;  %v12812_v28 = vunpack.i.l.bf16 %v12811_v63 }
0x1ee2   :  { %12855 = vrot.lane.b32.xlu0 %v18281_v19, %s13844_s18  ;;  %12865 = vrot.lane.b32.xlu1 %v12864_v50, %s13860_s14  ;;  %v12542_v38 = vpop.f32.mrb[25].mxu0  ;;  %v12813_v50 = vunpack.i.h.bf16 %v12811_v63  ;;  %v12823_v63 = vunpack.i.h.bf16 %v17672_v60 }
0x1ee3   :  { %v9771_v32 = vpop.f32.mrb[26].mxu0  ;;  %v12798_v38 = vunpack.i.h.bf16 %v12796_v13 }
0x1ee4   :  { %v12869_v41 = vpack.i.bf16 %v9771_v32, %v9768_v6  ;;  %v12543_v55 = vpop.f32.mrb[27].mxu0  ;;  %v12797_v32 = vunpack.i.l.bf16 %v12796_v13 }
0x1ee6   :  { %12880 = vrot.lane.b32.xlu1 %v18282_v0, %s13839_s13  ;;  %12870 = vrot.lane.b32.xlu0 %v12869_v41, %s13860_s14  ;;  %v10112_v12 = vsel %vm539_vm2, %v18293_v47, %v12797_v32 }
0x1eea   :  { %12875 = vrot.lane.b32.xlu0 %v18285_v39, %s13839_s13  ;;  %v18291_v39 = vld [vmem:[#allocation36_spill] sm:$0xff] }
0x1f18   :  { %v9909_v30 = vpop.f32.mrb[44].mxu1 }
0x1f19   :  { %v12560_v22 = vpop.f32.mrb[45].mxu1 }
0x1f1a   :  { %v9912_v21 = vpop.f32.mrb[46].mxu1 }
0x1f1b   :  { %v12889_v56 = vpack.i.bf16 %v9912_v21, %v9909_v30  ;;  %v12561_v15 = vpop.f32.mrb[47].mxu1  ;;  %v10114_v30 = vsel %vm539_vm2, %v18291_v39, %v12802_v46  ;;  %v18297_v46 = vld [vmem:[#allocation42_spill] sm:$0xff] }
0x1f1c   :  { %v9862_v10 = vpop.f32.mrb[28].mxu0  ;;  %v12807_v15 = vunpack.i.l.bf16 %v17670_v25 }
0x1f1d   :  { %12890 = vrot.lane.b32.xlu1 %v12889_v56, %s13860_s14  ;;  %v12554_v17 = vpop.f32.mrb[29].mxu0  ;;  %v12808_v56 = vunpack.i.h.bf16 %v17670_v25  ;;  %v12822_v25 = vunpack.i.l.bf16 %v17672_v60  ;;  %v18294_v60 = vld [vmem:[#allocation41_spill] sm:$0xff] }
0x1f1e   :  { %v9865_v35 = vpop.f32.mrb[30].mxu0  ;;  %v10131_v17 = vsel %vm953_vm3, %v10115_v59, %v12813_v50  ;;  %v10128_v52 = vsel %vm953_vm3, %v10112_v12, %v12807_v15  ;;  %v10119_v14 = vsel %vm539_vm2, %v18294_v60, %v12823_v63  ;;  %v18298_v59 = vld [vmem:[#allocation45_spill] sm:$0xff] }
0x1f1f   :  { %v12884_v5 = vpack.i.bf16 %v9865_v35, %v9862_v10  ;;  %v12555_v48 = vpop.f32.mrb[31].mxu0  ;;  %v10130_v10 = vsel %vm953_vm3, %v10114_v30, %v12812_v28  ;;  %v18299_v30 = vld [vmem:[#allocation44_spill] sm:$0xff] }
0x1f20   :  { %v18292_v48 = vld [vmem:[#allocation39_spill] sm:$0xff] }
0x1f21   :  { %12885 = vrot.lane.b32.xlu0 %v12884_v5, %s13860_s14  ;;  %v10113_v61 = vsel %vm539_vm2, %v18292_v48, %v12798_v38 }
0x1f22   :  { %v10129_v51 = vsel %vm953_vm3, %v10113_v61, %v12808_v56 }
0x1f44   :  { %v12826_v3 = vpop.permute.xlu1 %12825 }
0x1f45   :  { %v12828_v62 = vunpack.i.h.bf16 %v12826_v3  ;;  %v12827_v57 = vunpack.i.l.bf16 %v12826_v3 }
0x1f47   :  { %v10143_v40 = vsel %vm4690_vm4, %v10127_v9, %v12828_v62  ;;  %v10142_v34 = vsel %vm4690_vm4, %v10126_v4, %v12827_v57  ;;  %v10118_v4 = vsel %vm539_vm2, %v18295_v23, %v12822_v25  ;;  %v18301_v25 = vld [vmem:[#allocation46_spill] sm:$0xff]  ;;  %v18302_v23 = vld [vmem:[#allocation33_spill] sm:$0xff] }
0x1f48   :  { %v10157_v7 = vpack.c.bf16 %v10143_v40, %v10142_v34  ;;  %v12841_v53 = vpop.permute.xlu1 %12840  ;;  %v12831_v33 = vpop.permute.xlu0 %12830 }
0x1f49   :  { %v12833_v1 = vunpack.i.h.bf16 %v12831_v33  ;;  %v12832_v37 = vunpack.i.l.bf16 %v12831_v33  ;;  %v12843_v26 = vunpack.i.h.bf16 %v12841_v53  ;;  %v12842_v2 = vunpack.i.l.bf16 %v12841_v53  ;;  %v18296_v33 = vld [vmem:[#allocation43_spill] sm:$0xff] }
0x1f4a   :  { %v10117_v8 = vsel %vm539_vm2, %v18296_v33, %v12818_v29  ;;  %v17754_v29 = vld [vmem:[#allocation5 + $0x1] ss:$0 sm:$0xff]  ;;  %v18305_v33 = vld [vmem:[#allocation16_spill] sm:$0xff] }
0x1f4b   :  { %v10140_v6 = vsel %vm4690_vm4, %v10124_v49, %v12832_v37  ;;  %v10141_v19 = vsel %vm4690_vm4, %v10125_v27, %v12833_v1  ;;  %v10135_v34 = vsel %vm953_vm3, %v10119_v14, %v12843_v26  ;;  %v10134_v20 = vsel %vm953_vm3, %v10118_v4, %v12842_v2 }
0x1f4c   :  { %v10156_v41 = vpack.c.bf16 %v10141_v19, %v10140_v6  ;;  %v12846_v55 = vpop.permute.xlu1 %12845  ;;  %v12836_v0 = vpop.permute.xlu0 %12835  ;;  %v10116_v1 = vsel %vm539_vm2, %v18297_v46, %v12817_v58 }
0x1f4d   :  { %v12848_v22 = vunpack.i.h.bf16 %v12846_v55  ;;  %v12847_v21 = vunpack.i.l.bf16 %v12846_v55  ;;  %v12838_v43 = vunpack.i.h.bf16 %v12836_v0  ;;  %v12837_v31 = vunpack.i.l.bf16 %v12836_v0 }
0x1f4e   :  { %12566 = vmatprep.mubr.msk.bf16.mxu0 %vm129_vm0, %v10156_v41 }
0x1f4f   :  { %v10147_v35 = vsel %vm4690_vm4, %v10131_v17, %v12848_v22  ;;  %v10146_v5 = vsel %vm4690_vm4, %v10130_v10, %v12847_v21  ;;  %12567 = vmatmul.mubr.msk.bf16.vlgmr.msra.gmra.mrb[32].mxu0 %vm129_vm0, %v10157_v7  ;;  %v10132_v27 = vsel %vm953_vm3, %v10116_v1, %v12837_v31  ;;  %v10133_v50 = vsel %vm953_vm3, %v10117_v8, %v12838_v43  ;;  %v18304_v43 = vld [vmem:[#allocation17_spill] sm:$0xff] }
0x1f50   :  { %v10159_v11 = vpack.c.bf16 %v10147_v35, %v10146_v5  ;;  %v12861_v45 = vpop.permute.xlu1 %12860  ;;  %v12851_v13 = vpop.permute.xlu0 %12850 }
0x1f51   :  { %v12853_v54 = vunpack.i.h.bf16 %v12851_v13  ;;  %v12852_v44 = vunpack.i.l.bf16 %v12851_v13  ;;  %v12863_v32 = vunpack.i.h.bf16 %v12861_v45  ;;  %v12862_v41 = vunpack.i.l.bf16 %v12861_v45  ;;  %v18300_v13 = vld [vmem:[#allocation47_spill] sm:$0xff] }
0x1f53   :  { %v10144_v3 = vsel %vm4690_vm4, %v10128_v52, %v12852_v44  ;;  %v10145_v16 = vsel %vm4690_vm4, %v10129_v51, %v12853_v54  ;;  %v10123_v39 = vsel %vm539_vm2, %v18298_v59, %v12863_v32  ;;  %v10122_v22 = vsel %vm539_vm2, %v18299_v30, %v12862_v41  ;;  %v18309_v30 = vld [vmem:[#allocation18_spill] sm:$0xff] }
0x1f54   :  { %v10158_v24 = vpack.c.bf16 %v10145_v16, %v10144_v3  ;;  %v12866_v62 = vpop.permute.xlu1 %12865  ;;  %v12856_v57 = vpop.permute.xlu0 %12855 }
0x1f55   :  { %v12868_v9 = vunpack.i.h.bf16 %v12866_v62  ;;  %v12867_v40 = vunpack.i.l.bf16 %v12866_v62  ;;  %v12858_v56 = vunpack.i.h.bf16 %v12856_v57  ;;  %v12857_v15 = vunpack.i.l.bf16 %v12856_v57 }
0x1f56   :  { %12570 = vmatprep.mubr.msk.bf16.mxu0 %vm129_vm0, %v10158_v24 }
0x1f57   :  { %v10151_v18 = vsel %vm4690_vm4, %v10135_v34, %v12868_v9  ;;  %v10150_v42 = vsel %vm4690_vm4, %v10134_v20, %v12867_v40  ;;  %12571 = vmatmul.mubr.msk.bf16.gmra.mrb[36].mxu0 %vm129_vm0, %v10159_v11  ;;  %v10121_v63 = vsel %vm539_vm2, %v18300_v13, %v12858_v56  ;;  %v10120_v54 = vsel %vm539_vm2, %v18301_v25, %v12857_v15  ;;  %v18303_v40 = vld [vmem:[#allocation32_spill] sm:$0xff] }
0x1f58   :  { %v10161_v7 = vpack.c.bf16 %v10151_v18, %v10150_v42  ;;  %v12871_v53 = vpop.permute.xlu0 %12870  ;;  %v12881_v38 = vpop.permute.xlu1 %12880  ;;  %v18312_v13 = vld [vmem:[#allocation24_spill] sm:$0xff] }
0x1f59   :  { %v12873_v37 = vunpack.i.h.bf16 %v12871_v53  ;;  %v12872_v49 = vunpack.i.l.bf16 %v12871_v53  ;;  %v12883_v55 = vunpack.i.h.bf16 %v12881_v38  ;;  %v12882_v0 = vunpack.i.l.bf16 %v12881_v38  ;;  %v18307_v38 = vld [vmem:[#allocation21_spill] sm:$0xff] }
0x1f5b   :  { %v10148_v28 = vsel %vm4690_vm4, %v10132_v27, %v12872_v49  ;;  %v10149_v6 = vsel %vm4690_vm4, %v10133_v50, %v12873_v37  ;;  %v10139_v35 = vsel %vm953_vm3, %v10123_v39, %v12883_v55  ;;  %v10138_v5 = vsel %vm953_vm3, %v10122_v22, %v12882_v0  ;;  %v18308_v55 = vld [vmem:[#allocation20_spill] sm:$0xff] }
0x1f5c   :  { %v10160_v19 = vpack.c.bf16 %v10149_v6, %v10148_v28  ;;  %v12876_v36 = vpop.permute.xlu0 %12875  ;;  %v18306_v6 = vld [vmem:[#allocation19_spill] sm:$0xff] }
0x1f5d   :  { %v12878_v48 = vunpack.i.h.bf16 %v12876_v36  ;;  %v12877_v61 = vunpack.i.l.bf16 %v12876_v36 }
0x1f5e   :  { %12574 = vmatprep.mubr.msk.bf16.mxu0 %vm129_vm0, %v10160_v19 }
0x1f5f   :  { %12575 = vmatmul.mubr.msk.bf16.gmra.mrb[40].mxu0 %vm129_vm0, %v10161_v7  ;;  %v10136_v51 = vsel %vm953_vm3, %v10120_v54, %v12877_v61  ;;  %v10137_v26 = vsel %vm953_vm3, %v10121_v63, %v12878_v48  ;;  %v18310_v61 = vld [vmem:[#allocation23_spill] sm:$0xff]  ;;  %v18313_v54 = vld [vmem:[#allocation22_spill] sm:$0xff] }
0x1f8f   :  { %v12891_v21 = vpop.permute.xlu1 %12890 }
0x1f90   :  { %v12893_v10 = vunpack.i.h.bf16 %v12891_v21  ;;  %v12892_v17 = vunpack.i.l.bf16 %v12891_v21 }
0x1f92   :  { %v10155_v47 = vsel %vm4690_vm4, %v10139_v35, %v12893_v10  ;;  %v10154_v12 = vsel %vm4690_vm4, %v10138_v5, %v12892_v17 }
0x1f93   :  { %v10163_v11 = vpack.c.bf16 %v10155_v47, %v10154_v12  ;;  %v12886_v45 = vpop.permute.xlu0 %12885  ;;  %v18311_v12 = vld [vmem:[#allocation25_spill] sm:$0xff] }
0x1f94   :  { %v12888_v44 = vunpack.i.h.bf16 %v12886_v45  ;;  %v12887_v52 = vunpack.i.l.bf16 %v12886_v45 }
0x1f96   :  { %v10152_v2 = vsel %vm4690_vm4, %v10136_v51, %v12887_v52  ;;  %v10153_v3 = vsel %vm4690_vm4, %v10137_v26, %v12888_v44 }
0x1f97   :  { %v10162_v16 = vpack.c.bf16 %v10153_v3, %v10152_v2 }
0x1f99   :  { %12578 = vmatprep.mubr.msk.bf16.mxu0 %vm129_vm0, %v10162_v16 }
0x1f9a   :  { %12579 = vmatmul.mubr.msk.bf16.gmra.mrb[44].mxu0 %vm129_vm0, %v10163_v11 }
0x2022   :  { %v12568_v58 = vpop.f32.mrb[32].mxu0 }
0x2023   :  { %v10247_v24 = vpop.f32.mrb[33].mxu0  ;;  %v10256_v62 = vadd.f32 %v12568_v58, %v17754_v29 }
0x2024   :  { %v10248_v57 = vadd.f32 %v17754_v29, %v10247_v24  ;;  %v12569_v60 = vpop.f32.mrb[34].mxu0 }
0x2025   :  { %v10250_v14 = vpop.f32.mrb[35].mxu0  ;;  %v17763_v34 = vadd.f32 %v10256_v62, %v18303_v40  ;;  %v10259_v20 = vadd.f32 %v12569_v60, %v17754_v29 }
0x2026   :  { %v17759_v4 = vadd.f32 %v10248_v57, %v18302_v23  ;;  %v10251_v9 = vadd.f32 %v17754_v29, %v10250_v14  ;;  %v18314_v57 = vld [vmem:[#allocation29_spill] sm:$0xff] }
0x2027   :  { %v17774_v8 = vadd.f32 %v10259_v20, %v18305_v33  ;;  %v10336_v37 = vsel %vm129_vm0, %v17763_v34, 0.0  ;;  %v18316_v20 = vld [vmem:[#allocation27_spill] sm:$0xff] }
0x2028   :  { %v17767_v31 = vadd.f32 %v10251_v9, %v18304_v43  ;;  %v10330_v18 = vsel %vm129_vm0, %v17759_v4, 0.0  ;;  %v18315_v9 = vld [vmem:[#allocation28_spill] sm:$0xff] }
0x2029   :  { %10331 = vadd.xlane.f32.xlu0 %v10330_v18  ;;  %v10339_v41 = vsel %vm129_vm0, %v17774_v8, 0.0 }
0x202a   :  { %v12572_v42 = vpop.f32.mrb[36].mxu0  ;;  %v10333_v7 = vsel %vm129_vm0, %v17767_v31, 0.0 }
0x202b   :  { %v10263_v53 = vpop.f32.mrb[37].mxu0  ;;  %10334 = vadd.xlane.f32.xlu1 %v10333_v7  ;;  %v10272_v28 = vadd.f32 %v12572_v42, %v17754_v29  ;;  %v18317_v42 = vld [vmem:[#allocation26_spill] sm:$0xff] }
0x202c   :  { %v10264_v46 = vadd.f32 %v17754_v29, %v10263_v53  ;;  %v12573_v1 = vpop.f32.mrb[38].mxu0 }
0x202d   :  { %v10266_v49 = vpop.f32.mrb[39].mxu0  ;;  %10337 = vadd.xlane.f32.xlu0 %v10336_v37  ;;  %v10275_v27 = vadd.f32 %v12573_v1, %v17754_v29  ;;  %v17796_v22 = vadd.f32 %v10272_v28, %v18309_v30 }
0x202e   :  { %v10267_v50 = vadd.f32 %v17754_v29, %v10266_v49  ;;  %v17783_v19 = vadd.f32 %v10264_v46, %v18306_v6 }
0x202f   :  { %v17791_v0 = vadd.f32 %v10275_v27, %v18308_v55  ;;  %v10348_v45 = vsel %vm129_vm0, %v17796_v22, 0.0 }
0x2030   :  { %v17786_v32 = vadd.f32 %v10267_v50, %v18307_v38  ;;  %v10342_v15 = vsel %vm129_vm0, %v17783_v19, 0.0 }
0x2031   :  { %10340 = vadd.xlane.f32.xlu0 %v10339_v41  ;;  %v10351_v5 = vsel %vm129_vm0, %v17791_v0, 0.0 }
0x2032   :  { %v12576_v36 = vpop.f32.mrb[40].mxu0  ;;  %v10345_v59 = vsel %vm129_vm0, %v17786_v32, 0.0 }
0x2033   :  { %v10279_v39 = vpop.f32.mrb[41].mxu0  ;;  %10346 = vadd.xlane.f32.xlu1 %v10345_v59  ;;  %v10288_v48 = vadd.f32 %v12576_v36, %v17754_v29 }
0x2034   :  { %v10280_v21 = vadd.f32 %v17754_v29, %v10279_v39  ;;  %v12577_v56 = vpop.f32.mrb[42].mxu0 }
0x2035   :  { %v10282_v10 = vpop.f32.mrb[43].mxu0  ;;  %10343 = vadd.xlane.f32.xlu0 %v10342_v15  ;;  %v10291_v17 = vadd.f32 %v12577_v56, %v17754_v29  ;;  %v17820_v44 = vadd.f32 %v10288_v48, %v18313_v54 }
0x2036   :  { %v10283_v35 = vadd.f32 %v17754_v29, %v10282_v10  ;;  %v17807_v47 = vadd.f32 %v10280_v21, %v18310_v61 }
0x2037   :  { %10352 = vadd.xlane.f32.xlu1 %v10351_v5  ;;  %v17815_v63 = vadd.f32 %v10291_v17, %v18312_v13  ;;  %v10360_v26 = vsel %vm129_vm0, %v17820_v44, 0.0 }
0x2038   :  { %v17810_v11 = vadd.f32 %v10283_v35, %v18311_v12  ;;  %v10354_v52 = vsel %vm129_vm0, %v17807_v47, 0.0 }
0x2039   :  { %10349 = vadd.xlane.f32.xlu0 %v10348_v45  ;;  %v10363_v51 = vsel %vm129_vm0, %v17815_v63, 0.0 }
0x203a   :  { %v10357_v25 = vsel %vm129_vm0, %v17810_v11, 0.0 }
0x203b   :  { %10358 = vadd.xlane.f32.xlu1 %v10357_v25 }
0x203d   :  { %10355 = vadd.xlane.f32.xlu0 %v10354_v52 }
0x203f   :  { %10364 = vadd.xlane.f32.xlu1 %v10363_v51 }
0x2041   :  { %10361 = vadd.xlane.f32.xlu0 %v10360_v26 }
0x206d   :  { %v12580_v2 = vpop.f32.mrb[44].mxu0 }
0x206e   :  { %v10295_v3 = vpop.f32.mrb[45].mxu0  ;;  %v10304_v16 = vadd.f32 %v12580_v2, %v17754_v29 }
0x206f   :  { %v10296_v58 = vadd.f32 %v17754_v29, %v10295_v3  ;;  %v12581_v24 = vpop.f32.mrb[46].mxu0 }
0x2070   :  { %v10298_v62 = vpop.f32.mrb[47].mxu0  ;;  %v10307_v14 = vadd.f32 %v12581_v24, %v17754_v29  ;;  %v17836_v40 = vadd.f32 %v10304_v16, %v18315_v9 }
0x2071   :  { %v17831_v60 = vadd.f32 %v10296_v58, %v18314_v57  ;;  %v10299_v23 = vadd.f32 %v17754_v29, %v10298_v62 }
0x2072   :  { %v17844_v7 = vadd.f32 %v10307_v14, %v18317_v42  ;;  %v10372_v29 = vsel %vm129_vm0, %v17836_v40, 0.0 }
0x2073   :  { %v17839_v43 = vadd.f32 %v10299_v23, %v18316_v20  ;;  %v10366_v18 = vsel %vm129_vm0, %v17831_v60, 0.0 }
0x2074   :  { %10367 = vadd.xlane.f32.xlu0 %v10366_v18  ;;  %v10375_v33 = vsel %vm129_vm0, %v17844_v7, 0.0 }
0x2075   :  { %v10369_v53 = vsel %vm129_vm0, %v17839_v43, 0.0 }
0x2076   :  { %10370 = vadd.xlane.f32.xlu1 %v10369_v53 }
0x2078   :  { %10373 = vadd.xlane.f32.xlu0 %v10372_v29 }
0x207a   :  { %10376 = vadd.xlane.f32.xlu1 %v10375_v33 }
0x20b6   :  { %v10332_v46 = vpop.xlane.xlu0 %10331 }
0x20b7   :  { %v10378_v1 = vmul.f32 0.03125, %v10332_v46 }
0x20b8   :  { %v10335_v37 = vpop.xlane.xlu1 %10334 }
0x20b9   :  { %v17853_v49 = vsub.f32 %v17759_v4, %v10378_v1  ;;  %v10379_v27 = vmul.f32 0.03125, %v10335_v37 }
0x20ba   :  { %v10338_v50 = vpop.xlane.xlu0 %10337 }
0x20bb   :  { %v17856_v28 = vsub.f32 %v17767_v31, %v10379_v27  ;;  %v10380_v6 = vmul.f32 0.03125, %v10338_v50  ;;  %v10410_v38 = vmul.f32 %v17853_v49, %v17853_v49 }
0x20bd   :  { %v17861_v41 = vsub.f32 %v17763_v34, %v10380_v6  ;;  %v10426_v55 = vsel %vm129_vm0, %v10410_v38, 0.0  ;;  %v10411_v36 = vmul.f32 %v17856_v28, %v17856_v28 }
0x20be   :  { %10427 = vadd.xlane.f32.xlu0 %v10426_v55  ;;  %v10341_v59 = vpop.xlane.xlu0 %10340 }
0x20bf   :  { %v10381_v39 = vmul.f32 0.03125, %v10341_v59  ;;  %v10429_v30 = vsel %vm129_vm0, %v10411_v36, 0.0  ;;  %v10412_v21 = vmul.f32 %v17861_v41, %v17861_v41 }
0x20c0   :  { %10430 = vadd.xlane.f32.xlu1 %v10429_v30  ;;  %v10347_v56 = vpop.xlane.xlu1 %10346 }
0x20c1   :  { %v17870_v15 = vsub.f32 %v17774_v8, %v10381_v39  ;;  %v10383_v10 = vmul.f32 0.03125, %v10347_v56  ;;  %v10432_v17 = vsel %vm129_vm0, %v10412_v21, 0.0  ;;  %v12908_v21 = vld [vmem:[%s18154_s8 + $0x10] sm:$0xff]   ;;  %v12909_v56 = vld [vmem:[%s18154_s8 + $0x18] sm:$0xff]  }
0x20c2   :  { %10433 = vadd.xlane.f32.xlu0 %v10432_v17  ;;  %v10344_v35 = vpop.xlane.xlu0 %10343  ;;  %12582 = vmatprep.subr.bf16.mxu1 %v12908_v21 }
0x20c3   :  { %v17874_v5 = vsub.f32 %v17786_v32, %v10383_v10  ;;  %v10382_v48 = vmul.f32 0.03125, %v10344_v35  ;;  %v10413_v61 = vmul.f32 %v17870_v15, %v17870_v15  ;;  %12583 = vmatpush3.bf16.msra.mxu1 %v12908_v21 }
0x20c4   :  { %v10353_v12 = vpop.xlane.xlu1 %10352  ;;  %12584 = vmatprep.subr.bf16.mxu1 %v12909_v56 }
0x20c5   :  { %v17879_v45 = vsub.f32 %v17783_v19, %v10382_v48  ;;  %v10385_v13 = vmul.f32 0.03125, %v10353_v12  ;;  %v10435_v25 = vsel %vm129_vm0, %v10413_v61, 0.0  ;;  %v10415_v54 = vmul.f32 %v17874_v5, %v17874_v5 }
0x20c6   :  { %10436 = vadd.xlane.f32.xlu1 %v10435_v25  ;;  %v10350_v52 = vpop.xlane.xlu0 %10349 }
0x20c7   :  { %v17885_v51 = vsub.f32 %v17791_v0, %v10385_v13  ;;  %v10384_v26 = vmul.f32 0.03125, %v10350_v52  ;;  %v10414_v2 = vmul.f32 %v17879_v45, %v17879_v45  ;;  %v10441_v16 = vsel %vm129_vm0, %v10415_v54, 0.0  ;;  %12585 = vmatpush3.bf16.msra.mxu1 %v12909_v56 }
0x20c8   :  { %v10359_v3 = vpop.xlane.xlu1 %10358 }
0x20c9   :  { %v17891_v58 = vsub.f32 %v17796_v22, %v10384_v26  ;;  %v10387_v24 = vmul.f32 0.03125, %v10359_v3  ;;  %v10438_v62 = vsel %vm129_vm0, %v10414_v2, 0.0  ;;  %v10417_v57 = vmul.f32 %v17885_v51, %v17885_v51 }
0x20ca   :  { %10442 = vadd.xlane.f32.xlu1 %v10441_v16  ;;  %10439 = vadd.xlane.f32.xlu0 %v10438_v62  ;;  %v10356_v14 = vpop.xlane.xlu0 %10355 }
0x20cb   :  { %v17897_v23 = vsub.f32 %v17810_v11, %v10387_v24  ;;  %v10386_v9 = vmul.f32 0.03125, %v10356_v14  ;;  %v10416_v20 = vmul.f32 %v17891_v58, %v17891_v58  ;;  %v10447_v42 = vsel %vm129_vm0, %v10417_v57, 0.0 }
0x20cc   :  { %v10365_v18 = vpop.xlane.xlu1 %10364 }
0x20cd   :  { %v17903_v53 = vsub.f32 %v17807_v47, %v10386_v9  ;;  %v10389_v29 = vmul.f32 0.03125, %v10365_v18  ;;  %v10444_v33 = vsel %vm129_vm0, %v10416_v20, 0.0  ;;  %v10419_v46 = vmul.f32 %v17897_v23, %v17897_v23 }
0x20ce   :  { %10448 = vadd.xlane.f32.xlu1 %v10447_v42  ;;  %10445 = vadd.xlane.f32.xlu0 %v10444_v33  ;;  %v10362_v1 = vpop.xlane.xlu0 %10361 }
0x20cf   :  { %v17909_v37 = vsub.f32 %v17815_v63, %v10389_v29  ;;  %v10388_v27 = vmul.f32 0.03125, %v10362_v1  ;;  %v10418_v50 = vmul.f32 %v17903_v53, %v17903_v53  ;;  %v10453_v38 = vsel %vm129_vm0, %v10419_v46, 0.0 }
0x20d1   :  { %v17914_v6 = vsub.f32 %v17820_v44, %v10388_v27  ;;  %v10450_v55 = vsel %vm129_vm0, %v10418_v50, 0.0  ;;  %v10421_v36 = vmul.f32 %v17909_v37, %v17909_v37 }
0x20d2   :  { %10454 = vadd.xlane.f32.xlu1 %v10453_v38  ;;  %10451 = vadd.xlane.f32.xlu0 %v10450_v55 }
0x20d3   :  { %v10420_v59 = vmul.f32 %v17914_v6, %v17914_v6  ;;  %v10459_v39 = vsel %vm129_vm0, %v10421_v36, 0.0 }
0x20d5   :  { %v10456_v30 = vsel %vm129_vm0, %v10420_v59, 0.0 }
0x20d6   :  { %10460 = vadd.xlane.f32.xlu1 %v10459_v39  ;;  %10457 = vadd.xlane.f32.xlu0 %v10456_v30 }
0x2101   :  { %v10368_v10 = vpop.xlane.xlu0 %10367 }
0x2102   :  { %v10390_v17 = vmul.f32 0.03125, %v10368_v10 }
0x2103   :  { %v10371_v35 = vpop.xlane.xlu1 %10370 }
0x2104   :  { %v17931_v48 = vsub.f32 %v17831_v60, %v10390_v17  ;;  %v10391_v61 = vmul.f32 0.03125, %v10371_v35  ;;  %v17954_v17 = vld [vmem:[#allocation7 + $0x1] ss:$0 sm:$0xff] }
0x2105   :  { %v10374_v12 = vpop.xlane.xlu0 %10373 }
0x2106   :  { %v17934_v13 = vsub.f32 %v17839_v43, %v10391_v61  ;;  %v10392_v25 = vmul.f32 0.03125, %v10374_v12  ;;  %v10422_v54 = vmul.f32 %v17931_v48, %v17931_v48 }
0x2107   :  { %v10377_v52 = vpop.xlane.xlu1 %10376 }
0x2108   :  { %v17939_v26 = vsub.f32 %v17836_v40, %v10392_v25  ;;  %v10393_v2 = vmul.f32 0.03125, %v10377_v52  ;;  %v10462_v3 = vsel %vm129_vm0, %v10422_v54, 0.0  ;;  %v10423_v16 = vmul.f32 %v17934_v13, %v17934_v13 }
0x2109   :  { %10463 = vadd.xlane.f32.xlu0 %v10462_v3 }
0x210a   :  { %v17945_v24 = vsub.f32 %v17844_v7, %v10393_v2  ;;  %v10465_v62 = vsel %vm129_vm0, %v10423_v16, 0.0  ;;  %v10424_v57 = vmul.f32 %v17939_v26, %v17939_v26 }
0x210b   :  { %10466 = vadd.xlane.f32.xlu1 %v10465_v62 }
0x210c   :  { %v10468_v14 = vsel %vm129_vm0, %v10424_v57, 0.0  ;;  %v10425_v9 = vmul.f32 %v17945_v24, %v17945_v24 }
0x210d   :  { %10469 = vadd.xlane.f32.xlu0 %v10468_v14  ;;  %v17959_v14 = vld [vmem:[#allocation8 + $0x1] ss:$0 sm:$0xff] }
0x210e   :  { %v10471_v20 = vsel %vm129_vm0, %v10425_v9, 0.0 }
0x210f   :  { %10472 = vadd.xlane.f32.xlu1 %v10471_v20 }
0x214b   :  { %v10428_v18 = vpop.xlane.xlu0 %10427 }
0x214c   :  { %v10474_v42 = vmul.f32 0.03125, %v10428_v18 }
0x214d   :  { %v10431_v29 = vpop.xlane.xlu1 %10430 }
0x214e   :  { %v10490_v33 = vadd.f32 1e-05, %v10474_v42  ;;  %v10475_v46 = vmul.f32 0.03125, %v10431_v29 }
0x214f   :  { %v10434_v1 = vpop.xlane.xlu0 %10433 }
0x2150   :  { %13586 = vrsqrt.f32 %v10490_v33  ;;  %v10491_v27 = vadd.f32 1e-05, %v10475_v46  ;;  %v10476_v50 = vmul.f32 0.03125, %v10434_v1 }
0x2152   :  { %13588 = vrsqrt.f32 %v10491_v27  ;;  %v10492_v38 = vadd.f32 1e-05, %v10476_v50 }
0x2153   :  { %v10437_v55 = vpop.xlane.xlu1 %10436 }
0x2154   :  { %13590 = vrsqrt.f32 %v10492_v38  ;;  %v10477_v36 = vmul.f32 0.03125, %v10437_v55 }
0x2156   :  { %v10493_v59 = vadd.f32 1e-05, %v10477_v36 }
0x2157   :  { %v10443_v39 = vpop.xlane.xlu1 %10442  ;;  %v10440_v30 = vpop.xlane.xlu0 %10439 }
0x2158   :  { %13592 = vrsqrt.f32 %v10493_v59  ;;  %v10479_v21 = vmul.f32 0.03125, %v10443_v39  ;;  %v10478_v56 = vmul.f32 0.03125, %v10440_v30 }
0x215a   :  { %v13587_v10 = vpop.eup %13586  ;;  %v10495_v35 = vadd.f32 1e-05, %v10479_v21  ;;  %v10494_v61 = vadd.f32 1e-05, %v10478_v56 }
0x215b   :  { %v10522_v12 = vmul.f32 %v13587_v10, %v17853_v49  ;;  %v10449_v25 = vpop.xlane.xlu1 %10448  ;;  %v10446_v54 = vpop.xlane.xlu0 %10445 }
0x215c   :  { %v13589_v52 = vpop.eup %13588  ;;  %13594 = vrsqrt.f32 %v10495_v35  ;;  %v10481_v2 = vmul.f32 0.03125, %v10449_v25  ;;  %v10480_v3 = vmul.f32 0.03125, %v10446_v54 }
0x215d   :  { %v10523_v16 = vmul.f32 %v13589_v52, %v17856_v28  ;;  %13596 = vrsqrt.f32 %v10494_v61  ;;  %v10544_v62 = vmul.f32 %v17954_v17, %v10522_v12 }
0x215e   :  { %v13591_v57 = vpop.eup %13590  ;;  %v10497_v9 = vadd.f32 1e-05, %v10481_v2  ;;  %v10496_v20 = vadd.f32 1e-05, %v10480_v3 }
0x215f   :  { %v10524_v18 = vmul.f32 %v13591_v57, %v17861_v41  ;;  %v10455_v42 = vpop.xlane.xlu1 %10454  ;;  %v10452_v49 = vpop.xlane.xlu0 %10451  ;;  %v10545_v29 = vmul.f32 %v17954_v17, %v10523_v16  ;;  %v10566_v28 = vadd.f32 %v17959_v14, %v10544_v62 }
0x2160   :  { %13598 = vrsqrt.f32 %v10497_v9  ;;  %v10483_v33 = vmul.f32 0.03125, %v10455_v42  ;;  %v10482_v46 = vmul.f32 0.03125, %v10452_v49 }
0x2161   :  { %13600 = vrsqrt.f32 %v10496_v20  ;;  %v10567_v1 = vadd.f32 %v17959_v14, %v10545_v29  ;;  %v10546_v55 = vmul.f32 %v17954_v17, %v10524_v18 }
0x2162   :  { %v13593_v27 = vpop.eup %13592  ;;  %v10499_v50 = vadd.f32 1e-05, %v10483_v33  ;;  %v10498_v38 = vadd.f32 1e-05, %v10482_v46 }
0x2163   :  { %v10525_v36 = vmul.f32 %v13593_v27, %v17870_v15  ;;  %v10461_v41 = vpop.xlane.xlu1 %10460  ;;  %v10458_v59 = vpop.xlane.xlu0 %10457  ;;  %v10582_v39 = vpack.c.bf16 %v10567_v1, %v10566_v28  ;;  %v10568_v25 = vadd.f32 %v17959_v14, %v10546_v55 }
0x2164   :  { %13602 = vrsqrt.f32 %v10499_v50  ;;  %v10485_v30 = vmul.f32 0.03125, %v10461_v41  ;;  %v10484_v21 = vmul.f32 0.03125, %v10458_v59 }
0x2165   :  { %v10547_v56 = vmul.f32 %v17954_v17, %v10525_v36  ;;  %13604 = vrsqrt.f32 %v10498_v38  ;;  %12586 = vmatprep.mubr.msk.bf16.mxu1 %vm129_vm0, %v10582_v39 }
0x2166   :  { %v13595_v10 = vpop.eup %13594  ;;  %v10501_v35 = vadd.f32 1e-05, %v10485_v30  ;;  %v10500_v61 = vadd.f32 1e-05, %v10484_v21 }
0x2167   :  { %v13597_v12 = vpop.eup %13596  ;;  %v10569_v54 = vadd.f32 %v17959_v14, %v10547_v56  ;;  %v10527_v15 = vmul.f32 %v13595_v10, %v17874_v5 }
0x2168   :  { %v10526_v52 = vmul.f32 %v13597_v12, %v17879_v45  ;;  %13606 = vrsqrt.f32 %v10501_v35 }
0x2169   :  { %v10583_v2 = vpack.c.bf16 %v10569_v54, %v10568_v25  ;;  %13608 = vrsqrt.f32 %v10500_v61  ;;  %v10549_v3 = vmul.f32 %v17954_v17, %v10527_v15 }
0x216a   :  { %v13599_v16 = vpop.eup %13598  ;;  %v10548_v62 = vmul.f32 %v17954_v17, %v10526_v52 }
0x216b   :  { %v13601_v57 = vpop.eup %13600  ;;  %v10529_v9 = vmul.f32 %v13599_v16, %v17885_v51  ;;  %12587 = vmatmul.mubr.msk.bf16.vlgmr.msra.gmra.mrb[48].mxu1 %vm129_vm0, %v10583_v2  ;;  %v10571_v20 = vadd.f32 %v17959_v14, %v10549_v3 }
0x216c   :  { %v10528_v18 = vmul.f32 %v13601_v57, %v17891_v58  ;;  %v10570_v5 = vadd.f32 %v17959_v14, %v10548_v62 }
0x216d   :  { %v10551_v45 = vmul.f32 %v17954_v17, %v10529_v9 }
0x216e   :  { %v13603_v42 = vpop.eup %13602  ;;  %v10550_v49 = vmul.f32 %v17954_v17, %v10528_v18  ;;  %v10584_v29 = vpack.c.bf16 %v10571_v20, %v10570_v5 }
0x216f   :  { %v13605_v33 = vpop.eup %13604  ;;  %v10573_v46 = vadd.f32 %v17959_v14, %v10551_v45  ;;  %v10531_v28 = vmul.f32 %v13603_v42, %v17897_v23 }
0x2170   :  { %v10572_v51 = vadd.f32 %v17959_v14, %v10550_v49  ;;  %v10530_v1 = vmul.f32 %v13605_v33, %v17903_v53  ;;  %12590 = vmatprep.mubr.msk.bf16.mxu1 %vm129_vm0, %v10584_v29 }
0x2171   :  { %v10553_v58 = vmul.f32 %v17954_v17, %v10531_v28 }
0x2172   :  { %v13607_v27 = vpop.eup %13606  ;;  %v10585_v50 = vpack.c.bf16 %v10573_v46, %v10572_v51  ;;  %v10552_v38 = vmul.f32 %v17954_v17, %v10530_v1 }
0x2173   :  { %v13609_v55 = vpop.eup %13608  ;;  %v10533_v36 = vmul.f32 %v13607_v27, %v17909_v37  ;;  %v10575_v41 = vadd.f32 %v17959_v14, %v10553_v58  ;;  %v12913_v58 = vld [vmem:[%s18156_s10 + $0x38] sm:$0xff]   ;;  %v18026_v27 = vld [vmem:[#allocation10 + $0x1] ss:$0 sm:$0xff] }
0x2174   :  { %v10532_v59 = vmul.f32 %v13609_v55, %v17914_v6  ;;  %12591 = vmatmul.mubr.msk.bf16.gmra.mrb[52].mxu1 %vm129_vm0, %v10585_v50  ;;  %v10574_v23 = vadd.f32 %v17959_v14, %v10552_v38 }
0x2175   :  { %v10555_v53 = vmul.f32 %v17954_v17, %v10533_v36 }
0x2176   :  { %v10554_v39 = vmul.f32 %v17954_v17, %v10532_v59  ;;  %v10586_v30 = vpack.c.bf16 %v10575_v41, %v10574_v23 }
0x2177   :  { %v10577_v21 = vadd.f32 %v17959_v14, %v10555_v53 }
0x2178   :  { %v10576_v56 = vadd.f32 %v17959_v14, %v10554_v39  ;;  %12594 = vmatprep.mubr.msk.bf16.mxu1 %vm129_vm0, %v10586_v30 }
0x217a   :  { %v10587_v37 = vpack.c.bf16 %v10577_v21, %v10576_v56 }
0x217c   :  { %12595 = vmatmul.mubr.msk.bf16.gmra.mrb[56].mxu1 %vm129_vm0, %v10587_v37 }
0x2196   :  { %v10464_v10 = vpop.xlane.xlu0 %10463 }
0x2197   :  { %v10486_v6 = vmul.f32 0.03125, %v10464_v10 }
0x2198   :  { %v10467_v35 = vpop.xlane.xlu1 %10466 }
0x2199   :  { %v10502_v61 = vadd.f32 1e-05, %v10486_v6  ;;  %v10487_v12 = vmul.f32 0.03125, %v10467_v35 }
0x219a   :  { %v10470_v25 = vpop.xlane.xlu0 %10469 }
0x219b   :  { %13610 = vrsqrt.f32 %v10502_v61  ;;  %v10503_v54 = vadd.f32 1e-05, %v10487_v12  ;;  %v10488_v15 = vmul.f32 0.03125, %v10470_v25 }
0x219c   :  { %v10473_v52 = vpop.xlane.xlu1 %10472 }
0x219d   :  { %13612 = vrsqrt.f32 %v10503_v54  ;;  %v10504_v2 = vadd.f32 1e-05, %v10488_v15  ;;  %v10489_v3 = vmul.f32 0.03125, %v10473_v52 }
0x219f   :  { %13614 = vrsqrt.f32 %v10504_v2  ;;  %v10505_v16 = vadd.f32 1e-05, %v10489_v3 }
0x21a1   :  { %13616 = vrsqrt.f32 %v10505_v16 }
0x21a5   :  { %v13611_v62 = vpop.eup %13610 }
0x21a6   :  { %v10534_v57 = vmul.f32 %v13611_v62, %v17931_v48 }
0x21a7   :  { %v13613_v9 = vpop.eup %13612 }
0x21a8   :  { %v10535_v20 = vmul.f32 %v13613_v9, %v17934_v13  ;;  %v10556_v18 = vmul.f32 %v17954_v17, %v10534_v57 }
0x21a9   :  { %v13615_v5 = vpop.eup %13614 }
0x21aa   :  { %v10536_v45 = vmul.f32 %v13615_v5, %v17939_v26  ;;  %v10557_v42 = vmul.f32 %v17954_v17, %v10535_v20  ;;  %v10578_v46 = vadd.f32 %v17959_v14, %v10556_v18 }
0x21ab   :  { %v13617_v49 = vpop.eup %13616 }
0x21ac   :  { %v10558_v29 = vmul.f32 %v17954_v17, %v10536_v45  ;;  %v10537_v33 = vmul.f32 %v13617_v49, %v17945_v24  ;;  %v10579_v28 = vadd.f32 %v17959_v14, %v10557_v42  ;;  %v12910_v24 = vld [vmem:[%s18156_s10 + $0x20] sm:$0xff]  }
0x21ad   :  { %12602 = vmatprep.subr.bf16.mxu0 %v12910_v24 }
0x21ae   :  { %v10559_v48 = vmul.f32 %v17954_v17, %v10537_v33  ;;  %v10588_v51 = vpack.c.bf16 %v10579_v28, %v10578_v46  ;;  %v10580_v13 = vadd.f32 %v17959_v14, %v10558_v29  ;;  %12603 = vmatpush3.bf16.msra.mxu0 %v12910_v24  ;;  %v12911_v17 = vld [vmem:[%s18156_s10 + $0x28] sm:$0xff]  }
0x21af   :  { %12604 = vmatprep.subr.bf16.mxu0 %v12911_v17 }
0x21b0   :  { %v10581_v1 = vadd.f32 %v17959_v14, %v10559_v48  ;;  %12598 = vmatprep.mubr.msk.bf16.mxu1 %vm129_vm0, %v10588_v51  ;;  %v12912_v14 = vld [vmem:[%s18156_s10 + $0x30] sm:$0xff]  }
0x21b2   :  { %v10589_v26 = vpack.c.bf16 %v10581_v1, %v10580_v13  ;;  %12605 = vmatpush3.bf16.msra.mxu0 %v12911_v17 }
0x21b3   :  { %12606 = vmatprep.subr.bf16.mxu0 %v12912_v14 }
0x21b4   :  { %12599 = vmatmul.mubr.msk.bf16.gmra.mrb[60].mxu1 %vm129_vm0, %v10589_v26 }
0x21b6   :  { %12607 = vmatpush3.bf16.msra.mxu0 %v12912_v14 }
0x21b7   :  { %12608 = vmatprep.subr.bf16.mxu0 %v12913_v58 }
0x21ba   :  { %12609 = vmatpush3.bf16.msra.mxu0 %v12913_v58 }
0x223e   :  { %v12588_v50 = vpop.f32.mrb[48].mxu1 }
0x223f   :  { %v18029_v38 = vadd.f32 %v12588_v50, %v18026_v27  ;;  %v10673_v55 = vpop.f32.mrb[49].mxu1 }
0x2240   :  { %v18032_v36 = vadd.f32 %v18026_v27, %v10673_v55  ;;  %v12589_v41 = vpop.f32.mrb[50].mxu1 }
0x2241   :  { %v11314_v59 = vmul.f32 -1.442695, %v18029_v38  ;;  %v18036_v23 = vadd.f32 %v12589_v41, %v18026_v27  ;;  %v10676_v53 = vpop.f32.mrb[51].mxu1 }
0x2242   :  { %v11312_v39 = vmul.f32 -1.442695, %v18032_v36  ;;  %v18040_v30 = vadd.f32 %v18026_v27, %v10676_v53 }
0x2243   :  { %13618 = vpow2.f32 %v11314_v59  ;;  %v11315_v21 = vmul.f32 -1.442695, %v18036_v23 }
0x2244   :  { %13620 = vpow2.f32 %v11312_v39  ;;  %v11313_v56 = vmul.f32 -1.442695, %v18040_v30 }
0x2245   :  { %13622 = vpow2.f32 %v11315_v21 }
0x2246   :  { %13624 = vpow2.f32 %v11313_v56 }
0x2247   :  { %v12592_v37 = vpop.f32.mrb[52].mxu1 }
0x2248   :  { %v18045_v10 = vadd.f32 %v12592_v37, %v18026_v27  ;;  %v10689_v6 = vpop.f32.mrb[53].mxu1 }
0x2249   :  { %v18048_v35 = vadd.f32 %v18026_v27, %v10689_v6  ;;  %v12593_v61 = vpop.f32.mrb[54].mxu1 }
0x224a   :  { %v11318_v12 = vmul.f32 -1.442695, %v18045_v10  ;;  %v18052_v25 = vadd.f32 %v12593_v61, %v18026_v27  ;;  %v10692_v54 = vpop.f32.mrb[55].mxu1 }
0x224b   :  { %v11316_v15 = vmul.f32 -1.442695, %v18048_v35  ;;  %v18056_v52 = vadd.f32 %v18026_v27, %v10692_v54 }
0x224c   :  { %13626 = vpow2.f32 %v11318_v12  ;;  %v11319_v2 = vmul.f32 -1.442695, %v18052_v25 }
0x224d   :  { %v13619_v3 = vpop.eup %13618  ;;  %13628 = vpow2.f32 %v11316_v15  ;;  %v11317_v16 = vmul.f32 -1.442695, %v18056_v52 }
0x224e   :  { %v13621_v62 = vpop.eup %13620  ;;  %v10786_v57 = vadd.f32 1.0, %v13619_v3  ;;  %13630 = vpow2.f32 %v11319_v2 }
0x224f   :  { %v13623_v9 = vpop.eup %13622  ;;  %v10784_v20 = vadd.f32 1.0, %v13621_v62  ;;  %13632 = vpow2.f32 %v11317_v16  ;;  %v12596_v18 = vpop.f32.mrb[56].mxu1 }
0x2250   :  { %v13625_v5 = vpop.eup %13624  ;;  %13634 = vrcp.f32 %v10786_v57  ;;  %v10787_v45 = vadd.f32 1.0, %v13623_v9  ;;  %v18061_v42 = vadd.f32 %v12596_v18, %v18026_v27  ;;  %v10705_v49 = vpop.f32.mrb[57].mxu1 }
0x2251   :  { %13636 = vrcp.f32 %v10784_v20  ;;  %v10785_v29 = vadd.f32 1.0, %v13625_v5  ;;  %v18064_v33 = vadd.f32 %v18026_v27, %v10705_v49  ;;  %v12597_v46 = vpop.f32.mrb[58].mxu1 }
0x2252   :  { %13638 = vrcp.f32 %v10787_v45  ;;  %v11322_v28 = vmul.f32 -1.442695, %v18061_v42  ;;  %v18068_v48 = vadd.f32 %v12597_v46, %v18026_v27  ;;  %v10708_v51 = vpop.f32.mrb[59].mxu1 }
0x2253   :  { %13640 = vrcp.f32 %v10785_v29  ;;  %v11320_v13 = vmul.f32 -1.442695, %v18064_v33  ;;  %v10709_v1 = vadd.f32 %v18026_v27, %v10708_v51 }
0x2254   :  { %13642 = vpow2.f32 %v11322_v28  ;;  %v11323_v26 = vmul.f32 -1.442695, %v18068_v48 }
0x2255   :  { %13644 = vpow2.f32 %v11320_v13  ;;  %v11321_v24 = vmul.f32 -1.442695, %v10709_v1 }
0x2256   :  { %v13627_v17 = vpop.eup %13626  ;;  %13646 = vpow2.f32 %v11323_v26 }
0x2257   :  { %v13629_v14 = vpop.eup %13628  ;;  %v10790_v58 = vadd.f32 1.0, %v13627_v17  ;;  %13648 = vpow2.f32 %v11321_v24 }
0x2258   :  { %v13631_v50 = vpop.eup %13630  ;;  %v10788_v55 = vadd.f32 1.0, %v13629_v14 }
0x2259   :  { %v13633_v41 = vpop.eup %13632  ;;  %13650 = vrcp.f32 %v10790_v58  ;;  %v10791_v59 = vadd.f32 1.0, %v13631_v50 }
0x225a   :  { %v13635_v53 = vpop.eup %13634  ;;  %13652 = vrcp.f32 %v10788_v55  ;;  %v10789_v39 = vadd.f32 1.0, %v13633_v41 }
0x225b   :  { %v13637_v21 = vpop.eup %13636  ;;  %13654 = vrcp.f32 %v10791_v59  ;;  %v10834_v6 = vmul.f32 %v13635_v53, %v18029_v38 }
0x225c   :  { %v13639_v56 = vpop.eup %13638  ;;  %13656 = vrcp.f32 %v10789_v39  ;;  %v10832_v54 = vmul.f32 %v13637_v21, %v18032_v36 }
0x225d   :  { %v13641_v37 = vpop.eup %13640  ;;  %v10835_v61 = vmul.f32 %v13639_v56, %v18036_v23 }
0x225e   :  { %v13643_v12 = vpop.eup %13642  ;;  %v10833_v15 = vmul.f32 %v13641_v37, %v18040_v30 }
0x225f   :  { %v13645_v2 = vpop.eup %13644  ;;  %v10849_v3 = vpack.c.bf16 %v10835_v61, %v10834_v6  ;;  %v10794_v16 = vadd.f32 1.0, %v13643_v12 }
0x2260   :  { %v13647_v62 = vpop.eup %13646  ;;  %v10848_v57 = vpack.c.bf16 %v10833_v15, %v10832_v54  ;;  %v10792_v9 = vadd.f32 1.0, %v13645_v2 }
0x2261   :  { %v13649_v20 = vpop.eup %13648  ;;  %13658 = vrcp.f32 %v10794_v16  ;;  %v10795_v18 = vadd.f32 1.0, %v13647_v62 }
0x2262   :  { %13660 = vrcp.f32 %v10792_v9  ;;  %v10793_v5 = vadd.f32 1.0, %v13649_v20  ;;  %12610 = vmatprep.mubr.msk.bf16.mxu0 %vm5440_vm5, %v10848_v57 }
0x2263   :  { %v13651_v38 = vpop.eup %13650  ;;  %13662 = vrcp.f32 %v10795_v18  ;;  %12611 = vmatmul.mubr.msk.bf16.vlgmr.msra.gmra.mrb[48].mxu0 %vm5440_vm5, %v10849_v3 }
0x2264   :  { %v13653_v36 = vpop.eup %13652  ;;  %13664 = vrcp.f32 %v10793_v5  ;;  %v10838_v45 = vmul.f32 %v13651_v38, %v18045_v10 }
0x2265   :  { %v13655_v23 = vpop.eup %13654  ;;  %v10836_v29 = vmul.f32 %v13653_v36, %v18048_v35 }
0x2266   :  { %v13657_v30 = vpop.eup %13656  ;;  %v10839_v49 = vmul.f32 %v13655_v23, %v18052_v25  ;;  %v11337_v23 = vld [vmem:[%s18157_s11 + $0x1] ss:$0 sm:$0xff]  ;;  %s13861_s11 = smov [#allocation11]  }
0x2267   :  { %v10837_v46 = vmul.f32 %v13657_v30, %v18056_v52  ;;  %s11055_s9 = sshll.u32 %s13861_s11, 4  ;;  %s11056_s9 = int_to_ptr.vmem [resolvable:$true] %s11055_s9 }
0x2268   :  { %v10851_v28 = vpack.c.bf16 %v10839_v49, %v10838_v45  ;;  %s13808_s22 = scalar_lea.vmem %s11056_s9, 2048  ;;  %p13813_p13 = scmp.lt.s32.totalorder %s11056_s9, %s11056_s9 }
0x2269   :  { %v10850_v51 = vpack.c.bf16 %v10837_v46, %v10836_v29  ;;  %p13809_p12 = scmp.ne.s32.totalorder %s11056_s9, %s13808_s22  ;;  %p13814_p0 = scmp.lt.s32.totalorder %s13808_s22, %s13808_s22 }
0x226b   :  { %v13659_v13 = vpop.eup %13658  ;;  %12614 = vmatprep.mubr.msk.bf16.mxu0 %vm5440_vm5, %v10850_v51  ;;  %p13815_p1 = por %p13814_p0, %p13813_p13 }
0x226c   :  { %v13661_v26 = vpop.eup %13660  ;;  %12615 = vmatmul.mubr.msk.bf16.gmra.mrb[52].mxu0 %vm5440_vm5, %v10851_v28  ;;  %v10842_v14 = vmul.f32 %v13659_v13, %v18061_v42 }
0x226d   :  { %v13663_v24 = vpop.eup %13662  ;;  %v10840_v25 = vmul.f32 %v13661_v26, %v18064_v33  ;;  %p13816_p2 = pnand %p13815_p1, %p13809_p12 }
0x226e   :  { %v13665_v17 = vpop.eup %13664  ;;  %v10843_v10 = vmul.f32 %v13663_v24, %v18068_v48 }
0x226f   :  { %v10841_v58 = vmul.f32 %v13665_v17, %v10709_v1 }
0x2270   :  { %v10853_v35 = vpack.c.bf16 %v10843_v10, %v10842_v14 }
0x2271   :  { %v10852_v50 = vpack.c.bf16 %v10841_v58, %v10840_v25 }
0x2273   :  { %12618 = vmatprep.mubr.msk.bf16.mxu0 %vm5440_vm5, %v10852_v50 }
0x2274   :  { %12619 = vmatmul.mubr.msk.bf16.gmra.mrb[56].mxu0 %vm5440_vm5, %v10853_v35 }
0x2287   :  { %v12600_v52 = vpop.f32.mrb[60].mxu1 }
0x2288   :  { %v10730_v55 = vadd.f32 %v12600_v52, %v18026_v27  ;;  %v10721_v41 = vpop.f32.mrb[61].mxu1 }
0x2289   :  { %v10722_v59 = vadd.f32 %v18026_v27, %v10721_v41  ;;  %v12601_v53 = vpop.f32.mrb[62].mxu1 }
0x228a   :  { %v11326_v39 = vmul.f32 -1.442695, %v10730_v55  ;;  %v10733_v42 = vadd.f32 %v12601_v53, %v18026_v27  ;;  %v10724_v48 = vpop.f32.mrb[63].mxu1 }
0x228b   :  { %v11324_v21 = vmul.f32 -1.442695, %v10722_v59  ;;  %v10725_v33 = vadd.f32 %v18026_v27, %v10724_v48 }
0x228c   :  { %13666 = vpow2.f32 %v11326_v39  ;;  %v11327_v1 = vmul.f32 -1.442695, %v10733_v42 }
0x228d   :  { %13668 = vpow2.f32 %v11324_v21  ;;  %v11325_v56 = vmul.f32 -1.442695, %v10725_v33 }
0x228e   :  { %13670 = vpow2.f32 %v11327_v1 }
0x228f   :  { %13672 = vpow2.f32 %v11325_v56 }
0x2296   :  { %v13667_v37 = vpop.eup %13666 }
0x2297   :  { %v13669_v6 = vpop.eup %13668  ;;  %v10798_v61 = vadd.f32 1.0, %v13667_v37 }
0x2298   :  { %v13671_v12 = vpop.eup %13670  ;;  %v10796_v54 = vadd.f32 1.0, %v13669_v6 }
0x2299   :  { %v13673_v15 = vpop.eup %13672  ;;  %13674 = vrcp.f32 %v10798_v61  ;;  %v10799_v2 = vadd.f32 1.0, %v13671_v12 }
0x229a   :  { %13676 = vrcp.f32 %v10796_v54  ;;  %v10797_v3 = vadd.f32 1.0, %v13673_v15 }
0x229b   :  { %13678 = vrcp.f32 %v10799_v2 }
0x229c   :  { %13680 = vrcp.f32 %v10797_v3 }
0x22a3   :  { %v13675_v16 = vpop.eup %13674 }
0x22a4   :  { %v13677_v27 = vpop.eup %13676  ;;  %v10846_v9 = vmul.f32 %v13675_v16, %v10730_v55 }
0x22a5   :  { %v13679_v62 = vpop.eup %13678  ;;  %v10844_v18 = vmul.f32 %v13677_v27, %v10722_v59 }
0x22a6   :  { %v13681_v57 = vpop.eup %13680  ;;  %v10847_v20 = vmul.f32 %v13679_v62, %v10733_v42 }
0x22a7   :  { %v10845_v5 = vmul.f32 %v13681_v57, %v10725_v33 }
0x22a8   :  { %v10855_v38 = vpack.c.bf16 %v10847_v20, %v10846_v9 }
0x22a9   :  { %v10854_v36 = vpack.c.bf16 %v10845_v5, %v10844_v18 }
0x22ab   :  { %12622 = vmatprep.mubr.msk.bf16.mxu0 %vm5440_vm5, %v10854_v36 }
0x22ac   :  { %12623 = vmatmul.mubr.msk.bf16.gmra.mrb[60].mxu0 %vm5440_vm5, %v10855_v38 }
0x2336   :  { %v12612_v30 = vpop.f32.mrb[48].mxu0 }
0x2337   :  { %v10964_v45 = vadd.f32 %v12612_v30, %v11337_v23  ;;  %v10955_v49 = vpop.f32.mrb[49].mxu0 }
0x2338   :  { %v10956_v29 = vadd.f32 %v11337_v23, %v10955_v49  ;;  %v12613_v46 = vpop.f32.mrb[50].mxu0 }
0x2339   :  { %v11020_v28 = vadd.f32 %v10964_v45, %v17763_v34  ;;  %v10967_v51 = vadd.f32 %v12613_v46, %v11337_v23  ;;  %v10958_v13 = vpop.f32.mrb[51].mxu0 }
0x233a   :  { %v11018_v26 = vadd.f32 %v10956_v29, %v17759_v4  ;;  %v10959_v24 = vadd.f32 %v11337_v23, %v10958_v13 }
0x233b   :  { %11036 = vst.msk [vmem:[#allocation11 + $0x10] sm:$0xff] %vm129_vm0, %v11020_v28  ;;  %v11021_v17 = vadd.f32 %v10967_v51, %v17774_v8 }
0x233c   :  { %11034 = vst.msk [vmem:[#allocation11] sm:$0xff] %vm129_vm0, %v11018_v26  ;;  %v11019_v14 = vadd.f32 %v10959_v24, %v17767_v31 }
0x233d   :  { %11037 = vst.msk [vmem:[#allocation11 + $0x18] sm:$0xff] %vm129_vm0, %v11021_v17 }
0x233e   :  { %11035 = vst.msk [vmem:[#allocation11 + $0x8] sm:$0xff] %vm129_vm0, %v11019_v14 }
0x233f   :  { %v12616_v10 = vpop.f32.mrb[52].mxu0 }
0x2340   :  { %v10980_v25 = vadd.f32 %v12616_v10, %v11337_v23  ;;  %v10971_v34 = vpop.f32.mrb[53].mxu0 }
0x2341   :  { %v10972_v58 = vadd.f32 %v11337_v23, %v10971_v34  ;;  %v12617_v35 = vpop.f32.mrb[54].mxu0 }
0x2342   :  { %v11024_v4 = vadd.f32 %v10980_v25, %v17796_v22  ;;  %v10983_v50 = vadd.f32 %v12617_v35, %v11337_v23  ;;  %v10974_v52 = vpop.f32.mrb[55].mxu0 }
0x2343   :  { %v11022_v55 = vadd.f32 %v10972_v58, %v17783_v19  ;;  %v10975_v8 = vadd.f32 %v11337_v23, %v10974_v52 }
0x2344   :  { %11040 = vst.msk [vmem:[#allocation11 + $0x30] sm:$0xff] %vm129_vm0, %v11024_v4  ;;  %v11025_v31 = vadd.f32 %v10983_v50, %v17791_v0 }
0x2345   :  { %11038 = vst.msk [vmem:[#allocation11 + $0x20] sm:$0xff] %vm129_vm0, %v11022_v55  ;;  %v11023_v41 = vadd.f32 %v10975_v8, %v17786_v32 }
0x2346   :  { %11041 = vst.msk [vmem:[#allocation11 + $0x38] sm:$0xff] %vm129_vm0, %v11025_v31 }
0x2347   :  { %11039 = vst.msk [vmem:[#allocation11 + $0x28] sm:$0xff] %vm129_vm0, %v11023_v41  ;;  %v12620_v59 = vpop.f32.mrb[56].mxu0 }
0x2348   :  { %v10996_v53 = vadd.f32 %v12620_v59, %v11337_v23  ;;  %v10987_v22 = vpop.f32.mrb[57].mxu0 }
0x2349   :  { %v10988_v39 = vadd.f32 %v11337_v23, %v10987_v22  ;;  %v12621_v42 = vpop.f32.mrb[58].mxu0 }
0x234a   :  { %v11028_v19 = vadd.f32 %v10996_v53, %v17820_v44  ;;  %v10999_v48 = vadd.f32 %v12621_v42, %v11337_v23  ;;  %v10990_v21 = vpop.f32.mrb[59].mxu0 }
0x234b   :  { %v11026_v33 = vadd.f32 %v10988_v39, %v17807_v47  ;;  %v10991_v0 = vadd.f32 %v11337_v23, %v10990_v21 }
0x234c   :  { %11044 = vst.msk [vmem:[#allocation11 + $0x50] sm:$0xff] %vm129_vm0, %v11028_v19  ;;  %v11029_v32 = vadd.f32 %v10999_v48, %v17815_v63 }
0x234d   :  { %11042 = vst.msk [vmem:[#allocation11 + $0x40] sm:$0xff] %vm129_vm0, %v11026_v33  ;;  %v11027_v1 = vadd.f32 %v10991_v0, %v17810_v11 }
0x234e   :  { %11045 = vst.msk [vmem:[#allocation11 + $0x58] sm:$0xff] %vm129_vm0, %v11029_v32 }
0x234f   :  { %11043 = vst.msk [vmem:[#allocation11 + $0x48] sm:$0xff] %vm129_vm0, %v11027_v1 }
0x237f   :  { %v12624_v56 = vpop.f32.mrb[60].mxu0 }
0x2380   :  { %v11012_v37 = vadd.f32 %v12624_v56, %v11337_v23  ;;  %v11003_v44 = vpop.f32.mrb[61].mxu0 }
0x2381   :  { %v11004_v6 = vadd.f32 %v11337_v23, %v11003_v44  ;;  %v12625_v61 = vpop.f32.mrb[62].mxu0 }
0x2382   :  { %v11032_v47 = vadd.f32 %v11012_v37, %v17836_v40  ;;  %v11015_v12 = vadd.f32 %v12625_v61, %v11337_v23  ;;  %v11006_v54 = vpop.f32.mrb[63].mxu0 }
0x2383   :  { %v11030_v63 = vadd.f32 %v11004_v6, %v17831_v60  ;;  %v11007_v15 = vadd.f32 %v11337_v23, %v11006_v54 }
0x2384   :  { %11048 = vst.msk [vmem:[#allocation11 + $0x70] sm:$0xff] %vm129_vm0, %v11032_v47  ;;  %v11033_v11 = vadd.f32 %v11015_v12, %v17844_v7 }
0x2385   :  { %11046 = vst.msk [vmem:[#allocation11 + $0x60] sm:$0xff] %vm129_vm0, %v11030_v63  ;;  %v11031_v2 = vadd.f32 %v11007_v15, %v17839_v43 }
0x2386   :  { %11049 = vst.msk [vmem:[#allocation11 + $0x78] sm:$0xff] %vm129_vm0, %v11033_v11 }
0x2387   :  { %11047 = vst.msk [vmem:[#allocation11 + $0x68] sm:$0xff] %vm129_vm0, %v11031_v2 }
0x2388   :  { %13819 = shalt.err (!%p13816_p2)
}
0x2389   :  { %s13820_s19 = scalar_lea.hbm %s18158_s12, 2048 }
0x238a   :  { %p13821_p3 = scmp.ne.s32.totalorder %s18158_s12, %s13820_s19  ;;  %p13824_p4 = scmp.lt.u32.totalorder %s13820_s19, %s18158_s12 }
0x238c   :  { %p13826_p5 = pnand %p13824_p4, %p13821_p3 }
0x238e   :  { %13829 = shalt.err (!%p13826_p5)
}
0x238f   :  { %11061 = dma.vmem_to_hbm [thread:$0]  %s11056_s9, 2048, %s18158_s12, [#allocation4], %s13843_s7, %s13843_s7, %s13844_s18  }
0x2390   :  { %13836 = dma.done.wait [#allocation4], 2048  }
0x2391   :  { %13837 = vsyncadd [#allocation4], 4294965248 }
0x2392   :  { %11065 = vsyncpa [#allocation3], 1 }
0x2393   :  { %11066 = vsyncpa [#allocation6], 1 }
0x2394   :  { %11067 = vsyncpa [#allocation9], 1 }
0x2395   :  { %11068 = vsyncpa [#allocation4], 1 }

</bundles_post_ra>
